<compile_context>
chip_gen: v5e
topology: v5e:2x2
jax: 0.10.0
libtpu: 0.0.40
codegen_flags: <defaults>
</compile_context>

<pallas_src>
import functools

import jax
import jax.numpy as jnp
from jax.experimental import pallas as pl
from jax.experimental.pallas import tpu as pltpu

LEAKY_SLOPE = 0.2
BN_EPS = 1e-5


def _round_up(v, m):
    return (v + m - 1) // m * m


# ------------------------------------------------------------------ kernels -

def _tap_matmul(x_ref, w_ref, taps, m_out):
    """Sum of shifted-tap matmuls (implicit im2col) -> (M_out, OC) f32."""
    acc = None
    for t, d in enumerate(taps):
        xa = x_ref[0, d:d + m_out, :]                       # (M_out, 4C) bf16
        part = jnp.dot(xa, w_ref[t], preferred_element_type=jnp.float32)
        acc = part if acc is None else acc + part
    return acc


def _conv_taps_lrelu_kernel(x_ref, w_ref, o_ref, *, taps, m_out):
    """Conv + LeakyReLU (no BatchNorm), bf16 output."""
    acc = _tap_matmul(x_ref, w_ref, taps, m_out)
    acc = jnp.where(acc > 0, acc, LEAKY_SLOPE * acc)
    o_ref[0] = acc.astype(o_ref.dtype)


def _conv_taps_stats_kernel(x_ref, w_ref, mask_ref, o_ref, sum_ref, sq_ref, *,
                            taps, m_out):
    """Conv (pre-BN) + per-image BatchNorm partial statistics.

    x_ref:    (1, M_in, 4C)   bf16
    w_ref:    (4, 4C, OC)     bf16
    mask_ref: (M_out, 1)      f32   1.0 on valid output rows, 0.0 on pad rows
    o_ref:    (1, M_out, OC)  f32   masked conv output (pre-BN)
    sum_ref/sq_ref: (1, 8, OC) f32  per-image sum / sum-of-squares (row 0 used)
    """
    acc = _tap_matmul(x_ref, w_ref, taps, m_out)
    acc = acc * mask_ref[...]                               # zero invalid rows
    s = jnp.sum(acc, axis=0, keepdims=True)                 # (1, OC)
    q = jnp.sum(acc * acc, axis=0, keepdims=True)
    sum_ref[0] = jnp.broadcast_to(s, sum_ref.shape[1:])
    sq_ref[0] = jnp.broadcast_to(q, sq_ref.shape[1:])
    o_ref[0] = acc


def _affine_lrelu_kernel(x_ref, scale_ref, shift_ref, o_ref):
    v = x_ref[...] * scale_ref[...] + shift_ref[...]
    o_ref[...] = jnp.where(v > 0, v, LEAKY_SLOPE * v).astype(o_ref.dtype)


def _head_kernel(x_ref, w_ref, o_ref):
    acc = jnp.dot(x_ref[...], w_ref[...], preferred_element_type=jnp.float32)
    # sigmoid epilogue: exp + approx reciprocal both run on the (idle) EUP slot
    o_ref[...] = pl.reciprocal(1.0 + jnp.exp(-acc), approx=True)


# ----------------------------------------------------------------- wrappers -

def conv4x4_s2(x_nhwc, w_taps, *, with_stats):
    """4x4 / stride-2 / pad-1 bias-free conv.  x_nhwc: (N,H,W,C).

    Returns (y, stats, dims); y is laid out on the flattened space-to-depth
    grid (N, M_out, OC); dims carries the geometry needed to extract the
    valid (N, H/2, W/2, OC) region downstream."""
    n, h, w, c = x_nhwc.shape
    assert h % 2 == 0 and w % 2 == 0
    oc = w_taps.shape[-1]
    oh, ow = h // 2, w // 2
    hs, ws = (h + 2) // 2, (w + 2) // 2
    cs = 4 * c

    # pad + space-to-depth + flatten: 1x data rearrangement (fused by XLA).
    xp = jnp.pad(x_nhwc, ((0, 0), (1, 1), (1, 1), (0, 0)))
    xs = xp.reshape(n, hs, 2, ws, 2, c).transpose(0, 1, 3, 2, 4, 5)
    xs = xs.reshape(n, hs * ws, cs)

    m = hs * ws
    m_out = _round_up(m, 8)
    m_in = m_out + ws + 8                       # slack rows for the shifted taps
    xs = jnp.pad(xs, ((0, 0), (0, m_in - m), (0, 0))).astype(jnp.bfloat16)

    taps = (0, 1, ws, ws + 1)
    dims = dict(n=n, oh=oh, ow=ow, oc=oc, hs=hs, ws=ws)

    if not with_stats:
        kernel = functools.partial(_conv_taps_lrelu_kernel, taps=taps, m_out=m_out)
        y = pl.pallas_call(
            kernel,
            out_shape=jax.ShapeDtypeStruct((n, m_out, oc), jnp.bfloat16),
            grid=(n,),
            in_specs=[pl.BlockSpec((1, m_in, cs), lambda i: (i, 0, 0)),
                      pl.BlockSpec((4, cs, oc), lambda i: (0, 0, 0))],
            out_specs=pl.BlockSpec((1, m_out, oc), lambda i: (i, 0, 0)),
            compiler_params=pltpu.CompilerParams(
                dimension_semantics=("parallel",)),
        )(xs, w_taps)
        return y, None, dims

    # valid-row mask (excludes the space-to-depth edge row/col and pad rows)
    rows = jnp.arange(m_out)
    mask = ((rows % ws < ow) & (rows // ws < oh)).astype(jnp.float32)
    mask = mask.reshape(m_out, 1)

    kernel = functools.partial(_conv_taps_stats_kernel, taps=taps, m_out=m_out)
    y, ssum, ssq = pl.pallas_call(
        kernel,
        out_shape=(jax.ShapeDtypeStruct((n, m_out, oc), jnp.float32),
                   jax.ShapeDtypeStruct((n, 8, oc), jnp.float32),
                   jax.ShapeDtypeStruct((n, 8, oc), jnp.float32)),
        grid=(n,),
        in_specs=[pl.BlockSpec((1, m_in, cs), lambda i: (i, 0, 0)),
                  pl.BlockSpec((4, cs, oc), lambda i: (0, 0, 0)),
                  pl.BlockSpec((m_out, 1), lambda i: (0, 0))],
        out_specs=(pl.BlockSpec((1, m_out, oc), lambda i: (i, 0, 0)),
                   pl.BlockSpec((1, 8, oc), lambda i: (i, 0, 0)),
                   pl.BlockSpec((1, 8, oc), lambda i: (i, 0, 0))),
        compiler_params=pltpu.CompilerParams(
            dimension_semantics=("parallel",)),
    )(xs, w_taps, mask)
    return y, (ssum, ssq), dims


def _extract_valid(y, dims):
    n, oh, ow, oc = dims["n"], dims["oh"], dims["ow"], dims["oc"]
    hs, ws = dims["hs"], dims["ws"]
    y = y[:, :hs * ws, :].reshape(n, hs, ws, oc)
    return y[:, :oh, :ow, :]                    # (N, OH, OW, OC), fused w/ next prep


def _bn_scale_shift(stats, count, gamma, beta):
    """Reduce per-image partial sums (tiny, done by XLA) -> per-channel affine."""
    ssum, ssq = stats
    total = jnp.sum(ssum[:, 0, :], axis=0)
    total_sq = jnp.sum(ssq[:, 0, :], axis=0)
    mean = total / count
    var = jnp.maximum(total_sq / count - mean * mean, 0.0)   # guard cancellation
    scale = gamma * jax.lax.rsqrt(var + BN_EPS)
    shift = beta - mean * scale
    return scale.reshape(1, -1), shift.reshape(1, -1)


def affine_lrelu(y, scale, shift):
    """y: (N, M, C) f32; per-channel scale/shift: (1, C) f32; bf16 output."""
    n, m, c = y.shape
    return pl.pallas_call(
        _affine_lrelu_kernel,
        out_shape=jax.ShapeDtypeStruct((n, m, c), jnp.bfloat16),
        grid=(n,),
        in_specs=[pl.BlockSpec((1, m, c), lambda i: (i, 0, 0)),
                  pl.BlockSpec((1, c), lambda i: (0, 0)),
                  pl.BlockSpec((1, c), lambda i: (0, 0))],
        out_specs=pl.BlockSpec((1, m, c), lambda i: (i, 0, 0)),
        compiler_params=pltpu.CompilerParams(
            dimension_semantics=("parallel",)),
    )(y, scale, shift)


def head_matmul_sigmoid(x_flat, w_head):
    """Final Conv(256->1, 4x4, s1, p0) + Sigmoid as one matmul (4x4 input)."""
    n, k = x_flat.shape
    mp = _round_up(max(n, 8), 8)
    x_p = jnp.pad(x_flat, ((0, mp - n), (0, 0))).astype(jnp.bfloat16)
    n_lanes = w_head.shape[-1]
    out = pl.pallas_call(
        _head_kernel,
        out_shape=jax.ShapeDtypeStruct((mp, n_lanes), jnp.float32),
        grid=(1,),
        in_specs=[pl.BlockSpec((mp, k), lambda i: (0, 0)),
                  pl.BlockSpec((k, n_lanes), lambda i: (0, 0))],
        out_specs=pl.BlockSpec((mp, n_lanes), lambda i: (0, 0)),
    )(x_p, w_head)
    return out[:n, :1]


# ------------------------------------------------- one-time weight prep -----

def prepare_params(params):
    def s2_weight(w):                            # (OC, C, 4, 4) OIHW, k4 s2 p1
        oc, c = w.shape[0], w.shape[1]
        wt = jnp.transpose(w, (2, 3, 1, 0))              # (KH, KW, C, OC)
        wt = wt.reshape(2, 2, 2, 2, c, oc)               # (a, r, b, q, c, oc)
        wt = jnp.transpose(wt, (0, 2, 1, 3, 4, 5))       # (a, b, r, q, c, oc)
        return wt.reshape(4, 4 * c, oc).astype(jnp.bfloat16)

    def head_weight(w, lanes=128):               # (1, 256, 4, 4) OIHW, k4 s1 p0
        oc = w.shape[0]
        wt = jnp.transpose(w, (2, 3, 1, 0)).reshape(-1, oc)   # (K*K*C, OC)
        return jnp.pad(wt, ((0, 0), (0, lanes - oc))).astype(jnp.bfloat16)

    return {
        "w1": s2_weight(params["w1"]),
        "w2": s2_weight(params["w2"]),
        "w3": s2_weight(params["w3"]),
        "w4": head_weight(params["w4"]),
        "gamma2": params["gamma2"].astype(jnp.float32),
        "beta2": params["beta2"].astype(jnp.float32),
        "gamma3": params["gamma3"].astype(jnp.float32),
        "beta3": params["beta3"].astype(jnp.float32),
    }


# ----------------------------------------------------------------- forward --

def discriminator_forward(img_nchw, prep):
    n = img_nchw.shape[0]
    x = jnp.transpose(img_nchw, (0, 2, 3, 1))     # single NCHW -> NHWC

    # block 1: Conv(C->64, 4x4 s2 p1) + LeakyReLU(0.2)   (no BN)
    y, _, dims = conv4x4_s2(x, prep["w1"], with_stats=False)
    x = _extract_valid(y, dims)

    # block 2: Conv(64->128) + BatchNorm2d (train-mode stats) + LeakyReLU
    y, stats, dims = conv4x4_s2(x, prep["w2"], with_stats=True)
    scale, shift = _bn_scale_shift(stats, n * dims["oh"] * dims["ow"],
                                   prep["gamma2"], prep["beta2"])
    y = affine_lrelu(y, scale, shift)
    x = _extract_valid(y, dims)

    # block 3: Conv(128->256) + BatchNorm2d + LeakyReLU
    y, stats, dims = conv4x4_s2(x, prep["w3"], with_stats=True)
    scale, shift = _bn_scale_shift(stats, n * dims["oh"] * dims["ow"],
                                   prep["gamma3"], prep["beta3"])
    y = affine_lrelu(y, scale, shift)
    x = _extract_valid(y, dims)

    # head: Conv(256->1, 4x4, s1, p0) + Sigmoid == full-spatial contraction.
    # TODO(synk): the head assumes a 4x4 final spatial extent (32x32 inputs,
    # the standard config for this module); larger images would need a tap loop.
    prob = head_matmul_sigmoid(x.reshape(n, -1), prep["w4"])
    return prob.reshape(n, 1, 1, 1)               # (N, 1, 1, 1), NCHW


# --------------------------------------------------------- XLA references ---

def reference_forward(img, params, compute_dtype=jnp.float32):
    def conv(x, w, s, p):
        return jax.lax.conv_general_dilated(
            x.astype(compute_dtype), w.astype(compute_dtype), (s, s),
            [(p, p), (p, p)], dimension_numbers=("NCHW", "OIHW", "NCHW"),
            preferred_element_type=jnp.float32)

    def bn_lrelu(x, gamma, beta):
        mean = jnp.mean(x, axis=(0, 2, 3), keepdims=True)
        var = jnp.mean((x - mean) ** 2, axis=(0, 2, 3), keepdims=True)
        y = (x - mean) * jax.lax.rsqrt(var + BN_EPS)
        y = y * gamma.reshape(1, -1, 1, 1) + beta.reshape(1, -1, 1, 1)
        return jnp.where(y > 0, y, LEAKY_SLOPE * y)

    x = conv(img, params["w1"], 2, 1)
    x = jnp.where(x > 0, x, LEAKY_SLOPE * x)
    x = bn_lrelu(conv(x, params["w2"], 2, 1), params["gamma2"], params["beta2"])
    x = bn_lrelu(conv(x, params["w3"], 2, 1), params["gamma3"], params["beta3"])
    return jax.nn.sigmoid(conv(x, params["w4"], 1, 0))


if __name__ == "__main__":
    key = jax.random.PRNGKey(0)
    kimg, k1, k2, k3, k4, kg2, kb2, kg3, kb3 = jax.random.split(key, 9)
    N, C, H, W = 2, 3, 32, 32     # 32x32 so the 4x4/s1/p0 head sees 4x4
    img = jax.random.normal(kimg, (N, C, H, W), jnp.float32)
    params = {
        "w1": 0.02 * jax.random.normal(k1, (64, C, 4, 4), jnp.float32),
        "w2": 0.02 * jax.random.normal(k2, (128, 64, 4, 4), jnp.float32),
        "w3": 0.02 * jax.random.normal(k3, (256, 128, 4, 4), jnp.float32),
        "w4": 0.02 * jax.random.normal(k4, (1, 256, 4, 4), jnp.float32),
        "gamma2": 1.0 + 0.1 * jax.random.normal(kg2, (128,), jnp.float32),
        "beta2": 0.1 * jax.random.normal(kb2, (128,), jnp.float32),
        "gamma3": 1.0 + 0.1 * jax.random.normal(kg3, (256,), jnp.float32),
        "beta3": 0.1 * jax.random.normal(kb3, (256,), jnp.float32),
    }

    prep = prepare_params(params)
    fwd = jax.jit(discriminator_forward)
    out = jax.block_until_ready(fwd(img, prep))
    assert out.shape == (N, 1, 1, 1), out.shape

    # Matched-precision XLA reference (bf16 conv inputs, f32 accumulation --
    # the same numerics the Pallas kernels use).
    ref_bf16 = reference_forward(img, params, compute_dtype=jnp.bfloat16)
    ref_bf16 = ref_bf16.reshape(out.shape)
    assert jnp.allclose(out, ref_bf16, atol=5e-3, rtol=5e-3), (out, ref_bf16)

    # Sanity check against the full-f32 reference (difference is just the
    # bf16 rounding of the matmul inputs + approx reciprocal in the sigmoid).
    ref_f32 = reference_forward(img, params).reshape(out.shape)
    assert jnp.allclose(out, ref_f32, atol=2e-2, rtol=2e-2), (out, ref_f32)

    print("KERNEL_OK")
</pallas_src>

<mosaic_0001>
module attributes {stable_mosaic.version = 11 : i64} {
  func.func @_conv_taps_lrelu_kernel(%arg0: i32, %arg1: memref<1x321x12xbf16, #tpu.memory_space<vmem>>, %arg2: memref<4x12x64xbf16, #tpu.memory_space<vmem>>, %arg3: memref<1x296x64xbf16, #tpu.memory_space<vmem>>) attributes {dimension_semantics = [#tpu.dimension_semantics<parallel>], iteration_bounds = array<i64: 2>, scalar_prefetch = 0 : i64, scratch_operands = 0 : i64, tpu.core_type = #tpu.core_type<tc>, window_params = [{transform_indices = @transform_0, window_bounds = array<i64: 1, 321, 12>}, {pipeline_mode = #tpu.pipeline_mode<synchronous>, transform_indices = @transform_1, window_bounds = array<i64: 4, 12, 64>}, {transform_indices = @transform_2, window_bounds = array<i64: 1, 296, 64>}]} {
    %c0 = arith.constant 0 : index
    %c0_0 = arith.constant 0 : index
    %c0_1 = arith.constant 0 : index
    %0 = vector.load %arg1[%c0, %c0_0, %c0_1] : memref<1x321x12xbf16, #tpu.memory_space<vmem>>, vector<1x296x12xbf16>
    %1 = vector.shape_cast %0 : vector<1x296x12xbf16> to vector<296x12xbf16>
    %c0_2 = arith.constant 0 : index
    %c0_3 = arith.constant 0 : index
    %c0_4 = arith.constant 0 : index
    %2 = vector.load %arg2[%c0_2, %c0_3, %c0_4] : memref<4x12x64xbf16, #tpu.memory_space<vmem>>, vector<1x12x64xbf16>
    %3 = vector.shape_cast %2 : vector<1x12x64xbf16> to vector<12x64xbf16>
    %cst = arith.constant dense<0.000000e+00> : vector<296x64xf32>
    %4 = tpu.matmul %1, %3, %cst {dimension_numbers = #tpu.dot_dimension_numbers<[1], [0], [0], [1], [0, 0, 1, 1], [], []>} : vector<296x12xbf16>, vector<12x64xbf16>, vector<296x64xf32> -> vector<296x64xf32>
    %c0_5 = arith.constant 0 : index
    %c1 = arith.constant 1 : index
    %c0_6 = arith.constant 0 : index
    %5 = vector.load %arg1[%c0_5, %c1, %c0_6] : memref<1x321x12xbf16, #tpu.memory_space<vmem>>, vector<1x296x12xbf16>
    %6 = vector.shape_cast %5 : vector<1x296x12xbf16> to vector<296x12xbf16>
    %c1_7 = arith.constant 1 : index
    %c0_8 = arith.constant 0 : index
    %c0_9 = arith.constant 0 : index
    %7 = vector.load %arg2[%c1_7, %c0_8, %c0_9] : memref<4x12x64xbf16, #tpu.memory_space<vmem>>, vector<1x12x64xbf16>
    %8 = vector.shape_cast %7 : vector<1x12x64xbf16> to vector<12x64xbf16>
    %cst_10 = arith.constant dense<0.000000e+00> : vector<296x64xf32>
    %9 = tpu.matmul %6, %8, %cst_10 {dimension_numbers = #tpu.dot_dimension_numbers<[1], [0], [0], [1], [0, 0, 1, 1], [], []>} : vector<296x12xbf16>, vector<12x64xbf16>, vector<296x64xf32> -> vector<296x64xf32>
    %10 = arith.addf %4, %9 : vector<296x64xf32>
    %c0_11 = arith.constant 0 : index
    %c17 = arith.constant 17 : index
    %c0_12 = arith.constant 0 : index
    %11 = vector.load %arg1[%c0_11, %c17, %c0_12] : memref<1x321x12xbf16, #tpu.memory_space<vmem>>, vector<1x296x12xbf16>
    %12 = vector.shape_cast %11 : vector<1x296x12xbf16> to vector<296x12xbf16>
    %c2 = arith.constant 2 : index
    %c0_13 = arith.constant 0 : index
    %c0_14 = arith.constant 0 : index
    %13 = vector.load %arg2[%c2, %c0_13, %c0_14] : memref<4x12x64xbf16, #tpu.memory_space<vmem>>, vector<1x12x64xbf16>
    %14 = vector.shape_cast %13 : vector<1x12x64xbf16> to vector<12x64xbf16>
    %cst_15 = arith.constant dense<0.000000e+00> : vector<296x64xf32>
    %15 = tpu.matmul %12, %14, %cst_15 {dimension_numbers = #tpu.dot_dimension_numbers<[1], [0], [0], [1], [0, 0, 1, 1], [], []>} : vector<296x12xbf16>, vector<12x64xbf16>, vector<296x64xf32> -> vector<296x64xf32>
    %16 = arith.addf %10, %15 : vector<296x64xf32>
    %c0_16 = arith.constant 0 : index
    %c18 = arith.constant 18 : index
    %c0_17 = arith.constant 0 : index
    %17 = vector.load %arg1[%c0_16, %c18, %c0_17] : memref<1x321x12xbf16, #tpu.memory_space<vmem>>, vector<1x296x12xbf16>
    %18 = vector.shape_cast %17 : vector<1x296x12xbf16> to vector<296x12xbf16>
    %c3 = arith.constant 3 : index
    %c0_18 = arith.constant 0 : index
    %c0_19 = arith.constant 0 : index
    %19 = vector.load %arg2[%c3, %c0_18, %c0_19] : memref<4x12x64xbf16, #tpu.memory_space<vmem>>, vector<1x12x64xbf16>
    %20 = vector.shape_cast %19 : vector<1x12x64xbf16> to vector<12x64xbf16>
    %cst_20 = arith.constant dense<0.000000e+00> : vector<296x64xf32>
    %21 = tpu.matmul %18, %20, %cst_20 {dimension_numbers = #tpu.dot_dimension_numbers<[1], [0], [0], [1], [0, 0, 1, 1], [], []>} : vector<296x12xbf16>, vector<12x64xbf16>, vector<296x64xf32> -> vector<296x64xf32>
    %22 = arith.addf %16, %21 : vector<296x64xf32>
    %cst_21 = arith.constant 0.000000e+00 : f32
    %23 = vector.broadcast %cst_21 : f32 to vector<296x64xf32>
    %24 = arith.cmpf ogt, %22, %23 : vector<296x64xf32>
    %cst_22 = arith.constant 2.000000e-01 : f32
    %25 = vector.broadcast %cst_22 : f32 to vector<296x64xf32>
    %26 = arith.mulf %25, %22 : vector<296x64xf32>
    %27 = arith.select %24, %22, %26 : vector<296x64xi1>, vector<296x64xf32>
    %28 = arith.truncf %27 : vector<296x64xf32> to vector<296x64xbf16>
    %c0_23 = arith.constant 0 : index
    %c0_24 = arith.constant 0 : index
    %c0_25 = arith.constant 0 : index
    %29 = vector.load %arg3[%c0_23, %c0_24, %c0_25] : memref<1x296x64xbf16, #tpu.memory_space<vmem>>, vector<1x296x64xbf16>
    %30 = vector.shape_cast %29 : vector<1x296x64xbf16> to vector<296x64xbf16>
    %31 = vector.shape_cast %28 : vector<296x64xbf16> to vector<1x296x64xbf16>
    tpu.vector_store %arg3[%c0_23, %c0_24, %c0_25], %31 {strides = array<i32>} : memref<1x296x64xbf16, #tpu.memory_space<vmem>>, vector<1x296x64xbf16>,
    return
  }
  func.func @transform_0(%arg0: i32) -> (i32, i32, i32) {
    %c0_i32 = arith.constant 0 : i32
    %c0_i32_0 = arith.constant 0 : i32
    %c0_i32_1 = arith.constant 0 : i32
    return %arg0, %c0_i32, %c0_i32_0 : i32, i32, i32
  }
  func.func @transform_1(%arg0: i32) -> (i32, i32, i32) {
    %c0_i32 = arith.constant 0 : i32
    %c0_i32_0 = arith.constant 0 : i32
    %c0_i32_1 = arith.constant 0 : i32
    %c0_i32_2 = arith.constant 0 : i32
    return %c0_i32, %c0_i32_0, %c0_i32_1 : i32, i32, i32
  }
  func.func @transform_2(%arg0: i32) -> (i32, i32, i32) {
    %c0_i32 = arith.constant 0 : i32
    %c0_i32_0 = arith.constant 0 : i32
    %c0_i32_1 = arith.constant 0 : i32
    return %arg0, %c0_i32, %c0_i32_0 : i32, i32, i32
  }
}

module attributes {stable_mosaic.version = 11 : i64} {
  func.func @_conv_taps_stats_kernel(%arg0: i32, %arg1: memref<1x105x256xbf16, #tpu.memory_space<vmem>>, %arg2: memref<4x256x128xbf16, #tpu.memory_space<vmem>>, %arg3: memref<88x1xf32, #tpu.memory_space<vmem>>, %arg4: memref<1x88x128xf32, #tpu.memory_space<vmem>>, %arg5: memref<1x8x128xf32, #tpu.memory_space<vmem>>, %arg6: memref<1x8x128xf32, #tpu.memory_space<vmem>>) attributes {dimension_semantics = [#tpu.dimension_semantics<parallel>], iteration_bounds = array<i64: 2>, scalar_prefetch = 0 : i64, scratch_operands = 0 : i64, tpu.core_type = #tpu.core_type<tc>, window_params = [{transform_indices = @transform_0, window_bounds = array<i64: 1, 105, 256>}, {pipeline_mode = #tpu.pipeline_mode<synchronous>, transform_indices = @transform_1, window_bounds = array<i64: 4, 256, 128>}, {pipeline_mode = #tpu.pipeline_mode<synchronous>, transform_indices = @transform_2, window_bounds = array<i64: 88, 1>}, {transform_indices = @transform_3, window_bounds = array<i64: 1, 88, 128>}, {transform_indices = @transform_4, window_bounds = array<i64: 1, 8, 128>}, {transform_indices = @transform_5, window_bounds = array<i64: 1, 8, 128>}]} {
    %c0 = arith.constant 0 : index
    %c0_0 = arith.constant 0 : index
    %c0_1 = arith.constant 0 : index
    %0 = vector.load %arg1[%c0, %c0_0, %c0_1] : memref<1x105x256xbf16, #tpu.memory_space<vmem>>, vector<1x88x256xbf16>
    %1 = vector.shape_cast %0 : vector<1x88x256xbf16> to vector<88x256xbf16>
    %c0_2 = arith.constant 0 : index
    %c0_3 = arith.constant 0 : index
    %c0_4 = arith.constant 0 : index
    %2 = vector.load %arg2[%c0_2, %c0_3, %c0_4] : memref<4x256x128xbf16, #tpu.memory_space<vmem>>, vector<1x256x128xbf16>
    %3 = vector.shape_cast %2 : vector<1x256x128xbf16> to vector<256x128xbf16>
    %cst = arith.constant dense<0.000000e+00> : vector<88x128xf32>
    %4 = tpu.matmul %1, %3, %cst {dimension_numbers = #tpu.dot_dimension_numbers<[1], [0], [0], [1], [0, 0, 1, 1], [], []>} : vector<88x256xbf16>, vector<256x128xbf16>, vector<88x128xf32> -> vector<88x128xf32>
    %c0_5 = arith.constant 0 : index
    %c1 = arith.constant 1 : index
    %c0_6 = arith.constant 0 : index
    %5 = vector.load %arg1[%c0_5, %c1, %c0_6] : memref<1x105x256xbf16, #tpu.memory_space<vmem>>, vector<1x88x256xbf16>
    %6 = vector.shape_cast %5 : vector<1x88x256xbf16> to vector<88x256xbf16>
    %c1_7 = arith.constant 1 : index
    %c0_8 = arith.constant 0 : index
    %c0_9 = arith.constant 0 : index
    %7 = vector.load %arg2[%c1_7, %c0_8, %c0_9] : memref<4x256x128xbf16, #tpu.memory_space<vmem>>, vector<1x256x128xbf16>
    %8 = vector.shape_cast %7 : vector<1x256x128xbf16> to vector<256x128xbf16>
    %cst_10 = arith.constant dense<0.000000e+00> : vector<88x128xf32>
    %9 = tpu.matmul %6, %8, %cst_10 {dimension_numbers = #tpu.dot_dimension_numbers<[1], [0], [0], [1], [0, 0, 1, 1], [], []>} : vector<88x256xbf16>, vector<256x128xbf16>, vector<88x128xf32> -> vector<88x128xf32>
    %10 = arith.addf %4, %9 : vector<88x128xf32>
    %c0_11 = arith.constant 0 : index
    %c9 = arith.constant 9 : index
    %c0_12 = arith.constant 0 : index
    %11 = vector.load %arg1[%c0_11, %c9, %c0_12] : memref<1x105x256xbf16, #tpu.memory_space<vmem>>, vector<1x88x256xbf16>
    %12 = vector.shape_cast %11 : vector<1x88x256xbf16> to vector<88x256xbf16>
    %c2 = arith.constant 2 : index
    %c0_13 = arith.constant 0 : index
    %c0_14 = arith.constant 0 : index
    %13 = vector.load %arg2[%c2, %c0_13, %c0_14] : memref<4x256x128xbf16, #tpu.memory_space<vmem>>, vector<1x256x128xbf16>
    %14 = vector.shape_cast %13 : vector<1x256x128xbf16> to vector<256x128xbf16>
    %cst_15 = arith.constant dense<0.000000e+00> : vector<88x128xf32>
    %15 = tpu.matmul %12, %14, %cst_15 {dimension_numbers = #tpu.dot_dimension_numbers<[1], [0], [0], [1], [0, 0, 1, 1], [], []>} : vector<88x256xbf16>, vector<256x128xbf16>, vector<88x128xf32> -> vector<88x128xf32>
    %16 = arith.addf %10, %15 : vector<88x128xf32>
    %c0_16 = arith.constant 0 : index
    %c10 = arith.constant 10 : index
    %c0_17 = arith.constant 0 : index
    %17 = vector.load %arg1[%c0_16, %c10, %c0_17] : memref<1x105x256xbf16, #tpu.memory_space<vmem>>, vector<1x88x256xbf16>
    %18 = vector.shape_cast %17 : vector<1x88x256xbf16> to vector<88x256xbf16>
    %c3 = arith.constant 3 : index
    %c0_18 = arith.constant 0 : index
    %c0_19 = arith.constant 0 : index
    %19 = vector.load %arg2[%c3, %c0_18, %c0_19] : memref<4x256x128xbf16, #tpu.memory_space<vmem>>, vector<1x256x128xbf16>
    %20 = vector.shape_cast %19 : vector<1x256x128xbf16> to vector<256x128xbf16>
    %cst_20 = arith.constant dense<0.000000e+00> : vector<88x128xf32>
    %21 = tpu.matmul %18, %20, %cst_20 {dimension_numbers = #tpu.dot_dimension_numbers<[1], [0], [0], [1], [0, 0, 1, 1], [], []>} : vector<88x256xbf16>, vector<256x128xbf16>, vector<88x128xf32> -> vector<88x128xf32>
    %22 = arith.addf %16, %21 : vector<88x128xf32>
    %c0_21 = arith.constant 0 : index
    %c0_22 = arith.constant 0 : index
    %23 = vector.load %arg3[%c0_21, %c0_22] : memref<88x1xf32, #tpu.memory_space<vmem>>, vector<88x1xf32>
    %24 = vector.broadcast %23 : vector<88x1xf32> to vector<88x128xf32>
    %25 = arith.mulf %22, %24 : vector<88x128xf32>
    %cst_23 = arith.constant dense<0.000000e+00> : vector<128xf32>
    %26 = vector.multi_reduction <add>, %25, %cst_23 [0] : vector<88x128xf32> to vector<128xf32>
    %27 = vector.shape_cast %26 : vector<128xf32> to vector<1x128xf32>
    %28 = arith.mulf %25, %25 : vector<88x128xf32>
    %cst_24 = arith.constant dense<0.000000e+00> : vector<128xf32>
    %29 = vector.multi_reduction <add>, %28, %cst_24 [0] : vector<88x128xf32> to vector<128xf32>
    %30 = vector.shape_cast %29 : vector<128xf32> to vector<1x128xf32>
    %31 = vector.shape_cast %27 : vector<1x128xf32> to vector<1x128xf32>
    %32 = vector.broadcast %31 : vector<1x128xf32> to vector<8x128xf32>
    %c0_25 = arith.constant 0 : index
    %c0_26 = arith.constant 0 : index
    %c0_27 = arith.constant 0 : index
    %33 = vector.load %arg5[%c0_25, %c0_26, %c0_27] : memref<1x8x128xf32, #tpu.memory_space<vmem>>, vector<1x8x128xf32>
    %34 = vector.shape_cast %33 : vector<1x8x128xf32> to vector<8x128xf32>
    %35 = vector.shape_cast %32 : vector<8x128xf32> to vector<1x8x128xf32>
    tpu.vector_store %arg5[%c0_25, %c0_26, %c0_27], %35 {strides = array<i32>} : memref<1x8x128xf32, #tpu.memory_space<vmem>>, vector<1x8x128xf32>,
    %36 = vector.shape_cast %30 : vector<1x128xf32> to vector<1x128xf32>
    %37 = vector.broadcast %36 : vector<1x128xf32> to vector<8x128xf32>
    %c0_28 = arith.constant 0 : index
    %c0_29 = arith.constant 0 : index
    %c0_30 = arith.constant 0 : index
    %38 = vector.load %arg6[%c0_28, %c0_29, %c0_30] : memref<1x8x128xf32, #tpu.memory_space<vmem>>, vector<1x8x128xf32>
    %39 = vector.shape_cast %38 : vector<1x8x128xf32> to vector<8x128xf32>
    %40 = vector.shape_cast %37 : vector<8x128xf32> to vector<1x8x128xf32>
    tpu.vector_store %arg6[%c0_28, %c0_29, %c0_30], %40 {strides = array<i32>} : memref<1x8x128xf32, #tpu.memory_space<vmem>>, vector<1x8x128xf32>,
    %c0_31 = arith.constant 0 : index
    %c0_32 = arith.constant 0 : index
    %c0_33 = arith.constant 0 : index
    %41 = vector.load %arg4[%c0_31, %c0_32, %c0_33] : memref<1x88x128xf32, #tpu.memory_space<vmem>>, vector<1x88x128xf32>
    %42 = vector.shape_cast %41 : vector<1x88x128xf32> to vector<88x128xf32>
    %43 = vector.shape_cast %25 : vector<88x128xf32> to vector<1x88x128xf32>
    tpu.vector_store %arg4[%c0_31, %c0_32, %c0_33], %43 {strides = array<i32>} : memref<1x88x128xf32, #tpu.memory_space<vmem>>, vector<1x88x128xf32>,
    return
  }
  func.func @transform_0(%arg0: i32) -> (i32, i32, i32) {
    %c0_i32 = arith.constant 0 : i32
    %c0_i32_0 = arith.constant 0 : i32
    %c0_i32_1 = arith.constant 0 : i32
    return %arg0, %c0_i32, %c0_i32_0 : i32, i32, i32
  }
  func.func @transform_1(%arg0: i32) -> (i32, i32, i32) {
    %c0_i32 = arith.constant 0 : i32
    %c0_i32_0 = arith.constant 0 : i32
    %c0_i32_1 = arith.constant 0 : i32
    %c0_i32_2 = arith.constant 0 : i32
    return %c0_i32, %c0_i32_0, %c0_i32_1 : i32, i32, i32
  }
  func.func @transform_2(%arg0: i32) -> (i32, i32) {
    %c0_i32 = arith.constant 0 : i32
    %c0_i32_0 = arith.constant 0 : i32
    %c0_i32_1 = arith.constant 0 : i32
    return %c0_i32, %c0_i32_0 : i32, i32
  }
  func.func @transform_3(%arg0: i32) -> (i32, i32, i32) {
    %c0_i32 = arith.constant 0 : i32
    %c0_i32_0 = arith.constant 0 : i32
    %c0_i32_1 = arith.constant 0 : i32
    return %arg0, %c0_i32, %c0_i32_0 : i32, i32, i32
  }
  func.func @transform_4(%arg0: i32) -> (i32, i32, i32) {
    %c0_i32 = arith.constant 0 : i32
    %c0_i32_0 = arith.constant 0 : i32
    %c0_i32_1 = arith.constant 0 : i32
    return %arg0, %c0_i32, %c0_i32_0 : i32, i32, i32
  }
  func.func @transform_5(%arg0: i32) -> (i32, i32, i32) {
    %c0_i32 = arith.constant 0 : i32
    %c0_i32_0 = arith.constant 0 : i32
    %c0_i32_1 = arith.constant 0 : i32
    return %arg0, %c0_i32, %c0_i32_0 : i32, i32, i32
  }
}

module attributes {stable_mosaic.version = 11 : i64} {
  func.func @_affine_lrelu_kernel(%arg0: i32, %arg1: memref<1x88x128xf32, #tpu.memory_space<vmem>>, %arg2: memref<1x128xf32, #tpu.memory_space<vmem>>, %arg3: memref<1x128xf32, #tpu.memory_space<vmem>>, %arg4: memref<1x88x128xbf16, #tpu.memory_space<vmem>>) attributes {dimension_semantics = [#tpu.dimension_semantics<parallel>], iteration_bounds = array<i64: 2>, scalar_prefetch = 0 : i64, scratch_operands = 0 : i64, tpu.core_type = #tpu.core_type<tc>, window_params = [{transform_indices = @transform_0, window_bounds = array<i64: 1, 88, 128>}, {pipeline_mode = #tpu.pipeline_mode<synchronous>, transform_indices = @transform_1, window_bounds = array<i64: 1, 128>}, {pipeline_mode = #tpu.pipeline_mode<synchronous>, transform_indices = @transform_2, window_bounds = array<i64: 1, 128>}, {transform_indices = @transform_3, window_bounds = array<i64: 1, 88, 128>}]} {
    %c0 = arith.constant 0 : index
    %c0_0 = arith.constant 0 : index
    %c0_1 = arith.constant 0 : index
    %0 = vector.load %arg1[%c0, %c0_0, %c0_1] : memref<1x88x128xf32, #tpu.memory_space<vmem>>, vector<1x88x128xf32>
    %c0_2 = arith.constant 0 : index
    %c0_3 = arith.constant 0 : index
    %1 = vector.load %arg2[%c0_2, %c0_3] : memref<1x128xf32, #tpu.memory_space<vmem>>, vector<1x128xf32>
    %2 = vector.shape_cast %1 : vector<1x128xf32> to vector<1x1x128xf32>
    %3 = vector.broadcast %2 : vector<1x1x128xf32> to vector<1x88x128xf32>
    %4 = arith.mulf %0, %3 : vector<1x88x128xf32>
    %c0_4 = arith.constant 0 : index
    %c0_5 = arith.constant 0 : index
    %5 = vector.load %arg3[%c0_4, %c0_5] : memref<1x128xf32, #tpu.memory_space<vmem>>, vector<1x128xf32>
    %6 = vector.shape_cast %5 : vector<1x128xf32> to vector<1x1x128xf32>
    %7 = vector.broadcast %6 : vector<1x1x128xf32> to vector<1x88x128xf32>
    %8 = arith.addf %4, %7 : vector<1x88x128xf32>
    %cst = arith.constant 0.000000e+00 : f32
    %9 = vector.broadcast %cst : f32 to vector<1x88x128xf32>
    %10 = arith.cmpf ogt, %8, %9 : vector<1x88x128xf32>
    %cst_6 = arith.constant 2.000000e-01 : f32
    %11 = vector.broadcast %cst_6 : f32 to vector<1x88x128xf32>
    %12 = arith.mulf %11, %8 : vector<1x88x128xf32>
    %13 = arith.select %10, %8, %12 : vector<1x88x128xi1>, vector<1x88x128xf32>
    %14 = arith.truncf %13 : vector<1x88x128xf32> to vector<1x88x128xbf16>
    %c0_7 = arith.constant 0 : index
    %c0_8 = arith.constant 0 : index
    %c0_9 = arith.constant 0 : index
    %15 = vector.load %arg4[%c0_7, %c0_8, %c0_9] : memref<1x88x128xbf16, #tpu.memory_space<vmem>>, vector<1x88x128xbf16>
    tpu.vector_store %arg4[%c0_7, %c0_8, %c0_9], %14 {strides = array<i32>} : memref<1x88x128xbf16, #tpu.memory_space<vmem>>, vector<1x88x128xbf16>,
    return
  }
  func.func @transform_0(%arg0: i32) -> (i32, i32, i32) {
    %c0_i32 = arith.constant 0 : i32
    %c0_i32_0 = arith.constant 0 : i32
    %c0_i32_1 = arith.constant 0 : i32
    return %arg0, %c0_i32, %c0_i32_0 : i32, i32, i32
  }
  func.func @transform_1(%arg0: i32) -> (i32, i32) {
    %c0_i32 = arith.constant 0 : i32
    %c0_i32_0 = arith.constant 0 : i32
    %c0_i32_1 = arith.constant 0 : i32
    return %c0_i32, %c0_i32_0 : i32, i32
  }
  func.func @transform_2(%arg0: i32) -> (i32, i32) {
    %c0_i32 = arith.constant 0 : i32
    %c0_i32_0 = arith.constant 0 : i32
    %c0_i32_1 = arith.constant 0 : i32
    return %c0_i32, %c0_i32_0 : i32, i32
  }
  func.func @transform_3(%arg0: i32) -> (i32, i32, i32) {
    %c0_i32 = arith.constant 0 : i32
    %c0_i32_0 = arith.constant 0 : i32
    %c0_i32_1 = arith.constant 0 : i32
    return %arg0, %c0_i32, %c0_i32_0 : i32, i32, i32
  }
}

module attributes {stable_mosaic.version = 11 : i64} {
  func.func @_conv_taps_stats_kernel(%arg0: i32, %arg1: memref<1x45x512xbf16, #tpu.memory_space<vmem>>, %arg2: memref<4x512x256xbf16, #tpu.memory_space<vmem>>, %arg3: memref<32x1xf32, #tpu.memory_space<vmem>>, %arg4: memref<1x32x256xf32, #tpu.memory_space<vmem>>, %arg5: memref<1x8x256xf32, #tpu.memory_space<vmem>>, %arg6: memref<1x8x256xf32, #tpu.memory_space<vmem>>) attributes {dimension_semantics = [#tpu.dimension_semantics<parallel>], iteration_bounds = array<i64: 2>, scalar_prefetch = 0 : i64, scratch_operands = 0 : i64, tpu.core_type = #tpu.core_type<tc>, window_params = [{transform_indices = @transform_0, window_bounds = array<i64: 1, 45, 512>}, {pipeline_mode = #tpu.pipeline_mode<synchronous>, transform_indices = @transform_1, window_bounds = array<i64: 4, 512, 256>}, {pipeline_mode = #tpu.pipeline_mode<synchronous>, transform_indices = @transform_2, window_bounds = array<i64: 32, 1>}, {transform_indices = @transform_3, window_bounds = array<i64: 1, 32, 256>}, {transform_indices = @transform_4, window_bounds = array<i64: 1, 8, 256>}, {transform_indices = @transform_5, window_bounds = array<i64: 1, 8, 256>}]} {
    %c0 = arith.constant 0 : index
    %c0_0 = arith.constant 0 : index
    %c0_1 = arith.constant 0 : index
    %0 = vector.load %arg1[%c0, %c0_0, %c0_1] : memref<1x45x512xbf16, #tpu.memory_space<vmem>>, vector<1x32x512xbf16>
    %1 = vector.shape_cast %0 : vector<1x32x512xbf16> to vector<32x512xbf16>
    %c0_2 = arith.constant 0 : index
    %c0_3 = arith.constant 0 : index
    %c0_4 = arith.constant 0 : index
    %2 = vector.load %arg2[%c0_2, %c0_3, %c0_4] : memref<4x512x256xbf16, #tpu.memory_space<vmem>>, vector<1x512x256xbf16>
    %3 = vector.shape_cast %2 : vector<1x512x256xbf16> to vector<512x256xbf16>
    %cst = arith.constant dense<0.000000e+00> : vector<32x256xf32>
    %4 = tpu.matmul %1, %3, %cst {dimension_numbers = #tpu.dot_dimension_numbers<[1], [0], [0], [1], [0, 0, 1, 1], [], []>} : vector<32x512xbf16>, vector<512x256xbf16>, vector<32x256xf32> -> vector<32x256xf32>
    %c0_5 = arith.constant 0 : index
    %c1 = arith.constant 1 : index
    %c0_6 = arith.constant 0 : index
    %5 = vector.load %arg1[%c0_5, %c1, %c0_6] : memref<1x45x512xbf16, #tpu.memory_space<vmem>>, vector<1x32x512xbf16>
    %6 = vector.shape_cast %5 : vector<1x32x512xbf16> to vector<32x512xbf16>
    %c1_7 = arith.constant 1 : index
    %c0_8 = arith.constant 0 : index
    %c0_9 = arith.constant 0 : index
    %7 = vector.load %arg2[%c1_7, %c0_8, %c0_9] : memref<4x512x256xbf16, #tpu.memory_space<vmem>>, vector<1x512x256xbf16>
    %8 = vector.shape_cast %7 : vector<1x512x256xbf16> to vector<512x256xbf16>
    %cst_10 = arith.constant dense<0.000000e+00> : vector<32x256xf32>
    %9 = tpu.matmul %6, %8, %cst_10 {dimension_numbers = #tpu.dot_dimension_numbers<[1], [0], [0], [1], [0, 0, 1, 1], [], []>} : vector<32x512xbf16>, vector<512x256xbf16>, vector<32x256xf32> -> vector<32x256xf32>
    %10 = arith.addf %4, %9 : vector<32x256xf32>
    %c0_11 = arith.constant 0 : index
    %c5 = arith.constant 5 : index
    %c0_12 = arith.constant 0 : index
    %11 = vector.load %arg1[%c0_11, %c5, %c0_12] : memref<1x45x512xbf16, #tpu.memory_space<vmem>>, vector<1x32x512xbf16>
    %12 = vector.shape_cast %11 : vector<1x32x512xbf16> to vector<32x512xbf16>
    %c2 = arith.constant 2 : index
    %c0_13 = arith.constant 0 : index
    %c0_14 = arith.constant 0 : index
    %13 = vector.load %arg2[%c2, %c0_13, %c0_14] : memref<4x512x256xbf16, #tpu.memory_space<vmem>>, vector<1x512x256xbf16>
    %14 = vector.shape_cast %13 : vector<1x512x256xbf16> to vector<512x256xbf16>
    %cst_15 = arith.constant dense<0.000000e+00> : vector<32x256xf32>
    %15 = tpu.matmul %12, %14, %cst_15 {dimension_numbers = #tpu.dot_dimension_numbers<[1], [0], [0], [1], [0, 0, 1, 1], [], []>} : vector<32x512xbf16>, vector<512x256xbf16>, vector<32x256xf32> -> vector<32x256xf32>
    %16 = arith.addf %10, %15 : vector<32x256xf32>
    %c0_16 = arith.constant 0 : index
    %c6 = arith.constant 6 : index
    %c0_17 = arith.constant 0 : index
    %17 = vector.load %arg1[%c0_16, %c6, %c0_17] : memref<1x45x512xbf16, #tpu.memory_space<vmem>>, vector<1x32x512xbf16>
    %18 = vector.shape_cast %17 : vector<1x32x512xbf16> to vector<32x512xbf16>
    %c3 = arith.constant 3 : index
    %c0_18 = arith.constant 0 : index
    %c0_19 = arith.constant 0 : index
    %19 = vector.load %arg2[%c3, %c0_18, %c0_19] : memref<4x512x256xbf16, #tpu.memory_space<vmem>>, vector<1x512x256xbf16>
    %20 = vector.shape_cast %19 : vector<1x512x256xbf16> to vector<512x256xbf16>
    %cst_20 = arith.constant dense<0.000000e+00> : vector<32x256xf32>
    %21 = tpu.matmul %18, %20, %cst_20 {dimension_numbers = #tpu.dot_dimension_numbers<[1], [0], [0], [1], [0, 0, 1, 1], [], []>} : vector<32x512xbf16>, vector<512x256xbf16>, vector<32x256xf32> -> vector<32x256xf32>
    %22 = arith.addf %16, %21 : vector<32x256xf32>
    %c0_21 = arith.constant 0 : index
    %c0_22 = arith.constant 0 : index
    %23 = vector.load %arg3[%c0_21, %c0_22] : memref<32x1xf32, #tpu.memory_space<vmem>>, vector<32x1xf32>
    %24 = vector.broadcast %23 : vector<32x1xf32> to vector<32x256xf32>
    %25 = arith.mulf %22, %24 : vector<32x256xf32>
    %cst_23 = arith.constant dense<0.000000e+00> : vector<256xf32>
    %26 = vector.multi_reduction <add>, %25, %cst_23 [0] : vector<32x256xf32> to vector<256xf32>
    %27 = vector.shape_cast %26 : vector<256xf32> to vector<1x256xf32>
    %28 = arith.mulf %25, %25 : vector<32x256xf32>
    %cst_24 = arith.constant dense<0.000000e+00> : vector<256xf32>
    %29 = vector.multi_reduction <add>, %28, %cst_24 [0] : vector<32x256xf32> to vector<256xf32>
    %30 = vector.shape_cast %29 : vector<256xf32> to vector<1x256xf32>
    %31 = vector.shape_cast %27 : vector<1x256xf32> to vector<1x256xf32>
    %32 = vector.broadcast %31 : vector<1x256xf32> to vector<8x256xf32>
    %c0_25 = arith.constant 0 : index
    %c0_26 = arith.constant 0 : index
    %c0_27 = arith.constant 0 : index
    %33 = vector.load %arg5[%c0_25, %c0_26, %c0_27] : memref<1x8x256xf32, #tpu.memory_space<vmem>>, vector<1x8x256xf32>
    %34 = vector.shape_cast %33 : vector<1x8x256xf32> to vector<8x256xf32>
    %35 = vector.shape_cast %32 : vector<8x256xf32> to vector<1x8x256xf32>
    tpu.vector_store %arg5[%c0_25, %c0_26, %c0_27], %35 {strides = array<i32>} : memref<1x8x256xf32, #tpu.memory_space<vmem>>, vector<1x8x256xf32>,
    %36 = vector.shape_cast %30 : vector<1x256xf32> to vector<1x256xf32>
    %37 = vector.broadcast %36 : vector<1x256xf32> to vector<8x256xf32>
    %c0_28 = arith.constant 0 : index
    %c0_29 = arith.constant 0 : index
    %c0_30 = arith.constant 0 : index
    %38 = vector.load %arg6[%c0_28, %c0_29, %c0_30] : memref<1x8x256xf32, #tpu.memory_space<vmem>>, vector<1x8x256xf32>
    %39 = vector.shape_cast %38 : vector<1x8x256xf32> to vector<8x256xf32>
    %40 = vector.shape_cast %37 : vector<8x256xf32> to vector<1x8x256xf32>
    tpu.vector_store %arg6[%c0_28, %c0_29, %c0_30], %40 {strides = array<i32>} : memref<1x8x256xf32, #tpu.memory_space<vmem>>, vector<1x8x256xf32>,
    %c0_31 = arith.constant 0 : index
    %c0_32 = arith.constant 0 : index
    %c0_33 = arith.constant 0 : index
    %41 = vector.load %arg4[%c0_31, %c0_32, %c0_33] : memref<1x32x256xf32, #tpu.memory_space<vmem>>, vector<1x32x256xf32>
    %42 = vector.shape_cast %41 : vector<1x32x256xf32> to vector<32x256xf32>
    %43 = vector.shape_cast %25 : vector<32x256xf32> to vector<1x32x256xf32>
    tpu.vector_store %arg4[%c0_31, %c0_32, %c0_33], %43 {strides = array<i32>} : memref<1x32x256xf32, #tpu.memory_space<vmem>>, vector<1x32x256xf32>,
    return
  }
  func.func @transform_0(%arg0: i32) -> (i32, i32, i32) {
    %c0_i32 = arith.constant 0 : i32
    %c0_i32_0 = arith.constant 0 : i32
    %c0_i32_1 = arith.constant 0 : i32
    return %arg0, %c0_i32, %c0_i32_0 : i32, i32, i32
  }
  func.func @transform_1(%arg0: i32) -> (i32, i32, i32) {
    %c0_i32 = arith.constant 0 : i32
    %c0_i32_0 = arith.constant 0 : i32
    %c0_i32_1 = arith.constant 0 : i32
    %c0_i32_2 = arith.constant 0 : i32
    return %c0_i32, %c0_i32_0, %c0_i32_1 : i32, i32, i32
  }
  func.func @transform_2(%arg0: i32) -> (i32, i32) {
    %c0_i32 = arith.constant 0 : i32
    %c0_i32_0 = arith.constant 0 : i32
    %c0_i32_1 = arith.constant 0 : i32
    return %c0_i32, %c0_i32_0 : i32, i32
  }
  func.func @transform_3(%arg0: i32) -> (i32, i32, i32) {
    %c0_i32 = arith.constant 0 : i32
    %c0_i32_0 = arith.constant 0 : i32
    %c0_i32_1 = arith.constant 0 : i32
    return %arg0, %c0_i32, %c0_i32_0 : i32, i32, i32
  }
  func.func @transform_4(%arg0: i32) -> (i32, i32, i32) {
    %c0_i32 = arith.constant 0 : i32
    %c0_i32_0 = arith.constant 0 : i32
    %c0_i32_1 = arith.constant 0 : i32
    return %arg0, %c0_i32, %c0_i32_0 : i32, i32, i32
  }
  func.func @transform_5(%arg0: i32) -> (i32, i32, i32) {
    %c0_i32 = arith.constant 0 : i32
    %c0_i32_0 = arith.constant 0 : i32
    %c0_i32_1 = arith.constant 0 : i32
    return %arg0, %c0_i32, %c0_i32_0 : i32, i32, i32
  }
}

module attributes {stable_mosaic.version = 11 : i64} {
  func.func @_affine_lrelu_kernel(%arg0: i32, %arg1: memref<1x32x256xf32, #tpu.memory_space<vmem>>, %arg2: memref<1x256xf32, #tpu.memory_space<vmem>>, %arg3: memref<1x256xf32, #tpu.memory_space<vmem>>, %arg4: memref<1x32x256xbf16, #tpu.memory_space<vmem>>) attributes {dimension_semantics = [#tpu.dimension_semantics<parallel>], iteration_bounds = array<i64: 2>, scalar_prefetch = 0 : i64, scratch_operands = 0 : i64, tpu.core_type = #tpu.core_type<tc>, window_params = [{transform_indices = @transform_0, window_bounds = array<i64: 1, 32, 256>}, {pipeline_mode = #tpu.pipeline_mode<synchronous>, transform_indices = @transform_1, window_bounds = array<i64: 1, 256>}, {pipeline_mode = #tpu.pipeline_mode<synchronous>, transform_indices = @transform_2, window_bounds = array<i64: 1, 256>}, {transform_indices = @transform_3, window_bounds = array<i64: 1, 32, 256>}]} {
    %c0 = arith.constant 0 : index
    %c0_0 = arith.constant 0 : index
    %c0_1 = arith.constant 0 : index
    %0 = vector.load %arg1[%c0, %c0_0, %c0_1] : memref<1x32x256xf32, #tpu.memory_space<vmem>>, vector<1x32x256xf32>
    %c0_2 = arith.constant 0 : index
    %c0_3 = arith.constant 0 : index
    %1 = vector.load %arg2[%c0_2, %c0_3] : memref<1x256xf32, #tpu.memory_space<vmem>>, vector<1x256xf32>
    %2 = vector.shape_cast %1 : vector<1x256xf32> to vector<1x1x256xf32>
    %3 = vector.broadcast %2 : vector<1x1x256xf32> to vector<1x32x256xf32>
    %4 = arith.mulf %0, %3 : vector<1x32x256xf32>
    %c0_4 = arith.constant 0 : index
    %c0_5 = arith.constant 0 : index
    %5 = vector.load %arg3[%c0_4, %c0_5] : memref<1x256xf32, #tpu.memory_space<vmem>>, vector<1x256xf32>
    %6 = vector.shape_cast %5 : vector<1x256xf32> to vector<1x1x256xf32>
    %7 = vector.broadcast %6 : vector<1x1x256xf32> to vector<1x32x256xf32>
    %8 = arith.addf %4, %7 : vector<1x32x256xf32>
    %cst = arith.constant 0.000000e+00 : f32
    %9 = vector.broadcast %cst : f32 to vector<1x32x256xf32>
    %10 = arith.cmpf ogt, %8, %9 : vector<1x32x256xf32>
    %cst_6 = arith.constant 2.000000e-01 : f32
    %11 = vector.broadcast %cst_6 : f32 to vector<1x32x256xf32>
    %12 = arith.mulf %11, %8 : vector<1x32x256xf32>
    %13 = arith.select %10, %8, %12 : vector<1x32x256xi1>, vector<1x32x256xf32>
    %14 = arith.truncf %13 : vector<1x32x256xf32> to vector<1x32x256xbf16>
    %c0_7 = arith.constant 0 : index
    %c0_8 = arith.constant 0 : index
    %c0_9 = arith.constant 0 : index
    %15 = vector.load %arg4[%c0_7, %c0_8, %c0_9] : memref<1x32x256xbf16, #tpu.memory_space<vmem>>, vector<1x32x256xbf16>
    tpu.vector_store %arg4[%c0_7, %c0_8, %c0_9], %14 {strides = array<i32>} : memref<1x32x256xbf16, #tpu.memory_space<vmem>>, vector<1x32x256xbf16>,
    return
  }
  func.func @transform_0(%arg0: i32) -> (i32, i32, i32) {
    %c0_i32 = arith.constant 0 : i32
    %c0_i32_0 = arith.constant 0 : i32
    %c0_i32_1 = arith.constant 0 : i32
    return %arg0, %c0_i32, %c0_i32_0 : i32, i32, i32
  }
  func.func @transform_1(%arg0: i32) -> (i32, i32) {
    %c0_i32 = arith.constant 0 : i32
    %c0_i32_0 = arith.constant 0 : i32
    %c0_i32_1 = arith.constant 0 : i32
    return %c0_i32, %c0_i32_0 : i32, i32
  }
  func.func @transform_2(%arg0: i32) -> (i32, i32) {
    %c0_i32 = arith.constant 0 : i32
    %c0_i32_0 = arith.constant 0 : i32
    %c0_i32_1 = arith.constant 0 : i32
    return %c0_i32, %c0_i32_0 : i32, i32
  }
  func.func @transform_3(%arg0: i32) -> (i32, i32, i32) {
    %c0_i32 = arith.constant 0 : i32
    %c0_i32_0 = arith.constant 0 : i32
    %c0_i32_1 = arith.constant 0 : i32
    return %arg0, %c0_i32, %c0_i32_0 : i32, i32, i32
  }
}

module attributes {stable_mosaic.version = 11 : i64} {
  func.func @_head_kernel(%arg0: i32, %arg1: memref<8x4096xbf16, #tpu.memory_space<vmem>>, %arg2: memref<4096x128xbf16, #tpu.memory_space<vmem>>, %arg3: memref<8x128xf32, #tpu.memory_space<vmem>>) attributes {dimension_semantics = [#tpu.dimension_semantics<arbitrary>], iteration_bounds = array<i64: 1>, scalar_prefetch = 0 : i64, scratch_operands = 0 : i64, tpu.core_type = #tpu.core_type<tc>, window_params = [{pipeline_mode = #tpu.pipeline_mode<synchronous>, transform_indices = @transform_0, window_bounds = array<i64: 8, 4096>}, {pipeline_mode = #tpu.pipeline_mode<synchronous>, transform_indices = @transform_1, window_bounds = array<i64: 4096, 128>}, {pipeline_mode = #tpu.pipeline_mode<synchronous>, transform_indices = @transform_2, window_bounds = array<i64: 8, 128>}]} {
    %c0 = arith.constant 0 : index
    %c0_0 = arith.constant 0 : index
    %0 = vector.load %arg1[%c0, %c0_0] : memref<8x4096xbf16, #tpu.memory_space<vmem>>, vector<8x4096xbf16>
    %c0_1 = arith.constant 0 : index
    %c0_2 = arith.constant 0 : index
    %1 = vector.load %arg2[%c0_1, %c0_2] : memref<4096x128xbf16, #tpu.memory_space<vmem>>, vector<4096x128xbf16>
    %cst = arith.constant dense<0.000000e+00> : vector<8x128xf32>
    %2 = tpu.matmul %0, %1, %cst {dimension_numbers = #tpu.dot_dimension_numbers<[1], [0], [0], [1], [0, 0, 1, 1], [], []>} : vector<8x4096xbf16>, vector<4096x128xbf16>, vector<8x128xf32> -> vector<8x128xf32>
    %cst_3 = arith.constant 0.000000e+00 : f32
    %3 = vector.broadcast %cst_3 : f32 to vector<8x128xf32>
    %4 = arith.subf %3, %2 : vector<8x128xf32>
    %5 = math.exp %4 : vector<8x128xf32>
    %cst_4 = arith.constant 1.000000e+00 : f32
    %6 = vector.broadcast %cst_4 : f32 to vector<8x128xf32>
    %7 = arith.addf %6, %5 : vector<8x128xf32>
    %8 = tpu.reciprocal %7 {approx = true} : vector<8x128xf32> -> vector<8x128xf32>
    %c0_5 = arith.constant 0 : index
    %c0_6 = arith.constant 0 : index
    %9 = vector.load %arg3[%c0_5, %c0_6] : memref<8x128xf32, #tpu.memory_space<vmem>>, vector<8x128xf32>
    tpu.vector_store %arg3[%c0_5, %c0_6], %8 {strides = array<i32>} : memref<8x128xf32, #tpu.memory_space<vmem>>, vector<8x128xf32>,
    return
  }
  func.func @transform_0(%arg0: i32) -> (i32, i32) {
    %c0_i32 = arith.constant 0 : i32
    %c0_i32_0 = arith.constant 0 : i32
    %c0_i32_1 = arith.constant 0 : i32
    return %c0_i32, %c0_i32_0 : i32, i32
  }
  func.func @transform_1(%arg0: i32) -> (i32, i32) {
    %c0_i32 = arith.constant 0 : i32
    %c0_i32_0 = arith.constant 0 : i32
    %c0_i32_1 = arith.constant 0 : i32
    return %c0_i32, %c0_i32_0 : i32, i32
  }
  func.func @transform_2(%arg0: i32) -> (i32, i32) {
    %c0_i32 = arith.constant 0 : i32
    %c0_i32_0 = arith.constant 0 : i32
    %c0_i32_1 = arith.constant 0 : i32
    return %c0_i32, %c0_i32_0 : i32, i32
  }
}

</mosaic_0001>

<bundles_post_ra>
// kernel: discriminator_forward.6
= control target key start
LH: loop header
LB: loop body
LE: loop exit
PB: predicated region body
PF: predicated region fallthrough
CT: control target
= control target key end

     0   :  { %s2071_s9 = smov 0   ;;  %s2425_s0 = inlined_call_operand.vmem [shape: bf16[2,321,12], index: 0, kind: input, shape index: {}]   ;;  %s2426_s1 = inlined_call_operand.vmem [shape: bf16[4,12,64], index: 1, kind: input, shape index: {}]   ;;  %s2427_s2 = inlined_call_operand.vmem [shape: bf16[2,296,64], index: 2, kind: output, shape index: {}]  }
   0x1 LB: > { %s1739_s10 = sadd.s32 4294967295, %s2054_s9   ;;  %p1743_p0 = scmp.ge.s32.totalorder %s2054_s9, 1  ;;  %s2054_s9 = sphi %s2071_s9, %s12_s9  }
   0x2   : > { %p112_p1 = scmp.lt.s32.totalorder %s2054_s9, 3 }
   0x4   : > { %p113_p2 = pnand %p1743_p0, %p112_p1 }
   0x5   : > { %p134_p3 = scmp.lt.s32.totalorder (!%p113_p2), %s1739_s10, 1 }
   0x6   : > { %116 = sbr.rel (%p113_p2) target bundleno = 457 (0x1c9), region = 28 }
   0xb   : > { %v1845_v0 = vld [vmem:[%s2426_s1] sm:$0xf]  ;;  %v2008_v1 = vld [vmem:[%s2426_s1] sm:$0x30]  ;;  %vm498_vm0 = vcmask 1045504   ;;  %s2429_s10 = smov (!%p134_p3, %s1739_s10), 1 }
   0xc   : > { %v1846_v2 = vor.u32 %v2008_v1, %v1845_v0  ;;  %v1967_v3 = vld [vmem:[%s2426_s1 + $0x18] sm:$0xf]  ;;  %v2029_v4 = vld [vmem:[%s2426_s1 + $0x18] sm:$0x30]  ;;  %v1942_v6 = vld [vmem:[%s2426_s1 + $0x10] sm:$0xf] }
   0xd   : > { %v1968_v5 = vor.u32 %v2029_v4, %v1967_v3  ;;  %v2028_v7 = vld [vmem:[%s2426_s1 + $0x10] sm:$0x30]  ;;  %v1822_v10 = vld [vmem:[%s2426_s1 + $0x8] sm:$0xf]  ;;  %v2009_v11 = vld [vmem:[%s2426_s1 + $0x8] sm:$0x30] }
   0xe   : > { %v651_v8 = vsel %vm498_vm0, %v1846_v2, 0  ;;  %v1943_v9 = vor.u32 %v2028_v7, %v1942_v6  ;;  %s2038_s27 = smul.u32 164, %s2429_s10  ;;  %v1823_v13 = vor.u32 %v2009_v11, %v1822_v10  ;;  %vm440_vm1 = vcmask 97280  }
   0xf   : > { %660 = vmatpush.bf16.msra.mxu1 %v651_v8  ;;  %v1356_v12 = vsel %vm498_vm0, %v1968_v5, 0  ;;  %vm1255_vm2 = vcmask 1046528   ;;  %vm283_vm3 = vsmask.f32 7424  ;;  %s2039_s3 = smul.u32 148, %s2429_s10  ;;  %vm1646_vm5 = vcmask 519168  }
  0x10   : > { %1365 = vmatpush.bf16.msra.mxu3 %v1356_v12  ;;  %v1106_v14 = vsel %vm498_vm0, %v1943_v9, 0  ;;  %s2112_s30 = scalar_lea.vmem %s2425_s0, %s2038_s27  ;;  %v500_v15 = vsel %vm498_vm0, %v1823_v13, 0 }
  0x11   : > { %1115 = vmatpush.bf16.msra.mxu2 %v1106_v14  ;;  %v1990_v16 = vld [vmem:[%s2112_s30] sm:$0xff]  ;;  %v2035_v17 = vld [vmem:[%s2112_s30 + $0x8] sm:$0xf0]  ;;  %v2010_v18 = vld [vmem:[%s2112_s30 + $0x10] sm:$0xff]  ;;  %509 = vmatpush.bf16.msra.mxu0 %v500_v15  ;;  %s2211_s6 = scalar_lea.vmem %s2427_s2, %s2039_s3 }
  0x12   : > { %v2036_v19 = vld [vmem:[%s2112_s30 + $0x8] sm:$0xe]  ;;  %v287_v22 = vshll.u32 %v1990_v16, 16  ;;  %1847 = vmatmul.msk.bf16.vlgmr.msra.gmra.mxu1 %vm440_vm1, %v1990_v16  ;;  %v1257_v24 = vrot.slane %v2010_v18, 1  ;;  %v900_v27 = vshll.u32 %v2010_v18, 16  ;;  %v285_v28 = vshrl.u32 %v1990_v16, 16 }
  0x13   : > { %v2034_v20 = vld [vmem:[%s2112_s30 + $0x8] sm:$0xff]   ;;  %v2037_v23 = vor.u32 %v2036_v19, %v2035_v17  ;;  %v1992_v40 = vld [vmem:[%s2112_s30 + $0x10] sm:$0xff]  ;;  %v2011_v41 = vld [vmem:[%s2112_s30 + $0x18] sm:$0xff]  ;;  %v904_v44 = vshrl.u32 %v2010_v18, 16 }
  0x14   : > { %v1991_v21 = vld [vmem:[%s2112_s30 + $0x8] sm:$0xff]  ;;  %v893_v25 = vshrl.u32 %v2034_v20, 16  ;;  %v895_v26 = vshll.u32 %v2034_v20, 16  ;;  %v289_v31 = vrot.slane %v287_v22, 1  ;;  %v902_v33 = vrot.slane %v900_v27, 1  ;;  %v1993_v54 = vld [vmem:[%s2112_s30 + $0x18] sm:$0xff] }
  0x15   : > { %v292_v29 = vshll.u32 %v1991_v21, 16  ;;  %v1256_v30 = vrot.slane %v2037_v23, 1  ;;  %v296_v42 = vshrl.u32 %v1991_v21, 16  ;;  %v300_v43 = vshll.u32 %v1992_v40, 16  ;;  %v2012_v55 = vld [vmem:[%s2112_s30 + $0x20] sm:$0xff]  ;;  %v2013_v5 = vld [vmem:[%s2112_s30 + $0x28] sm:$0xff] }
  0x16   : > { %v897_v32 = vrot.slane %v895_v26, 1  ;;  %v290_v36 = vor.u32 %v289_v31, %v285_v28  ;;  %v908_v45 = vshll.u32 %v2011_v41, 16  ;;  %v1259_v46 = vrot.slane %v2011_v41, 1  ;;  %v1994_v4 = vld [vmem:[%s2112_s30 + $0x20] sm:$0xff]  ;;  %v1995_v18 = vld [vmem:[%s2112_s30 + $0x28] sm:$0xff]  ;;  %v2014_v19 = vld [vmem:[%s2112_s30 + $0x30] sm:$0xff] }
  0x17   : > { %v294_v34 = vrot.slane %v292_v29, 1  ;;  %v1258_v35 = vsel %vm1255_vm2, %v1256_v30, %v1257_v24  ;;  %v302_v48 = vrot.slane %v300_v43, 1  ;;  %v906_v49 = vor.u32 %v904_v44, %v902_v33 }
  0x18   : > { %1969 = vmatmul.msk.bf16.vlgmr.msra.gmra.mxu3 %vm440_vm1, %v1258_v35  ;;  %v898_v37 = vor.u32 %v897_v32, %v893_v25  ;;  %v910_v50 = vrot.slane %v908_v45, 1  ;;  %v1260_v51 = vsel %vm1255_vm2, %v1257_v24, %v1259_v46  ;;  %v304_v56 = vshrl.u32 %v1992_v40, 16  ;;  %v1996_v32 = vld [vmem:[%s2112_s30 + $0x30] sm:$0xff] }
  0x19   : > { %v295_v38 = vsel %vm283_vm3, %v290_v36, %v294_v34  ;;  %v298_v47 = vor.u32 %v296_v42, %v294_v34  ;;  %v308_v57 = vshll.u32 %v1993_v54, 16  ;;  %v912_v58 = vshrl.u32 %v2011_v41, 16 }
  0x1a   : > { %v903_v39 = vsel %vm283_vm3, %v898_v37, %v902_v33  ;;  %1824 = vmatmul.msk.bf16.vlgmr.msra.gmra.mxu0 %vm440_vm1, %v295_v38  ;;  %v911_v53 = vsel %vm283_vm3, %v906_v49, %v910_v50  ;;  %v916_v59 = vshll.u32 %v2012_v55, 16  ;;  %v1261_v60 = vrot.slane %v2012_v55, 1  ;;  %v2015_v33 = vld [vmem:[%s2112_s30 + $0x38] sm:$0xff] }
  0x1b   : > { %1944 = vmatmul.msk.bf16.vlgmr.msra.gmra.mxu2 %vm440_vm1, %v903_v39  ;;  %v303_v52 = vsel %vm283_vm3, %v298_v47, %v302_v48  ;;  %v306_v61 = vor.u32 %v304_v56, %v302_v48  ;;  %v310_v62 = vrot.slane %v308_v57, 1  ;;  %v914_v63 = vor.u32 %v912_v58, %v910_v50  ;;  %v2016_v47 = vld [vmem:[%s2112_s30 + $0x40] sm:$0xff] }
  0x1c   : > { %v918_v0 = vrot.slane %v916_v59, 1  ;;  %v1262_v1 = vsel %vm1255_vm2, %v1259_v46, %v1261_v60  ;;  %v312_v6 = vshrl.u32 %v1993_v54, 16  ;;  %v316_v7 = vshll.u32 %v1994_v4, 16  ;;  %v1997_v46 = vld [vmem:[%s2112_s30 + $0x38] sm:$0xff] }
  0x1d   : > { %v311_v2 = vsel %vm283_vm3, %v306_v61, %v310_v62  ;;  %v920_v8 = vshrl.u32 %v2012_v55, 16  ;;  %v924_v9 = vshll.u32 %v2013_v5, 16  ;;  %v1263_v10 = vrot.slane %v2013_v5, 1  ;;  %v2017_v61 = vld [vmem:[%s2112_s30 + $0x48] sm:$0xff] }
  0x1e   : > { %v919_v3 = vsel %vm283_vm3, %v914_v63, %v918_v0  ;;  %v314_v11 = vor.u32 %v312_v6, %v310_v62  ;;  %v318_v12 = vrot.slane %v316_v7, 1  ;;  %v320_v20 = vshrl.u32 %v1994_v4, 16 }
  0x1f   : > { %v922_v13 = vor.u32 %v920_v8, %v918_v0  ;;  %v926_v14 = vrot.slane %v924_v9, 1  ;;  %v1264_v15 = vsel %vm1255_vm2, %v1261_v60, %v1263_v10  ;;  %v928_v22 = vshrl.u32 %v2013_v5, 16  ;;  %v1998_v60 = vld [vmem:[%s2112_s30 + $0x40] sm:$0xff] }
  0x20   : > { %v319_v16 = vsel %vm283_vm3, %v314_v11, %v318_v12  ;;  %v932_v23 = vshll.u32 %v2014_v19, 16  ;;  %v1265_v24 = vrot.slane %v2014_v19, 1  ;;  %v322_v25 = vor.u32 %v320_v20, %v318_v12  ;;  %v2018_v11 = vld [vmem:[%s2112_s30 + $0x50] sm:$0xff] }
  0x21   : > { %v927_v17 = vsel %vm283_vm3, %v922_v13, %v926_v14  ;;  %v930_v27 = vor.u32 %v928_v22, %v926_v14  ;;  %v328_v34 = vshrl.u32 %v1995_v18, 16  ;;  %v332_v35 = vshll.u32 %v1996_v32, 16 }
  0x22   : > { %1848 = vmatmul.msk.bf16.gmra.mxu1 %vm440_vm1, %v1991_v21  ;;  %v324_v21 = vshll.u32 %v1995_v18, 16  ;;  %v934_v28 = vrot.slane %v932_v23, 1  ;;  %v1266_v29 = vsel %vm1255_vm2, %v1263_v10, %v1265_v24  ;;  %v936_v36 = vshrl.u32 %v2014_v19, 16  ;;  %v1999_v10 = vld [vmem:[%s2112_s30 + $0x48] sm:$0xff] }
  0x23   : > { %v940_v37 = vshll.u32 %v2015_v33, 16  ;;  %v1267_v38 = vrot.slane %v2015_v33, 1  ;;  %v336_v48 = vshrl.u32 %v1996_v32, 16  ;;  %v340_v49 = vshll.u32 %v1997_v46, 16 }
  0x24   : > { %v326_v26 = vrot.slane %v324_v21, 1  ;;  %v935_v31 = vsel %vm283_vm3, %v930_v27, %v934_v28  ;;  %v938_v41 = vor.u32 %v936_v36, %v934_v28  ;;  %v944_v50 = vshrl.u32 %v2015_v33, 16 }
  0x25   : > { %v942_v42 = vrot.slane %v940_v37, 1  ;;  %v1268_v43 = vsel %vm1255_vm2, %v1265_v24, %v1267_v38  ;;  %v344_v62 = vshrl.u32 %v1997_v46, 16  ;;  %v348_v63 = vshll.u32 %v1998_v60, 16 }
  0x26   : > { %v327_v30 = vsel %vm283_vm3, %v322_v25, %v326_v26  ;;  %v330_v39 = vor.u32 %v328_v34, %v326_v26  ;;  %v952_v0 = vshrl.u32 %v2016_v47, 16  ;;  %v352_v12 = vshrl.u32 %v1998_v60, 16 }
  0x27   : > { %v943_v45 = vsel %vm283_vm3, %v938_v41, %v942_v42  ;;  %v946_v55 = vor.u32 %v944_v50, %v942_v42  ;;  %v356_v13 = vshll.u32 %v1999_v10, 16  ;;  %v360_v34 = vshrl.u32 %v1999_v10, 16 }
  0x28   : > { %1970 = vmatmul.msk.bf16.gmra.mxu3 %vm440_vm1, %v1260_v51  ;;  %v948_v51 = vshll.u32 %v2016_v47, 16  ;;  %v968_v37 = vshrl.u32 %v2018_v11, 16 }
  0x29   : > { %v358_v19 = vrot.slane %v356_v13, 1 }
  0x2a   : > { %1825 = vmatmul.msk.bf16.gmra.mxu0 %vm440_vm1, %v303_v52  ;;  %v1269_v52 = vrot.slane %v2016_v47, 1  ;;  %v950_v56 = vrot.slane %v948_v51, 1 }
  0x2b   : > { %1945 = vmatmul.msk.bf16.gmra.mxu2 %vm440_vm1, %v911_v53 }
  0x2c   : > { %v1270_v57 = vsel %vm1255_vm2, %v1267_v38, %v1269_v52  ;;  %v951_v59 = vsel %vm283_vm3, %v946_v55, %v950_v56  ;;  %v954_v5 = vor.u32 %v952_v0, %v950_v56 }
  0x32   : > { %1849 = vmatmul.msk.bf16.gmra.mxu1 %vm440_vm1, %v1992_v40  ;;  %v334_v40 = vrot.slane %v332_v35, 1 }
  0x34   : > { %v335_v44 = vsel %vm283_vm3, %v330_v39, %v334_v40  ;;  %v338_v53 = vor.u32 %v336_v48, %v334_v40 }
  0x38   : > { %1971 = vmatmul.msk.bf16.gmra.mxu3 %vm440_vm1, %v1262_v1  ;;  %v956_v1 = vshll.u32 %v2017_v61, 16 }
  0x3a   : > { %1826 = vmatmul.msk.bf16.gmra.mxu0 %vm440_vm1, %v311_v2  ;;  %v1271_v2 = vrot.slane %v2017_v61, 1  ;;  %v958_v6 = vrot.slane %v956_v1, 1 }
  0x3b   : > { %1946 = vmatmul.msk.bf16.gmra.mxu2 %vm440_vm1, %v919_v3 }
  0x3c   : > { %v1272_v7 = vsel %vm1255_vm2, %v1269_v52, %v1271_v2  ;;  %v959_v9 = vsel %vm283_vm3, %v954_v5, %v958_v6 }
  0x42   : > { %1850 = vmatmul.msk.bf16.gmra.mxu1 %vm440_vm1, %v1993_v54  ;;  %v342_v54 = vrot.slane %v340_v49, 1 }
  0x44   : > { %v343_v58 = vsel %vm283_vm3, %v338_v53, %v342_v54  ;;  %v346_v3 = vor.u32 %v344_v62, %v342_v54  ;;  %v2223_v62 = vld [vmem:[%s2112_s30 + $0x60] sm:$0xff] }
  0x48   : > { %1972 = vmatmul.msk.bf16.gmra.mxu3 %vm440_vm1, %v1264_v15  ;;  %v960_v15 = vshrl.u32 %v2017_v61, 16  ;;  %v2001_v61 = vld [vmem:[%s2112_s30 + $0x58] sm:$0xff] }
  0x49   : > { %v372_v5 = vshll.u32 %v2001_v61, 16 }
  0x4a   : > { %1827 = vmatmul.msk.bf16.gmra.mxu0 %vm440_vm1, %v319_v16  ;;  %v964_v16 = vshll.u32 %v2018_v11, 16  ;;  %v962_v20 = vor.u32 %v960_v15, %v958_v6 }
  0x4b   : > { %1947 = vmatmul.msk.bf16.gmra.mxu2 %vm440_vm1, %v927_v17  ;;  %v1273_v17 = vrot.slane %v2018_v11, 1 }
  0x4c   : > { %v966_v21 = vrot.slane %v964_v16, 1 }
  0x4d   : > { %v1274_v22 = vsel %vm1255_vm2, %v1271_v2, %v1273_v17 }
  0x4e   : > { %v967_v25 = vsel %vm283_vm3, %v962_v20, %v966_v21 }
  0x52   : > { %1851 = vmatmul.msk.bf16.gmra.mxu1 %vm440_vm1, %v1994_v4  ;;  %v350_v4 = vrot.slane %v348_v63, 1 }
  0x54   : > { %v351_v8 = vsel %vm283_vm3, %v346_v3, %v350_v4 }
  0x58   : > { %1973 = vmatmul.msk.bf16.gmra.mxu3 %vm440_vm1, %v1266_v29  ;;  %v2000_v29 = vld [vmem:[%s2112_s30 + $0x50] sm:$0xff] }
  0x59   : > { %v364_v35 = vshll.u32 %v2000_v29, 16 }
  0x5a   : > { %1828 = vmatmul.msk.bf16.gmra.mxu0 %vm440_vm1, %v327_v30  ;;  %v2202_v30 = vld [vmem:[%s2112_s30 + $0x58] sm:$0xff] }
  0x5b   : > { %1948 = vmatmul.msk.bf16.gmra.mxu2 %vm440_vm1, %v935_v31  ;;  %v972_v38 = vshll.u32 %v2202_v30, 16  ;;  %v1275_v40 = vrot.slane %v2202_v30, 1 }
  0x5d   : > { %v1276_v49 = vsel %vm1255_vm2, %v1273_v17, %v1275_v40 }
  0x62   : > { %1852 = vmatmul.msk.bf16.gmra.mxu1 %vm440_vm1, %v1995_v18  ;;  %v354_v18 = vor.u32 %v352_v12, %v350_v4  ;;  %v368_v4 = vshrl.u32 %v2000_v29, 16 }
  0x64   : > { %v359_v24 = vsel %vm283_vm3, %v354_v18, %v358_v19 }
  0x68   : > { %1974 = vmatmul.msk.bf16.gmra.mxu3 %vm440_vm1, %v1268_v43  ;;  %v362_v43 = vor.u32 %v360_v34, %v358_v19 }
  0x6a   : > { %1829 = vmatmul.msk.bf16.gmra.mxu0 %vm440_vm1, %v335_v44  ;;  %v366_v44 = vrot.slane %v364_v35, 1 }
  0x6b   : > { %1949 = vmatmul.msk.bf16.gmra.mxu2 %vm440_vm1, %v943_v45  ;;  %v970_v45 = vor.u32 %v968_v37, %v966_v21 }
  0x6c   : > { %v367_v54 = vsel %vm283_vm3, %v362_v43, %v366_v44  ;;  %v370_v13 = vor.u32 %v368_v4, %v366_v44 }
  0x72   : > { %1853 = vmatmul.msk.bf16.gmra.mxu1 %vm440_vm1, %v1996_v32 }
  0x78   : > { %1975 = vmatmul.msk.bf16.gmra.mxu3 %vm440_vm1, %v1270_v57 }
  0x7a   : > { %1830 = vmatmul.msk.bf16.gmra.mxu0 %vm440_vm1, %v343_v58 }
  0x7b   : > { %1950 = vmatmul.msk.bf16.gmra.mxu2 %vm440_vm1, %v951_v59 }
  0x82   : > { %1854 = vmatmul.msk.bf16.gmra.mxu1 %vm440_vm1, %v1997_v46  ;;  %v974_v46 = vrot.slane %v972_v38, 1  ;;  %v376_v38 = vshrl.u32 %v2001_v61, 16 }
  0x84   : > { %v975_v55 = vsel %vm283_vm3, %v970_v45, %v974_v46 }
  0x88   : > { %1976 = vmatmul.msk.bf16.gmra.mxu3 %vm440_vm1, %v1272_v7  ;;  %v976_v7 = vshrl.u32 %v2202_v30, 16 }
  0x8a   : > { %1831 = vmatmul.msk.bf16.gmra.mxu0 %vm440_vm1, %v351_v8  ;;  %v980_v8 = vshll.u32 %v2223_v62, 16  ;;  %v978_v15 = vor.u32 %v976_v7, %v974_v46 }
  0x8b   : > { %1951 = vmatmul.msk.bf16.gmra.mxu2 %vm440_vm1, %v959_v9 }
  0x8c   : > { %v982_v16 = vrot.slane %v980_v8, 1 }
  0x8f   : > { %v662_v14 = vpop.f32.mrf.mxu1 }
  0x92   : > { %1855 = vmatmul.msk.bf16.gmra.mxu1 %vm440_vm1, %v1998_v60 }
  0x97   : > { %v511_v23 = vpop.f32.mrf.mxu0  ;;  %v664_v26 = vpop.f32.mrf.mxu1 }
  0x98   : > { %1977 = vmatmul.msk.bf16.gmra.mxu3 %vm440_vm1, %v1274_v22  ;;  %v663_v27 = vadd.f32 %v662_v14, %v511_v23  ;;  %v374_v14 = vrot.slane %v372_v5, 1 }
  0x9a   : > { %1832 = vmatmul.msk.bf16.gmra.mxu0 %vm440_vm1, %v359_v24  ;;  %v375_v24 = vsel %vm283_vm3, %v370_v13, %v374_v14 }
  0x9b   : > { %1952 = vmatmul.msk.bf16.gmra.mxu2 %vm440_vm1, %v967_v25  ;;  %v1367_v28 = vpop.f32.mrf.mxu3  ;;  %v983_v25 = vsel %vm283_vm3, %v978_v15, %v982_v16 }
  0x9e   : > { %v1117_v31 = vpop.f32.mrf.mxu2 }
  0x9f   : > { %v1211_v32 = vadd.f32 %v1117_v31, %v663_v27  ;;  %v513_v33 = vpop.f32.mrf.mxu0  ;;  %v667_v36 = vpop.f32.mrf.mxu1  ;;  %v2002_v31 = vld [vmem:[%s2112_s30 + $0x60] sm:$0xff] }
  0xa0   : > { %v665_v48 = vadd.f32 %v664_v26, %v513_v33  ;;  %v384_v8 = vshrl.u32 %v2002_v31, 16 }
  0xa1   : > { %v1461_v39 = vadd.f32 %v1367_v28, %v1211_v32  ;;  %v2241_v32 = vld [vmem:[%s2112_s30 + $0x68] sm:$0xff] }
  0xa2   : > { %1856 = vmatmul.msk.bf16.gmra.mxu1 %vm440_vm1, %v1999_v10  ;;  %v1277_v10 = vrot.slane %v2223_v62, 1  ;;  %v1279_v44 = vrot.slane %v2241_v32, 1 }
  0xa3   : > { %vm1498_vm4 = vcmp.gt.f32.partialorder %v1461_v39, 0.0  ;;  %v1535_v41 = vmul.f32 0.2, %v1461_v39  ;;  %v1369_v42 = vpop.f32.mrf.mxu3 }
  0xa4   : > { %v1278_v19 = vsel %vm1255_vm2, %v1275_v40, %v1277_v10 }
  0xa5   : > { %v1572_v47 = vsel %vm1498_vm4, %v1461_v39, %v1535_v41  ;;  %v380_v39 = vshll.u32 %v2002_v31, 16  ;;  %v984_v41 = vshrl.u32 %v2223_v62, 16 }
  0xa6   : > { %v1609_v50 = vpack.c.bf16 %v1572_v47, %v1572_v47  ;;  %v1119_v51 = vpop.f32.mrf.mxu2  ;;  %v378_v47 = vor.u32 %v376_v38, %v374_v14 }
  0xa7   : > { %v1212_v52 = vadd.f32 %v1119_v51, %v665_v48  ;;  %v516_v53 = vpop.f32.mrf.mxu0  ;;  %v669_v56 = vpop.f32.mrf.mxu1  ;;  %v382_v48 = vrot.slane %v380_v39, 1 }
  0xa8   : > { %1647 = vst.msk [vmem:[%s2211_s6] sm:$0xf] %vm1646_vm5, %v1609_v50  ;;  %1978 = vmatmul.msk.bf16.gmra.mxu3 %vm440_vm1, %v1276_v49  ;;  %v668_v59 = vadd.f32 %v667_v36, %v516_v53  ;;  %v986_v49 = vor.u32 %v984_v41, %v982_v16  ;;  %v1280_v53 = vsel %vm1255_vm2, %v1277_v10, %v1279_v44 }
  0xa9   : > { %v1462_v57 = vadd.f32 %v1369_v42, %v1212_v52  ;;  %v988_v42 = vshll.u32 %v2241_v32, 16 }
  0xaa   : > { %1833 = vmatmul.msk.bf16.gmra.mxu0 %vm440_vm1, %v367_v54 }
  0xab   : > { %vm1499_vm6 = vcmp.gt.f32.partialorder %v1462_v57, 0.0  ;;  %v1536_v58 = vmul.f32 0.2, %v1462_v57  ;;  %1953 = vmatmul.msk.bf16.gmra.mxu2 %vm440_vm1, %v975_v55  ;;  %v1372_v60 = vpop.f32.mrf.mxu3  ;;  %v990_v50 = vrot.slane %v988_v42, 1 }
  0xad   : > { %v1573_v63 = vsel %vm1499_vm6, %v1462_v57, %v1536_v58  ;;  %v383_v58 = vsel %vm283_vm3, %v378_v47, %v382_v48 }
  0xae   : > { %v1610_v0 = vpack.c.bf16 %v1573_v63, %v1573_v63  ;;  %v1122_v1 = vpop.f32.mrf.mxu2 }
  0xaf   : > { %v1213_v2 = vadd.f32 %v1122_v1, %v668_v59  ;;  %v518_v3 = vpop.f32.mrf.mxu0  ;;  %v672_v6 = vpop.f32.mrf.mxu1  ;;  %v991_v59 = vsel %vm283_vm3, %v986_v49, %v990_v50  ;;  %v2003_v1 = vld [vmem:[%s2112_s30 + $0x68] sm:$0xff] }
  0xb0   : > { %1648 = vst.msk [vmem:[%s2211_s6 + $0x4] sm:$0xf] %vm1646_vm5, %v1610_v0  ;;  %v670_v18 = vadd.f32 %v669_v56, %v518_v3  ;;  %v392_v42 = vshrl.u32 %v2003_v1, 16 }
  0xb1   : > { %v1463_v9 = vadd.f32 %v1372_v60, %v1213_v2  ;;  %v2259_v2 = vld [vmem:[%s2112_s30 + $0x70] sm:$0xff] }
  0xb2   : > { %1857 = vmatmul.msk.bf16.gmra.mxu1 %vm440_vm1, %v2000_v29  ;;  %v1281_v14 = vrot.slane %v2259_v2, 1 }
  0xb3   : > { %vm1500_vm7 = vcmp.gt.f32.partialorder %v1463_v9, 0.0  ;;  %v1537_v11 = vmul.f32 0.2, %v1463_v9  ;;  %v1374_v12 = vpop.f32.mrf.mxu3 }
  0xb5   : > { %v1574_v17 = vsel %vm1500_vm7, %v1463_v9, %v1537_v11  ;;  %v388_v9 = vshll.u32 %v2003_v1, 16  ;;  %v992_v11 = vshrl.u32 %v2241_v32, 16 }
  0xb6   : > { %v1611_v20 = vpack.c.bf16 %v1574_v17, %v1574_v17  ;;  %v1124_v21 = vpop.f32.mrf.mxu2  ;;  %v386_v17 = vor.u32 %v384_v8, %v382_v48 }
  0xb7   : > { %v1214_v22 = vadd.f32 %v1124_v21, %v670_v18  ;;  %v521_v23 = vpop.f32.mrf.mxu0  ;;  %v674_v26 = vpop.f32.mrf.mxu1  ;;  %v390_v18 = vrot.slane %v388_v9, 1 }
  0xb8   : > { %1649 = vst.msk [vmem:[%s2211_s6 + $0x8] sm:$0xf] %vm1646_vm5, %v1611_v20  ;;  %1979 = vmatmul.msk.bf16.gmra.mxu3 %vm440_vm1, %v1278_v19  ;;  %v673_v29 = vadd.f32 %v672_v6, %v521_v23  ;;  %v994_v19 = vor.u32 %v992_v11, %v990_v50  ;;  %v1282_v23 = vsel %vm1255_vm2, %v1279_v44, %v1281_v14 }
  0xb9   : > { %v1464_v27 = vadd.f32 %v1374_v12, %v1214_v22  ;;  %v996_v12 = vshll.u32 %v2259_v2, 16 }
  0xba   : > { %1834 = vmatmul.msk.bf16.gmra.mxu0 %vm440_vm1, %v375_v24 }
  0xbb   : > { %vm1501_vm8 = vcmp.gt.f32.partialorder %v1464_v27, 0.0  ;;  %v1538_v28 = vmul.f32 0.2, %v1464_v27  ;;  %1954 = vmatmul.msk.bf16.gmra.mxu2 %vm440_vm1, %v983_v25  ;;  %v1377_v30 = vpop.f32.mrf.mxu3  ;;  %v998_v20 = vrot.slane %v996_v12, 1 }
  0xbd   : > { %v1575_v33 = vsel %vm1501_vm8, %v1464_v27, %v1538_v28  ;;  %v391_v28 = vsel %vm283_vm3, %v386_v17, %v390_v18 }
  0xbe   : > { %v1612_v34 = vpack.c.bf16 %v1575_v33, %v1575_v33  ;;  %v1127_v35 = vpop.f32.mrf.mxu2 }
  0xbf   : > { %v1215_v36 = vadd.f32 %v1127_v35, %v673_v29  ;;  %v523_v37 = vpop.f32.mrf.mxu0  ;;  %v677_v40 = vpop.f32.mrf.mxu1  ;;  %v999_v29 = vsel %vm283_vm3, %v994_v19, %v998_v20  ;;  %v2004_v35 = vld [vmem:[%s2112_s30 + $0x70] sm:$0xff] }
  0xc0   : > { %1650 = vst.msk [vmem:[%s2211_s6 + $0xc] sm:$0xf] %vm1646_vm5, %v1612_v34  ;;  %v675_v52 = vadd.f32 %v674_v26, %v523_v37  ;;  %v400_v12 = vshrl.u32 %v2004_v35, 16 }
  0xc1   : > { %v1465_v43 = vadd.f32 %v1377_v30, %v1215_v36  ;;  %v2277_v36 = vld [vmem:[%s2112_s30 + $0x78] sm:$0xff] }
  0xc2   : > { %1858 = vmatmul.msk.bf16.gmra.mxu1 %vm440_vm1, %v2001_v61  ;;  %v1283_v48 = vrot.slane %v2277_v36, 1 }
  0xc3   : > { %vm1502_vm9 = vcmp.gt.f32.partialorder %v1465_v43, 0.0  ;;  %v1539_v45 = vmul.f32 0.2, %v1465_v43  ;;  %v1379_v46 = vpop.f32.mrf.mxu3 }
  0xc5   : > { %v1576_v51 = vsel %vm1502_vm9, %v1465_v43, %v1539_v45  ;;  %v396_v43 = vshll.u32 %v2004_v35, 16  ;;  %v1000_v45 = vshrl.u32 %v2259_v2, 16 }
  0xc6   : > { %v1613_v54 = vpack.c.bf16 %v1576_v51, %v1576_v51  ;;  %v1129_v55 = vpop.f32.mrf.mxu2  ;;  %v394_v51 = vor.u32 %v392_v42, %v390_v18 }
  0xc7   : > { %v1216_v56 = vadd.f32 %v1129_v55, %v675_v52  ;;  %v526_v57 = vpop.f32.mrf.mxu0  ;;  %v679_v60 = vpop.f32.mrf.mxu1  ;;  %v398_v52 = vrot.slane %v396_v43, 1 }
  0xc8   : > { %1651 = vst.msk [vmem:[%s2211_s6 + $0x10] sm:$0xf] %vm1646_vm5, %v1613_v54  ;;  %1980 = vmatmul.msk.bf16.gmra.mxu3 %vm440_vm1, %v1280_v53  ;;  %v678_v63 = vadd.f32 %v677_v40, %v526_v57  ;;  %v1002_v53 = vor.u32 %v1000_v45, %v998_v20  ;;  %v1284_v57 = vsel %vm1255_vm2, %v1281_v14, %v1283_v48 }
  0xc9   : > { %v1466_v61 = vadd.f32 %v1379_v46, %v1216_v56  ;;  %v1004_v46 = vshll.u32 %v2277_v36, 16 }
  0xca   : > { %1835 = vmatmul.msk.bf16.gmra.mxu0 %vm440_vm1, %v383_v58 }
  0xcb   : > { %vm1503_vm10 = vcmp.gt.f32.partialorder %v1466_v61, 0.0  ;;  %v1540_v62 = vmul.f32 0.2, %v1466_v61  ;;  %1955 = vmatmul.msk.bf16.gmra.mxu2 %vm440_vm1, %v991_v59  ;;  %v1382_v0 = vpop.f32.mrf.mxu3  ;;  %v1006_v54 = vrot.slane %v1004_v46, 1 }
  0xcd   : > { %v1577_v3 = vsel %vm1503_vm10, %v1466_v61, %v1540_v62  ;;  %v399_v62 = vsel %vm283_vm3, %v394_v51, %v398_v52 }
  0xce   : > { %v1614_v4 = vpack.c.bf16 %v1577_v3, %v1577_v3  ;;  %v1132_v5 = vpop.f32.mrf.mxu2 }
  0xcf   : > { %v1217_v6 = vadd.f32 %v1132_v5, %v678_v63  ;;  %v528_v7 = vpop.f32.mrf.mxu0  ;;  %v682_v10 = vpop.f32.mrf.mxu1  ;;  %v1007_v63 = vsel %vm283_vm3, %v1002_v53, %v1006_v54  ;;  %v2005_v5 = vld [vmem:[%s2112_s30 + $0x78] sm:$0xff] }
  0xd0   : > { %1652 = vst.msk [vmem:[%s2211_s6 + $0x14] sm:$0xf] %vm1646_vm5, %v1614_v4  ;;  %v680_v22 = vadd.f32 %v679_v60, %v528_v7  ;;  %v408_v46 = vshrl.u32 %v2005_v5, 16 }
  0xd1   : > { %v1467_v13 = vadd.f32 %v1382_v0, %v1217_v6  ;;  %v2295_v6 = vld [vmem:[%s2112_s30 + $0x80] sm:$0xff] }
  0xd2   : > { %1859 = vmatmul.msk.bf16.gmra.mxu1 %vm440_vm1, %v2002_v31  ;;  %v1285_v18 = vrot.slane %v2295_v6, 1 }
  0xd3   : > { %vm1504_vm11 = vcmp.gt.f32.partialorder %v1467_v13, 0.0  ;;  %v1541_v15 = vmul.f32 0.2, %v1467_v13  ;;  %v1384_v16 = vpop.f32.mrf.mxu3 }
  0xd5   : > { %v1578_v21 = vsel %vm1504_vm11, %v1467_v13, %v1541_v15  ;;  %v404_v13 = vshll.u32 %v2005_v5, 16  ;;  %v1008_v15 = vshrl.u32 %v2277_v36, 16 }
  0xd6   : > { %v1615_v24 = vpack.c.bf16 %v1578_v21, %v1578_v21  ;;  %v1134_v25 = vpop.f32.mrf.mxu2  ;;  %v402_v21 = vor.u32 %v400_v12, %v398_v52 }
  0xd7   : > { %v1218_v26 = vadd.f32 %v1134_v25, %v680_v22  ;;  %v531_v27 = vpop.f32.mrf.mxu0  ;;  %v684_v30 = vpop.f32.mrf.mxu1  ;;  %v406_v22 = vrot.slane %v404_v13, 1 }
  0xd8   : > { %1653 = vst.msk [vmem:[%s2211_s6 + $0x18] sm:$0xf] %vm1646_vm5, %v1615_v24  ;;  %1981 = vmatmul.msk.bf16.gmra.mxu3 %vm440_vm1, %v1282_v23  ;;  %v683_v33 = vadd.f32 %v682_v10, %v531_v27  ;;  %v1010_v23 = vor.u32 %v1008_v15, %v1006_v54  ;;  %v1286_v27 = vsel %vm1255_vm2, %v1283_v48, %v1285_v18 }
  0xd9   : > { %v1468_v31 = vadd.f32 %v1384_v16, %v1218_v26  ;;  %v1012_v16 = vshll.u32 %v2295_v6, 16 }
  0xda   : > { %1836 = vmatmul.msk.bf16.gmra.mxu0 %vm440_vm1, %v391_v28 }
  0xdb   : > { %vm1505_vm12 = vcmp.gt.f32.partialorder %v1468_v31, 0.0  ;;  %v1542_v32 = vmul.f32 0.2, %v1468_v31  ;;  %1956 = vmatmul.msk.bf16.gmra.mxu2 %vm440_vm1, %v999_v29  ;;  %v1387_v34 = vpop.f32.mrf.mxu3  ;;  %v1014_v24 = vrot.slane %v1012_v16, 1 }
  0xdd   : > { %v1579_v37 = vsel %vm1505_vm12, %v1468_v31, %v1542_v32  ;;  %v407_v32 = vsel %vm283_vm3, %v402_v21, %v406_v22 }
  0xde   : > { %v1616_v38 = vpack.c.bf16 %v1579_v37, %v1579_v37  ;;  %v1137_v39 = vpop.f32.mrf.mxu2 }
  0xdf   : > { %v1219_v40 = vadd.f32 %v1137_v39, %v683_v33  ;;  %v533_v41 = vpop.f32.mrf.mxu0  ;;  %v687_v44 = vpop.f32.mrf.mxu1  ;;  %v1015_v33 = vsel %vm283_vm3, %v1010_v23, %v1014_v24  ;;  %v2006_v39 = vld [vmem:[%s2112_s30 + $0x80] sm:$0xff] }
  0xe0   : > { %1654 = vst.msk [vmem:[%s2211_s6 + $0x1c] sm:$0xf] %vm1646_vm5, %v1616_v38  ;;  %v685_v56 = vadd.f32 %v684_v30, %v533_v41  ;;  %v416_v16 = vshrl.u32 %v2006_v39, 16 }
  0xe1   : > { %v1469_v47 = vadd.f32 %v1387_v34, %v1219_v40  ;;  %v2313_v40 = vld [vmem:[%s2112_s30 + $0x88] sm:$0xff] }
  0xe2   : > { %1860 = vmatmul.msk.bf16.gmra.mxu1 %vm440_vm1, %v2003_v1  ;;  %v1287_v52 = vrot.slane %v2313_v40, 1 }
  0xe3   : > { %vm1506_vm13 = vcmp.gt.f32.partialorder %v1469_v47, 0.0  ;;  %v1543_v49 = vmul.f32 0.2, %v1469_v47  ;;  %v1389_v50 = vpop.f32.mrf.mxu3 }
  0xe5   : > { %v1580_v55 = vsel %vm1506_vm13, %v1469_v47, %v1543_v49  ;;  %v412_v47 = vshll.u32 %v2006_v39, 16  ;;  %v1016_v49 = vshrl.u32 %v2295_v6, 16 }
  0xe6   : > { %v1617_v58 = vpack.c.bf16 %v1580_v55, %v1580_v55  ;;  %v1139_v59 = vpop.f32.mrf.mxu2  ;;  %v410_v55 = vor.u32 %v408_v46, %v406_v22 }
  0xe7   : > { %v1220_v60 = vadd.f32 %v1139_v59, %v685_v56  ;;  %v536_v61 = vpop.f32.mrf.mxu0  ;;  %v689_v0 = vpop.f32.mrf.mxu1  ;;  %v414_v56 = vrot.slane %v412_v47, 1 }
  0xe8   : > { %1655 = vst.msk [vmem:[%s2211_s6 + $0x20] sm:$0xf] %vm1646_vm5, %v1617_v58  ;;  %1982 = vmatmul.msk.bf16.gmra.mxu3 %vm440_vm1, %v1284_v57  ;;  %v688_v3 = vadd.f32 %v687_v44, %v536_v61  ;;  %v1018_v57 = vor.u32 %v1016_v49, %v1014_v24  ;;  %v1288_v61 = vsel %vm1255_vm2, %v1285_v18, %v1287_v52 }
  0xe9   : > { %v1470_v1 = vadd.f32 %v1389_v50, %v1220_v60  ;;  %v1020_v50 = vshll.u32 %v2313_v40, 16 }
  0xea   : > { %1837 = vmatmul.msk.bf16.gmra.mxu0 %vm440_vm1, %v399_v62 }
  0xeb   : > { %vm1507_vm14 = vcmp.gt.f32.partialorder %v1470_v1, 0.0  ;;  %v1544_v2 = vmul.f32 0.2, %v1470_v1  ;;  %1957 = vmatmul.msk.bf16.gmra.mxu2 %vm440_vm1, %v1007_v63  ;;  %v1392_v4 = vpop.f32.mrf.mxu3  ;;  %v1022_v58 = vrot.slane %v1020_v50, 1 }
  0xed   : > { %v1581_v7 = vsel %vm1507_vm14, %v1470_v1, %v1544_v2  ;;  %v415_v2 = vsel %vm283_vm3, %v410_v55, %v414_v56 }
  0xee   : > { %v1618_v8 = vpack.c.bf16 %v1581_v7, %v1581_v7  ;;  %v1142_v9 = vpop.f32.mrf.mxu2 }
  0xef   : > { %v1221_v10 = vadd.f32 %v1142_v9, %v688_v3  ;;  %v538_v11 = vpop.f32.mrf.mxu0  ;;  %v692_v14 = vpop.f32.mrf.mxu1  ;;  %v1023_v3 = vsel %vm283_vm3, %v1018_v57, %v1022_v58  ;;  %v2330_v9 = vld [vmem:[%s2112_s30 + $0x88] sm:$0xff] }
  0xf0   : > { %1656 = vst.msk [vmem:[%s2211_s6 + $0x24] sm:$0xf] %vm1646_vm5, %v1618_v8  ;;  %v690_v26 = vadd.f32 %v689_v0, %v538_v11 }
  0xf1   : > { %v1471_v17 = vadd.f32 %v1392_v4, %v1221_v10  ;;  %v2333_v10 = vld [vmem:[%s2112_s30 + $0x90] sm:$0xff] }
  0xf2   : > { %1861 = vmatmul.msk.bf16.gmra.mxu1 %vm440_vm1, %v2004_v35  ;;  %v1289_v22 = vrot.slane %v2333_v10, 1 }
  0xf3   : > { %vm1508_vm15 = vcmp.gt.f32.partialorder %v1471_v17, 0.0  ;;  %v1545_v19 = vmul.f32 0.2, %v1471_v17  ;;  %v1394_v20 = vpop.f32.mrf.mxu3 }
  0xf5   : > { %v1582_v25 = vsel %vm1508_vm15, %v1471_v17, %v1545_v19  ;;  %v420_v17 = vshll.u32 %v2330_v9, 16  ;;  %v1024_v19 = vshrl.u32 %v2313_v40, 16 }
  0xf6   : > { %v1619_v28 = vpack.c.bf16 %v1582_v25, %v1582_v25  ;;  %v1144_v29 = vpop.f32.mrf.mxu2  ;;  %v418_v25 = vor.u32 %v416_v16, %v414_v56  ;;  %v424_v56 = vshrl.u32 %v2330_v9, 16 }
  0xf7   : > { %v1222_v30 = vadd.f32 %v1144_v29, %v690_v26  ;;  %v541_v31 = vpop.f32.mrf.mxu0  ;;  %v694_v34 = vpop.f32.mrf.mxu1  ;;  %v422_v26 = vrot.slane %v420_v17, 1  ;;  %v181_v29 = vld [vmem:[%s2112_s30 + $0x90] sm:$0xf] }
  0xf8   : > { %1657 = vst.msk [vmem:[%s2211_s6 + $0x28] sm:$0xf] %vm1646_vm5, %v1619_v28  ;;  %1983 = vmatmul.msk.bf16.gmra.mxu3 %vm440_vm1, %v1286_v27  ;;  %v693_v37 = vadd.f32 %v692_v14, %v541_v31  ;;  %v1026_v27 = vor.u32 %v1024_v19, %v1022_v58 }
  0xf9   : > { %v1472_v35 = vadd.f32 %v1394_v20, %v1222_v30  ;;  %v1028_v20 = vshll.u32 %v2333_v10, 16  ;;  %v184_v30 = vld [vmem:[%s2112_s30 + $0x94] sm:$0x1] }
  0xfa   : > { %1838 = vmatmul.msk.bf16.gmra.mxu0 %vm440_vm1, %v407_v32  ;;  %v263_v40 = vunpack.c.l.b16 %v184_v30 }
  0xfb   : > { %vm1509_vm0 = vcmp.gt.f32.partialorder %v1472_v35, 0.0  ;;  %v1546_v36 = vmul.f32 0.2, %v1472_v35  ;;  %1958 = vmatmul.msk.bf16.gmra.mxu2 %vm440_vm1, %v1015_v33  ;;  %v1397_v38 = vpop.f32.mrf.mxu3  ;;  %v1030_v28 = vrot.slane %v1028_v20, 1  ;;  %v1290_v33 = vsel %vm1255_vm2, %v1287_v52, %v1289_v22 }
  0xfd   : > { %v1583_v41 = vsel %vm1509_vm0, %v1472_v35, %v1546_v36 }
  0xfe   : > { %v1620_v42 = vpack.c.bf16 %v1583_v41, %v1583_v41  ;;  %v1147_v43 = vpop.f32.mrf.mxu2  ;;  %v1031_v41 = vsel %vm283_vm3, %v1026_v27, %v1030_v28 }
  0xff   : > { %v1223_v44 = vadd.f32 %v1147_v43, %v693_v37  ;;  %v543_v45 = vpop.f32.mrf.mxu0  ;;  %v697_v48 = vpop.f32.mrf.mxu1 }
 0x100   : > { %1658 = vst.msk [vmem:[%s2211_s6 + $0x2c] sm:$0xf] %vm1646_vm5, %v1620_v42  ;;  %v695_v60 = vadd.f32 %v694_v34, %v543_v45  ;;  %v2027_v45 = vld [vmem:[%s2112_s30 + $0x98] sm:$0x10] }
 0x101   : > { %v1473_v51 = vadd.f32 %v1397_v38, %v1223_v44  ;;  %v423_v38 = vsel %vm283_vm3, %v418_v25, %v422_v26  ;;  %v1938_v44 = vld [vmem:[%s2112_s30 + $0x98] sm:$0xf] }
 0x102   : > { %1862 = vmatmul.msk.bf16.gmra.mxu1 %vm440_vm1, %v2005_v5  ;;  %v2357_v50 = vor.u32 %v2027_v45, %v1938_v44 }
 0x103   : > { %vm1510_vm4 = vcmp.gt.f32.partialorder %v1473_v51, 0.0  ;;  %v1547_v53 = vmul.f32 0.2, %v1473_v51  ;;  %v1399_v54 = vpop.f32.mrf.mxu3 }
 0x104   : > { %v1040_v30 = vshrl.u32 %v2357_v50, 16 }
 0x105   : > { %v1584_v59 = vsel %vm1510_vm4, %v1473_v51, %v1547_v53 }
 0x106   : > { %v1621_v62 = vpack.c.bf16 %v1584_v59, %v1584_v59  ;;  %v1149_v63 = vpop.f32.mrf.mxu2  ;;  %v1032_v59 = vshrl.u32 %v2333_v10, 16 }
 0x107   : > { %v1224_v0 = vadd.f32 %v1149_v63, %v695_v60  ;;  %v546_v1 = vpop.f32.mrf.mxu0  ;;  %v699_v4 = vpop.f32.mrf.mxu1  ;;  %v1036_v60 = vshll.u32 %v2357_v50, 16 }
 0x108   : > { %1659 = vst.msk [vmem:[%s2211_s6 + $0x30] sm:$0xf] %vm1646_vm5, %v1621_v62  ;;  %1984 = vmatmul.msk.bf16.gmra.mxu3 %vm440_vm1, %v1288_v61  ;;  %v698_v7 = vadd.f32 %v697_v48, %v546_v1  ;;  %v1291_v62 = vrot.slane %v2357_v50, 1  ;;  %v426_v1 = vor.u32 %v424_v56, %v422_v26 }
 0x109   : > { %v1474_v5 = vadd.f32 %v1399_v54, %v1224_v0 }
 0x10a   : > { %1839 = vmatmul.msk.bf16.gmra.mxu0 %vm440_vm1, %v415_v2 }
 0x10b   : > { %vm1511_vm6 = vcmp.gt.f32.partialorder %v1474_v5, 0.0  ;;  %v1548_v6 = vmul.f32 0.2, %v1474_v5  ;;  %1959 = vmatmul.msk.bf16.gmra.mxu2 %vm440_vm1, %v1023_v3  ;;  %v1402_v8 = vpop.f32.mrf.mxu3  ;;  %v1034_v3 = vor.u32 %v1032_v59, %v1030_v28 }
 0x10d   : > { %v1585_v11 = vsel %vm1511_vm6, %v1474_v5, %v1548_v6 }
 0x10e   : > { %v1622_v12 = vpack.c.bf16 %v1585_v11, %v1585_v11  ;;  %v1152_v13 = vpop.f32.mrf.mxu2 }
 0x10f   : > { %v1225_v14 = vadd.f32 %v1152_v13, %v698_v7  ;;  %v548_v15 = vpop.f32.mrf.mxu0  ;;  %v702_v18 = vpop.f32.mrf.mxu1  ;;  %v1292_v7 = vsel %vm1255_vm2, %v1289_v22, %v1291_v62 }
 0x110   : > { %1660 = vst.msk [vmem:[%s2211_s6 + $0x34] sm:$0xf] %vm1646_vm5, %v1622_v12  ;;  %v700_v32 = vadd.f32 %v699_v4, %v548_v15  ;;  %v1038_v4 = vrot.slane %v1036_v60, 1 }
 0x111   : > { %v1475_v21 = vadd.f32 %v1402_v8, %v1225_v14 }
 0x112   : > { %1863 = vmatmul.msk.bf16.gmra.mxu1 %vm440_vm1, %v2006_v39  ;;  %v2346_v39 = vunpack.c.l.b16 %v181_v29 }
 0x113   : > { %vm1512_vm7 = vcmp.gt.f32.partialorder %v1475_v21, 0.0  ;;  %v1549_v23 = vmul.f32 0.2, %v1475_v21  ;;  %v1404_v24 = vpop.f32.mrf.mxu3 }
 0x114   : > { %v282_v49 = vpack.c.b16 %v263_v40, %v2346_v39 }
 0x115   : > { %v1586_v31 = vsel %vm1512_vm7, %v1475_v21, %v1549_v23 }
 0x116   : > { %v1623_v34 = vpack.c.bf16 %v1586_v31, %v1586_v31  ;;  %v1154_v35 = vpop.f32.mrf.mxu2  ;;  %v428_v57 = vshll.u32 %v282_v49, 16  ;;  %v432_v27 = vshrl.u32 %v282_v49, 16 }
 0x117   : > { %v1226_v36 = vadd.f32 %v1154_v35, %v700_v32  ;;  %v551_v37 = vpop.f32.mrf.mxu0  ;;  %v704_v42 = vpop.f32.mrf.mxu1 }
 0x118   : > { %1661 = vst.msk [vmem:[%s2211_s6 + $0x38] sm:$0xf] %vm1646_vm5, %v1623_v34  ;;  %1985 = vmatmul.msk.bf16.gmra.mxu3 %vm440_vm1, %v1290_v33  ;;  %v703_v47 = vadd.f32 %v702_v18, %v551_v37  ;;  %v430_v2 = vrot.slane %v428_v57, 1 }
 0x119   : > { %v1476_v43 = vadd.f32 %v1404_v24, %v1226_v36  ;;  %v605_v24 = vpack.c.b16 %v2346_v39, %v2346_v39 }
 0x11a   : > { %1840 = vmatmul.msk.bf16.gmra.mxu0 %vm440_vm1, %v423_v38  ;;  %v431_v13 = vsel %vm283_vm3, %v426_v1, %v430_v2  ;;  %v434_v35 = vor.u32 %v432_v27, %v430_v2  ;;  %v1042_v38 = vor.u32 %v1040_v30, %v1038_v4 }
 0x11b   : > { %vm1513_vm8 = vcmp.gt.f32.partialorder %v1476_v43, 0.0  ;;  %v1550_v46 = vmul.f32 0.2, %v1476_v43  ;;  %1960 = vmatmul.msk.bf16.gmra.mxu2 %vm440_vm1, %v1031_v41  ;;  %v1407_v48 = vpop.f32.mrf.mxu3 }
 0x11d   : > { %v1587_v51 = vsel %vm1513_vm8, %v1476_v43, %v1550_v46 }
 0x11e   : > { %v1624_v52 = vpack.c.bf16 %v1587_v51, %v1587_v51  ;;  %v1157_v53 = vpop.f32.mrf.mxu2 }
 0x11f   : > { %v1227_v54 = vadd.f32 %v1157_v53, %v703_v47  ;;  %v553_v55 = vpop.f32.mrf.mxu0  ;;  %v707_v58 = vpop.f32.mrf.mxu1 }
 0x120   : > { %1662 = vst.msk [vmem:[%s2211_s6 + $0x3c] sm:$0xf] %vm1646_vm5, %v1624_v52  ;;  %v705_v6 = vadd.f32 %v704_v42, %v553_v55 }
 0x121   : > { %v1477_v61 = vadd.f32 %v1407_v48, %v1227_v54 }
 0x122   : > { %1864 = vmatmul.msk.bf16.gmra.mxu1 %vm440_vm1, %v2330_v9  ;;  %v1039_v9 = vsel %vm283_vm3, %v1034_v3, %v1038_v4 }
 0x123   : > { %vm1514_vm9 = vcmp.gt.f32.partialorder %v1477_v61, 0.0  ;;  %v1551_v63 = vmul.f32 0.2, %v1477_v61  ;;  %v1409_v0 = vpop.f32.mrf.mxu3 }
 0x125   : > { %v1588_v5 = vsel %vm1514_vm9, %v1477_v61, %v1551_v63 }
 0x126   : > { %v1625_v8 = vpack.c.bf16 %v1588_v5, %v1588_v5  ;;  %v1159_v10 = vpop.f32.mrf.mxu2 }
 0x127   : > { %v1228_v11 = vadd.f32 %v1159_v10, %v705_v6  ;;  %v556_v12 = vpop.f32.mrf.mxu0  ;;  %v709_v14 = vpop.f32.mrf.mxu1 }
 0x128   : > { %1663 = vst.msk [vmem:[%s2211_s6 + $0x40] sm:$0xf] %vm1646_vm5, %v1625_v8  ;;  %1986 = vmatmul.msk.bf16.gmra.mxu3 %vm440_vm1, %v1292_v7  ;;  %v708_v17 = vadd.f32 %v707_v58, %v556_v12 }
 0x129   : > { %v1478_v15 = vadd.f32 %v1409_v0, %v1228_v11 }
 0x12a   : > { %1841 = vmatmul.msk.bf16.gmra.mxu0 %vm440_vm1, %v431_v13 }
 0x12b   : > { %vm1515_vm10 = vcmp.gt.f32.partialorder %v1478_v15, 0.0  ;;  %v1552_v16 = vmul.f32 0.2, %v1478_v15  ;;  %1961 = vmatmul.msk.bf16.gmra.mxu2 %vm440_vm1, %v1039_v9  ;;  %v1412_v18 = vpop.f32.mrf.mxu3 }
 0x12d   : > { %v1589_v19 = vsel %vm1515_vm10, %v1478_v15, %v1552_v16 }
 0x12e   : > { %v1626_v20 = vpack.c.bf16 %v1589_v19, %v1589_v19  ;;  %v1162_v21 = vpop.f32.mrf.mxu2 }
 0x12f   : > { %v1229_v22 = vadd.f32 %v1162_v21, %v708_v17  ;;  %v558_v23 = vpop.f32.mrf.mxu0  ;;  %v712_v25 = vpop.f32.mrf.mxu1 }
 0x130   : > { %1664 = vst.msk [vmem:[%s2211_s6 + $0x44] sm:$0xf] %vm1646_vm5, %v1626_v20  ;;  %v710_v32 = vadd.f32 %v709_v14, %v558_v23 }
 0x131   : > { %v1479_v26 = vadd.f32 %v1412_v18, %v1229_v22 }
 0x132   : > { %1865 = vmatmul.msk.bf16.gmra.mxu1 %vm440_vm1, %v605_v24 }
 0x133   : > { %vm1516_vm2 = vcmp.gt.f32.partialorder %v1479_v26, 0.0  ;;  %v1553_v28 = vmul.f32 0.2, %v1479_v26  ;;  %v1414_v29 = vpop.f32.mrf.mxu3 }
 0x135   : > { %v1590_v31 = vsel %vm1516_vm2, %v1479_v26, %v1553_v28 }
 0x136   : > { %v1627_v33 = vpack.c.bf16 %v1590_v31, %v1590_v31  ;;  %v1164_v34 = vpop.f32.mrf.mxu2 }
 0x137   : > { %v1230_v36 = vadd.f32 %v1164_v34, %v710_v32  ;;  %v561_v37 = vpop.f32.mrf.mxu0  ;;  %v714_v39 = vpop.f32.mrf.mxu1 }
 0x138   : > { %1665 = vst.msk [vmem:[%s2211_s6 + $0x48] sm:$0xf] %vm1646_vm5, %v1627_v33  ;;  %1987 = vmatmul.msk.bf16.gmra.mxu3 %vm440_vm1, %v1291_v62  ;;  %v713_v42 = vadd.f32 %v712_v25, %v561_v37 }
 0x139   : > { %v1480_v40 = vadd.f32 %v1414_v29, %v1230_v36 }
 0x13a   : > { %1842 = vmatmul.msk.bf16.gmra.mxu0 %vm440_vm1, %v434_v35 }
 0x13b   : > { %vm1517_vm3 = vcmp.gt.f32.partialorder %v1480_v40, 0.0  ;;  %v1554_v41 = vmul.f32 0.2, %v1480_v40  ;;  %1962 = vmatmul.msk.bf16.gmra.mxu2 %vm440_vm1, %v1042_v38  ;;  %v1417_v43 = vpop.f32.mrf.mxu3 }
 0x13d   : > { %v1591_v44 = vsel %vm1517_vm3, %v1480_v40, %v1554_v41 }
 0x13e   : > { %v1628_v45 = vpack.c.bf16 %v1591_v44, %v1591_v44  ;;  %v1167_v46 = vpop.f32.mrf.mxu2 }
 0x13f   : > { %v1231_v47 = vadd.f32 %v1167_v46, %v713_v42  ;;  %v563_v48 = vpop.f32.mrf.mxu0  ;;  %v717_v49 = vpop.f32.mrf.mxu1 }
 0x140   : > { %1666 = vst.msk [vmem:[%s2211_s6 + $0x4c] sm:$0xf] %vm1646_vm5, %v1628_v45  ;;  %v715_v54 = vadd.f32 %v714_v39, %v563_v48 }
 0x141   : > { %v1481_v50 = vadd.f32 %v1417_v43, %v1231_v47 }
 0x143   : > { %vm1518_vm11 = vcmp.gt.f32.partialorder %v1481_v50, 0.0  ;;  %v1555_v51 = vmul.f32 0.2, %v1481_v50  ;;  %v1419_v52 = vpop.f32.mrf.mxu3 }
 0x145   : > { %v1592_v53 = vsel %vm1518_vm11, %v1481_v50, %v1555_v51 }
 0x146   : > { %v1629_v55 = vpack.c.bf16 %v1592_v53, %v1592_v53  ;;  %v1169_v56 = vpop.f32.mrf.mxu2 }
 0x147   : > { %v1232_v57 = vadd.f32 %v1169_v56, %v715_v54  ;;  %v566_v58 = vpop.f32.mrf.mxu0  ;;  %v719_v59 = vpop.f32.mrf.mxu1 }
 0x148   : > { %1667 = vst.msk [vmem:[%s2211_s6 + $0x50] sm:$0xf] %vm1646_vm5, %v1629_v55  ;;  %v718_v62 = vadd.f32 %v717_v49, %v566_v58 }
 0x149   : > { %v1482_v60 = vadd.f32 %v1419_v52, %v1232_v57 }
 0x14b   : > { %vm1519_vm1 = vcmp.gt.f32.partialorder %v1482_v60, 0.0  ;;  %v1556_v61 = vmul.f32 0.2, %v1482_v60  ;;  %v1422_v63 = vpop.f32.mrf.mxu3 }
 0x14d   : > { %v1593_v0 = vsel %vm1519_vm1, %v1482_v60, %v1556_v61 }
 0x14e   : > { %v1630_v1 = vpack.c.bf16 %v1593_v0, %v1593_v0  ;;  %v1172_v2 = vpop.f32.mrf.mxu2 }
 0x14f   : > { %v1233_v3 = vadd.f32 %v1172_v2, %v718_v62  ;;  %v568_v4 = vpop.f32.mrf.mxu0  ;;  %v722_v5 = vpop.f32.mrf.mxu1 }
 0x150   : > { %1668 = vst.msk [vmem:[%s2211_s6 + $0x54] sm:$0xf] %vm1646_vm5, %v1630_v1  ;;  %v720_v11 = vadd.f32 %v719_v59, %v568_v4 }
 0x151   : > { %v1483_v6 = vadd.f32 %v1422_v63, %v1233_v3 }
 0x153   : > { %vm1520_vm12 = vcmp.gt.f32.partialorder %v1483_v6, 0.0  ;;  %v1557_v7 = vmul.f32 0.2, %v1483_v6  ;;  %v1424_v8 = vpop.f32.mrf.mxu3 }
 0x155   : > { %v1594_v10 = vsel %vm1520_vm12, %v1483_v6, %v1557_v7 }
 0x156   : > { %v1631_v12 = vpack.c.bf16 %v1594_v10, %v1594_v10  ;;  %v1174_v13 = vpop.f32.mrf.mxu2 }
 0x157   : > { %v1234_v9 = vadd.f32 %v1174_v13, %v720_v11  ;;  %v571_v14 = vpop.f32.mrf.mxu0  ;;  %v724_v15 = vpop.f32.mrf.mxu1 }
 0x158   : > { %1669 = vst.msk [vmem:[%s2211_s6 + $0x58] sm:$0xf] %vm1646_vm5, %v1631_v12  ;;  %v723_v18 = vadd.f32 %v722_v5, %v571_v14 }
 0x159   : > { %v1484_v16 = vadd.f32 %v1424_v8, %v1234_v9 }
 0x15b   : > { %vm1521_vm13 = vcmp.gt.f32.partialorder %v1484_v16, 0.0  ;;  %v1558_v17 = vmul.f32 0.2, %v1484_v16  ;;  %v1427_v19 = vpop.f32.mrf.mxu3 }
 0x15d   : > { %v1595_v20 = vsel %vm1521_vm13, %v1484_v16, %v1558_v17 }
 0x15e   : > { %v1632_v21 = vpack.c.bf16 %v1595_v20, %v1595_v20  ;;  %v1177_v22 = vpop.f32.mrf.mxu2 }
 0x15f   : > { %v1235_v23 = vadd.f32 %v1177_v22, %v723_v18  ;;  %v573_v24 = vpop.f32.mrf.mxu0  ;;  %v727_v25 = vpop.f32.mrf.mxu1 }
 0x160   : > { %1670 = vst.msk [vmem:[%s2211_s6 + $0x5c] sm:$0xf] %vm1646_vm5, %v1632_v21  ;;  %v725_v30 = vadd.f32 %v724_v15, %v573_v24 }
 0x161   : > { %v1485_v26 = vadd.f32 %v1427_v19, %v1235_v23 }
 0x163   : > { %vm1522_vm14 = vcmp.gt.f32.partialorder %v1485_v26, 0.0  ;;  %v1559_v27 = vmul.f32 0.2, %v1485_v26  ;;  %v1429_v28 = vpop.f32.mrf.mxu3 }
 0x165   : > { %v1596_v29 = vsel %vm1522_vm14, %v1485_v26, %v1559_v27 }
 0x166   : > { %v1633_v31 = vpack.c.bf16 %v1596_v29, %v1596_v29  ;;  %v1179_v32 = vpop.f32.mrf.mxu2 }
 0x167   : > { %v1236_v33 = vadd.f32 %v1179_v32, %v725_v30  ;;  %v576_v34 = vpop.f32.mrf.mxu0  ;;  %v729_v35 = vpop.f32.mrf.mxu1 }
 0x168   : > { %1671 = vst.msk [vmem:[%s2211_s6 + $0x60] sm:$0xf] %vm1646_vm5, %v1633_v31  ;;  %v728_v38 = vadd.f32 %v727_v25, %v576_v34 }
 0x169   : > { %v1486_v36 = vadd.f32 %v1429_v28, %v1236_v33 }
 0x16b   : > { %vm1523_vm15 = vcmp.gt.f32.partialorder %v1486_v36, 0.0  ;;  %v1560_v37 = vmul.f32 0.2, %v1486_v36  ;;  %v1432_v39 = vpop.f32.mrf.mxu3 }
 0x16d   : > { %v1597_v40 = vsel %vm1523_vm15, %v1486_v36, %v1560_v37 }
 0x16e   : > { %v1634_v41 = vpack.c.bf16 %v1597_v40, %v1597_v40  ;;  %v1182_v42 = vpop.f32.mrf.mxu2 }
 0x16f   : > { %v1237_v43 = vadd.f32 %v1182_v42, %v728_v38  ;;  %v578_v44 = vpop.f32.mrf.mxu0  ;;  %v732_v45 = vpop.f32.mrf.mxu1 }
 0x170   : > { %1672 = vst.msk [vmem:[%s2211_s6 + $0x64] sm:$0xf] %vm1646_vm5, %v1634_v41  ;;  %v730_v50 = vadd.f32 %v729_v35, %v578_v44 }
 0x171   : > { %v1487_v46 = vadd.f32 %v1432_v39, %v1237_v43 }
 0x173   : > { %vm1524_vm0 = vcmp.gt.f32.partialorder %v1487_v46, 0.0  ;;  %v1561_v47 = vmul.f32 0.2, %v1487_v46  ;;  %v1434_v48 = vpop.f32.mrf.mxu3 }
 0x175   : > { %v1598_v49 = vsel %vm1524_vm0, %v1487_v46, %v1561_v47 }
 0x176   : > { %v1635_v51 = vpack.c.bf16 %v1598_v49, %v1598_v49  ;;  %v1184_v52 = vpop.f32.mrf.mxu2 }
 0x177   : > { %v1238_v53 = vadd.f32 %v1184_v52, %v730_v50  ;;  %v581_v54 = vpop.f32.mrf.mxu0  ;;  %v734_v55 = vpop.f32.mrf.mxu1 }
 0x178   : > { %1673 = vst.msk [vmem:[%s2211_s6 + $0x68] sm:$0xf] %vm1646_vm5, %v1635_v51  ;;  %v733_v58 = vadd.f32 %v732_v45, %v581_v54 }
 0x179   : > { %v1488_v56 = vadd.f32 %v1434_v48, %v1238_v53 }
 0x17b   : > { %vm1525_vm4 = vcmp.gt.f32.partialorder %v1488_v56, 0.0  ;;  %v1562_v57 = vmul.f32 0.2, %v1488_v56  ;;  %v1437_v59 = vpop.f32.mrf.mxu3 }
 0x17d   : > { %v1599_v60 = vsel %vm1525_vm4, %v1488_v56, %v1562_v57 }
 0x17e   : > { %v1636_v61 = vpack.c.bf16 %v1599_v60, %v1599_v60  ;;  %v1187_v62 = vpop.f32.mrf.mxu2 }
 0x17f   : > { %v1239_v63 = vadd.f32 %v1187_v62, %v733_v58  ;;  %v583_v0 = vpop.f32.mrf.mxu0  ;;  %v737_v1 = vpop.f32.mrf.mxu1 }
 0x180   : > { %1674 = vst.msk [vmem:[%s2211_s6 + $0x6c] sm:$0xf] %vm1646_vm5, %v1636_v61  ;;  %v735_v6 = vadd.f32 %v734_v55, %v583_v0 }
 0x181   : > { %v1489_v2 = vadd.f32 %v1437_v59, %v1239_v63 }
 0x183   : > { %vm1526_vm6 = vcmp.gt.f32.partialorder %v1489_v2, 0.0  ;;  %v1563_v3 = vmul.f32 0.2, %v1489_v2  ;;  %v1439_v4 = vpop.f32.mrf.mxu3 }
 0x185   : > { %v1600_v5 = vsel %vm1526_vm6, %v1489_v2, %v1563_v3 }
 0x186   : > { %v1637_v7 = vpack.c.bf16 %v1600_v5, %v1600_v5  ;;  %v1189_v8 = vpop.f32.mrf.mxu2 }
 0x187   : > { %v1240_v10 = vadd.f32 %v1189_v8, %v735_v6  ;;  %v586_v11 = vpop.f32.mrf.mxu0  ;;  %v739_v12 = vpop.f32.mrf.mxu1 }
 0x188   : > { %1675 = vst.msk [vmem:[%s2211_s6 + $0x70] sm:$0xf] %vm1646_vm5, %v1637_v7  ;;  %v738_v14 = vadd.f32 %v737_v1, %v586_v11 }
 0x189   : > { %v1490_v13 = vadd.f32 %v1439_v4, %v1240_v10 }
 0x18b   : > { %vm1527_vm7 = vcmp.gt.f32.partialorder %v1490_v13, 0.0  ;;  %v1564_v9 = vmul.f32 0.2, %v1490_v13  ;;  %v1442_v15 = vpop.f32.mrf.mxu3 }
 0x18d   : > { %v1601_v16 = vsel %vm1527_vm7, %v1490_v13, %v1564_v9 }
 0x18e   : > { %v1638_v17 = vpack.c.bf16 %v1601_v16, %v1601_v16  ;;  %v1192_v18 = vpop.f32.mrf.mxu2 }
 0x18f   : > { %v1241_v19 = vadd.f32 %v1192_v18, %v738_v14  ;;  %v588_v20 = vpop.f32.mrf.mxu0  ;;  %v742_v21 = vpop.f32.mrf.mxu1 }
 0x190   : > { %1676 = vst.msk [vmem:[%s2211_s6 + $0x74] sm:$0xf] %vm1646_vm5, %v1638_v17  ;;  %v740_v26 = vadd.f32 %v739_v12, %v588_v20 }
 0x191   : > { %v1491_v22 = vadd.f32 %v1442_v15, %v1241_v19 }
 0x193   : > { %vm1528_vm8 = vcmp.gt.f32.partialorder %v1491_v22, 0.0  ;;  %v1565_v23 = vmul.f32 0.2, %v1491_v22  ;;  %v1444_v24 = vpop.f32.mrf.mxu3 }
 0x195   : > { %v1602_v25 = vsel %vm1528_vm8, %v1491_v22, %v1565_v23 }
 0x196   : > { %v1639_v27 = vpack.c.bf16 %v1602_v25, %v1602_v25  ;;  %v1194_v28 = vpop.f32.mrf.mxu2 }
 0x197   : > { %v1242_v29 = vadd.f32 %v1194_v28, %v740_v26  ;;  %v591_v30 = vpop.f32.mrf.mxu0  ;;  %v744_v31 = vpop.f32.mrf.mxu1 }
 0x198   : > { %1677 = vst.msk [vmem:[%s2211_s6 + $0x78] sm:$0xf] %vm1646_vm5, %v1639_v27  ;;  %v743_v34 = vadd.f32 %v742_v21, %v591_v30 }
 0x199   : > { %v1492_v32 = vadd.f32 %v1444_v24, %v1242_v29 }
 0x19b   : > { %vm1529_vm9 = vcmp.gt.f32.partialorder %v1492_v32, 0.0  ;;  %v1566_v33 = vmul.f32 0.2, %v1492_v32  ;;  %v1447_v35 = vpop.f32.mrf.mxu3 }
 0x19d   : > { %v1603_v36 = vsel %vm1529_vm9, %v1492_v32, %v1566_v33 }
 0x19e   : > { %v1640_v37 = vpack.c.bf16 %v1603_v36, %v1603_v36  ;;  %v1197_v38 = vpop.f32.mrf.mxu2 }
 0x19f   : > { %v1243_v39 = vadd.f32 %v1197_v38, %v743_v34  ;;  %v593_v40 = vpop.f32.mrf.mxu0  ;;  %v747_v41 = vpop.f32.mrf.mxu1 }
 0x1a0   : > { %1678 = vst.msk [vmem:[%s2211_s6 + $0x7c] sm:$0xf] %vm1646_vm5, %v1640_v37  ;;  %v745_v46 = vadd.f32 %v744_v31, %v593_v40 }
 0x1a1   : > { %v1493_v42 = vadd.f32 %v1447_v35, %v1243_v39 }
 0x1a3   : > { %vm1530_vm10 = vcmp.gt.f32.partialorder %v1493_v42, 0.0  ;;  %v1567_v43 = vmul.f32 0.2, %v1493_v42  ;;  %v1449_v44 = vpop.f32.mrf.mxu3 }
 0x1a5   : > { %v1604_v45 = vsel %vm1530_vm10, %v1493_v42, %v1567_v43 }
 0x1a6   : > { %v1641_v47 = vpack.c.bf16 %v1604_v45, %v1604_v45  ;;  %v1199_v48 = vpop.f32.mrf.mxu2 }
 0x1a7   : > { %v1244_v49 = vadd.f32 %v1199_v48, %v745_v46  ;;  %v596_v50 = vpop.f32.mrf.mxu0  ;;  %v749_v51 = vpop.f32.mrf.mxu1 }
 0x1a8   : > { %1679 = vst.msk [vmem:[%s2211_s6 + $0x80] sm:$0xf] %vm1646_vm5, %v1641_v47  ;;  %v748_v54 = vadd.f32 %v747_v41, %v596_v50 }
 0x1a9   : > { %v1494_v52 = vadd.f32 %v1449_v44, %v1244_v49 }
 0x1ab   : > { %vm1531_vm2 = vcmp.gt.f32.partialorder %v1494_v52, 0.0  ;;  %v1568_v53 = vmul.f32 0.2, %v1494_v52  ;;  %v1452_v55 = vpop.f32.mrf.mxu3 }
 0x1ad   : > { %v1605_v56 = vsel %vm1531_vm2, %v1494_v52, %v1568_v53 }
 0x1ae   : > { %v1642_v57 = vpack.c.bf16 %v1605_v56, %v1605_v56  ;;  %v1202_v58 = vpop.f32.mrf.mxu2 }
 0x1af   : > { %v1245_v59 = vadd.f32 %v1202_v58, %v748_v54  ;;  %v598_v60 = vpop.f32.mrf.mxu0  ;;  %v752_v61 = vpop.f32.mrf.mxu1 }
 0x1b0   : > { %1680 = vst.msk [vmem:[%s2211_s6 + $0x84] sm:$0xf] %vm1646_vm5, %v1642_v57  ;;  %v750_v2 = vadd.f32 %v749_v51, %v598_v60 }
 0x1b1   : > { %v1495_v62 = vadd.f32 %v1452_v55, %v1245_v59 }
 0x1b3   : > { %vm1532_vm3 = vcmp.gt.f32.partialorder %v1495_v62, 0.0  ;;  %v1569_v63 = vmul.f32 0.2, %v1495_v62  ;;  %v1454_v0 = vpop.f32.mrf.mxu3 }
 0x1b5   : > { %v1606_v1 = vsel %vm1532_vm3, %v1495_v62, %v1569_v63 }
 0x1b6   : > { %v1643_v3 = vpack.c.bf16 %v1606_v1, %v1606_v1  ;;  %v1204_v4 = vpop.f32.mrf.mxu2 }
 0x1b7   : > { %v1246_v5 = vadd.f32 %v1204_v4, %v750_v2  ;;  %v601_v6 = vpop.f32.mrf.mxu0  ;;  %v754_v7 = vpop.f32.mrf.mxu1 }
 0x1b8   : > { %1681 = vst.msk [vmem:[%s2211_s6 + $0x88] sm:$0xf] %vm1646_vm5, %v1643_v3  ;;  %v753_v11 = vadd.f32 %v752_v61, %v601_v6 }
 0x1b9   : > { %v1496_v8 = vadd.f32 %v1454_v0, %v1246_v5 }
 0x1bb   : > { %vm1533_vm11 = vcmp.gt.f32.partialorder %v1496_v8, 0.0  ;;  %v1570_v10 = vmul.f32 0.2, %v1496_v8  ;;  %v1457_v12 = vpop.f32.mrf.mxu3 }
 0x1bd   : > { %v1607_v13 = vsel %vm1533_vm11, %v1496_v8, %v1570_v10 }
 0x1be   : > { %v1644_v9 = vpack.c.bf16 %v1607_v13, %v1607_v13  ;;  %v1207_v14 = vpop.f32.mrf.mxu2 }
 0x1bf   : > { %v1247_v15 = vadd.f32 %v1207_v14, %v753_v11  ;;  %v603_v16 = vpop.f32.mrf.mxu0 }
 0x1c0   : > { %1682 = vst.msk [vmem:[%s2211_s6 + $0x8c] sm:$0xf] %vm1646_vm5, %v1644_v9 }
 0x1c1   : > { %v1497_v17 = vadd.f32 %v1457_v12, %v1247_v15 }
 0x1c3   : > { %vm1534_vm1 = vcmp.gt.f32.partialorder %v1497_v17, 0.0  ;;  %v1571_v18 = vmul.f32 0.2, %v1497_v17  ;;  %v1459_v19 = vpop.f32.mrf.mxu3 }
 0x1c5   : > { %v1608_v20 = vsel %vm1534_vm1, %v1497_v17, %v1571_v18 }
 0x1c6   : > { %v1645_v21 = vpack.c.bf16 %v1608_v20, %v1608_v20  ;;  %v1209_v22 = vpop.f32.mrf.mxu2 }
 0x1c8   : > { %1683 = vst.msk [vmem:[%s2211_s6 + $0x90] sm:$0xf] %vm1646_vm5, %v1645_v21 }
 0x1c9 PF: > { %s12_s9 = sadd.s32 1, %s2054_s9  }
 0x1ca   : > { %p9_p4 = scmp.ge.s32.totalorder %s12_s9, 4  }
 0x1cc   :  { %11 = sbr.rel (!%p9_p4) target bundleno = 1 (0x1), region = 61 }

// kernel: discriminator_forward.7
= control target key start
LH: loop header
LB: loop body
LE: loop exit
PB: predicated region body
PF: predicated region fallthrough
CT: control target
= control target key end

     0   :  { %s2305_s18 = smov 0   ;;  %s2746_s0 = inlined_call_operand.vmem [shape: bf16[2,105,256], index: 0, kind: input, shape index: {}]   ;;  %s2747_s1 = inlined_call_operand.vmem [shape: bf16[4,256,128], index: 1, kind: input, shape index: {}]   ;;  %s2748_s2 = inlined_call_operand.vmem [shape: f32[88,1], index: 2, kind: input, shape index: {}]   ;;  %s2749_s3 = inlined_call_operand.vmem [shape: f32[2,88,128], index: 3, kind: output, shape index: {0}]   ;;  %s2750_s4 = inlined_call_operand.vmem [shape: f32[2,8,128], index: 4, kind: output, shape index: {1}]   ;;  %s2751_s5 = inlined_call_operand.vmem [shape: f32[2,8,128], index: 5, kind: output, shape index: {2}]  }
   0x1 LB: > { %s1725_s19 = sadd.s32 4294967295, %s2272_s18   ;;  %p1729_p0 = scmp.ge.s32.totalorder %s2272_s18, 1  ;;  %s2272_s18 = sphi %s2305_s18, %s16_s18  }
   0x2   : > { %p192_p1 = scmp.lt.s32.totalorder %s2272_s18, 3 }
   0x4   : > { %p193_p2 = pnand %p1729_p0, %p192_p1 }
   0x5   : > { %p228_p3 = scmp.lt.s32.totalorder (!%p193_p2), %s1725_s19, 1 }
   0x6   : > { %196 = sbr.rel (%p193_p2) target bundleno = 377 (0x179), region = 32 }
   0xb   : > { %v2201_v0 = vld [vmem:[%s2747_s1 + $0xb8] sm:$0xff]  ;;  %v2200_v4 = vld [vmem:[%s2747_s1 + $0xb0] sm:$0xff]  ;;  %s2753_s19 = smov (!%p228_p3, %s1725_s19), 1  ;;  %v2199_v8 = vld [vmem:[%s2747_s1 + $0xa8] sm:$0xff]  ;;  %vm371_vm0 = vsmask.f32 7424 }
   0xc   : > { %v2209_v1 = vld [vmem:[%s2747_s1 + $0xf8] sm:$0xff]  ;;  %574 = vmatpush.bf16.msra.mxu0 %v2201_v0  ;;  %v2208_v5 = vld [vmem:[%s2747_s1 + $0xf0] sm:$0xff]  ;;  %s2252_s11 = smul.u32 112, %s2753_s19  ;;  %v2207_v9 = vld [vmem:[%s2747_s1 + $0xe8] sm:$0xff]  ;;  %vm1257_vm1 = vcmask 1046528   ;;  %s1732_s21 = sshll.u32 %s2753_s19, 3 }
   0xd   : > { %v2185_v2 = vld [vmem:[%s2747_s1 + $0x38] sm:$0xff]  ;;  %612 = vmatpush.bf16.msra.mxu1 %v2209_v1  ;;  %v2184_v6 = vld [vmem:[%s2747_s1 + $0x30] sm:$0xff]  ;;  %v2183_v10 = vld [vmem:[%s2747_s1 + $0x28] sm:$0xff]  ;;  %s2253_s15 = smul.u32 88, %s2753_s19  ;;  %s241_s25 = scalar_lea.vmem %s2750_s4, %s1732_s21 }
   0xe   : > { %v2193_v3 = vld [vmem:[%s2747_s1 + $0x78] sm:$0xff]  ;;  %760 = vmatpush.bf16.msra.mxu2 %v2185_v2  ;;  %v2192_v7 = vld [vmem:[%s2747_s1 + $0x70] sm:$0xff]  ;;  %v2191_v11 = vld [vmem:[%s2747_s1 + $0x68] sm:$0xff]  ;;  %s2355_s24 = scalar_lea.vmem %s2746_s0, %s2252_s11  ;;  %s245_s28 = scalar_lea.vmem %s2751_s5, %s1732_s21 }
   0xf   : > { %798 = vmatpush.bf16.msra.mxu3 %v2193_v3  ;;  %v2198_v12 = vld [vmem:[%s2747_s1 + $0xa0] sm:$0xff]  ;;  %v2169_v17 = vld [vmem:[%s2355_s24 + $0x4] sm:$0xf0]  ;;  %v1770_v19 = vld [vmem:[%s2355_s24 + $0x8] sm:$0xf0]  ;;  %s2713_s20 = scalar_lea.vmem %s2749_s3, %s2253_s15 }
  0x10   : > { %575 = vmatpush.bf16.msra.mxu0 %v2200_v4  ;;  %v2206_v13 = vld [vmem:[%s2747_s1 + $0xe0] sm:$0xff]  ;;  %v2197_v20 = vld [vmem:[%s2747_s1 + $0x98] sm:$0xff]  ;;  %v1776_v23 = vld [vmem:[%s2355_s24 + $0x10] sm:$0xf] }
  0x11   : > { %613 = vmatpush.bf16.msra.mxu1 %v2208_v5  ;;  %v2182_v14 = vld [vmem:[%s2747_s1 + $0x20] sm:$0xff]  ;;  %v2205_v21 = vld [vmem:[%s2747_s1 + $0xd8] sm:$0xff]  ;;  %v2170_v28 = vld [vmem:[%s2355_s24 + $0x14] sm:$0xf] }
  0x12   : > { %761 = vmatpush.bf16.msra.mxu2 %v2184_v6  ;;  %v2190_v15 = vld [vmem:[%s2747_s1 + $0x60] sm:$0xff]  ;;  %v2181_v22 = vld [vmem:[%s2747_s1 + $0x18] sm:$0xff]  ;;  %v2196_v31 = vld [vmem:[%s2747_s1 + $0x90] sm:$0xff] }
  0x13   : > { %799 = vmatpush.bf16.msra.mxu3 %v2192_v7  ;;  %v1768_v16 = vld [vmem:[%s2355_s24] sm:$0xf]  ;;  %v2168_v18 = vld [vmem:[%s2355_s24 + $0x4] sm:$0xf]  ;;  %v2171_v24 = vld [vmem:[%s2355_s24 + $0x14] sm:$0xf0] }
  0x14   : > { %576 = vmatpush.bf16.msra.mxu0 %v2199_v8  ;;  %v2384_v25 = vor.u32 %v2169_v17, %v1768_v16  ;;  %v2386_v26 = vor.u32 %v2168_v18, %v1770_v19  ;;  %v2189_v27 = vld [vmem:[%s2747_s1 + $0x58] sm:$0xff]  ;;  %v2393_v30 = vor.u32 %v2171_v24, %v1776_v23  ;;  %v2204_v32 = vld [vmem:[%s2747_s1 + $0xd0] sm:$0xff]  ;;  %v2195_v40 = vld [vmem:[%s2747_s1 + $0x88] sm:$0xff] }
  0x15   : > { %614 = vmatpush.bf16.msra.mxu1 %v2207_v9  ;;  %v1778_v29 = vld [vmem:[%s2355_s24 + $0x18] sm:$0xf0]  ;;  %v2180_v36 = vld [vmem:[%s2747_s1 + $0x10] sm:$0xff]  ;;  %v2203_v41 = vld [vmem:[%s2747_s1 + $0xc8] sm:$0xff] }
  0x16   : > { %762 = vmatpush.bf16.msra.mxu2 %v2183_v10  ;;  %v375_v33 = vshll.u32 %v2384_v25, 16  ;;  %v2402_v34 = vor.u32 %v2170_v28, %v1778_v29  ;;  %v387_v35 = vshll.u32 %v2386_v26, 16  ;;  %v2188_v37 = vld [vmem:[%s2747_s1 + $0x50] sm:$0xff]  ;;  %v373_v38 = vshrl.u32 %v2384_v25, 16  ;;  %v2179_v46 = vld [vmem:[%s2747_s1 + $0x8] sm:$0xff]  ;;  %v2194_v48 = vld [vmem:[%s2747_s1 + $0x80] sm:$0xff] }
  0x17   : > { %800 = vmatpush.bf16.msra.mxu3 %v2191_v11  ;;  %v380_v39 = vshll.u32 %v2393_v30, 16  ;;  %v385_v43 = vshrl.u32 %v2386_v26, 16  ;;  %v2187_v47 = vld [vmem:[%s2747_s1 + $0x48] sm:$0xff]  ;;  %v2202_v49 = vld [vmem:[%s2747_s1 + $0xc0] sm:$0xff]  ;;  %v2243_v56 = vld [vmem:[%s2747_s1 + $0x1b8] sm:$0xff]  ;;  %v396_v10 = vshrl.u32 %v2393_v30, 16 }
  0x18   : > { %577 = vmatpush.bf16.msra.mxu0 %v2198_v12  ;;  %v377_v42 = vrot.slane %v375_v33, 1  ;;  %v389_v44 = vrot.slane %v387_v35, 1  ;;  %v392_v45 = vshll.u32 %v2402_v34, 16  ;;  %v2178_v54 = vld [vmem:[%s2747_s1] sm:$0xff]  ;;  %v2251_v57 = vld [vmem:[%s2747_s1 + $0x1f8] sm:$0xff]  ;;  %v2242_v2 = vld [vmem:[%s2747_s1 + $0x1b0] sm:$0xff] }
  0x19   : > { %615 = vmatpush.bf16.msra.mxu1 %v2206_v13  ;;  %v382_v51 = vrot.slane %v380_v39, 1  ;;  %v2186_v55 = vld [vmem:[%s2747_s1 + $0x40] sm:$0xff]  ;;  %v2227_v60 = vld [vmem:[%s2747_s1 + $0x138] sm:$0xff]  ;;  %v2173_v63 = vld [vmem:[%s2355_s24 + $0x24] sm:$0xf0]  ;;  %v404_v12 = vshrl.u32 %v2402_v34, 16 }
  0x1a   : > { %763 = vmatpush.bf16.msra.mxu2 %v2182_v14  ;;  %v378_v50 = vor.u32 %v377_v42, %v373_v38  ;;  %v390_v52 = vor.u32 %v389_v44, %v385_v43  ;;  %v394_v53 = vrot.slane %v392_v45, 1  ;;  %v2235_v61 = vld [vmem:[%s2747_s1 + $0x178] sm:$0xff]  ;;  %v1784_v62 = vld [vmem:[%s2355_s24 + $0x20] sm:$0xf]  ;;  %v2172_v0 = vld [vmem:[%s2355_s24 + $0x24] sm:$0xf] }
  0x1b   : > { %801 = vmatpush.bf16.msra.mxu3 %v2190_v15  ;;  %v1786_v1 = vld [vmem:[%s2355_s24 + $0x28] sm:$0xf0]  ;;  %v2250_v3 = vld [vmem:[%s2747_s1 + $0x1f0] sm:$0xff]  ;;  %v2465_v4 = vor.u32 %v2173_v63, %v1784_v62  ;;  %v2240_v16 = vld [vmem:[%s2747_s1 + $0x1a0] sm:$0xff]  ;;  %v398_v18 = vor.u32 %v396_v10, %v382_v51 }
  0x1c   : > { %578 = vmatpush.bf16.msra.mxu0 %v2197_v20  ;;  %v383_v58 = vsel %vm371_vm0, %v378_v50, %v382_v51  ;;  %v395_v59 = vsel %vm371_vm0, %v390_v52, %v394_v53  ;;  %v2467_v5 = vor.u32 %v2172_v0, %v1786_v1  ;;  %v2226_v6 = vld [vmem:[%s2747_s1 + $0x130] sm:$0xff]  ;;  %v2241_v8 = vld [vmem:[%s2747_s1 + $0x1a8] sm:$0xff]  ;;  %v2248_v17 = vld [vmem:[%s2747_s1 + $0x1e0] sm:$0xff]  ;;  %v406_v20 = vor.u32 %v404_v12, %v394_v53 }
  0x1d   : > { %616 = vmatpush.bf16.msra.mxu1 %v2205_v21  ;;  %v2234_v7 = vld [vmem:[%s2747_s1 + $0x170] sm:$0xff]  ;;  %v2249_v9 = vld [vmem:[%s2747_s1 + $0x1e8] sm:$0xff]  ;;  %v400_v11 = vshll.u32 %v2465_v4, 16  ;;  %v2232_v23 = vld [vmem:[%s2747_s1 + $0x160] sm:$0xff]  ;;  %v412_v38 = vshrl.u32 %v2465_v4, 16 }
  0x1e   : > { %764 = vmatpush.bf16.msra.mxu2 %v2181_v22  ;;  %v408_v13 = vshll.u32 %v2467_v5, 16  ;;  %v2225_v14 = vld [vmem:[%s2747_s1 + $0x128] sm:$0xff]  ;;  %v2224_v22 = vld [vmem:[%s2747_s1 + $0x120] sm:$0xff]  ;;  %v2174_v28 = vld [vmem:[%s2355_s24 + $0x34] sm:$0xf] }
  0x1f   : > { %802 = vmatpush.bf16.msra.mxu3 %v2189_v27  ;;  %v2233_v15 = vld [vmem:[%s2747_s1 + $0x168] sm:$0xff]  ;;  %v402_v19 = vrot.slane %v400_v11, 1  ;;  %v2175_v27 = vld [vmem:[%s2355_s24 + $0x34] sm:$0xf0]  ;;  %v1794_v29 = vld [vmem:[%s2355_s24 + $0x38] sm:$0xf0] }
  0x20   : > { %579 = vmatpush.bf16.msra.mxu0 %v2196_v31  ;;  %v410_v21 = vrot.slane %v408_v13, 1  ;;  %v2239_v33 = vld [vmem:[%s2747_s1 + $0x198] sm:$0xff]  ;;  %v2176_v50 = vld [vmem:[%s2355_s24 + $0x44] sm:$0xf]  ;;  %v1802_v51 = vld [vmem:[%s2355_s24 + $0x48] sm:$0xf0] }
  0x21   : > { %617 = vmatpush.bf16.msra.mxu1 %v2204_v32  ;;  %v403_v24 = vsel %vm371_vm0, %v398_v18, %v402_v19  ;;  %v2513_v32 = vor.u32 %v2174_v28, %v1794_v29  ;;  %v2247_v35 = vld [vmem:[%s2747_s1 + $0x1d8] sm:$0xff]  ;;  %v414_v42 = vor.u32 %v412_v38, %v402_v19  ;;  %v1805_v53 = vor.u32 %v2176_v50, %v1802_v51  ;;  %v836_v28 = vld [vmem:[%s2355_s24 + $0x8] sm:$0xff]  ;;  %v837_v29 = vld [vmem:[%s2355_s24 + $0x10] sm:$0xff] }
  0x22   : > { %765 = vmatpush.bf16.msra.mxu2 %v2180_v36  ;;  %v2223_v36 = vld [vmem:[%s2747_s1 + $0x118] sm:$0xff]  ;;  %v1475_v51 = vld [vmem:[%s2748_s2] sm:$0xff] }
  0x23   : > { %803 = vmatpush.bf16.msra.mxu3 %v2188_v37  ;;  %v2246_v37 = vld [vmem:[%s2747_s1 + $0x1d0] sm:$0xff]  ;;  %v436_v62 = vshrl.u32 %v2513_v32, 16  ;;  %v440_v63 = vshll.u32 %v1805_v53, 16 }
  0x24   : > { %580 = vmatpush.bf16.msra.mxu0 %v2195_v40  ;;  %v420_v40 = vshrl.u32 %v2467_v5, 16 }
  0x25   : > { %618 = vmatpush.bf16.msra.mxu1 %v2203_v41  ;;  %v424_v41 = vshll.u32 %v2513_v32, 16 }
  0x26   : > { %766 = vmatpush.bf16.msra.mxu2 %v2179_v46  ;;  %v422_v44 = vor.u32 %v420_v40, %v410_v21  ;;  %v1800_v46 = vld [vmem:[%s2355_s24 + $0x40] sm:$0xf]  ;;  %v1968_v40 = vld [vmem:[%s2355_s24 + $0x18] sm:$0xf] }
  0x27   : > { %804 = vmatpush.bf16.msra.mxu3 %v2187_v47  ;;  %v426_v45 = vrot.slane %v424_v41, 1  ;;  %v2211_v41 = vld [vmem:[%s2355_s24 + $0x1c] sm:$0xf0] }
  0x28   : > { %581 = vmatpush.bf16.msra.mxu0 %v2194_v48 }
  0x29   : > { %619 = vmatpush.bf16.msra.mxu1 %v2202_v49  ;;  %v427_v48 = vsel %vm371_vm0, %v422_v44, %v426_v45  ;;  %v2177_v49 = vld [vmem:[%s2355_s24 + $0x44] sm:$0xf0]  ;;  %v2210_v44 = vld [vmem:[%s2355_s24 + $0x1c] sm:$0xf] }
  0x2a   : > { %767 = vmatpush.bf16.msra.mxu2 %v2178_v54  ;;  %v1801_v52 = vor.u32 %v2177_v49, %v1800_v46  ;;  %v2222_v54 = vld [vmem:[%s2747_s1 + $0x110] sm:$0xff]  ;;  %v1218_v46 = vld [vmem:[%s2355_s24 + $0x8] sm:$0xee] }
  0x2b   : > { %805 = vmatpush.bf16.msra.mxu3 %v2186_v55  ;;  %582 = vmatmul.bf16.vlgmr.msra.gmra.mxu0 %v383_v58  ;;  %v2230_v55 = vld [vmem:[%s2747_s1 + $0x150] sm:$0xff]  ;;  %v2221_v58 = vld [vmem:[%s2747_s1 + $0x108] sm:$0xff] }
  0x2c   : > { %620 = vmatmul.bf16.vlgmr.msra.gmra.mxu1 %v395_v59  ;;  %1131 = vmatpush.bf16.msrb.mxu0 %v2227_v60  ;;  %v2229_v59 = vld [vmem:[%s2747_s1 + $0x148] sm:$0xff]  ;;  %v444_v18 = vshrl.u32 %v1801_v52, 16 }
  0x2d   : > { %768 = vmatmul.bf16.vlgmr.msra.gmra.mxu2 %v2384_v25  ;;  %1169 = vmatpush.bf16.msrb.mxu1 %v2235_v61  ;;  %v411_v25 = vsel %vm371_vm0, %v406_v20, %v410_v21  ;;  %v432_v61 = vshll.u32 %v1801_v52, 16  ;;  %v452_v20 = vshrl.u32 %v1805_v53, 16 }
  0x2e   : > { %1388 = vmatpush.bf16.msrb.mxu2 %v2243_v56  ;;  %806 = vmatmul.bf16.vlgmr.msra.gmra.mxu3 %v2386_v26  ;;  %v1792_v26 = vld [vmem:[%s2355_s24 + $0x30] sm:$0xf]  ;;  %v2237_v56 = vld [vmem:[%s2747_s1 + $0x188] sm:$0xff] }
  0x2f   : > { %1426 = vmatpush.bf16.msrb.mxu3 %v2251_v57  ;;  %v2511_v31 = vor.u32 %v2175_v27, %v1792_v26  ;;  %v2245_v57 = vld [vmem:[%s2747_s1 + $0x1c8] sm:$0xff]  ;;  %v434_v1 = vrot.slane %v432_v61, 1 }
  0x30   : > { %1132 = vmatpush.bf16.msrb.mxu0 %v2226_v6 }
  0x31   : > { %1170 = vmatpush.bf16.msrb.mxu1 %v2234_v7  ;;  %v416_v39 = vshll.u32 %v2511_v31, 16  ;;  %v428_v60 = vshrl.u32 %v2511_v31, 16 }
  0x32   : > { %1389 = vmatpush.bf16.msrb.mxu2 %v2242_v2  ;;  %v438_v2 = vor.u32 %v436_v62, %v426_v45  ;;  %v1970_v45 = vld [vmem:[%s2355_s24 + $0x20] sm:$0xf0] }
  0x33   : > { %1427 = vmatpush.bf16.msrb.mxu3 %v2250_v3  ;;  %v418_v43 = vrot.slane %v416_v39, 1  ;;  %v442_v3 = vrot.slane %v440_v63, 1  ;;  %v1973_v49 = vor.u32 %v2210_v44, %v1970_v45  ;;  %v1476_v63 = vld [vmem:[%s2748_s2 + $0x8] sm:$0xff] }
  0x34   : > { %1133 = vmatpush.bf16.msrb.mxu0 %v2225_v14  ;;  %v2236_v14 = vld [vmem:[%s2747_s1 + $0x180] sm:$0xff] }
  0x35   : > { %1171 = vmatpush.bf16.msrb.mxu1 %v2233_v15  ;;  %v419_v47 = vsel %vm371_vm0, %v414_v42, %v418_v43  ;;  %v430_v0 = vor.u32 %v428_v60, %v418_v43  ;;  %v443_v7 = vsel %vm371_vm0, %v438_v2, %v442_v3  ;;  %v2244_v15 = vld [vmem:[%s2747_s1 + $0x1c0] sm:$0xff]  ;;  %v949_v60 = vshll.u32 %v1973_v49, 16 }
  0x36   : > { %1390 = vmatpush.bf16.msrb.mxu2 %v2241_v8 }
  0x37   : > { %1428 = vmatpush.bf16.msrb.mxu3 %v2249_v9  ;;  %v435_v6 = vsel %vm371_vm0, %v430_v0, %v434_v1 }
  0x38   : > { %1134 = vmatpush.bf16.msrb.mxu0 %v2224_v22  ;;  %v446_v22 = vor.u32 %v444_v18, %v434_v1 }
  0x39   : > { %1172 = vmatpush.bf16.msrb.mxu1 %v2232_v23 }
  0x3a   : > { %1391 = vmatpush.bf16.msrb.mxu2 %v2240_v16  ;;  %v2220_v16 = vld [vmem:[%s2747_s1 + $0x100] sm:$0xff] }
  0x3b   : > { %1429 = vmatpush.bf16.msrb.mxu3 %v2248_v17  ;;  %587 = vmatmul.bf16.gmra.mxu0 %v403_v24  ;;  %v2228_v17 = vld [vmem:[%s2747_s1 + $0x140] sm:$0xff]  ;;  %v454_v24 = vor.u32 %v452_v20, %v442_v3  ;;  %v951_v3 = vrot.slane %v949_v60, 1  ;;  %v961_v20 = vshrl.u32 %v1973_v49, 16  ;;  %v1994_v60 = vld [vmem:[%s2355_s24 + $0x50] sm:$0xf0] }
  0x3c   : > { %625 = vmatmul.bf16.gmra.mxu1 %v411_v25  ;;  %1135 = vmatpush.bf16.msrb.mxu0 %v2223_v36  ;;  %v894_v36 = vunpack.c.h.b16 %v836_v28 }
  0x3d   : > { %773 = vmatmul.bf16.gmra.mxu2 %v2393_v30  ;;  %v2231_v30 = vld [vmem:[%s2747_s1 + $0x158] sm:$0xff] }
  0x3e   : > { %811 = vmatmul.bf16.gmra.mxu3 %v2402_v34  ;;  %1392 = vmatpush.bf16.msrb.mxu2 %v2239_v33  ;;  %v2238_v34 = vld [vmem:[%s2747_s1 + $0x190] sm:$0xff]  ;;  %v893_v33 = vunpack.c.l.b16 %v836_v28 }
  0x3f   : > { %1430 = vmatpush.bf16.msrb.mxu3 %v2247_v35  ;;  %1173 = vmatpush.bf16.msrb.mxu1 %v2231_v30  ;;  %v895_v35 = vunpack.c.l.b16 %v837_v29  ;;  %v896_v30 = vunpack.c.h.b16 %v837_v29 }
  0x40   : > { %1136 = vmatpush.bf16.msrb.mxu0 %v2222_v54  ;;  %v2274_v54 = vmov 0  }
  0x41   : > { %v917_v42 = vpack.c.b16 %v895_v35, %v893_v33  ;;  %v918_v43 = vpack.c.b16 %v896_v30, %v894_v36  ;;  %2263 = vset.pattern.permute.xlu0 %v2274_v54  ;;  %2264 = vset.pattern.permute.xlu1 %v2274_v54  ;;  %v1478_v33 = vld [vmem:[%s2748_s2 + $0x18] sm:$0xff] }
  0x42   : > { %1393 = vmatpush.bf16.msrb.mxu2 %v2238_v34  ;;  %1488 = vperm.xlu0 %2263, %v1475_v51  }
  0x43   : > { %1431 = vmatpush.bf16.msrb.mxu3 %v2246_v37  ;;  %1174 = vmatpush.bf16.msrb.mxu1 %v2230_v55  ;;  %v944_v50 = vshll.u32 %v918_v43, 16  ;;  %v930_v55 = vshrl.u32 %v917_v42, 16 }
  0x44   : > { %1137 = vmatpush.bf16.msrb.mxu0 %v2221_v58  ;;  %2265 = vset.pattern.permute.xlu2 %v2274_v54  ;;  %v942_v58 = vshrl.u32 %v918_v43, 16  ;;  %v1992_v54 = vld [vmem:[%s2355_s24 + $0x48] sm:$0xf] }
  0x46   : > { %1394 = vmatpush.bf16.msrb.mxu2 %v2237_v56 }
  0x47   : > { %1432 = vmatpush.bf16.msrb.mxu3 %v2245_v57  ;;  %1175 = vmatpush.bf16.msrb.mxu1 %v2229_v59  ;;  %v946_v59 = vrot.slane %v944_v50, 1 }
  0x48   : > { %1138 = vmatpush.bf16.msrb.mxu0 %v2220_v16 }
  0x49   : > { %v947_v2 = vor.u32 %v946_v59, %v942_v58  ;;  %v2217_v58 = vld [vmem:[%s2355_s24 + $0x4c] sm:$0xf0]  ;;  %v2216_v59 = vld [vmem:[%s2355_s24 + $0x4c] sm:$0xf] }
  0x4a   : > { %1395 = vmatpush.bf16.msrb.mxu2 %v2236_v14  ;;  %1493 = vperm.xlu0 %2263, %v1476_v63   ;;  %v2212_v14 = vld [vmem:[%s2355_s24 + $0x2c] sm:$0xf]  ;;  %v1481_v63 = vld [vmem:[%s2748_s2 + $0x30] sm:$0xff] }
  0x4b   : > { %592 = vmatmul.bf16.gmra.mxu0 %v419_v47  ;;  %1433 = vmatpush.bf16.msrb.mxu3 %v2244_v15  ;;  %v2592_v47 = vor.u32 %v2211_v41, %v1968_v40  ;;  %v1978_v15 = vld [vmem:[%s2355_s24 + $0x30] sm:$0xf0] }
  0x4c   : > { %630 = vmatmul.bf16.gmra.mxu1 %v427_v48  ;;  %v932_v48 = vshll.u32 %v917_v42, 16 }
  0x4d   : > { %778 = vmatmul.bf16.gmra.mxu2 %v2465_v4  ;;  %v256_v4 = vld [vmem:[%s2355_s24 + $0x50] sm:$0xff]  ;;  %1176 = vmatpush.bf16.msrb.mxu1 %v2228_v17  ;;  %v937_v56 = vshll.u32 %v2592_v47, 16  ;;  %v1981_v17 = vor.u32 %v2212_v14, %v1978_v15  ;;  %v953_v18 = vshrl.u32 %v2592_v47, 16 }
  0x4e   : > { %816 = vmatmul.bf16.gmra.mxu3 %v2467_v5  ;;  %v289_v5 = vld [vmem:[%s2355_s24 + $0x58] sm:$0x11]  ;;  %v355_v8 = vunpack.c.l.b16 %v256_v4  ;;  %v356_v10 = vunpack.c.h.b16 %v256_v4  ;;  %v934_v57 = vrot.slane %v932_v48, 1 }
  0x4f   : > { %v357_v9 = vunpack.c.l.b16 %v289_v5  ;;  %v358_v11 = vunpack.c.h.b16 %v289_v5  ;;  %v939_v1 = vrot.slane %v937_v56, 1  ;;  %v1259_v5 = vrot.slane %v2592_v47, 1 }
  0x50   : > { %v650_v38 = vpack.c.b16 %v355_v8, %v355_v8  ;;  %v651_v39 = vpack.c.b16 %v356_v10, %v356_v10  ;;  %v935_v0 = vor.u32 %v934_v57, %v930_v55  ;;  %v1266_v28 = vrot.slane %v1981_v17, 1 }
  0x51   : > { %v369_v12 = vpack.c.b16 %v357_v9, %v355_v8  ;;  %v370_v13 = vpack.c.b16 %v358_v11, %v356_v10  ;;  %v952_v9 = vsel %vm371_vm0, %v947_v2, %v951_v3  ;;  %v1976_v10 = vld [vmem:[%s2355_s24 + $0x28] sm:$0xf]  ;;  %v977_v42 = vshrl.u32 %v1981_v17, 16 }
  0x52   : > { %v940_v8 = vsel %vm371_vm0, %v935_v0, %v939_v1  ;;  %1518 = vperm.xlu0 %2263, %v1481_v63  }
  0x53   : > { %v448_v19 = vshll.u32 %v369_v12, 16  ;;  %v456_v21 = vshll.u32 %v370_v13, 16 }
  0x55   : > { %v450_v23 = vrot.slane %v448_v19, 1  ;;  %v458_v25 = vrot.slane %v456_v21, 1  ;;  %v965_v21 = vshll.u32 %v1981_v17, 16 }
  0x57   : > { %v451_v26 = vsel %vm371_vm0, %v446_v22, %v450_v23  ;;  %v459_v27 = vsel %vm371_vm0, %v454_v24, %v458_v25  ;;  %v1477_v22 = vld [vmem:[%s2748_s2 + $0x10] sm:$0xff] }
  0x58   : > { %1498 = vperm.xlu1 %2264, %v1477_v22  }
  0x5b   : > { %597 = vmatmul.bf16.gmra.mxu0 %v435_v6 }
  0x5c   : > { %635 = vmatmul.bf16.gmra.mxu1 %v443_v7  ;;  %v1262_v7 = vrot.slane %v1973_v49, 1 }
  0x5d   : > { %783 = vmatmul.bf16.gmra.mxu2 %v2511_v31  ;;  %v460_v31 = vshrl.u32 %v369_v12, 16 }
  0x5e   : > { %821 = vmatmul.bf16.gmra.mxu3 %v2513_v32  ;;  %v463_v32 = vshrl.u32 %v370_v13, 16  ;;  %v2213_v13 = vld [vmem:[%s2355_s24 + $0x2c] sm:$0xf0]  ;;  %v1267_v36 = vsel %vm1257_vm1, %v1262_v7, %v1266_v28 }
  0x5f   : > { %v462_v34 = vor.u32 %v460_v31, %v450_v23  ;;  %v1977_v16 = vor.u32 %v2213_v13, %v1976_v10  ;;  %v955_v23 = vor.u32 %v953_v18, %v939_v1 }
  0x60   : > { %v465_v37 = vor.u32 %v463_v32, %v458_v25  ;;  %v963_v25 = vor.u32 %v961_v20, %v951_v3  ;;  %v1984_v32 = vld [vmem:[%s2355_s24 + $0x38] sm:$0xf]  ;;  %1503 = vperm.xlu1 %2264, %v1478_v33   ;;  %v2219_v33 = vld [vmem:[%s2355_s24 + $0x5c] sm:$0x10] }
  0x61   : > { %v957_v19 = vshll.u32 %v1977_v16, 16  ;;  %v969_v40 = vshrl.u32 %v1977_v16, 16 }
  0x63   : > { %v959_v24 = vrot.slane %v957_v19, 1 }
  0x65   : > { %v960_v29 = vsel %vm371_vm0, %v955_v23, %v959_v24  ;;  %v971_v44 = vor.u32 %v969_v40, %v959_v24 }
  0x6b   : > { %602 = vmatmul.bf16.gmra.mxu0 %v451_v26  ;;  %v967_v26 = vrot.slane %v965_v21, 1 }
  0x6c   : > { %640 = vmatmul.bf16.gmra.mxu1 %v459_v27  ;;  %v1264_v27 = vrot.slane %v1977_v16, 1 }
  0x6d   : > { %788 = vmatmul.bf16.gmra.mxu2 %v1801_v52  ;;  %v1253_v52 = vunpack.c.l.b16 %v1218_v46  ;;  %v968_v31 = vsel %vm371_vm0, %v963_v25, %v967_v26 }
  0x6e   : > { %826 = vmatmul.bf16.gmra.mxu3 %v1805_v53  ;;  %v1254_v53 = vunpack.c.h.b16 %v1218_v46  ;;  %v979_v46 = vor.u32 %v977_v42, %v967_v26  ;;  %v2000_v26 = vld [vmem:[%s2355_s24 + $0x58] sm:$0xf] }
  0x6f   : > { %v1255_v61 = vpack.c.b16 %v895_v35, %v1253_v52  ;;  %v1265_v35 = vsel %vm1257_vm1, %v1259_v5, %v1264_v27 }
  0x70   : > { %v1256_v62 = vpack.c.b16 %v896_v30, %v1254_v53  ;;  %v2215_v30 = vld [vmem:[%s2355_s24 + $0x3c] sm:$0xf0] }
  0x71   : > { %v1258_v4 = vrot.slane %v1255_v61, 1  ;;  %v2641_v61 = vor.u32 %v2217_v58, %v1992_v54 }
  0x72   : > { %v1261_v6 = vrot.slane %v1256_v62, 1  ;;  %v2643_v62 = vor.u32 %v2216_v59, %v1994_v60 }
  0x73   : > { %v1260_v11 = vsel %vm1257_vm1, %v1258_v4, %v1259_v5  ;;  %v1272_v17 = vrot.slane %v2641_v61, 1  ;;  %v1001_v40 = vshrl.u32 %v2641_v61, 16 }
  0x74   : > { %v1263_v12 = vsel %vm1257_vm1, %v1261_v6, %v1262_v7  ;;  %v989_v6 = vshll.u32 %v2641_v61, 16  ;;  %v1274_v18 = vrot.slane %v2643_v62, 1 }
  0x76   : > { %v991_v14 = vrot.slane %v989_v6, 1 }
  0x7b   : > { %607 = vmatmul.bf16.gmra.mxu0 %v462_v34  ;;  %v2214_v34 = vld [vmem:[%s2355_s24 + $0x3c] sm:$0xf] }
  0x7c   : > { %645 = vmatmul.bf16.gmra.mxu1 %v465_v37  ;;  %v1986_v37 = vld [vmem:[%s2355_s24 + $0x40] sm:$0xf0] }
  0x7d   : > { %793 = vmatmul.bf16.gmra.mxu2 %v650_v38  ;;  %v2625_v38 = vor.u32 %v2215_v30, %v1984_v32 }
  0x7e   : > { %831 = vmatmul.bf16.gmra.mxu3 %v651_v39  ;;  %v2627_v39 = vor.u32 %v2214_v34, %v1986_v37  ;;  %v2001_v34 = vor.u32 %v2219_v33, %v2000_v26 }
  0x7f   : > { %v973_v41 = vshll.u32 %v2625_v38, 16  ;;  %v1268_v48 = vrot.slane %v2625_v38, 1  ;;  %v985_v2 = vshrl.u32 %v2625_v38, 16 }
  0x80   : > { %v981_v43 = vshll.u32 %v2627_v39, 16  ;;  %v1270_v49 = vrot.slane %v2627_v39, 1  ;;  %v993_v7 = vshrl.u32 %v2627_v39, 16  ;;  %v1276_v54 = vrot.slane %v2001_v34, 1 }
  0x81   : > { %v975_v45 = vrot.slane %v973_v41, 1  ;;  %v1269_v56 = vsel %vm1257_vm1, %v1264_v27, %v1268_v48  ;;  %v1479_v27 = vld [vmem:[%s2748_s2 + $0x20] sm:$0xff] }
  0x82   : > { %v983_v47 = vrot.slane %v981_v43, 1  ;;  %v1271_v57 = vsel %vm1257_vm1, %v1266_v28, %v1270_v49  ;;  %v1485_v28 = vld [vmem:[%s2748_s2 + $0x50] sm:$0xff]  ;;  %v1275_v32 = vsel %vm1257_vm1, %v1270_v49, %v1274_v18  ;;  %1508 = vperm.xlu2 %2265, %v1479_v27  }
  0x83   : > { %v976_v52 = vsel %vm371_vm0, %v971_v44, %v975_v45  ;;  %v987_v13 = vor.u32 %v985_v2, %v975_v45  ;;  %v1005_v44 = vshll.u32 %v2001_v34, 16  ;;  %v1009_v45 = vshrl.u32 %v2643_v62, 16 }
  0x84   : > { %v984_v53 = vsel %vm371_vm0, %v979_v46, %v983_v47  ;;  %v995_v15 = vor.u32 %v993_v7, %v983_v47  ;;  %v1480_v47 = vld [vmem:[%s2748_s2 + $0x28] sm:$0xff] }
  0x85   : > { %v992_v24 = vsel %vm371_vm0, %v987_v13, %v991_v14 }
  0x8a   : > { %1513 = vperm.xlu2 %2265, %v1480_v47  }
  0x8b   : > { %1139 = vmatmul.bf16.vlgmr.msrb.gmra.mxu0 %v940_v8  ;;  %v997_v8 = vshll.u32 %v2643_v62, 16 }
  0x8c   : > { %1177 = vmatmul.bf16.vlgmr.msrb.gmra.mxu1 %v952_v9  ;;  %v1482_v9 = vld [vmem:[%s2748_s2 + $0x38] sm:$0xff] }
  0x8d   : > { %1396 = vmatmul.bf16.vlgmr.msrb.gmra.mxu2 %v1260_v11  ;;  %1523 = vperm.xlu1 %2264, %v1482_v9   ;;  %v999_v16 = vrot.slane %v997_v8, 1 }
  0x8e   : > { %1434 = vmatmul.bf16.vlgmr.msrb.gmra.mxu3 %v1263_v12  ;;  %v1484_v12 = vld [vmem:[%s2748_s2 + $0x48] sm:$0xff] }
  0x8f   : > { %1533 = vperm.xlu0 %2263, %v1484_v12   ;;  %v1000_v25 = vsel %vm371_vm0, %v995_v15, %v999_v16  ;;  %v1017_v12 = vshrl.u32 %v2001_v34, 16 }
  0x95   : > { %1538 = vperm.xlu1 %2264, %v1485_v28  }
  0x9b   : > { %1144 = vmatmul.bf16.gmra.mxu0 %v960_v29 }
  0x9c   : > { %1182 = vmatmul.bf16.gmra.mxu1 %v968_v31  ;;  %v1273_v31 = vsel %vm1257_vm1, %v1268_v48, %v1272_v17 }
  0x9d   : > { %1401 = vmatmul.bf16.gmra.mxu2 %v1265_v35  ;;  %v2218_v35 = vld [vmem:[%s2355_s24 + $0x5c] sm:$0xf] }
  0x9e   : > { %1439 = vmatmul.bf16.gmra.mxu3 %v1267_v36  ;;  %v2002_v36 = vld [vmem:[%s2355_s24 + $0x60] sm:$0x10] }
  0x9f   : > { %v2005_v37 = vor.u32 %v2218_v35, %v2002_v36 }
  0xa1   : > { %v1013_v46 = vshll.u32 %v2005_v37, 16  ;;  %v1020_v13 = vshrl.u32 %v2005_v37, 16 }
  0xa8   : > { %v583_v50 = vpop.f32.mrf.mxu0 }
  0xa9   : > { %v621_v51 = vpop.f32.mrf.mxu1 }
  0xaa   : > { %v622_v55 = vadd.f32 %v621_v51, %v583_v50  ;;  %v1003_v50 = vor.u32 %v1001_v40, %v991_v14  ;;  %v1007_v51 = vrot.slane %v1005_v44, 1 }
  0xab   : > { %1149 = vmatmul.bf16.gmra.mxu0 %v976_v52  ;;  %v1011_v52 = vor.u32 %v1009_v45, %v999_v16 }
  0xac   : > { %1187 = vmatmul.bf16.gmra.mxu1 %v984_v53  ;;  %v1015_v53 = vrot.slane %v1013_v46, 1  ;;  %v1008_v61 = vsel %vm371_vm0, %v1003_v50, %v1007_v51  ;;  %v1019_v16 = vor.u32 %v1017_v12, %v1007_v51 }
  0xad   : > { %1406 = vmatmul.bf16.gmra.mxu2 %v1269_v56 }
  0xae   : > { %1444 = vmatmul.bf16.gmra.mxu3 %v1271_v57  ;;  %v1016_v62 = vsel %vm371_vm0, %v1011_v52, %v1015_v53 }
  0xb0   : > { %v769_v0 = vpop.f32.mrf.mxu2  ;;  %v585_v4 = vpop.f32.mrf.mxu0 }
  0xb1   : > { %v807_v1 = vpop.f32.mrf.mxu3  ;;  %v770_v3 = vadd.f32 %v769_v0, %v622_v55  ;;  %v623_v5 = vpop.f32.mrf.mxu1  ;;  %v1278_v55 = vrot.slane %v2005_v37, 1  ;;  %v1277_v0 = vsel %vm1257_vm1, %v1272_v17, %v1276_v54  ;;  %v1022_v17 = vor.u32 %v1020_v13, %v1015_v53 }
  0xb2   : > { %v624_v10 = vadd.f32 %v623_v5, %v585_v4 }
  0xb3   : > { %v2655_v11 = vadd.f32 %v807_v1, %v770_v3  ;;  %v1279_v1 = vsel %vm1257_vm1, %v1274_v18, %v1278_v55 }
  0xb8   : > { %v771_v19 = vpop.f32.mrf.mxu2  ;;  %v588_v22 = vpop.f32.mrf.mxu0 }
  0xb9   : > { %v809_v20 = vpop.f32.mrf.mxu3  ;;  %v772_v21 = vadd.f32 %v771_v19, %v624_v10  ;;  %v626_v23 = vpop.f32.mrf.mxu1  ;;  %v1483_v10 = vld [vmem:[%s2748_s2 + $0x40] sm:$0xff] }
  0xba   : > { %v627_v29 = vadd.f32 %v626_v23, %v588_v22  ;;  %1528 = vperm.xlu2 %2265, %v1483_v10  }
  0xbb   : > { %v2676_v30 = vadd.f32 %v809_v20, %v772_v21  ;;  %1154 = vmatmul.bf16.gmra.mxu0 %v992_v24 }
  0xbc   : > { %1192 = vmatmul.bf16.gmra.mxu1 %v1000_v25 }
  0xbd   : > { %1411 = vmatmul.bf16.gmra.mxu2 %v1273_v31 }
  0xbe   : > { %1449 = vmatmul.bf16.gmra.mxu3 %v1275_v32 }
  0xc0   : > { %v774_v38 = vpop.f32.mrf.mxu2  ;;  %v590_v42 = vpop.f32.mrf.mxu0 }
  0xc1   : > { %v812_v39 = vpop.f32.mrf.mxu3  ;;  %v775_v41 = vadd.f32 %v774_v38, %v627_v29  ;;  %v628_v43 = vpop.f32.mrf.mxu1 }
  0xc2   : > { %v629_v48 = vadd.f32 %v628_v43, %v590_v42 }
  0xc3   : > { %v2683_v49 = vadd.f32 %v812_v39, %v775_v41 }
  0xc8   : > { %v776_v56 = vpop.f32.mrf.mxu2  ;;  %v593_v59 = vpop.f32.mrf.mxu0 }
  0xc9   : > { %v814_v57 = vpop.f32.mrf.mxu3  ;;  %v777_v58 = vadd.f32 %v776_v56, %v629_v48  ;;  %v631_v60 = vpop.f32.mrf.mxu1 }
  0xca   : > { %v632_v63 = vadd.f32 %v631_v60, %v593_v59 }
  0xcb   : > { %v2689_v2 = vadd.f32 %v814_v57, %v777_v58  ;;  %1159 = vmatmul.bf16.gmra.mxu0 %v1008_v61 }
  0xcc   : > { %1197 = vmatmul.bf16.gmra.mxu1 %v1016_v62 }
  0xcd   : > { %1416 = vmatmul.bf16.gmra.mxu2 %v1277_v0  ;;  %v1489_v0 = vpop.permute.xlu0 %1488 }
  0xce   : > { %1454 = vmatmul.bf16.gmra.mxu3 %v1279_v1 }
  0xd0   : > { %v779_v3 = vpop.f32.mrf.mxu2  ;;  %v595_v6 = vpop.f32.mrf.mxu0 }
  0xd1   : > { %v817_v4 = vpop.f32.mrf.mxu3  ;;  %v780_v5 = vadd.f32 %v779_v3, %v632_v63  ;;  %v633_v7 = vpop.f32.mrf.mxu1 }
  0xd2   : > { %v634_v8 = vadd.f32 %v633_v7, %v595_v6 }
  0xd3   : > { %v2691_v9 = vadd.f32 %v817_v4, %v780_v5 }
  0xd8   : > { %v781_v14 = vpop.f32.mrf.mxu2  ;;  %v598_v19 = vpop.f32.mrf.mxu0 }
  0xd9   : > { %v819_v15 = vpop.f32.mrf.mxu3  ;;  %v782_v18 = vadd.f32 %v781_v14, %v634_v8  ;;  %v636_v20 = vpop.f32.mrf.mxu1 }
  0xda   : > { %v637_v21 = vadd.f32 %v636_v20, %v598_v19 }
  0xdb   : > { %v2696_v22 = vadd.f32 %v819_v15, %v782_v18  ;;  %1164 = vmatmul.bf16.gmra.mxu0 %v1019_v16  ;;  %v1494_v18 = vpop.permute.xlu0 %1493 }
  0xdc   : > { %1202 = vmatmul.bf16.gmra.mxu1 %v1022_v17 }
  0xdd   : > { %1421 = vmatmul.bf16.gmra.mxu2 %v1276_v54 }
  0xde   : > { %1459 = vmatmul.bf16.gmra.mxu3 %v1278_v55 }
  0xe0   : > { %v784_v23 = vpop.f32.mrf.mxu2  ;;  %v600_v26 = vpop.f32.mrf.mxu0 }
  0xe1   : > { %v822_v24 = vpop.f32.mrf.mxu3  ;;  %v785_v25 = vadd.f32 %v784_v23, %v637_v21  ;;  %v638_v27 = vpop.f32.mrf.mxu1 }
  0xe2   : > { %v639_v28 = vadd.f32 %v638_v27, %v600_v26  ;;  %v1499_v26 = vpop.permute.xlu1 %1498 }
  0xe3   : > { %v2698_v29 = vadd.f32 %v822_v24, %v785_v25 }
  0xe8   : > { %v786_v31 = vpop.f32.mrf.mxu2  ;;  %v603_v35 = vpop.f32.mrf.mxu0 }
  0xe9   : > { %v824_v32 = vpop.f32.mrf.mxu3  ;;  %v787_v33 = vadd.f32 %v786_v31, %v639_v28  ;;  %v641_v36 = vpop.f32.mrf.mxu1 }
  0xea   : > { %v642_v34 = vadd.f32 %v641_v36, %v603_v35 }
  0xeb   : > { %v2700_v37 = vadd.f32 %v824_v32, %v787_v33 }
  0xf0   : > { %v789_v38 = vpop.f32.mrf.mxu2  ;;  %v605_v41 = vpop.f32.mrf.mxu0 }
  0xf1   : > { %v827_v39 = vpop.f32.mrf.mxu3  ;;  %v790_v40 = vadd.f32 %v789_v38, %v642_v34  ;;  %v643_v42 = vpop.f32.mrf.mxu1 }
  0xf2   : > { %v644_v43 = vadd.f32 %v643_v42, %v605_v41 }
  0xf3   : > { %v2702_v44 = vadd.f32 %v827_v39, %v790_v40 }
  0xf8   : > { %v791_v45 = vpop.f32.mrf.mxu2  ;;  %v608_v48 = vpop.f32.mrf.mxu0 }
  0xf9   : > { %v829_v46 = vpop.f32.mrf.mxu3  ;;  %v792_v47 = vadd.f32 %v791_v45, %v644_v43  ;;  %v646_v50 = vpop.f32.mrf.mxu1 }
  0xfa   : > { %v647_v51 = vadd.f32 %v646_v50, %v608_v48 }
  0xfb   : > { %v2704_v52 = vadd.f32 %v829_v46, %v792_v47 }
 0x100   : > { %v794_v53 = vpop.f32.mrf.mxu2  ;;  %v610_v56 = vpop.f32.mrf.mxu0 }
 0x101   : > { %v832_v54 = vpop.f32.mrf.mxu3  ;;  %v795_v55 = vadd.f32 %v794_v53, %v647_v51  ;;  %v648_v57 = vpop.f32.mrf.mxu1 }
 0x102   : > { %v1509_v56 = vpop.permute.xlu2 %1508 }
 0x103   : > { %v2706_v58 = vadd.f32 %v832_v54, %v795_v55 }
 0x108   : > { %v796_v59 = vpop.f32.mrf.mxu2  ;;  %v1140_v61 = vpop.f32.mrf.mxu0 }
 0x109   : > { %v834_v60 = vpop.f32.mrf.mxu3  ;;  %v1178_v62 = vpop.f32.mrf.mxu1 }
 0x10a   : > { %v1179_v63 = vadd.f32 %v1178_v62, %v1140_v61 }
 0x10c   : > { %v1207_v4 = vadd.f32 %v1179_v63, %v2655_v11 }
 0x110   : > { %v1397_v1 = vpop.f32.mrf.mxu2  ;;  %v1142_v6 = vpop.f32.mrf.mxu0 }
 0x111   : > { %v1435_v3 = vpop.f32.mrf.mxu3  ;;  %v1180_v7 = vpop.f32.mrf.mxu1 }
 0x112   : > { %v1436_v5 = vadd.f32 %v1435_v3, %v1397_v1  ;;  %v1181_v10 = vadd.f32 %v1180_v7, %v1142_v6 }
 0x114   : > { %v1464_v8 = vadd.f32 %v1436_v5, %v1207_v4  ;;  %v1208_v15 = vadd.f32 %v1181_v10, %v2676_v30 }
 0x116   : > { %v1541_v12 = vmul.f32 %v1489_v0, %v1464_v8 }
 0x118   : > { %1597 = vst [vmem:[%s2713_s20] sm:$0xff] %v1541_v12  ;;  %v1399_v13 = vpop.f32.mrf.mxu2  ;;  %v1145_v11 = vpop.f32.mrf.mxu0  ;;  %v1568_v23 = vmul.f32 %v1541_v12, %v1541_v12 }
 0x119   : > { %v1437_v14 = vpop.f32.mrf.mxu3  ;;  %v1183_v17 = vpop.f32.mrf.mxu1 }
 0x11a   : > { %v1438_v16 = vadd.f32 %v1437_v14, %v1399_v13  ;;  %v1184_v20 = vadd.f32 %v1183_v17, %v1145_v11 }
 0x11c   : > { %v1465_v19 = vadd.f32 %v1438_v16, %v1208_v15  ;;  %v1209_v31 = vadd.f32 %v1184_v20, %v2683_v49  ;;  %v1504_v49 = vpop.permute.xlu1 %1503 }
 0x11e   : > { %v1542_v21 = vmul.f32 %v1494_v18, %v1465_v19 }
 0x120   : > { %v1552_v24 = vadd.f32 %v1542_v21, %v1541_v12  ;;  %v1569_v25 = vmul.f32 %v1542_v21, %v1542_v21  ;;  %1598 = vst [vmem:[%s2713_s20 + $0x8] sm:$0xff] %v1542_v21  ;;  %v1402_v27 = vpop.f32.mrf.mxu2  ;;  %v1147_v30 = vpop.f32.mrf.mxu0 }
 0x121   : > { %v1440_v28 = vpop.f32.mrf.mxu3  ;;  %v1185_v35 = vpop.f32.mrf.mxu1 }
 0x122   : > { %v1579_v32 = vadd.f32 %v1569_v25, %v1568_v23  ;;  %v1441_v33 = vadd.f32 %v1440_v28, %v1402_v27  ;;  %v1186_v34 = vadd.f32 %v1185_v35, %v1147_v30  ;;  %v1519_v27 = vpop.permute.xlu0 %1518 }
 0x124   : > { %v1466_v36 = vadd.f32 %v1441_v33, %v1209_v31  ;;  %v1210_v43 = vadd.f32 %v1186_v34, %v2689_v2 }
 0x126   : > { %v1543_v38 = vmul.f32 %v1499_v26, %v1466_v36 }
 0x128   : > { %v1553_v39 = vadd.f32 %v1552_v24, %v1543_v38  ;;  %v1570_v40 = vmul.f32 %v1543_v38, %v1543_v38  ;;  %1599 = vst [vmem:[%s2713_s20 + $0x10] sm:$0xff] %v1543_v38  ;;  %v1404_v41 = vpop.f32.mrf.mxu2  ;;  %v1150_v47 = vpop.f32.mrf.mxu0 }
 0x129   : > { %v1442_v42 = vpop.f32.mrf.mxu3  ;;  %v1188_v48 = vpop.f32.mrf.mxu1 }
 0x12a   : > { %v1580_v45 = vadd.f32 %v1579_v32, %v1570_v40  ;;  %v1443_v46 = vadd.f32 %v1442_v42, %v1404_v41  ;;  %v1189_v51 = vadd.f32 %v1188_v48, %v1150_v47  ;;  %v1524_v41 = vpop.permute.xlu1 %1523 }
 0x12c   : > { %v1467_v50 = vadd.f32 %v1443_v46, %v1210_v43  ;;  %v1211_v60 = vadd.f32 %v1189_v51, %v2691_v9  ;;  %v1514_v9 = vpop.permute.xlu2 %1513 }
 0x12e   : > { %v1544_v53 = vmul.f32 %v1504_v49, %v1467_v50 }
 0x130   : > { %v1554_v54 = vadd.f32 %v1553_v39, %v1544_v53  ;;  %v1571_v55 = vmul.f32 %v1544_v53, %v1544_v53  ;;  %1600 = vst [vmem:[%s2713_s20 + $0x18] sm:$0xff] %v1544_v53  ;;  %v1407_v57 = vpop.f32.mrf.mxu2  ;;  %v1152_v2 = vpop.f32.mrf.mxu0 }
 0x131   : > { %v1445_v59 = vpop.f32.mrf.mxu3  ;;  %v1190_v63 = vpop.f32.mrf.mxu1 }
 0x132   : > { %v1581_v61 = vadd.f32 %v1580_v45, %v1571_v55  ;;  %v1446_v62 = vadd.f32 %v1445_v59, %v1407_v57  ;;  %v1191_v1 = vadd.f32 %v1190_v63, %v1152_v2 }
 0x134   : > { %v1468_v0 = vadd.f32 %v1446_v62, %v1211_v60  ;;  %v1212_v8 = vadd.f32 %v1191_v1, %v2696_v22  ;;  %v1529_v55 = vpop.permute.xlu2 %1528 }
 0x136   : > { %v1545_v3 = vmul.f32 %v1509_v56, %v1468_v0 }
 0x138   : > { %v1555_v4 = vadd.f32 %v1554_v54, %v1545_v3  ;;  %v1572_v5 = vmul.f32 %v1545_v3, %v1545_v3  ;;  %1601 = vst [vmem:[%s2713_s20 + $0x20] sm:$0xff] %v1545_v3  ;;  %v1409_v6 = vpop.f32.mrf.mxu2  ;;  %v1155_v13 = vpop.f32.mrf.mxu0 }
 0x139   : > { %v1447_v7 = vpop.f32.mrf.mxu3  ;;  %v1193_v14 = vpop.f32.mrf.mxu1 }
 0x13a   : > { %v1582_v10 = vadd.f32 %v1581_v61, %v1572_v5  ;;  %v1448_v12 = vadd.f32 %v1447_v7, %v1409_v6  ;;  %v1194_v16 = vadd.f32 %v1193_v14, %v1155_v13 }
 0x13c   : > { %v1469_v15 = vadd.f32 %v1448_v12, %v1212_v8  ;;  %v1213_v21 = vadd.f32 %v1194_v16, %v2698_v29 }
 0x13e   : > { %v1546_v11 = vmul.f32 %v1514_v9, %v1469_v15 }
 0x140   : > { %v1556_v17 = vadd.f32 %v1555_v4, %v1546_v11  ;;  %v1573_v18 = vmul.f32 %v1546_v11, %v1546_v11  ;;  %1602 = vst [vmem:[%s2713_s20 + $0x28] sm:$0xff] %v1546_v11  ;;  %v1412_v19 = vpop.f32.mrf.mxu2  ;;  %v1157_v25 = vpop.f32.mrf.mxu0 }
 0x141   : > { %v1450_v20 = vpop.f32.mrf.mxu3  ;;  %v1195_v22 = vpop.f32.mrf.mxu1 }
 0x142   : > { %v1583_v23 = vadd.f32 %v1582_v10, %v1573_v18  ;;  %v1451_v24 = vadd.f32 %v1450_v20, %v1412_v19  ;;  %v1196_v31 = vadd.f32 %v1195_v22, %v1157_v25  ;;  %v1534_v4 = vpop.permute.xlu0 %1533  ;;  %v1539_v11 = vpop.permute.xlu1 %1538 }
 0x144   : > { %v1470_v26 = vadd.f32 %v1451_v24, %v1213_v21  ;;  %v1214_v34 = vadd.f32 %v1196_v31, %v2700_v37 }
 0x146   : > { %v1547_v28 = vmul.f32 %v1519_v27, %v1470_v26 }
 0x148   : > { %v1557_v32 = vadd.f32 %v1556_v17, %v1547_v28  ;;  %v1574_v33 = vmul.f32 %v1547_v28, %v1547_v28  ;;  %1603 = vst [vmem:[%s2713_s20 + $0x30] sm:$0xff] %v1547_v28  ;;  %v1414_v30 = vpop.f32.mrf.mxu2  ;;  %v1160_v39 = vpop.f32.mrf.mxu0 }
 0x149   : > { %v1452_v35 = vpop.f32.mrf.mxu3  ;;  %v1198_v29 = vpop.f32.mrf.mxu1 }
 0x14a   : > { %v1584_v36 = vadd.f32 %v1583_v23, %v1574_v33  ;;  %v1453_v38 = vadd.f32 %v1452_v35, %v1414_v30  ;;  %v1199_v43 = vadd.f32 %v1198_v29, %v1160_v39 }
 0x14c   : > { %v1471_v40 = vadd.f32 %v1453_v38, %v1214_v34  ;;  %v1215_v50 = vadd.f32 %v1199_v43, %v2702_v44 }
 0x14e   : > { %v1548_v42 = vmul.f32 %v1524_v41, %v1471_v40 }
 0x150   : > { %v1558_v45 = vadd.f32 %v1557_v32, %v1548_v42  ;;  %v1575_v46 = vmul.f32 %v1548_v42, %v1548_v42  ;;  %1604 = vst [vmem:[%s2713_s20 + $0x38] sm:$0xff] %v1548_v42  ;;  %v1417_v47 = vpop.f32.mrf.mxu2  ;;  %v1162_v53 = vpop.f32.mrf.mxu0 }
 0x151   : > { %v1455_v48 = vpop.f32.mrf.mxu3  ;;  %v1200_v54 = vpop.f32.mrf.mxu1 }
 0x152   : > { %v1585_v49 = vadd.f32 %v1584_v36, %v1575_v46  ;;  %v1456_v51 = vadd.f32 %v1455_v48, %v1417_v47  ;;  %v1201_v57 = vadd.f32 %v1200_v54, %v1162_v53 }
 0x154   : > { %v1472_v37 = vadd.f32 %v1456_v51, %v1215_v50  ;;  %v1216_v63 = vadd.f32 %v1201_v57, %v2704_v52 }
 0x156   : > { %v1549_v56 = vmul.f32 %v1529_v55, %v1472_v37 }
 0x158   : > { %v1559_v59 = vadd.f32 %v1558_v45, %v1549_v56  ;;  %v1576_v60 = vmul.f32 %v1549_v56, %v1549_v56  ;;  %1605 = vst [vmem:[%s2713_s20 + $0x40] sm:$0xff] %v1549_v56  ;;  %v1419_v61 = vpop.f32.mrf.mxu2  ;;  %v1165_v1 = vpop.f32.mrf.mxu0 }
 0x159   : > { %v1457_v62 = vpop.f32.mrf.mxu3  ;;  %v1203_v3 = vpop.f32.mrf.mxu1 }
 0x15a   : > { %v1586_v2 = vadd.f32 %v1585_v49, %v1576_v60  ;;  %v1458_v0 = vadd.f32 %v1457_v62, %v1419_v61  ;;  %v1204_v6 = vadd.f32 %v1203_v3, %v1165_v1 }
 0x15c   : > { %v1473_v44 = vadd.f32 %v1458_v0, %v1216_v63  ;;  %v1217_v14 = vadd.f32 %v1204_v6, %v2706_v58 }
 0x15e   : > { %v1550_v5 = vmul.f32 %v1534_v4, %v1473_v44 }
 0x160   : > { %v1560_v7 = vadd.f32 %v1559_v59, %v1550_v5  ;;  %v1577_v8 = vmul.f32 %v1550_v5, %v1550_v5  ;;  %1606 = vst [vmem:[%s2713_s20 + $0x48] sm:$0xff] %v1550_v5  ;;  %v1422_v10 = vpop.f32.mrf.mxu2  ;;  %v1167_v15 = vpop.f32.mrf.mxu0 }
 0x161   : > { %v1460_v12 = vpop.f32.mrf.mxu3  ;;  %v1205_v52 = vpop.f32.mrf.mxu1 }
 0x162   : > { %v1587_v13 = vadd.f32 %v1586_v2, %v1577_v8  ;;  %v1461_v9 = vadd.f32 %v1460_v12, %v1422_v10 }
 0x164   : > { %v1474_v16 = vadd.f32 %v1461_v9, %v1217_v14 }
 0x166   : > { %v1551_v17 = vmul.f32 %v1539_v11, %v1474_v16 }
 0x168   : > { %v1561_v18 = vadd.f32 %v1560_v7, %v1551_v17  ;;  %v1578_v19 = vmul.f32 %v1551_v17, %v1551_v17  ;;  %1607 = vst [vmem:[%s2713_s20 + $0x50] sm:$0xff] %v1551_v17  ;;  %v1424_v20 = vpop.f32.mrf.mxu2 }
 0x169   : > { %v1462_v21 = vpop.f32.mrf.mxu3 }
 0x16a   : > { %v1562_v23 = vrot.slane %v1561_v18, 4  ;;  %v1588_v24 = vadd.f32 %v1587_v13, %v1578_v19 }
 0x16c   : > { %v1563_v25 = vadd.f32 %v1562_v23, %v1561_v18  ;;  %v1589_v22 = vrot.slane %v1588_v24, 4 }
 0x16e   : > { %v1564_v26 = vrot.slane %v1563_v25, 2  ;;  %v1590_v27 = vadd.f32 %v1589_v22, %v1588_v24 }
 0x170   : > { %v1565_v58 = vadd.f32 %v1564_v26, %v1563_v25  ;;  %v1591_v28 = vrot.slane %v1590_v27, 2 }
 0x172   : > { %v1566_v31 = vrot.slane %v1565_v58, 1  ;;  %v1592_v32 = vadd.f32 %v1591_v28, %v1590_v27 }
 0x174   : > { %v1567_v33 = vadd.f32 %v1566_v31, %v1565_v58  ;;  %v1593_v30 = vrot.slane %v1592_v32, 1 }
 0x176   : > { %v1594_v35 = vadd.f32 %v1593_v30, %v1592_v32  ;;  %1595 = vst [vmem:[%s241_s25] sm:$0xff] %v1567_v33 }
 0x178   : > { %1596 = vst [vmem:[%s245_s28] sm:$0xff] %v1594_v35 }
 0x179 PF: > { %s16_s18 = sadd.s32 1, %s2272_s18  }
 0x17a   : > { %p13_p4 = scmp.ge.s32.totalorder %s16_s18, 4  }
 0x17c   :  { %15 = sbr.rel (!%p13_p4) target bundleno = 1 (0x1), region = 89 }

// kernel: discriminator_forward.8
= control target key start
LH: loop header
LB: loop body
LE: loop exit
PB: predicated region body
PF: predicated region fallthrough
CT: control target
= control target key end

     0   :  { %s400_s12 = smov 0   ;;  %s462_s0 = inlined_call_operand.vmem [shape: f32[2,88,128], index: 0, kind: input, shape index: {}]   ;;  %s463_s1 = inlined_call_operand.vmem [shape: f32[1,128], index: 1, kind: input, shape index: {}]   ;;  %s464_s2 = inlined_call_operand.vmem [shape: f32[1,128], index: 2, kind: input, shape index: {}]   ;;  %s465_s3 = inlined_call_operand.vmem [shape: bf16[2,88,128], index: 3, kind: output, shape index: {}]  }
   0x1 LB: > { %s322_s13 = sadd.s32 4294967295, %s378_s12   ;;  %p326_p0 = scmp.ge.s32.totalorder %s378_s12, 1  ;;  %s378_s12 = sphi %s400_s12, %s13_s12  }
   0x2   : > { %p137_p1 = scmp.lt.s32.totalorder %s378_s12, 3 }
   0x4   : > { %p138_p2 = pnand %p326_p0, %p137_p1 }
   0x5   : > { %p161_p3 = scmp.lt.s32.totalorder (!%p138_p2), %s322_s13, 1 }
   0x6   : > { %141 = sbr.rel (%p138_p2) target bundleno = 37 (0x25), region = 32 }
   0xb   : > { %s467_s13 = smov (!%p161_p3, %s322_s13), 1  ;;  %v370_v0 = vld [vmem:[%s463_s1] ss:$0 sm:$0xff] }
   0xc   : > { %s360_s14 = smul.u32 88, %s467_s13  ;;  %v422_v1 = vld [vmem:[%s464_s2] ss:$0 sm:$0xff] }
   0xd   : > { %s361_s22 = smul.u32 44, %s467_s13 }
   0xe   : > { %s417_s19 = scalar_lea.vmem %s462_s0, %s360_s14 }
   0xf   : > { %v171_v2 = vld [vmem:[%s417_s19] sm:$0xff]  ;;  %v172_v3 = vld [vmem:[%s417_s19 + $0x8] sm:$0xff]  ;;  %v173_v4 = vld [vmem:[%s417_s19 + $0x10] sm:$0xff]  ;;  %s442_s25 = scalar_lea.vmem %s465_s3, %s361_s22 }
  0x10   : > { %v186_v5 = vmul.f32 %v370_v0, %v171_v2  ;;  %v187_v6 = vmul.f32 %v370_v0, %v172_v3  ;;  %v174_v7 = vld [vmem:[%s417_s19 + $0x18] sm:$0xff]  ;;  %v188_v8 = vmul.f32 %v370_v0, %v173_v4  ;;  %v175_v9 = vld [vmem:[%s417_s19 + $0x20] sm:$0xff]  ;;  %v176_v10 = vld [vmem:[%s417_s19 + $0x28] sm:$0xff] }
  0x11   : > { %v189_v11 = vmul.f32 %v370_v0, %v174_v7  ;;  %v190_v12 = vmul.f32 %v370_v0, %v175_v9  ;;  %v191_v13 = vmul.f32 %v370_v0, %v176_v10  ;;  %v177_v14 = vld [vmem:[%s417_s19 + $0x30] sm:$0xff]  ;;  %v178_v15 = vld [vmem:[%s417_s19 + $0x38] sm:$0xff]  ;;  %v179_v30 = vld [vmem:[%s417_s19 + $0x40] sm:$0xff] }
  0x12   : > { %v201_v16 = vadd.f32 %v422_v1, %v186_v5  ;;  %v202_v17 = vadd.f32 %v422_v1, %v187_v6  ;;  %v203_v18 = vadd.f32 %v422_v1, %v188_v8  ;;  %v192_v19 = vmul.f32 %v370_v0, %v177_v14  ;;  %v180_v31 = vld [vmem:[%s417_s19 + $0x48] sm:$0xff]  ;;  %v181_v32 = vld [vmem:[%s417_s19 + $0x50] sm:$0xff] }
  0x13   : > { %v204_v20 = vadd.f32 %v422_v1, %v189_v11  ;;  %v205_v21 = vadd.f32 %v422_v1, %v190_v12  ;;  %v206_v22 = vadd.f32 %v422_v1, %v191_v13  ;;  %v193_v23 = vmul.f32 %v370_v0, %v178_v15 }
  0x14   : > { %vm212_vm0 = vcmp.gt.f32.partialorder %v201_v16, 0.0  ;;  %vm213_vm1 = vcmp.gt.f32.partialorder %v202_v17, 0.0  ;;  %v223_v24 = vmul.f32 0.2, %v201_v16  ;;  %v224_v25 = vmul.f32 0.2, %v202_v17 }
  0x15   : > { %vm214_vm2 = vcmp.gt.f32.partialorder %v203_v18, 0.0  ;;  %vm215_vm3 = vcmp.gt.f32.partialorder %v204_v20, 0.0  ;;  %v225_v26 = vmul.f32 0.2, %v203_v18  ;;  %v226_v27 = vmul.f32 0.2, %v204_v20 }
  0x16   : > { %v234_v28 = vsel %vm212_vm0, %v201_v16, %v223_v24  ;;  %v235_v29 = vsel %vm213_vm1, %v202_v17, %v224_v25  ;;  %vm216_vm4 = vcmp.gt.f32.partialorder %v205_v21, 0.0  ;;  %vm217_vm5 = vcmp.gt.f32.partialorder %v206_v22, 0.0 }
  0x17   : > { %v334_v33 = vpack.c.bf16 %v235_v29, %v234_v28  ;;  %v236_v34 = vsel %vm214_vm2, %v203_v18, %v225_v26  ;;  %v237_v35 = vsel %vm215_vm3, %v204_v20, %v226_v27  ;;  %v227_v36 = vmul.f32 0.2, %v205_v21 }
  0x18   : > { %v339_v37 = vpack.c.bf16 %v237_v35, %v236_v34  ;;  %v228_v38 = vmul.f32 0.2, %v206_v22  ;;  %v207_v39 = vadd.f32 %v422_v1, %v192_v19  ;;  %v208_v40 = vadd.f32 %v422_v1, %v193_v23 }
  0x19   : > { %335 = vst [vmem:[%s442_s25] sm:$0xff] %v334_v33   ;;  %v238_v41 = vsel %vm216_vm4, %v205_v21, %v227_v36  ;;  %v194_v42 = vmul.f32 %v370_v0, %v179_v30  ;;  %v195_v43 = vmul.f32 %v370_v0, %v180_v31  ;;  %v196_v44 = vmul.f32 %v370_v0, %v181_v32 }
  0x1a   : > { %356 = vst [vmem:[%s442_s25 + $0x8] sm:$0xff] %v339_v37   ;;  %v239_v45 = vsel %vm217_vm5, %v206_v22, %v228_v38  ;;  %vm218_vm6 = vcmp.gt.f32.partialorder %v207_v39, 0.0  ;;  %vm219_vm7 = vcmp.gt.f32.partialorder %v208_v40, 0.0  ;;  %v229_v46 = vmul.f32 0.2, %v207_v39 }
  0x1b   : > { %v344_v47 = vpack.c.bf16 %v239_v45, %v238_v41  ;;  %v230_v48 = vmul.f32 0.2, %v208_v40  ;;  %v209_v49 = vadd.f32 %v422_v1, %v194_v42  ;;  %v210_v50 = vadd.f32 %v422_v1, %v195_v43 }
  0x1c   : > { %v240_v51 = vsel %vm218_vm6, %v207_v39, %v229_v46  ;;  %v211_v52 = vadd.f32 %v422_v1, %v196_v44 }
  0x1d   : > { %357 = vst [vmem:[%s442_s25 + $0x10] sm:$0xff] %v344_v47   ;;  %v241_v53 = vsel %vm219_vm7, %v208_v40, %v230_v48  ;;  %vm220_vm8 = vcmp.gt.f32.partialorder %v209_v49, 0.0  ;;  %vm221_vm9 = vcmp.gt.f32.partialorder %v210_v50, 0.0  ;;  %v231_v54 = vmul.f32 0.2, %v209_v49 }
  0x1e   : > { %v349_v55 = vpack.c.bf16 %v241_v53, %v240_v51  ;;  %v232_v56 = vmul.f32 0.2, %v210_v50  ;;  %vm222_vm10 = vcmp.gt.f32.partialorder %v211_v52, 0.0  ;;  %v233_v57 = vmul.f32 0.2, %v211_v52 }
  0x1f   : > { %v242_v58 = vsel %vm220_vm8, %v209_v49, %v231_v54 }
  0x20   : > { %358 = vst [vmem:[%s442_s25 + $0x18] sm:$0xff] %v349_v55   ;;  %v243_v59 = vsel %vm221_vm9, %v210_v50, %v232_v56  ;;  %v244_v60 = vsel %vm222_vm10, %v211_v52, %v233_v57 }
  0x21   : > { %v354_v61 = vpack.c.bf16 %v243_v59, %v242_v58  ;;  %v255_v62 = vpack.c.bf16 %v244_v60, %v244_v60 }
  0x23   : > { %359 = vst [vmem:[%s442_s25 + $0x20] sm:$0xff] %v354_v61  }
  0x24   : > { %266 = vst [vmem:[%s442_s25 + $0x28] sm:$0xf] %v255_v62 }
  0x25 PF: > { %s13_s12 = sadd.s32 1, %s378_s12  }
  0x26   : > { %p10_p4 = scmp.ge.s32.totalorder %s13_s12, 4  }
  0x28   :  { %12 = sbr.rel (!%p10_p4) target bundleno = 1 (0x1), region = 62 }

// kernel: discriminator_forward.10
= control target key start
LH: loop header
LB: loop body
LE: loop exit
PB: predicated region body
PF: predicated region fallthrough
CT: control target
= control target key end

     0   :  { %s343_s12 = smov 0   ;;  %s370_s0 = inlined_call_operand.vmem [shape: f32[2,32,256], index: 0, kind: input, shape index: {}]   ;;  %s371_s1 = inlined_call_operand.vmem [shape: f32[1,256], index: 1, kind: input, shape index: {}]   ;;  %s372_s2 = inlined_call_operand.vmem [shape: f32[1,256], index: 2, kind: input, shape index: {}]   ;;  %s373_s3 = inlined_call_operand.vmem [shape: bf16[2,32,256], index: 3, kind: output, shape index: {}]  }
   0x1 LB: > { %s294_s13 = sadd.s32 4294967295, %s321_s12   ;;  %p298_p0 = scmp.ge.s32.totalorder %s321_s12, 1  ;;  %s321_s12 = sphi %s343_s12, %s13_s12  }
   0x2   : > { %p137_p1 = scmp.lt.s32.totalorder %s321_s12, 3 }
   0x4   : > { %p138_p2 = pnand %p298_p0, %p137_p1 }
   0x5   : > { %p161_p3 = scmp.lt.s32.totalorder (!%p138_p2), %s294_s13, 1 }
   0x6   : > { %141 = sbr.rel (%p138_p2) target bundleno = 32 (0x20), region = 32 }
   0xb   : > { %v179_v0 = vld [vmem:[%s371_s1] sm:$0x3]  ;;  %s375_s13 = smov (!%p161_p3, %s294_s13), 1 }
   0xc   : > { %v193_v1 = vld [vmem:[%s372_s2] sm:$0x3]  ;;  %v181_v2 = vperm.slane %v179_v0, 0  ;;  %v182_v3 = vperm.slane %v179_v0, 1  ;;  %s305_s18 = sshll.u32 %s375_s13, 6  ;;  %s306_s22 = sshll.u32 %s375_s13, 5 }
   0xd   : > { %s165_s21 = scalar_lea.vmem %s370_s0, %s305_s18  ;;  %v195_v4 = vperm.slane %v193_v1, 0  ;;  %v196_v5 = vperm.slane %v193_v1, 1  ;;  %s170_s25 = scalar_lea.vmem %s373_s3, %s306_s22 }
   0xe   : > { %v171_v6 = vld [vmem:[%s165_s21] sm:$0xff]  ;;  %v172_v7 = vld [vmem:[%s165_s21 + $0x8] sm:$0xff]  ;;  %v173_v8 = vld [vmem:[%s165_s21 + $0x10] sm:$0xff] }
   0xf   : > { %v185_v9 = vmul.f32 %v181_v2, %v171_v6  ;;  %v186_v10 = vmul.f32 %v182_v3, %v172_v7  ;;  %v174_v11 = vld [vmem:[%s165_s21 + $0x18] sm:$0xff]  ;;  %v187_v12 = vmul.f32 %v181_v2, %v173_v8  ;;  %v175_v13 = vld [vmem:[%s165_s21 + $0x20] sm:$0xff]  ;;  %v176_v14 = vld [vmem:[%s165_s21 + $0x28] sm:$0xff] }
  0x10   : > { %v188_v15 = vmul.f32 %v182_v3, %v174_v11  ;;  %v189_v16 = vmul.f32 %v181_v2, %v175_v13  ;;  %v190_v17 = vmul.f32 %v182_v3, %v176_v14  ;;  %v177_v18 = vld [vmem:[%s165_s21 + $0x30] sm:$0xff]  ;;  %v178_v19 = vld [vmem:[%s165_s21 + $0x38] sm:$0xff] }
  0x11   : > { %v199_v20 = vadd.f32 %v195_v4, %v185_v9  ;;  %v200_v21 = vadd.f32 %v196_v5, %v186_v10  ;;  %v201_v22 = vadd.f32 %v195_v4, %v187_v12  ;;  %v191_v23 = vmul.f32 %v181_v2, %v177_v18 }
  0x12   : > { %v202_v24 = vadd.f32 %v196_v5, %v188_v15  ;;  %v203_v25 = vadd.f32 %v195_v4, %v189_v16  ;;  %v204_v26 = vadd.f32 %v196_v5, %v190_v17  ;;  %v192_v27 = vmul.f32 %v182_v3, %v178_v19 }
  0x13   : > { %vm207_vm0 = vcmp.gt.f32.partialorder %v199_v20, 0.0  ;;  %vm208_vm1 = vcmp.gt.f32.partialorder %v200_v21, 0.0  ;;  %v215_v28 = vmul.f32 0.2, %v199_v20  ;;  %v216_v29 = vmul.f32 0.2, %v200_v21 }
  0x14   : > { %vm209_vm2 = vcmp.gt.f32.partialorder %v201_v22, 0.0  ;;  %vm210_vm3 = vcmp.gt.f32.partialorder %v202_v24, 0.0  ;;  %v217_v30 = vmul.f32 0.2, %v201_v22  ;;  %v218_v31 = vmul.f32 0.2, %v202_v24 }
  0x15   : > { %v223_v32 = vsel %vm207_vm0, %v199_v20, %v215_v28  ;;  %v224_v33 = vsel %vm208_vm1, %v200_v21, %v216_v29  ;;  %vm211_vm4 = vcmp.gt.f32.partialorder %v203_v25, 0.0  ;;  %vm212_vm5 = vcmp.gt.f32.partialorder %v204_v26, 0.0 }
  0x16   : > { %v231_v34 = vpack.c.bf16 %v224_v33, %v223_v32  ;;  %v225_v35 = vsel %vm209_vm2, %v201_v22, %v217_v30  ;;  %v226_v36 = vsel %vm210_vm3, %v202_v24, %v218_v31  ;;  %v219_v37 = vmul.f32 0.2, %v203_v25 }
  0x17   : > { %v232_v38 = vpack.c.bf16 %v226_v36, %v225_v35  ;;  %v220_v39 = vmul.f32 0.2, %v204_v26  ;;  %v205_v40 = vadd.f32 %v195_v4, %v191_v23  ;;  %v206_v41 = vadd.f32 %v196_v5, %v192_v27 }
  0x18   : > { %235 = vst [vmem:[%s170_s25] sm:$0xff] %v231_v34  ;;  %v227_v42 = vsel %vm211_vm4, %v203_v25, %v219_v37 }
  0x19   : > { %236 = vst [vmem:[%s170_s25 + $0x8] sm:$0xff] %v232_v38  ;;  %v228_v43 = vsel %vm212_vm5, %v204_v26, %v220_v39  ;;  %vm213_vm6 = vcmp.gt.f32.partialorder %v205_v40, 0.0  ;;  %vm214_vm7 = vcmp.gt.f32.partialorder %v206_v41, 0.0  ;;  %v221_v44 = vmul.f32 0.2, %v205_v40 }
  0x1a   : > { %v233_v45 = vpack.c.bf16 %v228_v43, %v227_v42  ;;  %v222_v46 = vmul.f32 0.2, %v206_v41 }
  0x1b   : > { %v229_v47 = vsel %vm213_vm6, %v205_v40, %v221_v44 }
  0x1c   : > { %237 = vst [vmem:[%s170_s25 + $0x10] sm:$0xff] %v233_v45  ;;  %v230_v48 = vsel %vm214_vm7, %v206_v41, %v222_v46 }
  0x1d   : > { %v234_v49 = vpack.c.bf16 %v230_v48, %v229_v47 }
  0x1f   : > { %238 = vst [vmem:[%s170_s25 + $0x18] sm:$0xff] %v234_v49 }
  0x20 PF: > { %s13_s12 = sadd.s32 1, %s321_s12  }
  0x21   : > { %p10_p4 = scmp.ge.s32.totalorder %s13_s12, 4  }
  0x23   :  { %12 = sbr.rel (!%p10_p4) target bundleno = 1 (0x1), region = 62 }

// kernel: discriminator_forward.9
= control target key start
LH: loop header
LB: loop body
LE: loop exit
PB: predicated region body
PF: predicated region fallthrough
CT: control target
= control target key end

     0   :  { %s4489_s18 = smov 0   ;;  %s6639_s0 = inlined_call_operand.vmem [shape: bf16[2,45,512], index: 0, kind: input, shape index: {}]   ;;  %s6640_s1 = inlined_call_operand.vmem [shape: bf16[4,512,256], index: 1, kind: input, shape index: {}]   ;;  %s6641_s2 = inlined_call_operand.vmem [shape: f32[32,1], index: 2, kind: input, shape index: {}]   ;;  %s6642_s3 = inlined_call_operand.vmem [shape: f32[2,32,256], index: 3, kind: output, shape index: {0}]   ;;  %s6643_s4 = inlined_call_operand.vmem [shape: f32[2,8,256], index: 4, kind: output, shape index: {1}]   ;;  %s6644_s5 = inlined_call_operand.vmem [shape: f32[2,8,256], index: 5, kind: output, shape index: {2}]  }
   0x1 LB: > { %s2929_s19 = sadd.s32 4294967295, %s4456_s18   ;;  %p2933_p0 = scmp.ge.s32.totalorder %s4456_s18, 1  ;;  %s4456_s18 = sphi %s4489_s18, %s16_s18  }
   0x2   : > { %p192_p1 = scmp.lt.s32.totalorder %s4456_s18, 3 }
   0x4   : > { %p193_p2 = pnand %p2933_p0, %p192_p1 }
   0x5   : > { %p230_p3 = scmp.lt.s32.totalorder (!%p193_p2), %s2929_s19, 1 }
   0x6   : > { %196 = sbr.rel (%p193_p2) target bundleno = 468 (0x1d4), region = 32 }
   0xb   : > { %v3079_v0 = vld [vmem:[%s6640_s1 + $0x270] sm:$0xf]  ;;  %v4261_v1 = vld [vmem:[%s6640_s1 + $0x274] sm:$0xf0]  ;;  %v3071_v11 = vld [vmem:[%s6640_s1 + $0x260] sm:$0xf] }
   0xc   : > { %v3143_v2 = vld [vmem:[%s6640_s1 + $0x2f0] sm:$0xf]  ;;  %v3080_v3 = vor.u32 %v4261_v1, %v3079_v0  ;;  %v4277_v4 = vld [vmem:[%s6640_s1 + $0x2f4] sm:$0xf0]  ;;  %v4259_v13 = vld [vmem:[%s6640_s1 + $0x264] sm:$0xf0] }
   0xd   : > { %v3207_v5 = vld [vmem:[%s6640_s1 + $0x370] sm:$0xf]  ;;  %v4293_v6 = vld [vmem:[%s6640_s1 + $0x374] sm:$0xf0]  ;;  %v3144_v7 = vor.u32 %v4277_v4, %v3143_v2  ;;  %v3135_v14 = vld [vmem:[%s6640_s1 + $0x2e0] sm:$0xf]  ;;  %v3072_v16 = vor.u32 %v4259_v13, %v3071_v11 }
   0xe   : > { %v3208_v8 = vor.u32 %v4293_v6, %v3207_v5  ;;  %v3271_v9 = vld [vmem:[%s6640_s1 + $0x3f0] sm:$0xf]  ;;  %v4309_v10 = vld [vmem:[%s6640_s1 + $0x3f4] sm:$0xf0]  ;;  %840 = vmatpush.bf16.msra.mxu0 %v3080_v3  ;;  %v4275_v15 = vld [vmem:[%s6640_s1 + $0x2e4] sm:$0xf0] }
   0xf   : > { %v3272_v12 = vor.u32 %v4309_v10, %v3271_v9  ;;  %859 = vmatpush.bf16.msra.mxu1 %v3144_v7  ;;  %v3136_v17 = vor.u32 %v4275_v15, %v3135_v14  ;;  %v3199_v18 = vld [vmem:[%s6640_s1 + $0x360] sm:$0xf]  ;;  %v4291_v19 = vld [vmem:[%s6640_s1 + $0x364] sm:$0xf0]  ;;  %v3063_v23 = vld [vmem:[%s6640_s1 + $0x250] sm:$0xf] }
  0x10   : > { %878 = vmatpush.bf16.msra.mxu2 %v3208_v8  ;;  %v3263_v20 = vld [vmem:[%s6640_s1 + $0x3e0] sm:$0xf]  ;;  %v3200_v21 = vor.u32 %v4291_v19, %v3199_v18  ;;  %v4307_v22 = vld [vmem:[%s6640_s1 + $0x3e4] sm:$0xf0]  ;;  %v4257_v24 = vld [vmem:[%s6640_s1 + $0x254] sm:$0xf0] }
  0x11   : > { %897 = vmatpush.bf16.msra.mxu3 %v3272_v12  ;;  %v3264_v25 = vor.u32 %v4307_v22, %v3263_v20  ;;  %v3127_v26 = vld [vmem:[%s6640_s1 + $0x2d0] sm:$0xf]  ;;  %v4273_v27 = vld [vmem:[%s6640_s1 + $0x2d4] sm:$0xf0]  ;;  %v3064_v29 = vor.u32 %v4257_v24, %v3063_v23  ;;  %v3055_v35 = vld [vmem:[%s6640_s1 + $0x240] sm:$0xf] }
  0x12   : > { %v3191_v28 = vld [vmem:[%s6640_s1 + $0x350] sm:$0xf]  ;;  %841 = vmatpush.bf16.msra.mxu0 %v3072_v16  ;;  %v4289_v30 = vld [vmem:[%s6640_s1 + $0x354] sm:$0xf0]  ;;  %v3128_v33 = vor.u32 %v4273_v27, %v3127_v26  ;;  %v4255_v36 = vld [vmem:[%s6640_s1 + $0x244] sm:$0xf0] }
  0x13   : > { %v3255_v31 = vld [vmem:[%s6640_s1 + $0x3d0] sm:$0xf]  ;;  %v4305_v32 = vld [vmem:[%s6640_s1 + $0x3d4] sm:$0xf0]  ;;  %860 = vmatpush.bf16.msra.mxu1 %v3136_v17  ;;  %v3192_v34 = vor.u32 %v4289_v30, %v3191_v28  ;;  %v3119_v37 = vld [vmem:[%s6640_s1 + $0x2c0] sm:$0xf]  ;;  %v3056_v44 = vor.u32 %v4255_v36, %v3055_v35 }
  0x14   : > { %879 = vmatpush.bf16.msra.mxu2 %v3200_v21  ;;  %v3256_v38 = vor.u32 %v4305_v32, %v3255_v31  ;;  %v4271_v39 = vld [vmem:[%s6640_s1 + $0x2c4] sm:$0xf0]  ;;  %v3183_v40 = vld [vmem:[%s6640_s1 + $0x340] sm:$0xf]  ;;  %v3047_v47 = vld [vmem:[%s6640_s1 + $0x230] sm:$0xf] }
  0x15   : > { %898 = vmatpush.bf16.msra.mxu3 %v3264_v25  ;;  %v4287_v41 = vld [vmem:[%s6640_s1 + $0x344] sm:$0xf0]  ;;  %v3247_v42 = vld [vmem:[%s6640_s1 + $0x3c0] sm:$0xf]  ;;  %v3120_v45 = vor.u32 %v4271_v39, %v3119_v37  ;;  %v4253_v48 = vld [vmem:[%s6640_s1 + $0x234] sm:$0xf0] }
  0x16   : > { %v4303_v43 = vld [vmem:[%s6640_s1 + $0x3c4] sm:$0xf0]  ;;  %842 = vmatpush.bf16.msra.mxu0 %v3064_v29  ;;  %v3184_v46 = vor.u32 %v4287_v41, %v3183_v40  ;;  %v3111_v49 = vld [vmem:[%s6640_s1 + $0x2b0] sm:$0xf]  ;;  %v4269_v51 = vld [vmem:[%s6640_s1 + $0x2b4] sm:$0xf0]  ;;  %v3048_v56 = vor.u32 %v4253_v48, %v3047_v47 }
  0x17   : > { %861 = vmatpush.bf16.msra.mxu1 %v3128_v33  ;;  %v3248_v50 = vor.u32 %v4303_v43, %v3247_v42  ;;  %v3175_v52 = vld [vmem:[%s6640_s1 + $0x330] sm:$0xf]  ;;  %v4285_v53 = vld [vmem:[%s6640_s1 + $0x334] sm:$0xf0]  ;;  %v3039_v57 = vld [vmem:[%s6640_s1 + $0x220] sm:$0xf]  ;;  %v3112_v58 = vor.u32 %v4269_v51, %v3111_v49 }
  0x18   : > { %880 = vmatpush.bf16.msra.mxu2 %v3192_v34  ;;  %v3239_v54 = vld [vmem:[%s6640_s1 + $0x3b0] sm:$0xf]  ;;  %v4301_v55 = vld [vmem:[%s6640_s1 + $0x3b4] sm:$0xf0]  ;;  %v3176_v59 = vor.u32 %v4285_v53, %v3175_v52  ;;  %v4251_v60 = vld [vmem:[%s6640_s1 + $0x224] sm:$0xf0] }
  0x19   : > { %899 = vmatpush.bf16.msra.mxu3 %v3256_v38  ;;  %v3103_v61 = vld [vmem:[%s6640_s1 + $0x2a0] sm:$0xf]  ;;  %v4267_v62 = vld [vmem:[%s6640_s1 + $0x2a4] sm:$0xf0]  ;;  %v3240_v63 = vor.u32 %v4301_v55, %v3239_v54  ;;  %v3031_v4 = vld [vmem:[%s6640_s1 + $0x210] sm:$0xf]  ;;  %v3040_v6 = vor.u32 %v4251_v60, %v3039_v57 }
  0x1a   : > { %843 = vmatpush.bf16.msra.mxu0 %v3056_v44  ;;  %v3167_v0 = vld [vmem:[%s6640_s1 + $0x320] sm:$0xf]  ;;  %v4283_v1 = vld [vmem:[%s6640_s1 + $0x324] sm:$0xf0]  ;;  %v4249_v5 = vld [vmem:[%s6640_s1 + $0x214] sm:$0xf0]  ;;  %v3104_v10 = vor.u32 %v4267_v62, %v3103_v61 }
  0x1b   : > { %862 = vmatpush.bf16.msra.mxu1 %v3120_v45  ;;  %v3231_v2 = vld [vmem:[%s6640_s1 + $0x3a0] sm:$0xf]  ;;  %v4299_v3 = vld [vmem:[%s6640_s1 + $0x3a4] sm:$0xf0]  ;;  %v3095_v7 = vld [vmem:[%s6640_s1 + $0x290] sm:$0xf]  ;;  %v3168_v11 = vor.u32 %v4283_v1, %v3167_v0  ;;  %v3032_v25 = vor.u32 %v4249_v5, %v3031_v4 }
  0x1c   : > { %881 = vmatpush.bf16.msra.mxu2 %v3184_v46  ;;  %v4265_v8 = vld [vmem:[%s6640_s1 + $0x294] sm:$0xf0]  ;;  %v3159_v9 = vld [vmem:[%s6640_s1 + $0x310] sm:$0xf]  ;;  %v3232_v15 = vor.u32 %v4299_v3, %v3231_v2  ;;  %v4668_v16 = vld [vmem:[%s6640_s1 + $0x200] sm:$0xf] }
  0x1d   : > { %900 = vmatpush.bf16.msra.mxu3 %v3248_v50  ;;  %v4281_v12 = vld [vmem:[%s6640_s1 + $0x314] sm:$0xf0]  ;;  %v3223_v13 = vld [vmem:[%s6640_s1 + $0x390] sm:$0xf]  ;;  %v4673_v17 = vld [vmem:[%s6640_s1 + $0x204] sm:$0xf0]  ;;  %v3096_v28 = vor.u32 %v4265_v8, %v3095_v7 }
  0x1e   : > { %844 = vmatpush.bf16.msra.mxu0 %v3048_v56  ;;  %v4297_v14 = vld [vmem:[%s6640_s1 + $0x394] sm:$0xf0]  ;;  %v4680_v18 = vld [vmem:[%s6640_s1 + $0x280] sm:$0xf]  ;;  %v4685_v19 = vld [vmem:[%s6640_s1 + $0x284] sm:$0xf0]  ;;  %v3160_v29 = vor.u32 %v4281_v12, %v3159_v9  ;;  %v3024_v36 = vor.u32 %v4673_v17, %v4668_v16 }
  0x1f   : > { %863 = vmatpush.bf16.msra.mxu1 %v3112_v58  ;;  %v4690_v20 = vld [vmem:[%s6640_s1 + $0x300] sm:$0xf]  ;;  %v4695_v21 = vld [vmem:[%s6640_s1 + $0x304] sm:$0xf0]  ;;  %v4710_v24 = vld [vmem:[%s6640_s1 + $0x374] sm:$0xf]  ;;  %v3224_v33 = vor.u32 %v4297_v14, %v3223_v13  ;;  %v3088_v40 = vor.u32 %v4685_v19, %v4680_v18 }
  0x20   : > { %882 = vmatpush.bf16.msra.mxu2 %v3176_v59  ;;  %v4700_v22 = vld [vmem:[%s6640_s1 + $0x380] sm:$0xf]  ;;  %v4705_v23 = vld [vmem:[%s6640_s1 + $0x384] sm:$0xf0]  ;;  %s6646_s19 = smov (!%p230_p3, %s2929_s19), 1  ;;  %v3152_v41 = vor.u32 %v4695_v21, %v4690_v20  ;;  %vm2211_vm2 = vcmask 1044480  }
  0x21   : > { %901 = vmatpush.bf16.msra.mxu3 %v3240_v63  ;;  %v4719_v26 = vld [vmem:[%s6640_s1 + $0x378] sm:$0xf0]  ;;  %v4724_v27 = vld [vmem:[%s6640_s1 + $0x274] sm:$0xf]  ;;  %s4438_s22 = smul.u32 96, %s6646_s19  ;;  %v3216_v42 = vor.u32 %v4705_v23, %v4700_v22  ;;  %s4175_s7 = sshll.u32 %s6646_s19, 6 }
  0x22   : > { %845 = vmatpush.bf16.msra.mxu0 %v3040_v6  ;;  %v4729_v30 = vld [vmem:[%s6640_s1 + $0x278] sm:$0xf0]  ;;  %v4734_v31 = vld [vmem:[%s6640_s1 + $0x2f4] sm:$0xf]  ;;  %v4757_v37 = vld [vmem:[%s6640_s1 + $0x364] sm:$0xf]  ;;  %v3212_v43 = vor.u32 %v4710_v24, %v4719_v26  ;;  %s6571_s11 = scalar_lea.vmem %s6642_s3, %s4175_s7 }
  0x23   : > { %864 = vmatpush.bf16.msra.mxu1 %v3104_v10  ;;  %v4739_v32 = vld [vmem:[%s6640_s1 + $0x2f8] sm:$0xf0]  ;;  %v4745_v34 = vld [vmem:[%s6640_s1 + $0x3f4] sm:$0xf]  ;;  %v4762_v38 = vld [vmem:[%s6640_s1 + $0x368] sm:$0xf0]  ;;  %s4778_s10 = scalar_lea.vmem %s6639_s0, %s4438_s22  ;;  %v3084_v50 = vor.u32 %v4724_v27, %v4729_v30 }
  0x24   : > { %883 = vmatpush.bf16.msra.mxu2 %v3168_v11  ;;  %v4750_v35 = vld [vmem:[%s6640_s1 + $0x3f8] sm:$0xf0]  ;;  %v4767_v39 = vld [vmem:[%s6640_s1 + $0x264] sm:$0xf]  ;;  %v4785_v44 = vld [vmem:[%s6640_s1 + $0x268] sm:$0xf0]  ;;  %v3148_v51 = vor.u32 %v4734_v31, %v4739_v32  ;;  %v3204_v2 = vor.u32 %v4757_v37, %v4762_v38 }
  0x25   : > { %902 = vmatpush.bf16.msra.mxu3 %v3232_v15  ;;  %v4790_v45 = vld [vmem:[%s6640_s1 + $0x2e4] sm:$0xf]  ;;  %v4795_v46 = vld [vmem:[%s6640_s1 + $0x2e8] sm:$0xf0]  ;;  %v252_v48 = vld [vmem:[%s4778_s10 + $0x10] sm:$0xff]  ;;  %v3276_v52 = vor.u32 %v4745_v34, %v4750_v35  ;;  %v3076_v3 = vor.u32 %v4767_v39, %v4785_v44  ;;  %s4176_s12 = sshll.u32 %s6646_s19, 4 }
  0x26   : > { %846 = vmatpush.bf16.msra.mxu0 %v3032_v25  ;;  %v250_v47 = vld [vmem:[%s4778_s10] sm:$0xff]  ;;  %vm431_vm0 = vsmask.f32 7424  ;;  %v4180_v53 = vld [vmem:[%s4778_s10 + $0x2c] sm:$0xf0]  ;;  %v4807_v55 = vunpack.c.l.b16 %v252_v48  ;;  %v4811_v59 = vunpack.c.h.b16 %v252_v48  ;;  %v251_v63 = vld [vmem:[%s4778_s10 + $0x8] sm:$0xff]  ;;  %v3140_v15 = vor.u32 %v4790_v45, %v4795_v46  ;;  %s6612_s15 = scalar_lea.vmem %s6643_s4, %s4176_s12  ;;  %s6617_s17 = scalar_lea.vmem %s6644_s5, %s4176_s12 }
  0x27   : > { %865 = vmatpush.bf16.msra.mxu1 %v3096_v28  ;;  %v3007_v49 = vld [vmem:[%s4778_s10 + $0x20] sm:$0xf]  ;;  %v399_v54 = vunpack.c.l.b16 %v250_v47  ;;  %v4178_v56 = vld [vmem:[%s4778_s10 + $0x24] sm:$0xf]  ;;  %v3009_v57 = vld [vmem:[%s4778_s10 + $0x30] sm:$0xf0]  ;;  %v400_v58 = vunpack.c.h.b16 %v250_v47  ;;  %v401_v7 = vunpack.c.l.b16 %v251_v63  ;;  %v402_v24 = vunpack.c.h.b16 %v251_v63 }
  0x28   : > { %884 = vmatpush.bf16.msra.mxu2 %v3160_v29  ;;  %v4816_v60 = vld [vmem:[%s6640_s1 + $0x3e4] sm:$0xf]  ;;  %v4818_v61 = vor.u32 %v4180_v53, %v3007_v49  ;;  %v4820_v62 = vor.u32 %v4178_v56, %v3009_v57  ;;  %v253_v0 = vld [vmem:[%s4778_s10 + $0x18] sm:$0xff]  ;;  %v3015_v1 = vld [vmem:[%s4778_s10 + $0x28] sm:$0xf] }
  0x29   : > { %903 = vmatpush.bf16.msra.mxu3 %v3224_v33  ;;  %v4830_v4 = vpack.c.b16 %v4807_v55, %v399_v54  ;;  %v4833_v5 = vpack.c.b16 %v4811_v59, %v400_v58  ;;  %v4181_v6 = vld [vmem:[%s4778_s10 + $0x34] sm:$0xf0]  ;;  %v4836_v8 = vunpack.c.l.b16 %v253_v0  ;;  %v4179_v9 = vld [vmem:[%s4778_s10 + $0x2c] sm:$0xf]  ;;  %v3017_v14 = vld [vmem:[%s4778_s10 + $0x38] sm:$0xf0]  ;;  %v4878_v32 = vunpack.c.h.b16 %v253_v0 }
  0x2a   : > { %847 = vmatpush.bf16.msra.mxu0 %v3024_v36  ;;  %v3265_v10 = vld [vmem:[%s6640_s1 + $0x3e8] sm:$0xf0]  ;;  %v440_v11 = vshll.u32 %v4818_v61, 16  ;;  %v452_v12 = vshll.u32 %v4820_v62, 16  ;;  %v4844_v13 = vor.u32 %v4181_v6, %v3015_v1  ;;  %v4288_v16 = vld [vmem:[%s6640_s1 + $0x354] sm:$0xf]  ;;  %v4880_v33 = vor.u32 %v4179_v9, %v3017_v14 }
  0x2b   : > { %866 = vmatpush.bf16.msra.mxu1 %v3088_v40  ;;  %v433_v17 = vshrl.u32 %v4830_v4, 16  ;;  %v435_v18 = vshll.u32 %v4830_v4, 16  ;;  %v445_v19 = vshrl.u32 %v4833_v5, 16  ;;  %v447_v20 = vshll.u32 %v4833_v5, 16  ;;  %v3193_v21 = vld [vmem:[%s6640_s1 + $0x358] sm:$0xf0] }
  0x2c   : > { %885 = vmatpush.bf16.msra.mxu2 %v3152_v41  ;;  %v4861_v22 = vrot.slane %v440_v11, 1  ;;  %v4865_v23 = vrot.slane %v452_v12, 1  ;;  %v3268_v25 = vor.u32 %v4816_v60, %v3265_v10  ;;  %v4256_v26 = vld [vmem:[%s6640_s1 + $0x254] sm:$0xf]  ;;  %v4872_v29 = vpack.c.b16 %v4836_v8, %v401_v7  ;;  %v3065_v31 = vld [vmem:[%s6640_s1 + $0x258] sm:$0xf0] }
  0x2d   : > { %904 = vmatpush.bf16.msra.mxu3 %v3216_v42  ;;  %v437_v27 = vrot.slane %v435_v18, 1  ;;  %v449_v28 = vrot.slane %v447_v20, 1  ;;  %v464_v30 = vshll.u32 %v4844_v13, 16  ;;  %v3196_v34 = vor.u32 %v4288_v16, %v3193_v21  ;;  %v4272_v35 = vld [vmem:[%s6640_s1 + $0x2d4] sm:$0xf] }
  0x2e   : > { %916 = vmatpush.bf16.msrb.mxu0 %v3084_v50  ;;  %v3129_v36 = vld [vmem:[%s6640_s1 + $0x2d8] sm:$0xf0]  ;;  %v4304_v37 = vld [vmem:[%s6640_s1 + $0x3d4] sm:$0xf]  ;;  %v457_v40 = vshrl.u32 %v4872_v29, 16  ;;  %v459_v41 = vshll.u32 %v4872_v29, 16  ;;  %v4904_v45 = vpack.c.b16 %v4878_v32, %v402_v24  ;;  %v3068_v47 = vor.u32 %v4256_v26, %v3065_v31 }
  0x2f   : > { %935 = vmatpush.bf16.msrb.mxu1 %v3148_v51  ;;  %v438_v38 = vor.u32 %v437_v27, %v433_v17  ;;  %v450_v39 = vor.u32 %v449_v28, %v445_v19  ;;  %v3257_v42 = vld [vmem:[%s6640_s1 + $0x3d8] sm:$0xf0]  ;;  %v4901_v44 = vrot.slane %v464_v30, 1  ;;  %v476_v46 = vshll.u32 %v4880_v33, 16  ;;  %v3185_v48 = vld [vmem:[%s6640_s1 + $0x348] sm:$0xf0] }
  0x30   : > { %954 = vmatpush.bf16.msrb.mxu2 %v3212_v43  ;;  %v4286_v43 = vld [vmem:[%s6640_s1 + $0x344] sm:$0xf]  ;;  %v3132_v53 = vor.u32 %v4272_v35, %v3129_v36  ;;  %v3057_v54 = vld [vmem:[%s6640_s1 + $0x248] sm:$0xf0]  ;;  %v469_v57 = vshrl.u32 %v4904_v45, 16  ;;  %v471_v58 = vshll.u32 %v4904_v45, 16  ;;  %v3260_v1 = vor.u32 %v4304_v37, %v3257_v42 }
  0x31   : > { %973 = vmatpush.bf16.msrb.mxu3 %v3276_v52  ;;  %v4254_v49 = vld [vmem:[%s6640_s1 + $0x244] sm:$0xf]  ;;  %v4915_v50 = vsel %vm431_vm0, %v438_v38, %v4861_v22  ;;  %v4919_v51 = vsel %vm431_vm0, %v450_v39, %v4865_v23  ;;  %v461_v52 = vrot.slane %v459_v41, 1  ;;  %v4933_v60 = vrot.slane %v476_v46, 1  ;;  %v3121_v63 = vld [vmem:[%s6640_s1 + $0x2c8] sm:$0xf0] }
  0x32   : > { %917 = vmatpush.bf16.msrb.mxu0 %v3076_v3  ;;  %v4270_v56 = vld [vmem:[%s6640_s1 + $0x2c4] sm:$0xf]  ;;  %867 = vmatmul.bf16.vlgmr.msra.gmra.mxu1 %v4919_v51  ;;  %v3249_v6 = vld [vmem:[%s6640_s1 + $0x3c8] sm:$0xf0]  ;;  %v473_v9 = vrot.slane %v471_v58, 1  ;;  %v3060_v10 = vor.u32 %v4254_v49, %v3057_v54  ;;  %v480_v19 = vshrl.u32 %v4818_v61, 16 }
  0x33   : > { %936 = vmatpush.bf16.msrb.mxu1 %v3140_v15  ;;  %848 = vmatmul.bf16.vlgmr.msra.gmra.mxu0 %v4915_v50  ;;  %v462_v0 = vor.u32 %v461_v52, %v457_v40  ;;  %v4302_v3 = vld [vmem:[%s6640_s1 + $0x3c4] sm:$0xf]  ;;  %v3124_v14 = vor.u32 %v4270_v56, %v3121_v63  ;;  %v323_v16 = vld [vmem:[%s4778_s10 + $0x48] sm:$0x11]  ;;  %v4284_v21 = vld [vmem:[%s6640_s1 + $0x334] sm:$0xf] }
  0x34   : > { %955 = vmatpush.bf16.msrb.mxu2 %v3204_v2  ;;  %v3188_v2 = vor.u32 %v4286_v43, %v3185_v48  ;;  %v322_v7 = vld [vmem:[%s4778_s10 + $0x40] sm:$0x11]  ;;  %v3252_v18 = vor.u32 %v4302_v3, %v3249_v6  ;;  %v474_v24 = vor.u32 %v473_v9, %v469_v57  ;;  %v488_v26 = vshrl.u32 %v4820_v62, 16  ;;  %v3177_v28 = vld [vmem:[%s6640_s1 + $0x338] sm:$0xf0] }
  0x35   : > { %974 = vmatpush.bf16.msrb.mxu3 %v3268_v25  ;;  %v415_v15 = vunpack.c.l.b16 %v322_v7  ;;  %v4948_v17 = vsel %vm431_vm0, %v462_v0, %v4901_v44  ;;  %v416_v20 = vunpack.c.h.b16 %v322_v7  ;;  %v417_v27 = vunpack.c.l.b16 %v323_v16  ;;  %v4252_v31 = vld [vmem:[%s6640_s1 + $0x234] sm:$0xf]  ;;  %v3049_v35 = vld [vmem:[%s6640_s1 + $0x238] sm:$0xf0]  ;;  %v4282_v52 = vld [vmem:[%s6640_s1 + $0x324] sm:$0xf] }
  0x36   : > { %918 = vmatpush.bf16.msrb.mxu0 %v3068_v47  ;;  %886 = vmatmul.bf16.vlgmr.msra.gmra.mxu2 %v4948_v17  ;;  %v4268_v36 = vld [vmem:[%s6640_s1 + $0x2b4] sm:$0xf]  ;;  %v3113_v37 = vld [vmem:[%s6640_s1 + $0x2b8] sm:$0xf0]  ;;  %v4973_v38 = vsel %vm431_vm0, %v474_v24, %v4933_v60  ;;  %v482_v43 = vor.u32 %v480_v19, %v4861_v22  ;;  %v496_v48 = vshrl.u32 %v4844_v13, 16  ;;  %v418_v49 = vunpack.c.h.b16 %v323_v16 }
  0x37   : > { %937 = vmatpush.bf16.msrb.mxu1 %v3132_v53  ;;  %v427_v25 = vpack.c.b16 %v415_v15, %v415_v15  ;;  %v429_v40 = vpack.c.b16 %v417_v27, %v417_v27  ;;  %v4300_v41 = vld [vmem:[%s6640_s1 + $0x3b4] sm:$0xf]  ;;  %v3241_v42 = vld [vmem:[%s6640_s1 + $0x3b8] sm:$0xf0]  ;;  %905 = vmatmul.bf16.vlgmr.msra.gmra.mxu3 %v4973_v38  ;;  %v3169_v53 = vld [vmem:[%s6640_s1 + $0x328] sm:$0xf0]  ;;  %v490_v56 = vor.u32 %v488_v26, %v4865_v23 }
  0x38   : > { %956 = vmatpush.bf16.msrb.mxu2 %v3196_v34  ;;  %v428_v34 = vpack.c.b16 %v416_v20, %v416_v20  ;;  %v3180_v22 = vor.u32 %v4284_v21, %v3177_v28  ;;  %v4250_v58 = vld [vmem:[%s6640_s1 + $0x224] sm:$0xf]  ;;  %v3041_v63 = vld [vmem:[%s6640_s1 + $0x228] sm:$0xf0]  ;;  %v3116_v3 = vor.u32 %v4268_v36, %v3113_v37  ;;  %v3244_v15 = vor.u32 %v4300_v41, %v3241_v42  ;;  %v3161_v20 = vld [vmem:[%s6640_s1 + $0x318] sm:$0xf0] }
  0x39   : > { %975 = vmatpush.bf16.msrb.mxu3 %v3260_v1  ;;  %v484_v39 = vshll.u32 %v427_v25, 16  ;;  %v500_v57 = vshll.u32 %v429_v40, 16  ;;  %v430_v1 = vpack.c.b16 %v418_v49, %v418_v49  ;;  %v4266_v6 = vld [vmem:[%s6640_s1 + $0x2a4] sm:$0xf]  ;;  %v3105_v23 = vld [vmem:[%s6640_s1 + $0x2a8] sm:$0xf0]  ;;  %v3172_v16 = vor.u32 %v4282_v52, %v3169_v53 }
  0x3a   : > { %919 = vmatpush.bf16.msrb.mxu0 %v3060_v10  ;;  %v492_v47 = vshll.u32 %v428_v34, 16  ;;  %v4298_v7 = vld [vmem:[%s6640_s1 + $0x3a4] sm:$0xf]  ;;  %v3233_v9 = vld [vmem:[%s6640_s1 + $0x3a8] sm:$0xf0]  ;;  %v504_v10 = vshrl.u32 %v4880_v33, 16  ;;  %v498_v24 = vor.u32 %v496_v48, %v4901_v44  ;;  %v3044_v25 = vor.u32 %v4250_v58, %v3041_v63 }
  0x3b   : > { %938 = vmatpush.bf16.msrb.mxu1 %v3124_v14  ;;  %v486_v54 = vrot.slane %v484_v39, 1  ;;  %v508_v14 = vshll.u32 %v430_v1, 16  ;;  %v3108_v27 = vor.u32 %v4266_v6, %v3105_v23  ;;  %v4248_v28 = vld [vmem:[%s6640_s1 + $0x214] sm:$0xf]  ;;  %v502_v36 = vrot.slane %v500_v57, 1 }
  0x3c   : > { %957 = vmatpush.bf16.msrb.mxu2 %v3188_v2  ;;  %v494_v0 = vrot.slane %v492_v47, 1  ;;  %v3052_v2 = vor.u32 %v4252_v31, %v3049_v35  ;;  %v3033_v31 = vld [vmem:[%s6640_s1 + $0x218] sm:$0xf0]  ;;  %v4264_v34 = vld [vmem:[%s6640_s1 + $0x294] sm:$0xf]  ;;  %v3236_v44 = vor.u32 %v4298_v7, %v3233_v9 }
  0x3d   : > { %976 = vmatpush.bf16.msrb.mxu3 %v3252_v18  ;;  %v4280_v18 = vld [vmem:[%s6640_s1 + $0x314] sm:$0xf]  ;;  %v5021_v21 = vsel %vm431_vm0, %v482_v43, %v486_v54  ;;  %v510_v37 = vrot.slane %v508_v14, 1  ;;  %v3097_v39 = vld [vmem:[%s6640_s1 + $0x298] sm:$0xf0]  ;;  %v3036_v47 = vor.u32 %v4248_v28, %v3033_v31  ;;  %v5074_v63 = vsel %vm431_vm0, %v498_v24, %v502_v36 }
  0x3e   : > { %920 = vmatpush.bf16.msrb.mxu0 %v3052_v2  ;;  %v5036_v35 = vsel %vm431_vm0, %v490_v56, %v494_v0  ;;  %v3164_v40 = vor.u32 %v4280_v18, %v3161_v20  ;;  %v4296_v41 = vld [vmem:[%s6640_s1 + $0x394] sm:$0xf]  ;;  %v3225_v42 = vld [vmem:[%s6640_s1 + $0x398] sm:$0xf0]  ;;  %v4278_v43 = vld [vmem:[%s6640_s1 + $0x304] sm:$0xf]  ;;  %v3100_v49 = vor.u32 %v4264_v34, %v3097_v39  ;;  %v506_v56 = vor.u32 %v504_v10, %v4933_v60 }
  0x3f   : > { %939 = vmatpush.bf16.msrb.mxu1 %v3116_v3  ;;  %v3153_v52 = vld [vmem:[%s6640_s1 + $0x308] sm:$0xf0]  ;;  %v4246_v53 = vld [vmem:[%s6640_s1 + $0x204] sm:$0xf]  ;;  %v3228_v0 = vor.u32 %v4296_v41, %v3225_v42  ;;  %v3463_v1 = vld [vmem:[%s6640_s1 + $0x170] sm:$0xf] }
  0x40   : > { %958 = vmatpush.bf16.msrb.mxu2 %v3180_v22  ;;  %v3025_v54 = vld [vmem:[%s6640_s1 + $0x208] sm:$0xf0]  ;;  %v4262_v57 = vld [vmem:[%s6640_s1 + $0x284] sm:$0xf]  ;;  %v4229_v2 = vld [vmem:[%s6640_s1 + $0x174] sm:$0xf0]  ;;  %v3156_v3 = vor.u32 %v4278_v43, %v3153_v52  ;;  %v5105_v18 = vsel %vm431_vm0, %v506_v56, %v510_v37 }
  0x41   : > { %977 = vmatpush.bf16.msrb.mxu3 %v3244_v15  ;;  %v3089_v22 = vld [vmem:[%s6640_s1 + $0x288] sm:$0xf0]  ;;  %v4294_v58 = vld [vmem:[%s6640_s1 + $0x384] sm:$0xf]  ;;  %v3335_v6 = vld [vmem:[%s6640_s1 + $0x70] sm:$0xf]  ;;  %v3028_v9 = vor.u32 %v4246_v53, %v3025_v54  ;;  %v3464_v24 = vor.u32 %v4229_v2, %v3463_v1 }
  0x42   : > { %921 = vmatpush.bf16.msrb.mxu0 %v3044_v25  ;;  %872 = vmatmul.bf16.gmra.mxu1 %v5036_v35  ;;  %v3217_v60 = vld [vmem:[%s6640_s1 + $0x388] sm:$0xf0]  ;;  %v4197_v23 = vld [vmem:[%s6640_s1 + $0x74] sm:$0xf0]  ;;  %v3399_v7 = vld [vmem:[%s6640_s1 + $0xf0] sm:$0xf]  ;;  %v3092_v20 = vor.u32 %v4262_v57, %v3089_v22 }
  0x43   : > { %940 = vmatpush.bf16.msrb.mxu1 %v3108_v27  ;;  %853 = vmatmul.bf16.gmra.mxu0 %v5021_v21  ;;  %v4213_v14 = vld [vmem:[%s6640_s1 + $0xf4] sm:$0xf0]  ;;  %v3527_v15 = vld [vmem:[%s6640_s1 + $0x1f0] sm:$0xf]  ;;  %v3220_v25 = vor.u32 %v4294_v58, %v3217_v60  ;;  %v3336_v27 = vor.u32 %v4197_v23, %v3335_v6  ;;  %v3455_v28 = vld [vmem:[%s6640_s1 + $0x160] sm:$0xf] }
  0x44   : > { %959 = vmatpush.bf16.msrb.mxu2 %v3172_v16  ;;  %v4245_v16 = vld [vmem:[%s6640_s1 + $0x1f4] sm:$0xf0]  ;;  %v4227_v31 = vld [vmem:[%s6640_s1 + $0x164] sm:$0xf0]  ;;  %v3400_v34 = vor.u32 %v4213_v14, %v3399_v7  ;;  %v3327_v37 = vld [vmem:[%s6640_s1 + $0x60] sm:$0xf] }
  0x45   : > { %978 = vmatpush.bf16.msrb.mxu3 %v3236_v44  ;;  %v3528_v36 = vor.u32 %v4245_v16, %v3527_v15  ;;  %v4195_v44 = vld [vmem:[%s6640_s1 + $0x64] sm:$0xf0]  ;;  %v3391_v39 = vld [vmem:[%s6640_s1 + $0xe0] sm:$0xf]  ;;  %v3456_v43 = vor.u32 %v4227_v31, %v3455_v28  ;;  %v4225_v52 = vld [vmem:[%s6640_s1 + $0x154] sm:$0xf0] }
  0x46   : > { %922 = vmatpush.bf16.msrb.mxu0 %v3036_v47  ;;  %891 = vmatmul.bf16.gmra.mxu2 %v5074_v63  ;;  %v3519_v41 = vld [vmem:[%s6640_s1 + $0x1e0] sm:$0xf]  ;;  %v4243_v42 = vld [vmem:[%s6640_s1 + $0x1e4] sm:$0xf0]  ;;  %v3328_v47 = vor.u32 %v4195_v44, %v3327_v37  ;;  %v3319_v56 = vld [vmem:[%s6640_s1 + $0x50] sm:$0xf] }
  0x47   : > { %941 = vmatpush.bf16.msrb.mxu1 %v3100_v49  ;;  %910 = vmatmul.bf16.gmra.mxu3 %v5105_v18  ;;  %v3447_v49 = vld [vmem:[%s6640_s1 + $0x150] sm:$0xf]  ;;  %v3520_v54 = vor.u32 %v4243_v42, %v3519_v41  ;;  %v4193_v57 = vld [vmem:[%s6640_s1 + $0x54] sm:$0xf0]  ;;  %v4223_v6 = vld [vmem:[%s6640_s1 + $0x144] sm:$0xf0] }
  0x48   : > { %960 = vmatpush.bf16.msrb.mxu2 %v3164_v40  ;;  %v4211_v40 = vld [vmem:[%s6640_s1 + $0xe4] sm:$0xf0]  ;;  %v3383_v22 = vld [vmem:[%s6640_s1 + $0xd0] sm:$0xf]  ;;  %v4209_v58 = vld [vmem:[%s6640_s1 + $0xd4] sm:$0xf0]  ;;  %v3448_v1 = vor.u32 %v4225_v52, %v3447_v49  ;;  %v3320_v2 = vor.u32 %v4193_v57, %v3319_v56 }
  0x49   : > { %979 = vmatpush.bf16.msrb.mxu3 %v3228_v0  ;;  %v3392_v53 = vor.u32 %v4211_v40, %v3391_v39  ;;  %v3511_v0 = vld [vmem:[%s6640_s1 + $0x1d0] sm:$0xf]  ;;  %v4241_v60 = vld [vmem:[%s6640_s1 + $0x1d4] sm:$0xf0]  ;;  %v3384_v23 = vor.u32 %v4209_v58, %v3383_v22  ;;  %v4191_v14 = vld [vmem:[%s6640_s1 + $0x44] sm:$0xf0] }
  0x4a   : > { %923 = vmatpush.bf16.msrb.mxu0 %v3028_v9  ;;  %v3512_v7 = vor.u32 %v4241_v60, %v3511_v0  ;;  %v3311_v9 = vld [vmem:[%s6640_s1 + $0x40] sm:$0xf]  ;;  %v4207_v16 = vld [vmem:[%s6640_s1 + $0xc4] sm:$0xf0]  ;;  %v3431_v28 = vld [vmem:[%s6640_s1 + $0x130] sm:$0xf] }
  0x4b   : > { %942 = vmatpush.bf16.msrb.mxu1 %v3092_v20  ;;  %v3375_v15 = vld [vmem:[%s6640_s1 + $0xc0] sm:$0xf]  ;;  %v4221_v31 = vld [vmem:[%s6640_s1 + $0x134] sm:$0xf0]  ;;  %v3367_v37 = vld [vmem:[%s6640_s1 + $0xb0] sm:$0xf] }
  0x4c   : > { %961 = vmatpush.bf16.msrb.mxu2 %v3156_v3  ;;  %v3439_v3 = vld [vmem:[%s6640_s1 + $0x140] sm:$0xf]  ;;  %v4205_v44 = vld [vmem:[%s6640_s1 + $0xb4] sm:$0xf0]  ;;  %v3495_v39 = vld [vmem:[%s6640_s1 + $0x1b0] sm:$0xf]  ;;  %v3432_v41 = vor.u32 %v4221_v31, %v3431_v28 }
  0x4d   : > { %980 = vmatpush.bf16.msrb.mxu3 %v3220_v25  ;;  %v3503_v20 = vld [vmem:[%s6640_s1 + $0x1c0] sm:$0xf]  ;;  %v3440_v25 = vor.u32 %v4223_v6, %v3439_v3  ;;  %v4237_v40 = vld [vmem:[%s6640_s1 + $0x1b4] sm:$0xf0]  ;;  %v3368_v49 = vor.u32 %v4205_v44, %v3367_v37  ;;  %v4203_v56 = vld [vmem:[%s6640_s1 + $0xa4] sm:$0xf0] }
  0x4e   : > { %1320 = vmatpush.bf16.msra.mxu0 %v3336_v27  ;;  %v3312_v27 = vor.u32 %v4191_v14, %v3311_v9  ;;  %v3496_v52 = vor.u32 %v4237_v40, %v3495_v39  ;;  %v3487_v57 = vld [vmem:[%s6640_s1 + $0x1a0] sm:$0xf]  ;;  %v4235_v22 = vld [vmem:[%s6640_s1 + $0x1a4] sm:$0xf0]  ;;  %v4217_v60 = vld [vmem:[%s6640_s1 + $0x114] sm:$0xf0] }
  0x4f   : > { %1339 = vmatpush.bf16.msra.mxu1 %v3400_v34  ;;  %v3376_v34 = vor.u32 %v4207_v16, %v3375_v15  ;;  %v3287_v3 = vld [vmem:[%s6640_s1 + $0x10] sm:$0xf]  ;;  %v4185_v6 = vld [vmem:[%s6640_s1 + $0x14] sm:$0xf0]  ;;  %v3279_v28 = vld [vmem:[%s6640_s1] sm:$0xf] }
  0x50   : > { %1358 = vmatpush.bf16.msra.mxu2 %v3464_v24  ;;  %v4239_v24 = vld [vmem:[%s6640_s1 + $0x1c4] sm:$0xf0]  ;;  %v3479_v9 = vld [vmem:[%s6640_s1 + $0x190] sm:$0xf]  ;;  %v4233_v14 = vld [vmem:[%s6640_s1 + $0x194] sm:$0xf0]  ;;  %v3288_v16 = vor.u32 %v4185_v6, %v3287_v3 }
  0x51   : > { %1377 = vmatpush.bf16.msra.mxu3 %v3528_v36  ;;  %v3504_v36 = vor.u32 %v4239_v24, %v3503_v20  ;;  %v3407_v20 = vld [vmem:[%s6640_s1 + $0x100] sm:$0xf]  ;;  %v4215_v24 = vld [vmem:[%s6640_s1 + $0x104] sm:$0xf0]  ;;  %v4228_v37 = vld [vmem:[%s6640_s1 + $0x174] sm:$0xf] }
  0x52   : > { %1321 = vmatpush.bf16.msra.mxu0 %v3328_v47  ;;  %943 = vmatmul.bf16.vlgmr.msrb.gmra.mxu1 %v4919_v51  ;;  %v4189_v51 = vld [vmem:[%s6640_s1 + $0x34] sm:$0xf0]  ;;  %v4219_v47 = vld [vmem:[%s6640_s1 + $0x124] sm:$0xf0]  ;;  %v3465_v44 = vld [vmem:[%s6640_s1 + $0x178] sm:$0xf0]  ;;  %v3408_v40 = vor.u32 %v4215_v24, %v3407_v20 }
  0x53   : > { %1340 = vmatpush.bf16.msra.mxu1 %v3392_v53  ;;  %924 = vmatmul.bf16.vlgmr.msrb.gmra.mxu0 %v4915_v50  ;;  %v3303_v50 = vld [vmem:[%s6640_s1 + $0x30] sm:$0xf]  ;;  %v4187_v53 = vld [vmem:[%s6640_s1 + $0x24] sm:$0xf0]  ;;  %v4196_v39 = vld [vmem:[%s6640_s1 + $0x74] sm:$0xf] }
  0x54   : > { %1359 = vmatpush.bf16.msra.mxu2 %v3456_v43  ;;  %v3304_v42 = vor.u32 %v4189_v51, %v3303_v50  ;;  %v3423_v43 = vld [vmem:[%s6640_s1 + $0x120] sm:$0xf]  ;;  %v4183_v31 = vld [vmem:[%s6640_s1 + $0x4] sm:$0xf0]  ;;  %v4240_v24 = vld [vmem:[%s6640_s1 + $0x1d4] sm:$0xf] }
  0x55   : > { %1378 = vmatpush.bf16.msra.mxu3 %v3520_v54  ;;  %v3359_v54 = vld [vmem:[%s6640_s1 + $0xa0] sm:$0xf]  ;;  %v3424_v58 = vor.u32 %v4219_v47, %v3423_v43  ;;  %v4231_v51 = vld [vmem:[%s6640_s1 + $0x184] sm:$0xf0]  ;;  %vm1561_vm1 = vsmask.f32 5376 }
  0x56   : > { %1322 = vmatpush.bf16.msra.mxu0 %v3320_v2  ;;  %962 = vmatmul.bf16.vlgmr.msrb.gmra.mxu2 %v4948_v17  ;;  %v3295_v17 = vld [vmem:[%s6640_s1 + $0x20] sm:$0xf]  ;;  %v3488_v2 = vor.u32 %v4235_v22, %v3487_v57  ;;  %v3457_v57 = vld [vmem:[%s6640_s1 + $0x168] sm:$0xf0]  ;;  %v4194_v22 = vld [vmem:[%s6640_s1 + $0x64] sm:$0xf] }
  0x57   : > { %1341 = vmatpush.bf16.msra.mxu1 %v3384_v23  ;;  %981 = vmatmul.bf16.vlgmr.msrb.gmra.mxu3 %v4973_v38  ;;  %v3296_v0 = vor.u32 %v4187_v53, %v3295_v17  ;;  %v3415_v38 = vld [vmem:[%s6640_s1 + $0x110] sm:$0xf]  ;;  %v3471_v50 = vld [vmem:[%s6640_s1 + $0x180] sm:$0xf]  ;;  %v3468_v17 = vor.u32 %v4228_v37, %v3465_v44  ;;  %v4206_v37 = vld [vmem:[%s6640_s1 + $0xc4] sm:$0xf] }
  0x58   : > { %1360 = vmatpush.bf16.msra.mxu2 %v3448_v1  ;;  %v3360_v1 = vor.u32 %v4203_v56, %v3359_v54  ;;  %v3351_v23 = vld [vmem:[%s6640_s1 + $0x90] sm:$0xf]  ;;  %v3416_v15 = vor.u32 %v4217_v60, %v3415_v38  ;;  %v3472_v47 = vor.u32 %v4231_v51, %v3471_v50  ;;  %v4226_v56 = vld [vmem:[%s6640_s1 + $0x164] sm:$0xf]  ;;  %v3393_v38 = vld [vmem:[%s6640_s1 + $0xe8] sm:$0xf0] }
  0x59   : > { %1379 = vmatpush.bf16.msra.mxu3 %v3512_v7  ;;  %v4201_v7 = vld [vmem:[%s6640_s1 + $0x94] sm:$0xf0]  ;;  %v4242_v60 = vld [vmem:[%s6640_s1 + $0x1e4] sm:$0xf]  ;;  %v3313_v51 = vld [vmem:[%s6640_s1 + $0x48] sm:$0xf0] }
  0x5a   : > { %1323 = vmatpush.bf16.msra.mxu0 %v3312_v27  ;;  %v3480_v27 = vor.u32 %v4233_v14, %v3479_v9  ;;  %v3321_v14 = vld [vmem:[%s6640_s1 + $0x58] sm:$0xf0]  ;;  %v3377_v44 = vld [vmem:[%s6640_s1 + $0xc8] sm:$0xf0] }
  0x5b   : > { %1342 = vmatpush.bf16.msra.mxu1 %v3376_v34  ;;  %v3343_v34 = vld [vmem:[%s6640_s1 + $0x80] sm:$0xf] }
  0x5c   : > { %1361 = vmatpush.bf16.msra.mxu2 %v3440_v25  ;;  %v3352_v25 = vor.u32 %v4201_v7, %v3351_v23  ;;  %v4224_v23 = vld [vmem:[%s6640_s1 + $0x154] sm:$0xf]  ;;  %v3449_v7 = vld [vmem:[%s6640_s1 + $0x158] sm:$0xf0] }
  0x5d   : > { %1380 = vmatpush.bf16.msra.mxu3 %v3504_v36  ;;  %v4199_v36 = vld [vmem:[%s6640_s1 + $0x84] sm:$0xf0]  ;;  %v3452_v20 = vor.u32 %v4224_v23, %v3449_v7  ;;  %v4234_v23 = vld [vmem:[%s6640_s1 + $0x1a4] sm:$0xf]  ;;  %v3489_v7 = vld [vmem:[%s6640_s1 + $0x1a8] sm:$0xf0] }
  0x5e   : > { %1324 = vmatpush.bf16.msra.mxu0 %v3304_v42  ;;  %v3401_v42 = vld [vmem:[%s6640_s1 + $0xf8] sm:$0xf0]  ;;  %v3344_v43 = vor.u32 %v4199_v36, %v3343_v34  ;;  %v4190_v36 = vld [vmem:[%s6640_s1 + $0x44] sm:$0xf] }
  0x5f   : > { %1343 = vmatpush.bf16.msra.mxu1 %v3368_v49  ;;  %v4244_v49 = vld [vmem:[%s6640_s1 + $0x1f4] sm:$0xf] }
  0x60   : > { %1362 = vmatpush.bf16.msra.mxu2 %v3432_v41  ;;  %v3280_v41 = vor.u32 %v4183_v31, %v3279_v28  ;;  %v3441_v28 = vld [vmem:[%s6640_s1 + $0x148] sm:$0xf0] }
  0x61   : > { %1381 = vmatpush.bf16.msra.mxu3 %v3496_v52  ;;  %v3529_v52 = vld [vmem:[%s6640_s1 + $0x1f8] sm:$0xf0] }
  0x62   : > { %1325 = vmatpush.bf16.msra.mxu0 %v3296_v0  ;;  %948 = vmatmul.bf16.gmra.mxu1 %v5036_v35  ;;  %v4212_v35 = vld [vmem:[%s6640_s1 + $0xf4] sm:$0xf]  ;;  %v4210_v0 = vld [vmem:[%s6640_s1 + $0xe4] sm:$0xf] }
  0x63   : > { %1344 = vmatpush.bf16.msra.mxu1 %v3360_v1  ;;  %929 = vmatmul.bf16.gmra.mxu0 %v5021_v21  ;;  %v3337_v21 = vld [vmem:[%s6640_s1 + $0x78] sm:$0xf0]  ;;  %v3404_v54 = vor.u32 %v4212_v35, %v3401_v42  ;;  %v3521_v1 = vld [vmem:[%s6640_s1 + $0x1e8] sm:$0xf0]  ;;  %v3396_v6 = vor.u32 %v4210_v0, %v3393_v38  ;;  %v3316_v42 = vor.u32 %v4190_v36, %v3313_v51  ;;  %v4186_v38 = vld [vmem:[%s6640_s1 + $0x24] sm:$0xf] }
  0x64   : > { %1363 = vmatpush.bf16.msra.mxu2 %v3424_v58  ;;  %v3340_v53 = vor.u32 %v4196_v39, %v3337_v21  ;;  %v3532_v58 = vor.u32 %v4244_v49, %v3529_v52  ;;  %v3524_v9 = vor.u32 %v4242_v60, %v3521_v1  ;;  %v4220_v21 = vld [vmem:[%s6640_s1 + $0x134] sm:$0xf]  ;;  %v3433_v35 = vld [vmem:[%s6640_s1 + $0x138] sm:$0xf0]  ;;  %v3297_v1 = vld [vmem:[%s6640_s1 + $0x28] sm:$0xf0] }
  0x65   : > { %1382 = vmatpush.bf16.msra.mxu3 %v3488_v2  ;;  %v3460_v2 = vor.u32 %v4226_v56, %v3457_v57  ;;  %v3305_v52 = vld [vmem:[%s6640_s1 + $0x38] sm:$0xf0]  ;;  %v4236_v56 = vld [vmem:[%s6640_s1 + $0x1b4] sm:$0xf]  ;;  %v4214_v36 = vld [vmem:[%s6640_s1 + $0x104] sm:$0xf] }
  0x66   : > { %1326 = vmatpush.bf16.msra.mxu0 %v3288_v16  ;;  %967 = vmatmul.bf16.gmra.mxu2 %v5074_v63  ;;  %v3329_v63 = vld [vmem:[%s6640_s1 + $0x68] sm:$0xf0]  ;;  %v3385_v16 = vld [vmem:[%s6640_s1 + $0xd8] sm:$0xf0] }
  0x67   : > { %1345 = vmatpush.bf16.msra.mxu1 %v3352_v25  ;;  %986 = vmatmul.bf16.gmra.mxu3 %v5105_v18  ;;  %v3332_v3 = vor.u32 %v4194_v22, %v3329_v63  ;;  %v4192_v18 = vld [vmem:[%s6640_s1 + $0x54] sm:$0xf]  ;;  %v3513_v25 = vld [vmem:[%s6640_s1 + $0x1d8] sm:$0xf0]  ;;  %v4218_v22 = vld [vmem:[%s6640_s1 + $0x124] sm:$0xf] }
  0x68   : > { %1364 = vmatpush.bf16.msra.mxu2 %v3416_v15  ;;  %v4208_v15 = vld [vmem:[%s6640_s1 + $0xd4] sm:$0xf]  ;;  %v3324_v31 = vor.u32 %v4192_v18, %v3321_v14  ;;  %v3516_v50 = vor.u32 %v4240_v24, %v3513_v25  ;;  %v3497_v57 = vld [vmem:[%s6640_s1 + $0x1b8] sm:$0xf0]  ;;  %v3300_v14 = vor.u32 %v4186_v38, %v3297_v1  ;;  %v4355_v1 = vld [vmem:[%s6640_s1 + $0x564] sm:$0xf0] }
  0x69   : > { %1383 = vmatpush.bf16.msra.mxu3 %v3480_v27  ;;  %v4222_v27 = vld [vmem:[%s6640_s1 + $0x144] sm:$0xf]  ;;  %v3388_v34 = vor.u32 %v4208_v15, %v3385_v16  ;;  %v3500_v60 = vor.u32 %v4236_v56, %v3497_v57  ;;  %v3417_v18 = vld [vmem:[%s6640_s1 + $0x118] sm:$0xf0]  ;;  %v4184_v16 = vld [vmem:[%s6640_s1 + $0x14] sm:$0xf] }
  0x6a   : > { %1327 = vmatpush.bf16.msra.mxu0 %v3280_v41  ;;  %v3444_v39 = vor.u32 %v4222_v27, %v3441_v28  ;;  %v3505_v41 = vld [vmem:[%s6640_s1 + $0x1c8] sm:$0xf0]  ;;  %v3289_v24 = vld [vmem:[%s6640_s1 + $0x18] sm:$0xf0]  ;;  %v4200_v25 = vld [vmem:[%s6640_s1 + $0x94] sm:$0xf] }
  0x6b   : > { %1346 = vmatpush.bf16.msra.mxu1 %v3344_v43  ;;  %v3380_v43 = vor.u32 %v4206_v37, %v3377_v44  ;;  %v3353_v27 = vld [vmem:[%s6640_s1 + $0x98] sm:$0xf0]  ;;  %v3292_v51 = vor.u32 %v4184_v16, %v3289_v24  ;;  %v4182_v44 = vld [vmem:[%s6640_s1 + $0x4] sm:$0xf]  ;;  %v4341_v57 = vld [vmem:[%s6640_s1 + $0x4f4] sm:$0xf0] }
  0x6c   : > { %1365 = vmatpush.bf16.msra.mxu2 %v3408_v40  ;;  %v4238_v40 = vld [vmem:[%s6640_s1 + $0x1c4] sm:$0xf]  ;;  %v3356_v37 = vor.u32 %v4200_v25, %v3353_v27  ;;  %v4353_v24 = vld [vmem:[%s6640_s1 + $0x554] sm:$0xf0] }
  0x6d   : > { %1384 = vmatpush.bf16.msra.mxu3 %v3472_v47  ;;  %v4188_v47 = vld [vmem:[%s6640_s1 + $0x34] sm:$0xf]  ;;  %v3508_v49 = vor.u32 %v4238_v40, %v3505_v41  ;;  %v4198_v41 = vld [vmem:[%s6640_s1 + $0x84] sm:$0xf] }
  0x6e   : > { %1396 = vmatpush.bf16.msrb.mxu0 %v3340_v53  ;;  %v3369_v53 = vld [vmem:[%s6640_s1 + $0xb8] sm:$0xf0]  ;;  %v3308_v63 = vor.u32 %v4188_v47, %v3305_v52  ;;  %v3783_v47 = vld [vmem:[%s6640_s1 + $0x570] sm:$0xf] }
  0x6f   : > { %1415 = vmatpush.bf16.msrb.mxu1 %v3404_v54  ;;  %v3436_v54 = vor.u32 %v4220_v21, %v3433_v35  ;;  %v3345_v21 = vld [vmem:[%s6640_s1 + $0x88] sm:$0xf0]  ;;  %v4230_v35 = vld [vmem:[%s6640_s1 + $0x184] sm:$0xf]  ;;  %v3655_v52 = vld [vmem:[%s6640_s1 + $0x470] sm:$0xf] }
  0x70   : > { %1434 = vmatpush.bf16.msrb.mxu2 %v3468_v17  ;;  %v4204_v17 = vld [vmem:[%s6640_s1 + $0xb4] sm:$0xf]  ;;  %v3348_v56 = vor.u32 %v4198_v41, %v3345_v21  ;;  %v1583_v41 = vrot.slane %v452_v12, 3  ;;  %v1595_v21 = vrot.slane %v464_v30, 3  ;;  %v1594_v12 = vrot.slane %v496_v48, 2 }
  0x71   : > { %1453 = vmatpush.bf16.msrb.mxu3 %v3532_v58  ;;  %v3425_v58 = vld [vmem:[%s6640_s1 + $0x128] sm:$0xf0]  ;;  %v3372_v0 = vor.u32 %v4204_v17, %v3369_v53  ;;  %v4325_v17 = vld [vmem:[%s6640_s1 + $0x474] sm:$0xf0]  ;;  %v3719_v53 = vld [vmem:[%s6640_s1 + $0x4f0] sm:$0xf] }
  0x72   : > { %1397 = vmatpush.bf16.msrb.mxu0 %v3332_v3  ;;  %1347 = vmatmul.bf16.vlgmr.msra.gmra.mxu1 %v4833_v5  ;;  %v3361_v3 = vld [vmem:[%s6640_s1 + $0xa8] sm:$0xf0]  ;;  %v3656_v38 = vor.u32 %v4325_v17, %v3655_v52  ;;  %v3695_v30 = vld [vmem:[%s6640_s1 + $0x4c0] sm:$0xf]  ;;  %v4335_v52 = vld [vmem:[%s6640_s1 + $0x4c4] sm:$0xf0] }
  0x73   : > { %1416 = vmatpush.bf16.msrb.mxu1 %v3396_v6  ;;  %1328 = vmatmul.bf16.vlgmr.msra.gmra.mxu0 %v4830_v4  ;;  %v3428_v6 = vor.u32 %v4218_v22, %v3425_v58  ;;  %v3847_v22 = vld [vmem:[%s6640_s1 + $0x5f0] sm:$0xf]  ;;  %v4373_v58 = vld [vmem:[%s6640_s1 + $0x5f4] sm:$0xf0] }
  0x74   : > { %1435 = vmatpush.bf16.msrb.mxu2 %v3460_v2  ;;  %v4202_v2 = vld [vmem:[%s6640_s1 + $0xa4] sm:$0xf] }
  0x75   : > { %1454 = vmatpush.bf16.msrb.mxu3 %v3524_v9  ;;  %v4216_v9 = vld [vmem:[%s6640_s1 + $0x114] sm:$0xf]  ;;  %v3364_v15 = vor.u32 %v4202_v2, %v3361_v3  ;;  %v3720_v2 = vor.u32 %v4341_v57, %v3719_v53  ;;  %v3848_v3 = vor.u32 %v4373_v58, %v3847_v22  ;;  %v3823_v53 = vld [vmem:[%s6640_s1 + $0x5c0] sm:$0xf]  ;;  %v4349_v57 = vld [vmem:[%s6640_s1 + $0x534] sm:$0xf0] }
  0x76   : > { %1398 = vmatpush.bf16.msrb.mxu0 %v3324_v31  ;;  %1366 = vmatmul.bf16.vlgmr.msra.gmra.mxu2 %v4872_v29  ;;  %v3420_v28 = vor.u32 %v4216_v9, %v3417_v18  ;;  %v4232_v31 = vld [vmem:[%s6640_s1 + $0x194] sm:$0xf]  ;;  %v4339_v9 = vld [vmem:[%s6640_s1 + $0x4e4] sm:$0xf0]  ;;  %v3839_v18 = vld [vmem:[%s6640_s1 + $0x5e0] sm:$0xf] }
  0x77   : > { %1417 = vmatpush.bf16.msrb.mxu1 %v3388_v34  ;;  %1385 = vmatmul.bf16.vlgmr.msra.gmra.mxu3 %v4904_v45  ;;  %v3481_v34 = vld [vmem:[%s6640_s1 + $0x198] sm:$0xf0]  ;;  %v1472_v22 = vld [vmem:[%s4778_s10] sm:$0xcc]  ;;  %v1607_v58 = vrot.slane %v476_v46, 3 }
  0x78   : > { %1436 = vmatpush.bf16.msrb.mxu2 %v3452_v20  ;;  %v3492_v20 = vor.u32 %v4234_v23, %v3489_v7  ;;  %v3484_v40 = vor.u32 %v4232_v31, %v3481_v34  ;;  %v4323_v23 = vld [vmem:[%s6640_s1 + $0x464] sm:$0xf0]  ;;  %v3711_v7 = vld [vmem:[%s6640_s1 + $0x4e0] sm:$0xf]  ;;  %v4321_v31 = vld [vmem:[%s6640_s1 + $0x454] sm:$0xf0] }
  0x79   : > { %1455 = vmatpush.bf16.msrb.mxu3 %v3516_v50  ;;  %v3409_v50 = vld [vmem:[%s6640_s1 + $0x108] sm:$0xf0]  ;;  %v3712_v25 = vor.u32 %v4339_v9, %v3711_v7  ;;  %v1571_v34 = vrot.slane %v440_v11, 3  ;;  %v4369_v11 = vld [vmem:[%s6640_s1 + $0x5d4] sm:$0xf0] }
  0x7a   : > { %1399 = vmatpush.bf16.msrb.mxu0 %v3316_v42  ;;  %v3412_v42 = vor.u32 %v4214_v36, %v3409_v50  ;;  %v1570_v36 = vrot.slane %v480_v19, 2  ;;  %v3703_v50 = vld [vmem:[%s6640_s1 + $0x4d0] sm:$0xf]  ;;  %v3743_v9 = vld [vmem:[%s6640_s1 + $0x520] sm:$0xf] }
  0x7b   : > { %1418 = vmatpush.bf16.msrb.mxu1 %v3380_v43  ;;  %v3473_v43 = vld [vmem:[%s6640_s1 + $0x188] sm:$0xf0]  ;;  %v3687_v46 = vld [vmem:[%s6640_s1 + $0x4b0] sm:$0xf] }
  0x7c   : > { %1437 = vmatpush.bf16.msrb.mxu2 %v3444_v39  ;;  %v3281_v39 = vld [vmem:[%s6640_s1 + $0x8] sm:$0xf0]  ;;  %v5592_v48 = vor.u32 %v1571_v34, %v1570_v36  ;;  %v4363_v34 = vld [vmem:[%s6640_s1 + $0x5a4] sm:$0xf0] }
  0x7d   : > { %1456 = vmatpush.bf16.msrb.mxu3 %v3508_v49  ;;  %v4357_v49 = vld [vmem:[%s6640_s1 + $0x574] sm:$0xf0] }
  0x7e   : > { %1400 = vmatpush.bf16.msrb.mxu0 %v3308_v63  ;;  %v3476_v63 = vor.u32 %v4230_v35, %v3473_v43  ;;  %v3631_v35 = vld [vmem:[%s6640_s1 + $0x440] sm:$0xf]  ;;  %v1582_v43 = vrot.slane %v488_v26, 2  ;;  %v4367_v26 = vld [vmem:[%s6640_s1 + $0x5c4] sm:$0xf0] }
  0x7f   : > { %1419 = vmatpush.bf16.msrb.mxu1 %v3372_v0  ;;  %v3784_v0 = vor.u32 %v4357_v49, %v3783_v47 }
  0x80   : > { %1438 = vmatpush.bf16.msrb.mxu2 %v3436_v54  ;;  %v3284_v54 = vor.u32 %v4182_v44, %v3281_v39  ;;  %v3831_v44 = vld [vmem:[%s6640_s1 + $0x5d0] sm:$0xf]  ;;  %v3759_v39 = vld [vmem:[%s6640_s1 + $0x540] sm:$0xf] }
  0x81   : > { %1457 = vmatpush.bf16.msrb.mxu3 %v3500_v60  ;;  %v3775_v60 = vld [vmem:[%s6640_s1 + $0x560] sm:$0xf]  ;;  %v3832_v49 = vor.u32 %v4369_v11, %v3831_v44  ;;  %v1473_v44 = vld [vmem:[%s4778_s10 + $0x8] sm:$0xcc]  ;;  %v3607_v11 = vld [vmem:[%s6640_s1 + $0x410] sm:$0xf] }
  0x82   : > { %1401 = vmatpush.bf16.msrb.mxu0 %v3300_v14  ;;  %1352 = vmatmul.bf16.gmra.mxu1 %v4820_v62  ;;  %v4371_v14 = vld [vmem:[%s6640_s1 + $0x5e4] sm:$0xf0] }
  0x83   : > { %1420 = vmatpush.bf16.msrb.mxu1 %v3364_v15  ;;  %1333 = vmatmul.bf16.gmra.mxu0 %v4818_v61  ;;  %v3776_v15 = vor.u32 %v4355_v1, %v3775_v60  ;;  %v3840_v27 = vor.u32 %v4371_v14, %v3839_v18  ;;  %v4317_v60 = vld [vmem:[%s6640_s1 + $0x434] sm:$0xf0]  ;;  %v3824_v1 = vor.u32 %v4367_v26, %v3823_v53  ;;  %v4347_v18 = vld [vmem:[%s6640_s1 + $0x524] sm:$0xf0]  ;;  %v3615_v14 = vld [vmem:[%s6640_s1 + $0x420] sm:$0xf] }
  0x84   : > { %1439 = vmatpush.bf16.msrb.mxu2 %v3428_v6  ;;  %v3647_v6 = vld [vmem:[%s6640_s1 + $0x460] sm:$0xf]  ;;  %v4311_v26 = vld [vmem:[%s6640_s1 + $0x404] sm:$0xf0] }
  0x85   : > { %1458 = vmatpush.bf16.msrb.mxu3 %v3492_v20  ;;  %v3648_v16 = vor.u32 %v4323_v23, %v3647_v6  ;;  %v3767_v20 = vld [vmem:[%s6640_s1 + $0x550] sm:$0xf]  ;;  %v4365_v6 = vld [vmem:[%s6640_s1 + $0x5b4] sm:$0xf0]  ;;  %v1545_v23 = vunpack.c.l.b16 %v1472_v22  ;;  %v3599_v53 = vld [vmem:[%s6640_s1 + $0x400] sm:$0xf] }
  0x86   : > { %1402 = vmatpush.bf16.msrb.mxu0 %v3292_v51  ;;  %1371 = vmatmul.bf16.gmra.mxu2 %v4844_v13  ;;  %v3768_v51 = vor.u32 %v4353_v24, %v3767_v20 }
  0x87   : > { %1421 = vmatpush.bf16.msrb.mxu1 %v3356_v37  ;;  %1390 = vmatmul.bf16.gmra.mxu3 %v4880_v33  ;;  %v4337_v37 = vld [vmem:[%s6640_s1 + $0x4d4] sm:$0xf0]  ;;  %v1553_v36 = vpack.c.b16 %v4807_v55, %v1545_v23 }
  0x88   : > { %1440 = vmatpush.bf16.msrb.mxu2 %v3420_v28  ;;  %v3639_v28 = vld [vmem:[%s6640_s1 + $0x450] sm:$0xf]  ;;  %v3704_v47 = vor.u32 %v4337_v37, %v3703_v50  ;;  %v4345_v37 = vld [vmem:[%s6640_s1 + $0x514] sm:$0xf0] }
  0x89   : > { %1459 = vmatpush.bf16.msrb.mxu3 %v3484_v40  ;;  %v3640_v19 = vor.u32 %v4321_v31, %v3639_v28  ;;  %v4351_v40 = vld [vmem:[%s6640_s1 + $0x544] sm:$0xf0]  ;;  %v3807_v31 = vld [vmem:[%s6640_s1 + $0x5a0] sm:$0xf] }
  0x8a   : > { %1403 = vmatpush.bf16.msrb.mxu0 %v3284_v54  ;;  %v3760_v17 = vor.u32 %v4351_v40, %v3759_v39  ;;  %v4331_v28 = vld [vmem:[%s6640_s1 + $0x4a4] sm:$0xf0]  ;;  %v3808_v40 = vor.u32 %v4363_v34, %v3807_v31  ;;  %v4354_v31 = vld [vmem:[%s6640_s1 + $0x564] sm:$0xf]  ;;  %v3777_v34 = vld [vmem:[%s6640_s1 + $0x568] sm:$0xf0] }
  0x8b   : > { %1422 = vmatpush.bf16.msrb.mxu1 %v3348_v56  ;;  %v3751_v56 = vld [vmem:[%s6640_s1 + $0x530] sm:$0xf] }
  0x8c   : > { %1441 = vmatpush.bf16.msrb.mxu2 %v3412_v42  ;;  %v4319_v42 = vld [vmem:[%s6640_s1 + $0x444] sm:$0xf0] }
  0x8d   : > { %1460 = vmatpush.bf16.msrb.mxu3 %v3476_v63  ;;  %v3632_v54 = vor.u32 %v4319_v42, %v3631_v35  ;;  %v1606_v63 = vrot.slane %v504_v10, 2  ;;  %v5616_v10 = vor.u32 %v1583_v41, %v1582_v43  ;;  %v3671_v41 = vld [vmem:[%s6640_s1 + $0x490] sm:$0xf]  ;;  %v4361_v43 = vld [vmem:[%s6640_s1 + $0x594] sm:$0xf0] }
  0x8e   : > { %1974 = vmatpush.bf16.msra.mxu0 %v3656_v38  ;;  %v3623_v38 = vld [vmem:[%s6640_s1 + $0x430] sm:$0xf] }
  0x8f   : > { %1993 = vmatpush.bf16.msra.mxu1 %v3720_v2  ;;  %v4333_v2 = vld [vmem:[%s6640_s1 + $0x4b4] sm:$0xf0]  ;;  %v3624_v7 = vor.u32 %v4317_v60, %v3623_v38  ;;  %v5642_v20 = vor.u32 %v1607_v58, %v1606_v63  ;;  %v3799_v35 = vld [vmem:[%s6640_s1 + $0x590] sm:$0xf]  ;;  %v1548_v58 = vunpack.c.h.b16 %v1473_v44  ;;  %v4356_v63 = vld [vmem:[%s6640_s1 + $0x574] sm:$0xf] }
  0x90   : > { %2012 = vmatpush.bf16.msra.mxu2 %v3784_v0  ;;  %v3696_v0 = vor.u32 %v4335_v52, %v3695_v30  ;;  %v3688_v24 = vor.u32 %v4333_v2, %v3687_v46  ;;  %v1547_v30 = vunpack.c.l.b16 %v1473_v44  ;;  %v3800_v60 = vor.u32 %v4361_v43, %v3799_v35  ;;  %v4324_v46 = vld [vmem:[%s6640_s1 + $0x474] sm:$0xf]  ;;  %v1474_v44 = vld [vmem:[%s4778_s10 + $0x40] sm:$0x77] }
  0x91   : > { %2031 = vmatpush.bf16.msra.mxu3 %v3848_v3  ;;  %v3815_v3 = vld [vmem:[%s6640_s1 + $0x5b0] sm:$0xf]  ;;  %v4370_v35 = vld [vmem:[%s6640_s1 + $0x5e4] sm:$0xf] }
  0x92   : > { %1975 = vmatpush.bf16.msra.mxu0 %v3648_v16  ;;  %1423 = vmatmul.bf16.vlgmr.msrb.gmra.mxu1 %v4833_v5  ;;  %v3752_v5 = vor.u32 %v4349_v57, %v3751_v56  ;;  %v1546_v16 = vunpack.c.h.b16 %v1472_v22  ;;  %v4327_v56 = vld [vmem:[%s6640_s1 + $0x484] sm:$0xf0] }
  0x93   : > { %1994 = vmatpush.bf16.msra.mxu1 %v3712_v25  ;;  %1404 = vmatmul.bf16.vlgmr.msrb.gmra.mxu0 %v4830_v4  ;;  %v5618_v4 = vor.u32 %v1595_v21, %v1594_v12  ;;  %v3816_v25 = vor.u32 %v4365_v6, %v3815_v3  ;;  %v4329_v21 = vld [vmem:[%s6640_s1 + $0x494] sm:$0xf0]  ;;  %v3727_v12 = vld [vmem:[%s6640_s1 + $0x500] sm:$0xf]  ;;  %v4359_v3 = vld [vmem:[%s6640_s1 + $0x584] sm:$0xf0] }
  0x94   : > { %2013 = vmatpush.bf16.msra.mxu2 %v3776_v15  ;;  %v4315_v15 = vld [vmem:[%s6640_s1 + $0x424] sm:$0xf0]  ;;  %v3672_v38 = vor.u32 %v4329_v21, %v3671_v41  ;;  %v3780_v41 = vor.u32 %v4354_v31, %v3777_v34  ;;  %v3713_v21 = vld [vmem:[%s6640_s1 + $0x4e8] sm:$0xf0] }
  0x95   : > { %2032 = vmatpush.bf16.msra.mxu3 %v3840_v27  ;;  %v3744_v27 = vor.u32 %v4347_v18, %v3743_v9  ;;  %v3616_v50 = vor.u32 %v4315_v15, %v3615_v14  ;;  %v4340_v9 = vld [vmem:[%s6640_s1 + $0x4f4] sm:$0xf]  ;;  %v3600_v18 = vor.u32 %v4311_v26, %v3599_v53  ;;  %v3721_v15 = vld [vmem:[%s6640_s1 + $0x4f8] sm:$0xf0]  ;;  %v1550_v26 = vunpack.c.h.b16 %v1474_v44 }
  0x96   : > { %1976 = vmatpush.bf16.msra.mxu0 %v3640_v19  ;;  %1442 = vmatmul.bf16.vlgmr.msrb.gmra.mxu2 %v4872_v29  ;;  %v3679_v29 = vld [vmem:[%s6640_s1 + $0x4a0] sm:$0xf]  ;;  %v4313_v19 = vld [vmem:[%s6640_s1 + $0x414] sm:$0xf0]  ;;  %v3641_v53 = vld [vmem:[%s6640_s1 + $0x458] sm:$0xf0] }
  0x97   : > { %1995 = vmatpush.bf16.msra.mxu1 %v3704_v47  ;;  %1461 = vmatmul.bf16.vlgmr.msrb.gmra.mxu3 %v4904_v45  ;;  %v1554_v45 = vpack.c.b16 %v4811_v59, %v1546_v16  ;;  %v3680_v39 = vor.u32 %v4331_v28, %v3679_v29  ;;  %v1563_v47 = vshrl.u32 %v1553_v36, 16  ;;  %v3608_v52 = vor.u32 %v4313_v19, %v3607_v11  ;;  %v4372_v16 = vld [vmem:[%s6640_s1 + $0x5f4] sm:$0xf] }
  0x98   : > { %2014 = vmatpush.bf16.msra.mxu2 %v3768_v51  ;;  %v3735_v51 = vld [vmem:[%s6640_s1 + $0x510] sm:$0xf] }
  0x99   : > { %2033 = vmatpush.bf16.msra.mxu3 %v3832_v49  ;;  %v3736_v42 = vor.u32 %v4345_v37, %v3735_v51  ;;  %v1566_v49 = vshll.u32 %v1553_v36, 16  ;;  %v1575_v57 = vshrl.u32 %v1554_v45, 16  ;;  %v1578_v22 = vshll.u32 %v1554_v45, 16  ;;  %v4322_v51 = vld [vmem:[%s6640_s1 + $0x464] sm:$0xf] }
  0x9a   : > { %1977 = vmatpush.bf16.msra.mxu0 %v3632_v54  ;;  %v5699_v54 = vld [vmem:[%s6640_s1 + $0x480] sm:$0xf]  ;;  %v5722_v6 = vrot.slane %v1563_v47, 2  ;;  %v3649_v37 = vld [vmem:[%s6640_s1 + $0x468] sm:$0xf0]  ;;  %v3724_v45 = vor.u32 %v4340_v9, %v3721_v15  ;;  %v5819_v15 = vpack.c.b16 %v1550_v26, %v1550_v26 }
  0x9b   : > { %1996 = vmatpush.bf16.msra.mxu1 %v3696_v0  ;;  %v3785_v0 = vld [vmem:[%s6640_s1 + $0x578] sm:$0xf0]  ;;  %v5724_v23 = vrot.slane %v1566_v49, 3  ;;  %v5743_v29 = vrot.slane %v1578_v22, 3  ;;  %v3664_v36 = vor.u32 %v4327_v56, %v5699_v54  ;;  %v3652_v47 = vor.u32 %v4322_v51, %v3649_v37  ;;  %v4352_v49 = vld [vmem:[%s6640_s1 + $0x554] sm:$0xf] }
  0x9c   : > { %2015 = vmatpush.bf16.msra.mxu2 %v3760_v17  ;;  %v4343_v17 = vld [vmem:[%s6640_s1 + $0x504] sm:$0xf0]  ;;  %v3788_v14 = vor.u32 %v4356_v63, %v3785_v0  ;;  %v4336_v63 = vld [vmem:[%s6640_s1 + $0x4d4] sm:$0xf]  ;;  %v3825_v51 = vld [vmem:[%s6640_s1 + $0x5c8] sm:$0xf0] }
  0x9d   : > { %2034 = vmatpush.bf16.msra.mxu3 %v3824_v1  ;;  %v3791_v1 = vld [vmem:[%s6640_s1 + $0x580] sm:$0xf]  ;;  %v3728_v2 = vor.u32 %v4343_v17, %v3727_v12  ;;  %v4320_v17 = vld [vmem:[%s6640_s1 + $0x454] sm:$0xf]  ;;  %v1475_v54 = vld [vmem:[%s4778_s10 + $0x48] sm:$0x77]  ;;  %v1569_v0 = vor.u32 %v5724_v23, %v5722_v6 }
  0x9e   : > { %1978 = vmatpush.bf16.msra.mxu0 %v3624_v7  ;;  %v1555_v7 = vpack.c.b16 %v4836_v8, %v1547_v30  ;;  %v3769_v30 = vld [vmem:[%s6640_s1 + $0x558] sm:$0xf0]  ;;  %v3761_v6 = vld [vmem:[%s6640_s1 + $0x548] sm:$0xf0]  ;;  %v1552_v9 = vunpack.c.h.b16 %v1475_v54 }
  0x9f   : > { %1997 = vmatpush.bf16.msra.mxu1 %v3688_v24  ;;  %v3849_v24 = vld [vmem:[%s6640_s1 + $0x5f8] sm:$0xf0] }
  0xa0   : > { %2016 = vmatpush.bf16.msra.mxu2 %v3752_v5  ;;  %v3657_v5 = vld [vmem:[%s6640_s1 + $0x478] sm:$0xf0]  ;;  %v1587_v11 = vshrl.u32 %v1555_v7, 16  ;;  %v1590_v19 = vshll.u32 %v1555_v7, 16  ;;  %v1551_v7 = vunpack.c.l.b16 %v1475_v54  ;;  %v4364_v54 = vld [vmem:[%s6640_s1 + $0x5b4] sm:$0xf] }
  0xa1   : > { %2035 = vmatpush.bf16.msra.mxu3 %v3816_v25  ;;  %v5741_v25 = vrot.slane %v1575_v57, 2  ;;  %v3660_v28 = vor.u32 %v4324_v46, %v3657_v5  ;;  %v4368_v46 = vld [vmem:[%s6640_s1 + $0x5d4] sm:$0xf]  ;;  %v3833_v5 = vld [vmem:[%s6640_s1 + $0x5d8] sm:$0xf0] }
  0xa2   : > { %1979 = vmatpush.bf16.msra.mxu0 %v3616_v50  ;;  %1428 = vmatmul.bf16.gmra.mxu1 %v4820_v62  ;;  %v3792_v50 = vor.u32 %v4359_v3, %v3791_v1  ;;  %v5786_v56 = vrot.slane %v1587_v11, 2  ;;  %v5788_v57 = vrot.slane %v1590_v19, 3  ;;  %v3705_v1 = vld [vmem:[%s6640_s1 + $0x4d8] sm:$0xf0]  ;;  %v4350_v3 = vld [vmem:[%s6640_s1 + $0x544] sm:$0xf]  ;;  %v5850_v11 = vpack.c.b16 %v1551_v7, %v1551_v7 }
  0xa3   : > { %1998 = vmatpush.bf16.msra.mxu1 %v3680_v39  ;;  %1409 = vmatmul.bf16.gmra.mxu0 %v4818_v61  ;;  %v3852_v39 = vor.u32 %v4372_v16, %v3849_v24  ;;  %v3708_v16 = vor.u32 %v4336_v63, %v3705_v1  ;;  %v3836_v24 = vor.u32 %v4368_v46, %v3833_v5  ;;  %v3689_v26 = vld [vmem:[%s6640_s1 + $0x4b8] sm:$0xf0]  ;;  %v3617_v7 = vld [vmem:[%s6640_s1 + $0x428] sm:$0xf0] }
  0xa4   : > { %2017 = vmatpush.bf16.msra.mxu2 %v3744_v27  ;;  %v1556_v27 = vpack.c.b16 %v4878_v32, %v1548_v58  ;;  %v3764_v34 = vor.u32 %v4350_v3, %v3761_v6  ;;  %v1593_v37 = vor.u32 %v5788_v57, %v5786_v56  ;;  %v5852_v19 = vpack.c.b16 %v1552_v9, %v1552_v9  ;;  %v3817_v56 = vld [vmem:[%s6640_s1 + $0x5b8] sm:$0xf0]  ;;  %v4314_v6 = vld [vmem:[%s6640_s1 + $0x424] sm:$0xf] }
  0xa5   : > { %2036 = vmatpush.bf16.msra.mxu3 %v3808_v40  ;;  %v4338_v40 = vld [vmem:[%s6640_s1 + $0x4e4] sm:$0xf]  ;;  %v1629_v63 = vshrl.u32 %v5850_v11, 16  ;;  %v1632_v1 = vshll.u32 %v5850_v11, 16  ;;  %v3820_v3 = vor.u32 %v4364_v54, %v3817_v56 }
  0xa6   : > { %1980 = vmatpush.bf16.msra.mxu0 %v3608_v52  ;;  %1447 = vmatmul.bf16.gmra.mxu2 %v4844_v13  ;;  %v1599_v43 = vshrl.u32 %v1556_v27, 16  ;;  %v1602_v12 = vshll.u32 %v1556_v27, 16  ;;  %v1549_v52 = vunpack.c.l.b16 %v1474_v44  ;;  %v3716_v22 = vor.u32 %v4338_v40, %v3713_v21  ;;  %v4334_v27 = vld [vmem:[%s6640_s1 + $0x4c4] sm:$0xf] }
  0xa7   : > { %1999 = vmatpush.bf16.msra.mxu1 %v3672_v38  ;;  %1466 = vmatmul.bf16.gmra.mxu3 %v4880_v33  ;;  %v1581_v38 = vor.u32 %v5743_v29, %v5741_v25  ;;  %v4318_v25 = vld [vmem:[%s6640_s1 + $0x444] sm:$0xf]  ;;  %v3633_v29 = vld [vmem:[%s6640_s1 + $0x448] sm:$0xf0]  ;;  %v5887_v57 = vsel %vm1561_vm1, %v1593_v37, %v5618_v4  ;;  %v1638_v46 = vshrl.u32 %v5852_v19, 16 }
  0xa8   : > { %2018 = vmatpush.bf16.msra.mxu2 %v3736_v42  ;;  %v3841_v42 = vld [vmem:[%s6640_s1 + $0x5e8] sm:$0xf0]  ;;  %v5813_v23 = vpack.c.b16 %v1549_v52, %v1549_v52  ;;  %v3636_v21 = vor.u32 %v4318_v25, %v3633_v29  ;;  %v3625_v52 = vld [vmem:[%s6640_s1 + $0x438] sm:$0xf0]  ;;  %v4330_v9 = vld [vmem:[%s6640_s1 + $0x4a4] sm:$0xf] }
  0xa9   : > { %2037 = vmatpush.bf16.msra.mxu3 %v3800_v60  ;;  %v3844_v58 = vor.u32 %v4370_v35, %v3841_v42  ;;  %v3772_v60 = vor.u32 %v4352_v49, %v3769_v30  ;;  %v5836_v31 = vsel %vm1561_vm1, %v1581_v38, %v5616_v10  ;;  %v1620_v42 = vshrl.u32 %v5819_v15, 16  ;;  %v4316_v30 = vld [vmem:[%s6640_s1 + $0x434] sm:$0xf]  ;;  %v3745_v38 = vld [vmem:[%s6640_s1 + $0x528] sm:$0xf0] }
  0xaa   : > { %1981 = vmatpush.bf16.msra.mxu0 %v3600_v18  ;;  %v5815_v18 = vrot.slane %v1599_v43, 2  ;;  %v1611_v44 = vshrl.u32 %v5813_v23, 16  ;;  %v1614_v35 = vshll.u32 %v5813_v23, 16  ;;  %v1623_v43 = vshll.u32 %v5819_v15, 16 }
  0xab   : > { %2000 = vmatpush.bf16.msra.mxu1 %v3664_v36  ;;  %v3697_v36 = vld [vmem:[%s6640_s1 + $0x4c8] sm:$0xf0]  ;;  %v3628_v5 = vor.u32 %v4316_v30, %v3625_v52  ;;  %v1622_v29 = vrot.slane %v1620_v42, 2  ;;  %v3609_v42 = vld [vmem:[%s6640_s1 + $0x418] sm:$0xf0]  ;;  %v5962_v54 = vrot.slane %v1638_v46, 2 }
  0xac   : > { %2019 = vmatpush.bf16.msra.mxu2 %v3728_v2  ;;  %v3644_v2 = vor.u32 %v4320_v17, %v3641_v53  ;;  %v4332_v17 = vld [vmem:[%s6640_s1 + $0x4b4] sm:$0xf]  ;;  %v1625_v37 = vrot.slane %v1623_v43, 3  ;;  %v3673_v30 = vld [vmem:[%s6640_s1 + $0x498] sm:$0xf0] }
  0xad   : > { %2038 = vmatpush.bf16.msra.mxu3 %v3792_v50  ;;  %v4366_v50 = vld [vmem:[%s6640_s1 + $0x5c4] sm:$0xf]  ;;  %v4328_v43 = vld [vmem:[%s6640_s1 + $0x494] sm:$0xf] }
  0xae   : > { %2050 = vmatpush.bf16.msrb.mxu0 %v3660_v28  ;;  %v5832_v28 = vsel %vm1561_vm1, %v1569_v0, %v5592_v48  ;;  %v3828_v49 = vor.u32 %v4366_v50, %v3825_v51  ;;  %v4346_v0 = vld [vmem:[%s6640_s1 + $0x524] sm:$0xf]  ;;  %v4360_v52 = vld [vmem:[%s6640_s1 + $0x594] sm:$0xf]  ;;  %v3676_v46 = vor.u32 %v4328_v43, %v3673_v30 }
  0xaf   : > { %2069 = vmatpush.bf16.msrb.mxu1 %v3724_v45  ;;  %v4348_v45 = vld [vmem:[%s6640_s1 + $0x534] sm:$0xf] }
  0xb0   : > { %2088 = vmatpush.bf16.msrb.mxu2 %v3788_v14  ;;  %v5817_v14 = vrot.slane %v1602_v12, 3  ;;  %v849_v40 = vpop.f32.mrf.mxu0 }
  0xb1   : > { %2107 = vmatpush.bf16.msrb.mxu3 %v3852_v39  ;;  %v3753_v39 = vld [vmem:[%s6640_s1 + $0x538] sm:$0xf0] }
  0xb2   : > { %2051 = vmatpush.bf16.msrb.mxu0 %v3652_v47  ;;  %v3700_v47 = vor.u32 %v4334_v27, %v3697_v36  ;;  %v3756_v53 = vor.u32 %v4348_v45, %v3753_v39  ;;  %2001 = vmatmul.bf16.vlgmr.msra.gmra.mxu1 %v5836_v31  ;;  %v1641_v27 = vshll.u32 %v5852_v19, 16  ;;  %v3737_v36 = vld [vmem:[%s6640_s1 + $0x518] sm:$0xf0]  ;;  %v5936_v45 = vrot.slane %v1632_v1, 3 }
  0xb3   : > { %2070 = vmatpush.bf16.msrb.mxu1 %v3716_v22  ;;  %1982 = vmatmul.bf16.vlgmr.msra.gmra.mxu0 %v5832_v28  ;;  %v1605_v22 = vor.u32 %v5817_v14, %v5815_v18  ;;  %v3748_v18 = vor.u32 %v4346_v0, %v3745_v38  ;;  %v3681_v14 = vld [vmem:[%s6640_s1 + $0x4a8] sm:$0xf0]  ;;  %v3620_v39 = vor.u32 %v4314_v6, %v3617_v7  ;;  %v4421_v6 = vld [vmem:[%s6640_s1 + $0x774] sm:$0xf0] }
  0xb4   : > { %2089 = vmatpush.bf16.msrb.mxu2 %v3780_v41  ;;  %v868_v41 = vpop.f32.mrf.mxu1  ;;  %v5964_v56 = vrot.slane %v1641_v27, 3  ;;  %v1626_v0 = vor.u32 %v1625_v37, %v1622_v29  ;;  %v4389_v29 = vld [vmem:[%s6640_s1 + $0x674] sm:$0xf0]  ;;  %v4039_v27 = vld [vmem:[%s6640_s1 + $0x6f0] sm:$0xf] }
  0xb5   : > { %2108 = vmatpush.bf16.msrb.mxu3 %v3844_v58  ;;  %v5863_v12 = vadd.f32 %v868_v41, %v849_v40  ;;  %v5891_v58 = vrot.slane %v1611_v44, 2  ;;  %v5925_v25 = vsel %vm1561_vm1, %v1605_v22, %v5642_v20  ;;  %v5934_v44 = vrot.slane %v1629_v63, 2  ;;  %v4342_v22 = vld [vmem:[%s6640_s1 + $0x504] sm:$0xf]  ;;  %v3729_v63 = vld [vmem:[%s6640_s1 + $0x508] sm:$0xf0] }
  0xb6   : > { %2052 = vmatpush.bf16.msrb.mxu0 %v3644_v2  ;;  %v3692_v2 = vor.u32 %v4332_v17, %v3689_v26  ;;  %2020 = vmatmul.bf16.vlgmr.msra.gmra.mxu2 %v5887_v57  ;;  %v3684_v41 = vor.u32 %v4330_v9, %v3681_v14  ;;  %v3801_v17 = vld [vmem:[%s6640_s1 + $0x598] sm:$0xf0]  ;;  %v3732_v9 = vor.u32 %v4342_v22, %v3729_v63  ;;  %v3793_v14 = vld [vmem:[%s6640_s1 + $0x588] sm:$0xf0]  ;;  %v4159_v63 = vld [vmem:[%s6640_s1 + $0x7e0] sm:$0xf] }
  0xb7   : > { %2071 = vmatpush.bf16.msrb.mxu1 %v3708_v16  ;;  %v4362_v16 = vld [vmem:[%s6640_s1 + $0x5a4] sm:$0xf]  ;;  %2039 = vmatmul.bf16.vlgmr.msra.gmra.mxu3 %v5925_v25 }
  0xb8   : > { %2090 = vmatpush.bf16.msrb.mxu2 %v3772_v60  ;;  %v5900_v60 = vrot.slane %v1614_v35, 3  ;;  %v851_v50 = vpop.f32.mrf.mxu0  ;;  %v4312_v35 = vld [vmem:[%s6640_s1 + $0x414] sm:$0xf] }
  0xb9   : > { %2109 = vmatpush.bf16.msrb.mxu3 %v3836_v24  ;;  %v3809_v24 = vld [vmem:[%s6640_s1 + $0x5a8] sm:$0xf0]  ;;  %v3612_v38 = vor.u32 %v4312_v35, %v3609_v42 }
  0xba   : > { %2053 = vmatpush.bf16.msrb.mxu0 %v3636_v21  ;;  %v3812_v21 = vor.u32 %v4362_v16, %v3809_v24  ;;  %v1617_v26 = vor.u32 %v5900_v60, %v5891_v58  ;;  %v3601_v58 = vld [vmem:[%s6640_s1 + $0x408] sm:$0xf0]  ;;  %v4326_v60 = vld [vmem:[%s6640_s1 + $0x484] sm:$0xf]  ;;  %v906_v1 = vpop.f32.mrf.mxu3  ;;  %v3975_v16 = vld [vmem:[%s6640_s1 + $0x670] sm:$0xf] }
  0xbb   : > { %2072 = vmatpush.bf16.msrb.mxu1 %v3700_v47  ;;  %v887_v47 = vpop.f32.mrf.mxu2 }
  0xbc   : > { %2091 = vmatpush.bf16.msrb.mxu2 %v3764_v34  ;;  %v4344_v34 = vld [vmem:[%s6640_s1 + $0x514] sm:$0xf]  ;;  %v870_v51 = vpop.f32.mrf.mxu1  ;;  %v6003_v24 = vsel %vm1561_vm1, %v5592_v48, %v1617_v26  ;;  %v1635_v48 = vor.u32 %v5936_v45, %v5934_v44  ;;  %v4095_v44 = vld [vmem:[%s6640_s1 + $0x760] sm:$0xf]  ;;  %v4419_v45 = vld [vmem:[%s6640_s1 + $0x764] sm:$0xf0] }
  0xbd   : > { %2110 = vmatpush.bf16.msrb.mxu3 %v3828_v49  ;;  %v5938_v40 = vadd.f32 %v870_v51, %v851_v50  ;;  %v3740_v49 = vor.u32 %v4344_v34, %v3737_v36  ;;  %v4405_v34 = vld [vmem:[%s6640_s1 + $0x6f4] sm:$0xf0]  ;;  %v6016_v51 = vsel %vm1561_vm1, %v5616_v10, %v1626_v0  ;;  %v4387_v26 = vld [vmem:[%s6640_s1 + $0x664] sm:$0xf0] }
  0xbe   : > { %2054 = vmatpush.bf16.msrb.mxu0 %v3628_v5  ;;  %v3804_v5 = vor.u32 %v4360_v52, %v3801_v17  ;;  %v1644_v52 = vor.u32 %v5964_v56, %v5962_v54  ;;  %v6048_v22 = vsel %vm1561_vm1, %v5618_v4, %v1635_v48  ;;  %v4096_v54 = vor.u32 %v4419_v45, %v4095_v44  ;;  %v4403_v56 = vld [vmem:[%s6640_s1 + $0x6e4] sm:$0xf0]  ;;  %v4087_v4 = vld [vmem:[%s6640_s1 + $0x750] sm:$0xf]  ;;  %v4015_v44 = vld [vmem:[%s6640_s1 + $0x6c0] sm:$0xf] }
  0xbf   : > { %2073 = vmatpush.bf16.msrb.mxu1 %v3692_v2  ;;  %v3665_v2 = vld [vmem:[%s6640_s1 + $0x488] sm:$0xf0]  ;;  %v4435_v0 = vld [vmem:[%s6640_s1 + $0x7e4] sm:$0xf0] }
  0xc0   : > { %2092 = vmatpush.bf16.msrb.mxu2 %v3756_v53  ;;  %v888_v53 = vadd.f32 %v887_v47, %v5863_v12  ;;  %v4310_v12 = vld [vmem:[%s6640_s1 + $0x404] sm:$0xf]  ;;  %v854_v36 = vpop.f32.mrf.mxu0  ;;  %v3668_v42 = vor.u32 %v4326_v60, %v3665_v2  ;;  %v3976_v47 = vor.u32 %v4389_v29, %v3975_v16  ;;  %v3959_v2 = vld [vmem:[%s6640_s1 + $0x650] sm:$0xf]  ;;  %v4433_v29 = vld [vmem:[%s6640_s1 + $0x7d4] sm:$0xf0] }
  0xc1   : > { %2111 = vmatpush.bf16.msrb.mxu3 %v3820_v3  ;;  %v4103_v3 = vld [vmem:[%s6640_s1 + $0x770] sm:$0xf]  ;;  %v3604_v37 = vor.u32 %v4310_v12, %v3601_v58  ;;  %v4417_v12 = vld [vmem:[%s6640_s1 + $0x754] sm:$0xf0] }
  0xc2   : > { %2055 = vmatpush.bf16.msrb.mxu0 %v3620_v39  ;;  %v5990_v7 = vadd.f32 %v906_v1, %v888_v53  ;;  %v4104_v39 = vor.u32 %v4421_v6, %v4103_v3  ;;  %2006 = vmatmul.bf16.gmra.mxu1 %v6016_v51  ;;  %v3967_v53 = vld [vmem:[%s6640_s1 + $0x660] sm:$0xf]  ;;  %v6070_v1 = vsel %vm1561_vm1, %v5642_v20, %v1644_v52  ;;  %v4385_v3 = vld [vmem:[%s6640_s1 + $0x654] sm:$0xf0]  ;;  %v4023_v6 = vld [vmem:[%s6640_s1 + $0x6d0] sm:$0xf] }
  0xc3   : > { %2074 = vmatpush.bf16.msrb.mxu1 %v3684_v41  ;;  %v4167_v41 = vld [vmem:[%s6640_s1 + $0x7f0] sm:$0xf]  ;;  %v889_v43 = vpop.f32.mrf.mxu2  ;;  %1987 = vmatmul.bf16.gmra.mxu0 %v6003_v24  ;;  %v3968_v60 = vor.u32 %v4387_v26, %v3967_v53  ;;  %v4088_v20 = vor.u32 %v4417_v12, %v4087_v4  ;;  %v3960_v48 = vor.u32 %v4385_v3, %v3959_v2  ;;  %v4381_v26 = vld [vmem:[%s6640_s1 + $0x634] sm:$0xf0]  ;;  %v4063_v3 = vld [vmem:[%s6640_s1 + $0x720] sm:$0xf] }
  0xc4   : > { %2093 = vmatpush.bf16.msrb.mxu2 %v3748_v18  ;;  %v4358_v18 = vld [vmem:[%s6640_s1 + $0x584] sm:$0xf]  ;;  %v873_v50 = vpop.f32.mrf.mxu1  ;;  %v890_v30 = vadd.f32 %v889_v43, %v5938_v40  ;;  %v4031_v40 = vld [vmem:[%s6640_s1 + $0x6e0] sm:$0xf]  ;;  %v4151_v16 = vld [vmem:[%s6640_s1 + $0x7d0] sm:$0xf] }
  0xc5   : > { %2112 = vmatpush.bf16.msrb.mxu3 %v3812_v21  ;;  %v4437_v21 = vld [vmem:[%s6640_s1 + $0x7f4] sm:$0xf0]  ;;  %v874_v35 = vadd.f32 %v873_v50, %v854_v36  ;;  %v3796_v10 = vor.u32 %v4358_v18, %v3793_v14  ;;  %v4415_v36 = vld [vmem:[%s6640_s1 + $0x744] sm:$0xf0]  ;;  %v4143_v43 = vld [vmem:[%s6640_s1 + $0x7c0] sm:$0xf] }
  0xc6   : > { %2056 = vmatpush.bf16.msrb.mxu0 %v3612_v38  ;;  %v4168_v17 = vor.u32 %v4437_v21, %v4167_v41  ;;  %v908_v38 = vpop.f32.mrf.mxu3  ;;  %2025 = vmatmul.bf16.gmra.mxu2 %v6048_v22  ;;  %v4401_v14 = vld [vmem:[%s6640_s1 + $0x6d4] sm:$0xf0]  ;;  %v4152_v41 = vor.u32 %v4433_v29, %v4151_v16  ;;  %v3951_v21 = vld [vmem:[%s6640_s1 + $0x640] sm:$0xf]  ;;  %v4071_v52 = vld [vmem:[%s6640_s1 + $0x730] sm:$0xf] }
  0xc7   : > { %2075 = vmatpush.bf16.msrb.mxu1 %v3676_v46  ;;  %v6065_v58 = vadd.f32 %v908_v38, %v890_v30  ;;  %v4032_v46 = vor.u32 %v4403_v56, %v4031_v40  ;;  %2044 = vmatmul.bf16.gmra.mxu3 %v6070_v1  ;;  %v3943_v53 = vld [vmem:[%s6640_s1 + $0x630] sm:$0xf]  ;;  %v4397_v12 = vld [vmem:[%s6640_s1 + $0x6b4] sm:$0xf0]  ;;  %v3999_v29 = vld [vmem:[%s6640_s1 + $0x6a0] sm:$0xf] }
  0xc8   : > { %2094 = vmatpush.bf16.msrb.mxu2 %v3740_v49  ;;  %v4040_v49 = vor.u32 %v4405_v34, %v4039_v27  ;;  %v4079_v34 = vld [vmem:[%s6640_s1 + $0x740] sm:$0xf]  ;;  %v3944_v2 = vor.u32 %v4381_v26, %v3943_v53 }
  0xc9   : > { %2113 = vmatpush.bf16.msrb.mxu3 %v3804_v5  ;;  %v4160_v5 = vor.u32 %v4435_v0, %v4159_v63  ;;  %v4007_v0 = vld [vmem:[%s6640_s1 + $0x6b0] sm:$0xf]  ;;  %v4047_v26 = vld [vmem:[%s6640_s1 + $0x700] sm:$0xf] }
  0xca   : > { %2057 = vmatpush.bf16.msrb.mxu0 %v3604_v37 }
  0xcb   : > { %2076 = vmatpush.bf16.msrb.mxu1 %v3668_v42  ;;  %v892_v50 = vpop.f32.mrf.mxu2  ;;  %v4383_v42 = vld [vmem:[%s6640_s1 + $0x644] sm:$0xf0] }
  0xcc   : > { %2095 = vmatpush.bf16.msrb.mxu2 %v3732_v9  ;;  %v856_v9 = vpop.f32.mrf.mxu0  ;;  %v875_v18 = vpop.f32.mrf.mxu1  ;;  %v893_v37 = vadd.f32 %v892_v50, %v874_v35  ;;  %v4399_v35 = vld [vmem:[%s6640_s1 + $0x6c4] sm:$0xf0]  ;;  %v3952_v30 = vor.u32 %v4383_v42, %v3951_v21  ;;  %v4377_v21 = vld [vmem:[%s6640_s1 + $0x614] sm:$0xf0] }
  0xcd   : > { %2114 = vmatpush.bf16.msrb.mxu3 %v3796_v10  ;;  %v876_v27 = vadd.f32 %v875_v18, %v856_v9  ;;  %v4080_v10 = vor.u32 %v4415_v36, %v4079_v34  ;;  %v4016_v56 = vor.u32 %v4399_v35, %v4015_v44  ;;  %v3935_v18 = vld [vmem:[%s6640_s1 + $0x620] sm:$0xf]  ;;  %v4427_v36 = vld [vmem:[%s6640_s1 + $0x7a4] sm:$0xf0]  ;;  %v3991_v35 = vld [vmem:[%s6640_s1 + $0x690] sm:$0xf] }
  0xce   : > { %2560 = vmatpush.bf16.msra.mxu0 %v3976_v47  ;;  %v911_v45 = vpop.f32.mrf.mxu3  ;;  %v4431_v47 = vld [vmem:[%s6640_s1 + $0x7c4] sm:$0xf0]  ;;  %v4127_v34 = vld [vmem:[%s6640_s1 + $0x7a0] sm:$0xf] }
  0xcf   : > { %2579 = vmatpush.bf16.msra.mxu1 %v4040_v49  ;;  %v6115_v49 = vadd.f32 %v911_v45, %v893_v37  ;;  %v4144_v63 = vor.u32 %v4431_v47, %v4143_v43  ;;  %v4055_v37 = vld [vmem:[%s6640_s1 + $0x710] sm:$0xf]  ;;  %v4128_v45 = vor.u32 %v4427_v36, %v4127_v34  ;;  %v4393_v47 = vld [vmem:[%s6640_s1 + $0x694] sm:$0xf0]  ;;  %v4097_v34 = vld [vmem:[%s6640_s1 + $0x768] sm:$0xf0] }
  0xd0   : > { %2598 = vmatpush.bf16.msra.mxu2 %v4104_v39  ;;  %v4024_v39 = vor.u32 %v4401_v14, %v4023_v6  ;;  %v4411_v6 = vld [vmem:[%s6640_s1 + $0x724] sm:$0xf0]  ;;  %v4008_v14 = vor.u32 %v4397_v12, %v4007_v0  ;;  %v4105_v0 = vld [vmem:[%s6640_s1 + $0x778] sm:$0xf0] }
  0xd1   : > { %2617 = vmatpush.bf16.msra.mxu3 %v4168_v17  ;;  %v4413_v17 = vld [vmem:[%s6640_s1 + $0x734] sm:$0xf0] }
  0xd2   : > { %2561 = vmatpush.bf16.msra.mxu0 %v3968_v60  ;;  %v4072_v4 = vor.u32 %v4413_v17, %v4071_v52  ;;  %v4135_v60 = vld [vmem:[%s6640_s1 + $0x7b0] sm:$0xf]  ;;  %2077 = vmatmul.bf16.vlgmr.msrb.gmra.mxu1 %v5836_v31  ;;  %v4395_v31 = vld [vmem:[%s6640_s1 + $0x6a4] sm:$0xf0]  ;;  %v4425_v52 = vld [vmem:[%s6640_s1 + $0x794] sm:$0xf0] }
  0xd3   : > { %2580 = vmatpush.bf16.msra.mxu1 %v4032_v46  ;;  %v4429_v46 = vld [vmem:[%s6640_s1 + $0x7b4] sm:$0xf0]  ;;  %2058 = vmatmul.bf16.vlgmr.msrb.gmra.mxu0 %v5832_v28  ;;  %v4064_v28 = vor.u32 %v4411_v6, %v4063_v3  ;;  %v4000_v44 = vor.u32 %v4395_v31, %v3999_v29  ;;  %v4423_v3 = vld [vmem:[%s6640_s1 + $0x784] sm:$0xf0]  ;;  %v4388_v6 = vld [vmem:[%s6640_s1 + $0x674] sm:$0xf] }
  0xd4   : > { %2599 = vmatpush.bf16.msra.mxu2 %v4096_v54  ;;  %v925_v40 = vpop.f32.mrf.mxu0  ;;  %v944_v54 = vpop.f32.mrf.mxu1  ;;  %v4136_v16 = vor.u32 %v4429_v46, %v4135_v60  ;;  %v4391_v60 = vld [vmem:[%s6640_s1 + $0x684] sm:$0xf0]  ;;  %v4111_v46 = vld [vmem:[%s6640_s1 + $0x780] sm:$0xf]  ;;  %v4041_v29 = vld [vmem:[%s6640_s1 + $0x6f8] sm:$0xf0] }
  0xd5   : > { %2618 = vmatpush.bf16.msra.mxu3 %v4160_v5  ;;  %v945_v38 = vadd.f32 %v944_v54, %v925_v40  ;;  %v894_v5 = vpop.f32.mrf.mxu2  ;;  %v4407_v40 = vld [vmem:[%s6640_s1 + $0x704] sm:$0xf0]  ;;  %v3919_v54 = vld [vmem:[%s6640_s1 + $0x600] sm:$0xf]  ;;  %v4418_v31 = vld [vmem:[%s6640_s1 + $0x764] sm:$0xf] }
  0xd6   : > { %2562 = vmatpush.bf16.msra.mxu0 %v3960_v48  ;;  %v895_v9 = vadd.f32 %v894_v5, %v876_v27  ;;  %v913_v27 = vpop.f32.mrf.mxu3  ;;  %2096 = vmatmul.bf16.vlgmr.msrb.gmra.mxu2 %v5887_v57 }
  0xd7   : > { %2581 = vmatpush.bf16.msra.mxu1 %v4024_v39  ;;  %v4409_v39 = vld [vmem:[%s6640_s1 + $0x714] sm:$0xf0]  ;;  %2115 = vmatmul.bf16.vlgmr.msrb.gmra.mxu3 %v5925_v25  ;;  %v4375_v25 = vld [vmem:[%s6640_s1 + $0x604] sm:$0xf0] }
  0xd8   : > { %2600 = vmatpush.bf16.msra.mxu2 %v4088_v20  ;;  %v4379_v20 = vld [vmem:[%s6640_s1 + $0x624] sm:$0xf0]  ;;  %v6167_v50 = vadd.f32 %v913_v27, %v895_v9  ;;  %v4056_v57 = vor.u32 %v4409_v39, %v4055_v37  ;;  %v3977_v9 = vld [vmem:[%s6640_s1 + $0x678] sm:$0xf0]  ;;  %v4436_v27 = vld [vmem:[%s6640_s1 + $0x7f4] sm:$0xf]  ;;  %v4112_v39 = vor.u32 %v4423_v3, %v4111_v46 }
  0xd9   : > { %2619 = vmatpush.bf16.msra.mxu3 %v4152_v41  ;;  %v3936_v48 = vor.u32 %v4379_v20, %v3935_v18  ;;  %v3927_v41 = vld [vmem:[%s6640_s1 + $0x610] sm:$0xf]  ;;  %v3920_v20 = vor.u32 %v4375_v25, %v3919_v54  ;;  %v4025_v46 = vld [vmem:[%s6640_s1 + $0x6d8] sm:$0xf0]  ;;  %v4414_v3 = vld [vmem:[%s6640_s1 + $0x744] sm:$0xf] }
  0xda   : > { %2563 = vmatpush.bf16.msra.mxu0 %v3952_v30  ;;  %v4119_v30 = vld [vmem:[%s6640_s1 + $0x790] sm:$0xf]  ;;  %v3928_v53 = vor.u32 %v4377_v21, %v3927_v41  ;;  %v2134_v21 = vld [vmem:[%s4778_s10] sm:$0x88] }
  0xdb   : > { %2582 = vmatpush.bf16.msra.mxu1 %v4016_v56  ;;  %v4120_v12 = vor.u32 %v4425_v52, %v4119_v30  ;;  %v4402_v30 = vld [vmem:[%s6640_s1 + $0x6e4] sm:$0xf]  ;;  %v4033_v52 = vld [vmem:[%s6640_s1 + $0x6e8] sm:$0xf0]  ;;  %v2204_v54 = vunpack.c.h.b16 %v2134_v21 }
  0xdc   : > { %2601 = vmatpush.bf16.msra.mxu2 %v4080_v10  ;;  %v927_v42 = vpop.f32.mrf.mxu0  ;;  %v946_v10 = vpop.f32.mrf.mxu1 }
  0xdd   : > { %2620 = vmatpush.bf16.msra.mxu3 %v4144_v63  ;;  %v947_v43 = vadd.f32 %v946_v10, %v927_v42  ;;  %v963_v17 = vpop.f32.mrf.mxu2  ;;  %v4420_v63 = vld [vmem:[%s6640_s1 + $0x774] sm:$0xf]  ;;  %v3980_v42 = vor.u32 %v4388_v6, %v3977_v9  ;;  %v4081_v6 = vld [vmem:[%s6640_s1 + $0x748] sm:$0xf0] }
  0xde   : > { %2564 = vmatpush.bf16.msra.mxu0 %v3944_v2  ;;  %v964_v56 = vadd.f32 %v963_v17, %v945_v38  ;;  %v3983_v38 = vld [vmem:[%s6640_s1 + $0x680] sm:$0xf]  ;;  %v982_v5 = vpop.f32.mrf.mxu3  ;;  %v4048_v2 = vor.u32 %v4407_v40, %v4047_v26  ;;  %v4089_v26 = vld [vmem:[%s6640_s1 + $0x758] sm:$0xf0]  ;;  %v2203_v40 = vunpack.c.l.b16 %v2134_v21 }
  0xdf   : > { %2583 = vmatpush.bf16.msra.mxu1 %v4008_v14  ;;  %v4108_v14 = vor.u32 %v4420_v63, %v4105_v0  ;;  %v3984_v37 = vor.u32 %v4391_v60, %v3983_v38  ;;  %v4036_v63 = vor.u32 %v4402_v30, %v4033_v52  ;;  %v4384_v0 = vld [vmem:[%s6640_s1 + $0x654] sm:$0xf]  ;;  %v3961_v38 = vld [vmem:[%s6640_s1 + $0x658] sm:$0xf0] }
  0xe0   : > { %2602 = vmatpush.bf16.msra.mxu2 %v4072_v4  ;;  %v3992_v4 = vor.u32 %v4393_v47, %v3991_v35  ;;  %v6231_v18 = vadd.f32 %v982_v5, %v964_v56  ;;  %v3969_v47 = vld [vmem:[%s6640_s1 + $0x668] sm:$0xf0]  ;;  %v4400_v60 = vld [vmem:[%s6640_s1 + $0x6d4] sm:$0xf] }
  0xe1   : > { %2621 = vmatpush.bf16.msra.mxu3 %v4136_v16  ;;  %v4404_v16 = vld [vmem:[%s6640_s1 + $0x6f4] sm:$0xf]  ;;  %v6275_v56 = vld [vmem:[%s4778_s10 + $0x8] sm:$0x88] }
  0xe2   : > { %2565 = vmatpush.bf16.msra.mxu0 %v3936_v48  ;;  %v4044_v10 = vor.u32 %v4404_v16, %v4041_v29  ;;  %2082 = vmatmul.bf16.gmra.mxu1 %v6016_v51  ;;  %v4161_v51 = vld [vmem:[%s6640_s1 + $0x7e8] sm:$0xf0]  ;;  %v2205_v5 = vunpack.c.l.b16 %v6275_v56  ;;  %v2208_v16 = vpack.c.b16 %v4811_v59, %v2204_v54  ;;  %v4153_v29 = vld [vmem:[%s6640_s1 + $0x7d8] sm:$0xf0] }
  0xe3   : > { %2584 = vmatpush.bf16.msra.mxu1 %v4000_v44  ;;  %v4386_v44 = vld [vmem:[%s6640_s1 + $0x664] sm:$0xf]  ;;  %2063 = vmatmul.bf16.gmra.mxu0 %v6003_v24 }
  0xe4   : > { %2603 = vmatpush.bf16.msra.mxu2 %v4064_v28  ;;  %v4169_v28 = vld [vmem:[%s6640_s1 + $0x7f8] sm:$0xf0]  ;;  %v930_v36 = vpop.f32.mrf.mxu0  ;;  %v949_v48 = vpop.f32.mrf.mxu1  ;;  %v4434_v24 = vld [vmem:[%s6640_s1 + $0x7e4] sm:$0xf]  ;;  %v3972_v25 = vor.u32 %v4386_v44, %v3969_v47 }
  0xe5   : > { %2622 = vmatpush.bf16.msra.mxu3 %v4128_v45  ;;  %v6251_v41 = vadd.f32 %v949_v48, %v930_v36  ;;  %v965_v45 = vpop.f32.mrf.mxu2  ;;  %v4172_v35 = vor.u32 %v4436_v27, %v4169_v28  ;;  %v3964_v28 = vor.u32 %v4384_v0, %v3961_v38  ;;  %v4084_v36 = vor.u32 %v4414_v3, %v4081_v6  ;;  %v3953_v48 = vld [vmem:[%s6640_s1 + $0x648] sm:$0xf0]  ;;  %v4073_v44 = vld [vmem:[%s6640_s1 + $0x738] sm:$0xf0] }
  0xe6   : > { %2566 = vmatpush.bf16.msra.mxu0 %v3928_v53  ;;  %v966_v17 = vadd.f32 %v965_v45, %v947_v43  ;;  %v4416_v53 = vld [vmem:[%s6640_s1 + $0x754] sm:$0xf]  ;;  %v984_v43 = vpop.f32.mrf.mxu3  ;;  %2101 = vmatmul.bf16.gmra.mxu2 %v6048_v22  ;;  %v4065_v0 = vld [vmem:[%s6640_s1 + $0x728] sm:$0xf0] }
  0xe7   : > { %2585 = vmatpush.bf16.msra.mxu1 %v3992_v4  ;;  %v4432_v22 = vld [vmem:[%s6640_s1 + $0x7d4] sm:$0xf]  ;;  %2120 = vmatmul.bf16.gmra.mxu3 %v6070_v1  ;;  %v6331_v1 = vpack.c.b16 %v4836_v8, %v2205_v5  ;;  %v4430_v8 = vld [vmem:[%s6640_s1 + $0x7c4] sm:$0xf]  ;;  %v2219_v5 = vrot.slane %v4844_v13, 3 }
  0xe8   : > { %2604 = vmatpush.bf16.msra.mxu2 %v4056_v57  ;;  %v4100_v57 = vor.u32 %v4418_v31, %v4097_v34  ;;  %v6286_v4 = vadd.f32 %v984_v43, %v966_v17  ;;  %v4028_v31 = vor.u32 %v4400_v60, %v4025_v46  ;;  %v2206_v34 = vunpack.c.h.b16 %v6275_v56  ;;  %v4145_v17 = vld [vmem:[%s6640_s1 + $0x7c8] sm:$0xf0]  ;;  %v4396_v56 = vld [vmem:[%s6640_s1 + $0x6b4] sm:$0xf] }
  0xe9   : > { %2623 = vmatpush.bf16.msra.mxu3 %v4120_v12  ;;  %v4092_v12 = vor.u32 %v4416_v53, %v4089_v26  ;;  %v4380_v53 = vld [vmem:[%s6640_s1 + $0x634] sm:$0xf]  ;;  %v3945_v26 = vld [vmem:[%s6640_s1 + $0x638] sm:$0xf0]  ;;  %v2218_v43 = vrot.slane %v6331_v1, 3 }
  0xea   : > { %2567 = vmatpush.bf16.msra.mxu0 %v3920_v20  ;;  %v3948_v6 = vor.u32 %v4380_v53, %v3945_v26  ;;  %v4406_v26 = vld [vmem:[%s6640_s1 + $0x704] sm:$0xf] }
  0xeb   : > { %2586 = vmatpush.bf16.msra.mxu1 %v3984_v37  ;;  %v4398_v37 = vld [vmem:[%s6640_s1 + $0x6c4] sm:$0xf] }
  0xec   : > { %2605 = vmatpush.bf16.msra.mxu2 %v4048_v2  ;;  %v4164_v2 = vor.u32 %v4434_v24, %v4161_v51  ;;  %v932_v9 = vpop.f32.mrf.mxu0  ;;  %v951_v20 = vpop.f32.mrf.mxu1  ;;  %v4009_v24 = vld [vmem:[%s6640_s1 + $0x6b8] sm:$0xf0]  ;;  %v2720_v51 = vld [vmem:[%s6641_s2] sm:$0xff] }
  0xed   : > { %2624 = vmatpush.bf16.msra.mxu3 %v4112_v39  ;;  %v6313_v27 = vadd.f32 %v951_v20, %v932_v9  ;;  %v968_v59 = vpop.f32.mrf.mxu2  ;;  %v4017_v39 = vld [vmem:[%s6640_s1 + $0x6c8] sm:$0xf0]  ;;  %v4012_v9 = vor.u32 %v4396_v56, %v4009_v24  ;;  %v4428_v20 = vld [vmem:[%s6640_s1 + $0x7b4] sm:$0xf] }
  0xee   : > { %2636 = vmatpush.bf16.msrb.mxu0 %v3980_v42  ;;  %v969_v21 = vadd.f32 %v968_v59, %v6251_v41  ;;  %v4156_v42 = vor.u32 %v4432_v22, %v4153_v29  ;;  %v2216_v41 = vrot.slane %v4820_v62, 3  ;;  %v987_v47 = vpop.f32.mrf.mxu3  ;;  %v4020_v52 = vor.u32 %v4398_v37, %v4017_v39  ;;  %v4057_v37 = vld [vmem:[%s6640_s1 + $0x718] sm:$0xf0] }
  0xef   : > { %2655 = vmatpush.bf16.msrb.mxu1 %v4044_v10  ;;  %v4412_v10 = vld [vmem:[%s6640_s1 + $0x734] sm:$0xf] }
  0xf0   : > { %2674 = vmatpush.bf16.msrb.mxu2 %v4108_v14  ;;  %v2207_v14 = vpack.c.b16 %v4807_v55, %v2203_v40  ;;  %v4382_v55 = vld [vmem:[%s6640_s1 + $0x644] sm:$0xf]  ;;  %v6353_v40 = vadd.f32 %v987_v47, %v969_v21  ;;  %v4076_v54 = vor.u32 %v4412_v10, %v4073_v44  ;;  %v4129_v44 = vld [vmem:[%s6640_s1 + $0x7a8] sm:$0xf0] }
  0xf1   : > { %2693 = vmatpush.bf16.msrb.mxu3 %v4172_v35  ;;  %v2213_v35 = vrot.slane %v4818_v61, 3  ;;  %v3956_v30 = vor.u32 %v4382_v55, %v3953_v48  ;;  %v4408_v48 = vld [vmem:[%s6640_s1 + $0x714] sm:$0xf]  ;;  %v4426_v21 = vld [vmem:[%s6640_s1 + $0x7a4] sm:$0xf]  ;;  %v2230_v61 = vrot.slane %v5852_v19, 3 }
  0xf2   : > { %2637 = vmatpush.bf16.msrb.mxu0 %v3972_v25  ;;  %v2212_v45 = vrot.slane %v2207_v14, 3  ;;  %v2210_v25 = vpack.c.b16 %v4878_v32, %v2206_v34  ;;  %v4137_v14 = vld [vmem:[%s6640_s1 + $0x7b8] sm:$0xf0]  ;;  %v4060_v47 = vor.u32 %v4408_v48, %v4057_v37 }
  0xf3   : > { %2656 = vmatpush.bf16.msrb.mxu1 %v4036_v63  ;;  %v4410_v63 = vld [vmem:[%s6640_s1 + $0x724] sm:$0xf]  ;;  %v4140_v39 = vor.u32 %v4428_v20, %v4137_v14  ;;  %v2224_v14 = vrot.slane %v5813_v23, 3  ;;  %v2722_v23 = vld [vmem:[%s6641_s2 + $0x10] sm:$0xff] }
  0xf4   : > { %2675 = vmatpush.bf16.msrb.mxu2 %v4100_v57  ;;  %v2215_v57 = vrot.slane %v2208_v16, 3  ;;  %v1329_v38 = vpop.f32.mrf.mxu0  ;;  %v1348_v60 = vpop.f32.mrf.mxu1  ;;  %v6375_v46 = vsel %vm2211_vm2, %v2212_v45, %v2213_v35  ;;  %v4378_v16 = vld [vmem:[%s6640_s1 + $0x624] sm:$0xf]  ;;  %v4068_v29 = vor.u32 %v4410_v63, %v4065_v0  ;;  %v2221_v34 = vrot.slane %v2210_v25, 3  ;;  %v4376_v45 = vld [vmem:[%s6640_s1 + $0x614] sm:$0xf] }
  0xf5   : > { %2694 = vmatpush.bf16.msrb.mxu3 %v4164_v2  ;;  %v4148_v2 = vor.u32 %v4430_v8, %v4145_v17  ;;  %v1330_v3 = vadd.f32 %v1329_v38, %v5990_v7  ;;  %v970_v22 = vpop.f32.mrf.mxu2  ;;  %v3937_v7 = vld [vmem:[%s6640_s1 + $0x628] sm:$0xf0]  ;;  %2568 = vmatmul.bf16.vlgmr.msra.gmra.mxu0 %v6375_v46  ;;  %v4424_v0 = vld [vmem:[%s6640_s1 + $0x794] sm:$0xf]  ;;  %v4374_v38 = vld [vmem:[%s6640_s1 + $0x604] sm:$0xf]  ;;  %v2225_v48 = vsel %vm2211_vm2, %v2213_v35, %v2224_v14 }
  0xf6   : > { %2638 = vmatpush.bf16.msrb.mxu0 %v3964_v28  ;;  %v6380_v32 = vsel %vm2211_vm2, %v2215_v57, %v2216_v41  ;;  %v4394_v28 = vld [vmem:[%s6640_s1 + $0x6a4] sm:$0xf]  ;;  %v971_v55 = vadd.f32 %v970_v22, %v6313_v27  ;;  %v6415_v27 = vsel %vm2211_vm2, %v2218_v43, %v2219_v5  ;;  %v989_v1 = vpop.f32.mrf.mxu3  ;;  %v3929_v57 = vld [vmem:[%s6640_s1 + $0x618] sm:$0xf0]  ;;  %v2721_v17 = vld [vmem:[%s6641_s2 + $0x8] sm:$0xff] }
  0xf7   : > { %2657 = vmatpush.bf16.msrb.mxu1 %v4028_v31  ;;  %v4001_v31 = vld [vmem:[%s6640_s1 + $0x6a8] sm:$0xf0]  ;;  %v1349_v59 = vadd.f32 %v1348_v60, %v1330_v3  ;;  %2606 = vmatmul.bf16.vlgmr.msra.gmra.mxu2 %v6415_v27  ;;  %v3932_v25 = vor.u32 %v4376_v45, %v3929_v57  ;;  %v4390_v3 = vld [vmem:[%s6640_s1 + $0x684] sm:$0xf] }
  0xf8   : > { %2676 = vmatpush.bf16.msrb.mxu2 %v4092_v12  ;;  %v4458_v12 = vmov 0   ;;  %2587 = vmatmul.bf16.vlgmr.msra.gmra.mxu1 %v6380_v32  ;;  %v4004_v10 = vor.u32 %v4394_v28, %v4001_v31  ;;  %v6429_v8 = vadd.f32 %v989_v1, %v971_v55  ;;  %v4422_v31 = vld [vmem:[%s6640_s1 + $0x784] sm:$0xf]  ;;  %v4113_v55 = vld [vmem:[%s6640_s1 + $0x788] sm:$0xf0] }
  0xf9   : > { %2695 = vmatpush.bf16.msrb.mxu3 %v4156_v42  ;;  %4448 = vset.pattern.permute.xlu0 %v4458_v12  ;;  %v3940_v42 = vor.u32 %v4378_v16, %v3937_v7  ;;  %v2226_v16 = vrot.slane %v5819_v15, 3 }
  0xfa   : > { %2726 = vperm.xlu0 %4448, %v2720_v51   ;;  %4449 = vset.pattern.permute.xlu1 %v4458_v12  ;;  %v4132_v51 = vor.u32 %v4426_v21, %v4129_v44  ;;  %v4121_v12 = vld [vmem:[%s6640_s1 + $0x798] sm:$0xf0]  ;;  %v4116_v21 = vor.u32 %v4422_v31, %v4113_v55 }
  0xfb   : > { %2639 = vmatpush.bf16.msrb.mxu0 %v3956_v30  ;;  %2658 = vmatpush.bf16.msrb.mxu1 %v4020_v52  ;;  %v4392_v30 = vld [vmem:[%s6640_s1 + $0x694] sm:$0xf]  ;;  %v3993_v52 = vld [vmem:[%s6640_s1 + $0x698] sm:$0xf0]  ;;  %v4124_v22 = vor.u32 %v4424_v0, %v4121_v12  ;;  %v2227_v37 = vsel %vm2211_vm2, %v2216_v41, %v2226_v16 }
  0xfc   : > { %2677 = vmatpush.bf16.msrb.mxu2 %v4084_v36  ;;  %v2222_v36 = vrot.slane %v4880_v33, 3  ;;  %v1331_v56 = vpop.f32.mrf.mxu0  ;;  %v1350_v24 = vpop.f32.mrf.mxu1  ;;  %v3996_v63 = vor.u32 %v4392_v30, %v3993_v52  ;;  %2736 = vperm.xlu1 %4449, %v2722_v23  }
  0xfd   : > { %2696 = vmatpush.bf16.msrb.mxu3 %v4148_v2  ;;  %v1332_v43 = vadd.f32 %v1331_v56, %v6065_v58  ;;  %v1367_v60 = vpop.f32.mrf.mxu2  ;;  %v3921_v2 = vld [vmem:[%s6640_s1 + $0x608] sm:$0xf0] }
  0xfe   : > { %v6444_v53 = vsel %vm2211_vm2, %v2221_v34, %v2222_v36  ;;  %v3924_v7 = vor.u32 %v4374_v38, %v3921_v2  ;;  %v2231_v41 = vsel %vm2211_vm2, %v2222_v36, %v2230_v61 }
  0xff   : > { %2640 = vmatpush.bf16.msrb.mxu0 %v3948_v6  ;;  %2659 = vmatpush.bf16.msrb.mxu1 %v4012_v9  ;;  %v3985_v6 = vld [vmem:[%s6640_s1 + $0x688] sm:$0xf0]  ;;  %v1368_v9 = vadd.f32 %v1367_v60, %v1349_v59  ;;  %v1351_v20 = vadd.f32 %v1350_v24, %v1332_v43 }
 0x100   : > { %2678 = vmatpush.bf16.msrb.mxu2 %v4076_v54  ;;  %v4049_v54 = vld [vmem:[%s6640_s1 + $0x708] sm:$0xf0]  ;;  %2625 = vmatmul.bf16.vlgmr.msra.gmra.mxu3 %v6444_v53  ;;  %v3988_v28 = vor.u32 %v4390_v3, %v3985_v6 }
 0x101   : > { %2697 = vmatpush.bf16.msrb.mxu3 %v4140_v39  ;;  %v4052_v58 = vor.u32 %v4406_v26, %v4049_v54  ;;  %v2228_v39 = vrot.slane %v5850_v11, 3 }
 0x102   : > { %2731 = vperm.xlu0 %4448, %v2721_v17  }
 0x103   : > { %2641 = vmatpush.bf16.msrb.mxu0 %v3940_v42  ;;  %2660 = vmatpush.bf16.msrb.mxu1 %v4004_v10  ;;  %v2229_v62 = vsel %vm2211_vm2, %v2219_v5, %v2228_v39 }
 0x104   : > { %2679 = vmatpush.bf16.msrb.mxu2 %v4068_v29  ;;  %v1386_v29 = vpop.f32.mrf.mxu3  ;;  %v1334_v15 = vpop.f32.mrf.mxu0 }
 0x105   : > { %2698 = vmatpush.bf16.msrb.mxu3 %v4132_v51  ;;  %v6480_v59 = vadd.f32 %v1386_v29, %v1368_v9  ;;  %v1353_v34 = vpop.f32.mrf.mxu1  ;;  %v1335_v1 = vadd.f32 %v1334_v15, %v6115_v49  ;;  %v1369_v42 = vpop.f32.mrf.mxu2  ;;  %2573 = vmatmul.bf16.gmra.mxu0 %v2225_v48  ;;  %v2723_v49 = vld [vmem:[%s6641_s2 + $0x18] sm:$0xff] }
 0x106   : > { %v1370_v10 = vadd.f32 %v1369_v42, %v1351_v20  ;;  %2741 = vperm.xlu1 %4449, %v2723_v49  }
 0x107   : > { %2642 = vmatpush.bf16.msrb.mxu0 %v3932_v25  ;;  %2661 = vmatpush.bf16.msrb.mxu1 %v3996_v63  ;;  %v1354_v44 = vadd.f32 %v1353_v34, %v1335_v1 }
 0x108   : > { %2680 = vmatpush.bf16.msrb.mxu2 %v4060_v47  ;;  %2592 = vmatmul.bf16.gmra.mxu1 %v2227_v37 }
 0x109   : > { %2699 = vmatpush.bf16.msrb.mxu3 %v4124_v22  ;;  %2611 = vmatmul.bf16.gmra.mxu2 %v2229_v62 }
 0x10b   : > { %2643 = vmatpush.bf16.msrb.mxu0 %v3924_v7  ;;  %2662 = vmatpush.bf16.msrb.mxu1 %v3988_v28 }
 0x10c   : > { %2681 = vmatpush.bf16.msrb.mxu2 %v4052_v58  ;;  %v1388_v35 = vpop.f32.mrf.mxu3  ;;  %v1336_v45 = vpop.f32.mrf.mxu0 }
 0x10d   : > { %2700 = vmatpush.bf16.msrb.mxu3 %v4116_v21  ;;  %v6497_v11 = vadd.f32 %v1388_v35, %v1370_v10  ;;  %v1355_v19 = vpop.f32.mrf.mxu1  ;;  %v1337_v13 = vadd.f32 %v1336_v45, %v6167_v50  ;;  %v1372_v5 = vpop.f32.mrf.mxu2 }
 0x10e   : > { %v1373_v57 = vadd.f32 %v1372_v5, %v1354_v44 }
 0x10f   : > { %v1356_v47 = vadd.f32 %v1355_v19, %v1337_v13 }
 0x110   : > { %2630 = vmatmul.bf16.gmra.mxu3 %v2231_v41 }
 0x114   : > { %v1391_v30 = vpop.f32.mrf.mxu3  ;;  %v1405_v17 = vpop.f32.mrf.mxu0 }
 0x115   : > { %v6506_v52 = vadd.f32 %v1391_v30, %v1373_v57  ;;  %v1424_v26 = vpop.f32.mrf.mxu1  ;;  %v1406_v54 = vadd.f32 %v1405_v17, %v6231_v18  ;;  %v1374_v56 = vpop.f32.mrf.mxu2  ;;  %2644 = vmatmul.bf16.vlgmr.msrb.gmra.mxu0 %v6375_v46 }
 0x116   : > { %v1375_v33 = vadd.f32 %v1374_v56, %v1356_v47 }
 0x117   : > { %v1425_v24 = vadd.f32 %v1424_v26, %v1406_v54 }
 0x118   : > { %2663 = vmatmul.bf16.vlgmr.msrb.gmra.mxu1 %v6380_v32 }
 0x119   : > { %2682 = vmatmul.bf16.vlgmr.msrb.gmra.mxu2 %v6415_v27 }
 0x11c   : > { %v1393_v36 = vpop.f32.mrf.mxu3  ;;  %v1407_v51 = vpop.f32.mrf.mxu0 }
 0x11d   : > { %v6511_v50 = vadd.f32 %v1393_v36, %v1375_v33  ;;  %v1426_v43 = vpop.f32.mrf.mxu1  ;;  %v1408_v25 = vadd.f32 %v1407_v51, %v6286_v4  ;;  %v1443_v63 = vpop.f32.mrf.mxu2 }
 0x11e   : > { %v1444_v18 = vadd.f32 %v1443_v63, %v1425_v24 }
 0x11f   : > { %v1427_v0 = vadd.f32 %v1426_v43, %v1408_v25 }
 0x120   : > { %2701 = vmatmul.bf16.vlgmr.msrb.gmra.mxu3 %v6444_v53 }
 0x124   : > { %v1462_v12 = vpop.f32.mrf.mxu3  ;;  %v1410_v46 = vpop.f32.mrf.mxu0 }
 0x125   : > { %v6516_v38 = vadd.f32 %v1462_v12, %v1444_v18  ;;  %v1429_v60 = vpop.f32.mrf.mxu1  ;;  %v1411_v32 = vadd.f32 %v1410_v46, %v6353_v40  ;;  %v1445_v58 = vpop.f32.mrf.mxu2  ;;  %2649 = vmatmul.bf16.gmra.mxu0 %v2225_v48 }
 0x126   : > { %v1446_v2 = vadd.f32 %v1445_v58, %v1427_v0 }
 0x127   : > { %v1430_v3 = vadd.f32 %v1429_v60, %v1411_v32 }
 0x128   : > { %2668 = vmatmul.bf16.gmra.mxu1 %v2227_v37 }
 0x129   : > { %2687 = vmatmul.bf16.gmra.mxu2 %v2229_v62 }
 0x12c   : > { %v1464_v27 = vpop.f32.mrf.mxu3  ;;  %v1412_v4 = vpop.f32.mrf.mxu0 }
 0x12d   : > { %v6519_v6 = vadd.f32 %v1464_v27, %v1446_v2  ;;  %v1431_v53 = vpop.f32.mrf.mxu1  ;;  %v1413_v9 = vadd.f32 %v1412_v4, %v6429_v8  ;;  %v1448_v20 = vpop.f32.mrf.mxu2 }
 0x12e   : > { %v1449_v14 = vadd.f32 %v1448_v20, %v1430_v3 }
 0x12f   : > { %v1432_v16 = vadd.f32 %v1431_v53, %v1413_v9 }
 0x130   : > { %2706 = vmatmul.bf16.gmra.mxu3 %v2231_v41 }
 0x134   : > { %v1467_v22 = vpop.f32.mrf.mxu3  ;;  %v1983_v40 = vpop.f32.mrf.mxu0 }
 0x135   : > { %v6522_v29 = vadd.f32 %v1467_v22, %v1449_v14  ;;  %v2002_v7 = vpop.f32.mrf.mxu1  ;;  %v1450_v28 = vpop.f32.mrf.mxu2 }
 0x136   : > { %v1451_v31 = vadd.f32 %v1450_v28, %v1432_v16  ;;  %v2003_v51 = vadd.f32 %v2002_v7, %v1983_v40 }
 0x13c   : > { %v1469_v55 = vpop.f32.mrf.mxu3  ;;  %v1985_v15 = vpop.f32.mrf.mxu0 }
 0x13d   : > { %v6524_v23 = vadd.f32 %v1469_v55, %v1451_v31  ;;  %v2004_v34 = vpop.f32.mrf.mxu1  ;;  %v2021_v48 = vpop.f32.mrf.mxu2 }
 0x13e   : > { %v2022_v63 = vadd.f32 %v2021_v48, %v2003_v51  ;;  %v2005_v58 = vadd.f32 %v2004_v34, %v1985_v15 }
 0x144   : > { %v2040_v37 = vpop.f32.mrf.mxu3  ;;  %v1988_v39 = vpop.f32.mrf.mxu0 }
 0x145   : > { %v2007_v8 = vpop.f32.mrf.mxu1  ;;  %v2023_v21 = vpop.f32.mrf.mxu2  ;;  %v2041_v46 = vadd.f32 %v2040_v37, %v2022_v63 }
 0x146   : > { %v2024_v4 = vadd.f32 %v2023_v21, %v2005_v58  ;;  %v2008_v40 = vadd.f32 %v2007_v8, %v1988_v39 }
 0x147   : > { %v2126_v27 = vadd.f32 %v2041_v46, %v6480_v59 }
 0x14c   : > { %v2042_v1 = vpop.f32.mrf.mxu3  ;;  %v6526_v42 = vpop.f32.mrf.mxu0 }
 0x14d   : > { %v2009_v10 = vpop.f32.mrf.mxu1  ;;  %v2026_v44 = vpop.f32.mrf.mxu2  ;;  %v2043_v22 = vadd.f32 %v2042_v1, %v2024_v4 }
 0x14e   : > { %v2027_v15 = vadd.f32 %v2026_v44, %v2008_v40  ;;  %v2010_v63 = vadd.f32 %v2009_v10, %v6526_v42 }
 0x14f   : > { %v2128_v55 = vadd.f32 %v2043_v22, %v6497_v11 }
 0x154   : > { %v2045_v61 = vpop.f32.mrf.mxu3  ;;  %v6528_v62 = vpop.f32.mrf.mxu0 }
 0x155   : > { %v6530_v35 = vpop.f32.mrf.mxu1  ;;  %v6532_v49 = vpop.f32.mrf.mxu2  ;;  %v2046_v51 = vadd.f32 %v2045_v61, %v2027_v15 }
 0x156   : > { %v2079_v10 = vadd.f32 %v6530_v35, %v6528_v62 }
 0x157   : > { %v2130_v46 = vadd.f32 %v2046_v51, %v6506_v52 }
 0x15c   : > { %v6534_v41 = vpop.f32.mrf.mxu3  ;;  %v6536_v45 = vpop.f32.mrf.mxu0 }
 0x15d   : > { %v6538_v19 = vpop.f32.mrf.mxu1  ;;  %v6540_v13 = vpop.f32.mrf.mxu2 }
 0x15e   : > { %v2098_v22 = vadd.f32 %v6540_v13, %v2079_v10 }
 0x164   : > { %v6542_v5 = vpop.f32.mrf.mxu3  ;;  %v6544_v57 = vpop.f32.mrf.mxu0 }
 0x165   : > { %v6546_v47 = vpop.f32.mrf.mxu1  ;;  %v6548_v30 = vpop.f32.mrf.mxu2  ;;  %v2117_v35 = vadd.f32 %v6542_v5, %v2098_v22 }
 0x16c   : > { %v6550_v17 = vpop.f32.mrf.mxu3  ;;  %v6552_v26 = vpop.f32.mrf.mxu0 }
 0x16d   : > { %v6554_v54 = vpop.f32.mrf.mxu1  ;;  %v6556_v56 = vpop.f32.mrf.mxu2 }
 0x16e   : > { %v6564_v3 = vpop.permute.xlu0 %2726  ;;  %v6581_v44 = vpop.permute.xlu1 %2736 }
 0x174   : > { %v6558_v33 = vpop.f32.mrf.mxu3  ;;  %v2569_v24 = vpop.f32.mrf.mxu0 }
 0x175   : > { %v2588_v36 = vpop.f32.mrf.mxu1  ;;  %v6560_v43 = vpop.f32.mrf.mxu2 }
 0x176   : > { %v2589_v18 = vadd.f32 %v2588_v36, %v2569_v24  ;;  %v6576_v37 = vpop.permute.xlu0 %2731 }
 0x17c   : > { %v6562_v25 = vpop.f32.mrf.mxu3  ;;  %v2571_v0 = vpop.f32.mrf.mxu0 }
 0x17d   : > { %v2590_v12 = vpop.f32.mrf.mxu1  ;;  %v2607_v60 = vpop.f32.mrf.mxu2 }
 0x17e   : > { %v2608_v32 = vadd.f32 %v2607_v60, %v2589_v18  ;;  %v2591_v16 = vadd.f32 %v2590_v12, %v2571_v0  ;;  %v2029_v60 = vadd.f32 %v6532_v49, %v2010_v63 }
 0x180   : > { %v2048_v42 = vadd.f32 %v6534_v41, %v2029_v60  ;;  %v6592_v41 = vpop.permute.xlu1 %2741 }
 0x182   : > { %v2132_v49 = vadd.f32 %v2048_v42, %v6511_v50 }
 0x184   : > { %v2626_v2 = vpop.f32.mrf.mxu3  ;;  %v2574_v20 = vpop.f32.mrf.mxu0 }
 0x185   : > { %v2627_v53 = vadd.f32 %v2626_v2, %v2608_v32  ;;  %v2593_v14 = vpop.f32.mrf.mxu1  ;;  %v2609_v28 = vpop.f32.mrf.mxu2 }
 0x186   : > { %v2610_v31 = vadd.f32 %v2609_v28, %v2591_v16  ;;  %v2594_v48 = vadd.f32 %v2593_v14, %v2574_v20 }
 0x187   : > { %v2712_v9 = vadd.f32 %v2627_v53, %v2126_v27 }
 0x189   : > { %v2744_v7 = vmul.f32 %v6564_v3, %v2712_v9 }
 0x18b   : > { %2800 = vst [vmem:[%s6571_s11] sm:$0xff] %v2744_v7  ;;  %v2770_v18 = vmul.f32 %v2744_v7, %v2744_v7 }
 0x18c   : > { %v2628_v59 = vpop.f32.mrf.mxu3  ;;  %v2576_v24 = vpop.f32.mrf.mxu0 }
 0x18d   : > { %v2629_v34 = vadd.f32 %v2628_v59, %v2610_v31  ;;  %v2595_v36 = vpop.f32.mrf.mxu1  ;;  %v2612_v8 = vpop.f32.mrf.mxu2 }
 0x18e   : > { %v2613_v1 = vadd.f32 %v2612_v8, %v2594_v48  ;;  %v2596_v4 = vadd.f32 %v2595_v36, %v2576_v24  ;;  %v2127_v36 = vadd.f32 %v2117_v35, %v6516_v38 }
 0x18f   : > { %v2714_v21 = vadd.f32 %v2629_v34, %v2128_v55  ;;  %v2081_v34 = vadd.f32 %v6538_v19, %v6536_v45  ;;  %v2084_v19 = vadd.f32 %v6546_v47, %v6544_v57 }
 0x191   : > { %v2746_v39 = vmul.f32 %v6576_v37, %v2714_v21  ;;  %v2100_v13 = vadd.f32 %v6548_v30, %v2081_v34 }
 0x193   : > { %v2752_v0 = vadd.f32 %v2746_v39, %v2744_v7  ;;  %v2772_v12 = vmul.f32 %v2746_v39, %v2746_v39  ;;  %2802 = vst [vmem:[%s6571_s11 + $0x10] sm:$0xff] %v2746_v39 }
 0x194   : > { %v2631_v11 = vpop.f32.mrf.mxu3  ;;  %v2645_v2 = vpop.f32.mrf.mxu0 }
 0x195   : > { %v2778_v32 = vadd.f32 %v2772_v12, %v2770_v18  ;;  %v2632_v61 = vadd.f32 %v2631_v11, %v2613_v1  ;;  %v2664_v27 = vpop.f32.mrf.mxu1  ;;  %v2614_v9 = vpop.f32.mrf.mxu2  ;;  %v2119_v18 = vadd.f32 %v6550_v17, %v2100_v13  ;;  %v2103_v17 = vadd.f32 %v6556_v56, %v2084_v19 }
 0x196   : > { %v2615_v20 = vadd.f32 %v2614_v9, %v2596_v4  ;;  %v2665_v28 = vadd.f32 %v2664_v27, %v2645_v2 }
 0x197   : > { %v2716_v58 = vadd.f32 %v2632_v61, %v2130_v46 }
 0x199   : > { %v2748_v53 = vmul.f32 %v6581_v44, %v2716_v58  ;;  %v2129_v58 = vadd.f32 %v2119_v18, %v6519_v6  ;;  %v2122_v6 = vadd.f32 %v6558_v33, %v2103_v17 }
 0x19b   : > { %v2753_v14 = vadd.f32 %v2752_v0, %v2748_v53  ;;  %v2774_v16 = vmul.f32 %v2748_v53, %v2748_v53  ;;  %2804 = vst [vmem:[%s6571_s11 + $0x20] sm:$0xff] %v2748_v53 }
 0x19c   : > { %v2633_v52 = vpop.f32.mrf.mxu3  ;;  %v2647_v62 = vpop.f32.mrf.mxu0 }
 0x19d   : > { %v2779_v40 = vadd.f32 %v2778_v32, %v2774_v16  ;;  %v2634_v7 = vadd.f32 %v2633_v52, %v2615_v20  ;;  %v2683_v55 = vpop.f32.mrf.mxu2  ;;  %v2666_v15 = vpop.f32.mrf.mxu1 }
 0x19e   : > { %v2684_v50 = vadd.f32 %v2683_v55, %v2665_v28  ;;  %v2667_v45 = vadd.f32 %v2666_v15, %v2647_v62 }
 0x19f   : > { %v2718_v31 = vadd.f32 %v2634_v7, %v2132_v49 }
 0x1a1   : > { %v2750_v59 = vmul.f32 %v6592_v41, %v2718_v31 }
 0x1a3   : > { %v2754_v48 = vadd.f32 %v2753_v14, %v2750_v59  ;;  %v2776_v21 = vmul.f32 %v2750_v59, %v2750_v59  ;;  %2806 = vst [vmem:[%s6571_s11 + $0x30] sm:$0xff] %v2750_v59  ;;  %v2086_v14 = vadd.f32 %v6554_v54, %v6552_v26 }
 0x1a4   : > { %v2702_v24 = vpop.f32.mrf.mxu3  ;;  %v2650_v32 = vpop.f32.mrf.mxu0 }
 0x1a5   : > { %v2755_v51 = vrot.slane %v2754_v48, 4  ;;  %v2780_v39 = vadd.f32 %v2779_v40, %v2776_v21  ;;  %v2703_v5 = vadd.f32 %v2702_v24, %v2684_v50  ;;  %v2685_v11 = vpop.f32.mrf.mxu2  ;;  %v2669_v61 = vpop.f32.mrf.mxu1  ;;  %v2131_v40 = vadd.f32 %v2122_v6, %v6522_v29 }
 0x1a6   : > { %v2686_v46 = vadd.f32 %v2685_v11, %v2667_v45  ;;  %v2670_v47 = vadd.f32 %v2669_v61, %v2650_v32  ;;  %v2105_v33 = vadd.f32 %v6560_v43, %v2086_v14 }
 0x1a7   : > { %v2756_v8 = vadd.f32 %v2755_v51, %v2754_v48  ;;  %v2781_v1 = vrot.slane %v2780_v39, 4  ;;  %v2713_v63 = vadd.f32 %v2703_v5, %v2127_v36 }
 0x1a8   : > { %v2124_v26 = vadd.f32 %v6562_v25, %v2105_v33 }
 0x1a9   : > { %v2757_v0 = vrot.slane %v2756_v8, 2  ;;  %v2782_v12 = vadd.f32 %v2781_v1, %v2780_v39  ;;  %v2745_v30 = vmul.f32 %v6564_v3, %v2713_v63 }
 0x1aa   : > { %v2133_v29 = vadd.f32 %v2124_v26, %v6524_v23 }
 0x1ab   : > { %v2758_v38 = vadd.f32 %v2757_v0, %v2756_v8  ;;  %v2783_v60 = vrot.slane %v2782_v12, 2  ;;  %2801 = vst [vmem:[%s6571_s11 + $0x8] sm:$0xff] %v2745_v30  ;;  %v2771_v16 = vmul.f32 %v2745_v30, %v2745_v30 }
 0x1ac   : > { %v2704_v2 = vpop.f32.mrf.mxu3  ;;  %v2652_v31 = vpop.f32.mrf.mxu0 }
 0x1ad   : > { %v2759_v27 = vrot.slane %v2758_v38, 1  ;;  %v2784_v4 = vadd.f32 %v2783_v60, %v2782_v12  ;;  %v2705_v57 = vadd.f32 %v2704_v2, %v2686_v46  ;;  %v2688_v9 = vpop.f32.mrf.mxu2 }
 0x1ae   : > { %v2689_v20 = vadd.f32 %v2688_v9, %v2670_v47 }
 0x1af   : > { %v2760_v3 = vadd.f32 %v2759_v27, %v2758_v38  ;;  %v2785_v42 = vrot.slane %v2784_v4, 1  ;;  %v2715_v10 = vadd.f32 %v2705_v57, %v2129_v58 }
 0x1b1   : > { %v2786_v56 = vadd.f32 %v2785_v42, %v2784_v4  ;;  %2796 = vst [vmem:[%s6612_s15] sm:$0xff] %v2760_v3  ;;  %v2747_v53 = vmul.f32 %v6576_v37, %v2715_v10  ;;  %v2671_v37 = vpop.f32.mrf.mxu1 }
 0x1b2   : > { %v2672_v35 = vadd.f32 %v2671_v37, %v2652_v31 }
 0x1b3   : > { %2798 = vst [vmem:[%s6617_s17] sm:$0xff] %v2786_v56  ;;  %v2761_v52 = vadd.f32 %v2747_v53, %v2745_v30  ;;  %v2773_v49 = vmul.f32 %v2747_v53, %v2747_v53 }
 0x1b4   : > { %2803 = vst [vmem:[%s6571_s11 + $0x18] sm:$0xff] %v2747_v53  ;;  %v2707_v22 = vpop.f32.mrf.mxu3 }
 0x1b5   : > { %v2787_v7 = vadd.f32 %v2773_v49, %v2771_v16  ;;  %v2708_v28 = vadd.f32 %v2707_v22, %v2689_v20  ;;  %v2690_v59 = vpop.f32.mrf.mxu2 }
 0x1b6   : > { %v2691_v55 = vadd.f32 %v2690_v59, %v2672_v35 }
 0x1b7   : > { %v2717_v62 = vadd.f32 %v2708_v28, %v2131_v40 }
 0x1b9   : > { %v2749_v54 = vmul.f32 %v6581_v44, %v2717_v62 }
 0x1bb   : > { %v2762_v15 = vadd.f32 %v2761_v52, %v2749_v54  ;;  %v2775_v34 = vmul.f32 %v2749_v54, %v2749_v54  ;;  %2805 = vst [vmem:[%s6571_s11 + $0x28] sm:$0xff] %v2749_v54 }
 0x1bc   : > { %v2709_v50 = vpop.f32.mrf.mxu3 }
 0x1bd   : > { %v2788_v43 = vadd.f32 %v2787_v7, %v2775_v34  ;;  %v2710_v48 = vadd.f32 %v2709_v50, %v2691_v55 }
 0x1bf   : > { %v2719_v21 = vadd.f32 %v2710_v48, %v2133_v29 }
 0x1c1   : > { %v2751_v13 = vmul.f32 %v6592_v41, %v2719_v21 }
 0x1c3   : > { %v2763_v24 = vadd.f32 %v2762_v15, %v2751_v13  ;;  %v2777_v36 = vmul.f32 %v2751_v13, %v2751_v13  ;;  %2807 = vst [vmem:[%s6571_s11 + $0x38] sm:$0xff] %v2751_v13 }
 0x1c5   : > { %v2764_v25 = vrot.slane %v2763_v24, 4  ;;  %v2789_v44 = vadd.f32 %v2788_v43, %v2777_v36 }
 0x1c7   : > { %v2765_v51 = vadd.f32 %v2764_v25, %v2763_v24  ;;  %v2790_v39 = vrot.slane %v2789_v44, 4 }
 0x1c9   : > { %v2766_v5 = vrot.slane %v2765_v51, 2  ;;  %v2791_v8 = vadd.f32 %v2790_v39, %v2789_v44 }
 0x1cb   : > { %v2767_v1 = vadd.f32 %v2766_v5, %v2765_v51  ;;  %v2792_v63 = vrot.slane %v2791_v8, 2 }
 0x1cd   : > { %v2768_v18 = vrot.slane %v2767_v1, 1  ;;  %v2793_v23 = vadd.f32 %v2792_v63, %v2791_v8 }
 0x1cf   : > { %v2769_v45 = vadd.f32 %v2768_v18, %v2767_v1  ;;  %v2794_v19 = vrot.slane %v2793_v23, 1 }
 0x1d1   : > { %v2795_v0 = vadd.f32 %v2794_v19, %v2793_v23  ;;  %2797 = vst [vmem:[%s6612_s15 + $0x8] sm:$0xff] %v2769_v45 }
 0x1d3   : > { %2799 = vst [vmem:[%s6617_s17 + $0x8] sm:$0xff] %v2795_v0 }
 0x1d4 PF: > { %s16_s18 = sadd.s32 1, %s4456_s18  }
 0x1d5   : > { %p13_p4 = scmp.ge.s32.totalorder %s16_s18, 4  }
 0x1d7   :  { %15 = sbr.rel (!%p13_p4) target bundleno = 1 (0x1), region = 89 }

// kernel: discriminator_forward.11
= control target key start
LH: loop header
LB: loop body
LE: loop exit
PB: predicated region body
PF: predicated region fallthrough
CT: control target
= control target key end

     0   :  { %s4737_s1 = inlined_call_operand.vmem [shape: bf16[4096,128], index: 1, kind: input, shape index: {}]   ;;  %s4738_s0 = inlined_call_operand.vmem [shape: bf16[8,4096], index: 0, kind: input, shape index: {}]   ;;  %s4739_s2 = inlined_call_operand.vmem [shape: f32[8,128], index: 2, kind: output, shape index: {}]  }
   0x1   :  { %v3644_v0 = vld [vmem:[%s4737_s1 + $0x38] sm:$0xff]  ;;  %v3643_v4 = vld [vmem:[%s4737_s1 + $0x30] sm:$0xff]  ;;  %v3642_v8 = vld [vmem:[%s4737_s1 + $0x28] sm:$0xff] }
   0x2   :  { %v3652_v1 = vld [vmem:[%s4737_s1 + $0x78] sm:$0xff]  ;;  %2187 = vmatpush.bf16.msra.mxu0 %v3644_v0  ;;  %v3651_v5 = vld [vmem:[%s4737_s1 + $0x70] sm:$0xff]  ;;  %v3650_v9 = vld [vmem:[%s4737_s1 + $0x68] sm:$0xff] }
   0x3   :  { %v3660_v2 = vld [vmem:[%s4737_s1 + $0xb8] sm:$0xff]  ;;  %2200 = vmatpush.bf16.msra.mxu1 %v3652_v1  ;;  %v3659_v6 = vld [vmem:[%s4737_s1 + $0xb0] sm:$0xff]  ;;  %v3658_v10 = vld [vmem:[%s4737_s1 + $0xa8] sm:$0xff] }
   0x4   :  { %v3668_v3 = vld [vmem:[%s4737_s1 + $0xf8] sm:$0xff]  ;;  %2213 = vmatpush.bf16.msra.mxu2 %v3660_v2  ;;  %v3667_v7 = vld [vmem:[%s4737_s1 + $0xf0] sm:$0xff]  ;;  %v3666_v11 = vld [vmem:[%s4737_s1 + $0xe8] sm:$0xff] }
   0x5   :  { %2226 = vmatpush.bf16.msra.mxu3 %v3668_v3  ;;  %v3641_v12 = vld [vmem:[%s4737_s1 + $0x20] sm:$0xff]  ;;  %v3640_v16 = vld [vmem:[%s4737_s1 + $0x18] sm:$0xff]  ;;  %v3639_v20 = vld [vmem:[%s4737_s1 + $0x10] sm:$0xff] }
   0x6   :  { %2188 = vmatpush.bf16.msra.mxu0 %v3643_v4  ;;  %v3649_v13 = vld [vmem:[%s4737_s1 + $0x60] sm:$0xff]  ;;  %v3648_v17 = vld [vmem:[%s4737_s1 + $0x58] sm:$0xff]  ;;  %v3647_v21 = vld [vmem:[%s4737_s1 + $0x50] sm:$0xff] }
   0x7   :  { %2201 = vmatpush.bf16.msra.mxu1 %v3651_v5  ;;  %v3657_v14 = vld [vmem:[%s4737_s1 + $0xa0] sm:$0xff]  ;;  %v3656_v18 = vld [vmem:[%s4737_s1 + $0x98] sm:$0xff]  ;;  %v3655_v22 = vld [vmem:[%s4737_s1 + $0x90] sm:$0xff] }
   0x8   :  { %2214 = vmatpush.bf16.msra.mxu2 %v3659_v6  ;;  %v3665_v15 = vld [vmem:[%s4737_s1 + $0xe0] sm:$0xff]  ;;  %v3664_v19 = vld [vmem:[%s4737_s1 + $0xd8] sm:$0xff]  ;;  %v3663_v23 = vld [vmem:[%s4737_s1 + $0xd0] sm:$0xff] }
   0x9   :  { %2227 = vmatpush.bf16.msra.mxu3 %v3667_v7  ;;  %v3638_v24 = vld [vmem:[%s4737_s1 + $0x8] sm:$0xff]  ;;  %v11_v29 = vld [vmem:[%s4738_s0] sm:$0xff]  ;;  %v3676_v38 = vld [vmem:[%s4737_s1 + $0x138] sm:$0xff] }
   0xa   :  { %2189 = vmatpush.bf16.msra.mxu0 %v3642_v8  ;;  %v3646_v25 = vld [vmem:[%s4737_s1 + $0x48] sm:$0xff]  ;;  %v3637_v30 = vld [vmem:[%s4737_s1] sm:$0xff]  ;;  %v555_v33 = vunpack.c.l.b16 %v11_v29  ;;  %v556_v37 = vunpack.c.h.b16 %v11_v29  ;;  %v3684_v39 = vld [vmem:[%s4737_s1 + $0x178] sm:$0xff] }
   0xb   :  { %2202 = vmatpush.bf16.msra.mxu1 %v3650_v9  ;;  %v3654_v26 = vld [vmem:[%s4737_s1 + $0x88] sm:$0xff]  ;;  %v3645_v31 = vld [vmem:[%s4737_s1 + $0x40] sm:$0xff]  ;;  %v3692_v40 = vld [vmem:[%s4737_s1 + $0x1b8] sm:$0xff] }
   0xc   :  { %2215 = vmatpush.bf16.msra.mxu2 %v3658_v10  ;;  %v3662_v27 = vld [vmem:[%s4737_s1 + $0xc8] sm:$0xff]  ;;  %v3653_v34 = vld [vmem:[%s4737_s1 + $0x80] sm:$0xff]  ;;  %v3700_v41 = vld [vmem:[%s4737_s1 + $0x1f8] sm:$0xff]  ;;  %v587_v43 = vpack.c.b16 %v555_v33, %v555_v33  ;;  %v588_v45 = vpack.c.b16 %v556_v37, %v556_v37 }
   0xd   :  { %2228 = vmatpush.bf16.msra.mxu3 %v3666_v11  ;;  %v12_v28 = vld [vmem:[%s4738_s0 + $0x8] sm:$0xff]  ;;  %v3661_v35 = vld [vmem:[%s4737_s1 + $0xc0] sm:$0xff]  ;;  %v3675_v46 = vld [vmem:[%s4737_s1 + $0x130] sm:$0xff] }
   0xe   :  { %2190 = vmatpush.bf16.msra.mxu0 %v3641_v12  ;;  %v557_v32 = vunpack.c.l.b16 %v12_v28  ;;  %v558_v36 = vunpack.c.h.b16 %v12_v28  ;;  %v3683_v47 = vld [vmem:[%s4737_s1 + $0x170] sm:$0xff]  ;;  %v3674_v50 = vld [vmem:[%s4737_s1 + $0x128] sm:$0xff]  ;;  %v3673_v54 = vld [vmem:[%s4737_s1 + $0x120] sm:$0xff] }
   0xf   :  { %2203 = vmatpush.bf16.msra.mxu1 %v3649_v13  ;;  %v3691_v48 = vld [vmem:[%s4737_s1 + $0x1b0] sm:$0xff]  ;;  %v3682_v51 = vld [vmem:[%s4737_s1 + $0x168] sm:$0xff]  ;;  %v3681_v55 = vld [vmem:[%s4737_s1 + $0x160] sm:$0xff] }
  0x10   :  { %2216 = vmatpush.bf16.msra.mxu2 %v3657_v14  ;;  %v589_v42 = vpack.c.b16 %v557_v32, %v557_v32  ;;  %v590_v44 = vpack.c.b16 %v558_v36, %v558_v36  ;;  %v3699_v49 = vld [vmem:[%s4737_s1 + $0x1f0] sm:$0xff]  ;;  %v3690_v52 = vld [vmem:[%s4737_s1 + $0x1a8] sm:$0xff]  ;;  %v3689_v56 = vld [vmem:[%s4737_s1 + $0x1a0] sm:$0xff] }
  0x11   :  { %2229 = vmatpush.bf16.msra.mxu3 %v3665_v15  ;;  %v3698_v53 = vld [vmem:[%s4737_s1 + $0x1e8] sm:$0xff]  ;;  %v3697_v57 = vld [vmem:[%s4737_s1 + $0x1e0] sm:$0xff]  ;;  %v3672_v58 = vld [vmem:[%s4737_s1 + $0x118] sm:$0xff] }
  0x12   :  { %2191 = vmatpush.bf16.msra.mxu0 %v3640_v16  ;;  %v3680_v59 = vld [vmem:[%s4737_s1 + $0x158] sm:$0xff]  ;;  %v3671_v62 = vld [vmem:[%s4737_s1 + $0x110] sm:$0xff]  ;;  %v3670_v2 = vld [vmem:[%s4737_s1 + $0x108] sm:$0xff] }
  0x13   :  { %2204 = vmatpush.bf16.msra.mxu1 %v3648_v17  ;;  %v3688_v60 = vld [vmem:[%s4737_s1 + $0x198] sm:$0xff]  ;;  %v3679_v63 = vld [vmem:[%s4737_s1 + $0x150] sm:$0xff]  ;;  %v3678_v3 = vld [vmem:[%s4737_s1 + $0x148] sm:$0xff] }
  0x14   :  { %2217 = vmatpush.bf16.msra.mxu2 %v3656_v18  ;;  %v3696_v61 = vld [vmem:[%s4737_s1 + $0x1d8] sm:$0xff]  ;;  %v3687_v0 = vld [vmem:[%s4737_s1 + $0x190] sm:$0xff]  ;;  %v3686_v4 = vld [vmem:[%s4737_s1 + $0x188] sm:$0xff] }
  0x15   :  { %2230 = vmatpush.bf16.msra.mxu3 %v3664_v19  ;;  %v3695_v1 = vld [vmem:[%s4737_s1 + $0x1d0] sm:$0xff]  ;;  %v3694_v5 = vld [vmem:[%s4737_s1 + $0x1c8] sm:$0xff]  ;;  %v14_v6 = vld [vmem:[%s4738_s0 + $0x18] sm:$0xff] }
  0x16   :  { %2192 = vmatpush.bf16.msra.mxu0 %v3639_v20  ;;  %v13_v7 = vld [vmem:[%s4738_s0 + $0x10] sm:$0xff]  ;;  %v3669_v8 = vld [vmem:[%s4737_s1 + $0x100] sm:$0xff]  ;;  %v561_v10 = vunpack.c.l.b16 %v14_v6  ;;  %v562_v14 = vunpack.c.h.b16 %v14_v6  ;;  %v3708_v16 = vld [vmem:[%s4737_s1 + $0x238] sm:$0xff] }
  0x17   :  { %2205 = vmatpush.bf16.msra.mxu1 %v3647_v21  ;;  %v3677_v9 = vld [vmem:[%s4737_s1 + $0x140] sm:$0xff]  ;;  %v559_v11 = vunpack.c.l.b16 %v13_v7  ;;  %v560_v15 = vunpack.c.h.b16 %v13_v7  ;;  %v3716_v17 = vld [vmem:[%s4737_s1 + $0x278] sm:$0xff]  ;;  %v3706_v28 = vld [vmem:[%s4737_s1 + $0x228] sm:$0xff] }
  0x18   :  { %2218 = vmatpush.bf16.msra.mxu2 %v3655_v22  ;;  %v3685_v12 = vld [vmem:[%s4737_s1 + $0x180] sm:$0xff]  ;;  %v3724_v18 = vld [vmem:[%s4737_s1 + $0x2b8] sm:$0xff]  ;;  %v593_v20 = vpack.c.b16 %v561_v10, %v561_v10  ;;  %v594_v22 = vpack.c.b16 %v562_v14, %v562_v14  ;;  %v3714_v29 = vld [vmem:[%s4737_s1 + $0x268] sm:$0xff] }
  0x19   :  { %2231 = vmatpush.bf16.msra.mxu3 %v3663_v23  ;;  %v3693_v13 = vld [vmem:[%s4737_s1 + $0x1c0] sm:$0xff]  ;;  %v3732_v19 = vld [vmem:[%s4737_s1 + $0x2f8] sm:$0xff]  ;;  %v591_v21 = vpack.c.b16 %v559_v11, %v559_v11  ;;  %v592_v23 = vpack.c.b16 %v560_v15, %v560_v15  ;;  %v3738_v6 = vld [vmem:[%s4737_s1 + $0x328] sm:$0xff] }
  0x1a   :  { %2193 = vmatpush.bf16.msra.mxu0 %v3638_v24  ;;  %v3707_v24 = vld [vmem:[%s4737_s1 + $0x230] sm:$0xff]  ;;  %v3705_v32 = vld [vmem:[%s4737_s1 + $0x220] sm:$0xff]  ;;  %v3704_v36 = vld [vmem:[%s4737_s1 + $0x218] sm:$0xff] }
  0x1b   :  { %2206 = vmatpush.bf16.msra.mxu1 %v3646_v25  ;;  %v3715_v25 = vld [vmem:[%s4737_s1 + $0x270] sm:$0xff]  ;;  %v3713_v33 = vld [vmem:[%s4737_s1 + $0x260] sm:$0xff]  ;;  %v3712_v37 = vld [vmem:[%s4737_s1 + $0x258] sm:$0xff] }
  0x1c   :  { %2219 = vmatpush.bf16.msra.mxu2 %v3654_v26  ;;  %v3723_v26 = vld [vmem:[%s4737_s1 + $0x2b0] sm:$0xff]  ;;  %v3746_v7 = vld [vmem:[%s4737_s1 + $0x368] sm:$0xff]  ;;  %v3737_v10 = vld [vmem:[%s4737_s1 + $0x320] sm:$0xff] }
  0x1d   :  { %2232 = vmatpush.bf16.msra.mxu3 %v3662_v27  ;;  %v3731_v27 = vld [vmem:[%s4737_s1 + $0x2f0] sm:$0xff]  ;;  %v3745_v11 = vld [vmem:[%s4737_s1 + $0x360] sm:$0xff]  ;;  %v3736_v14 = vld [vmem:[%s4737_s1 + $0x318] sm:$0xff] }
  0x1e   :  { %2194 = vmatpush.bf16.msra.mxu0 %v3637_v30  ;;  %v3722_v30 = vld [vmem:[%s4737_s1 + $0x2a8] sm:$0xff]  ;;  %v3744_v15 = vld [vmem:[%s4737_s1 + $0x358] sm:$0xff] }
  0x1f   :  { %2207 = vmatpush.bf16.msra.mxu1 %v3645_v31  ;;  %v3730_v31 = vld [vmem:[%s4737_s1 + $0x2e8] sm:$0xff] }
  0x20   :  { %2220 = vmatpush.bf16.msra.mxu2 %v3653_v34  ;;  %v3721_v34 = vld [vmem:[%s4737_s1 + $0x2a0] sm:$0xff] }
  0x21   :  { %2233 = vmatpush.bf16.msra.mxu3 %v3661_v35  ;;  %2195 = vmatmul.bf16.vlgmr.msra.gmra.mxu0 %v587_v43  ;;  %v3729_v35 = vld [vmem:[%s4737_s1 + $0x2e0] sm:$0xff]  ;;  %v3727_v43 = vld [vmem:[%s4737_s1 + $0x2d0] sm:$0xff] }
  0x22   :  { %2239 = vmatpush.bf16.msrb.mxu0 %v3676_v38  ;;  %2208 = vmatmul.bf16.vlgmr.msra.gmra.mxu1 %v588_v45  ;;  %v3720_v38 = vld [vmem:[%s4737_s1 + $0x298] sm:$0xff]  ;;  %v3710_v45 = vld [vmem:[%s4737_s1 + $0x248] sm:$0xff] }
  0x23   :  { %2252 = vmatpush.bf16.msrb.mxu1 %v3684_v39  ;;  %2221 = vmatmul.bf16.vlgmr.msra.gmra.mxu2 %v589_v42  ;;  %v3728_v39 = vld [vmem:[%s4737_s1 + $0x2d8] sm:$0xff]  ;;  %v3719_v42 = vld [vmem:[%s4737_s1 + $0x290] sm:$0xff] }
  0x24   :  { %2265 = vmatpush.bf16.msrb.mxu2 %v3692_v40  ;;  %2234 = vmatmul.bf16.vlgmr.msra.gmra.mxu3 %v590_v44  ;;  %v3703_v40 = vld [vmem:[%s4737_s1 + $0x210] sm:$0xff]  ;;  %v3702_v44 = vld [vmem:[%s4737_s1 + $0x208] sm:$0xff] }
  0x25   :  { %2278 = vmatpush.bf16.msrb.mxu3 %v3700_v41  ;;  %v3711_v41 = vld [vmem:[%s4737_s1 + $0x250] sm:$0xff] }
  0x26   :  { %2240 = vmatpush.bf16.msrb.mxu0 %v3675_v46  ;;  %v3718_v46 = vld [vmem:[%s4737_s1 + $0x288] sm:$0xff] }
  0x27   :  { %2253 = vmatpush.bf16.msrb.mxu1 %v3683_v47  ;;  %v3726_v47 = vld [vmem:[%s4737_s1 + $0x2c8] sm:$0xff] }
  0x28   :  { %2266 = vmatpush.bf16.msrb.mxu2 %v3691_v48  ;;  %v15_v48 = vld [vmem:[%s4738_s0 + $0x20] sm:$0xff] }
  0x29   :  { %2279 = vmatpush.bf16.msrb.mxu3 %v3699_v49  ;;  %v16_v49 = vld [vmem:[%s4738_s0 + $0x28] sm:$0xff] }
  0x2a   :  { %2241 = vmatpush.bf16.msrb.mxu0 %v3674_v50  ;;  %v3701_v50 = vld [vmem:[%s4737_s1 + $0x200] sm:$0xff] }
  0x2b   :  { %2254 = vmatpush.bf16.msrb.mxu1 %v3682_v51  ;;  %v3709_v51 = vld [vmem:[%s4737_s1 + $0x240] sm:$0xff] }
  0x2c   :  { %2267 = vmatpush.bf16.msrb.mxu2 %v3690_v52  ;;  %v563_v52 = vunpack.c.l.b16 %v15_v48 }
  0x2d   :  { %2280 = vmatpush.bf16.msrb.mxu3 %v3698_v53  ;;  %v565_v53 = vunpack.c.l.b16 %v16_v49 }
  0x2e   :  { %2242 = vmatpush.bf16.msrb.mxu0 %v3673_v54  ;;  %v3717_v54 = vld [vmem:[%s4737_s1 + $0x280] sm:$0xff] }
  0x2f   :  { %2255 = vmatpush.bf16.msrb.mxu1 %v3681_v55  ;;  %v3725_v55 = vld [vmem:[%s4737_s1 + $0x2c0] sm:$0xff] }
  0x30   :  { %2268 = vmatpush.bf16.msrb.mxu2 %v3689_v56  ;;  %v564_v56 = vunpack.c.h.b16 %v15_v48  ;;  %v3770_v48 = vld [vmem:[%s4737_s1 + $0x428] sm:$0xff] }
  0x31   :  { %2281 = vmatpush.bf16.msrb.mxu3 %v3697_v57  ;;  %v566_v57 = vunpack.c.h.b16 %v16_v49  ;;  %v3778_v49 = vld [vmem:[%s4737_s1 + $0x468] sm:$0xff] }
  0x32   :  { %2243 = vmatpush.bf16.msrb.mxu0 %v3672_v58  ;;  %v3740_v58 = vld [vmem:[%s4737_s1 + $0x338] sm:$0xff] }
  0x33   :  { %2256 = vmatpush.bf16.msrb.mxu1 %v3680_v59  ;;  %v3748_v59 = vld [vmem:[%s4737_s1 + $0x378] sm:$0xff] }
  0x34   :  { %2269 = vmatpush.bf16.msrb.mxu2 %v3688_v60  ;;  %v3756_v60 = vld [vmem:[%s4737_s1 + $0x3b8] sm:$0xff] }
  0x35   :  { %2282 = vmatpush.bf16.msrb.mxu3 %v3696_v61  ;;  %v3764_v61 = vld [vmem:[%s4737_s1 + $0x3f8] sm:$0xff] }
  0x36   :  { %2244 = vmatpush.bf16.msrb.mxu0 %v3671_v62  ;;  %v595_v62 = vpack.c.b16 %v563_v52, %v563_v52  ;;  %v3769_v52 = vld [vmem:[%s4737_s1 + $0x420] sm:$0xff] }
  0x37   :  { %2257 = vmatpush.bf16.msrb.mxu1 %v3679_v63  ;;  %v597_v63 = vpack.c.b16 %v565_v53, %v565_v53  ;;  %v3777_v53 = vld [vmem:[%s4737_s1 + $0x460] sm:$0xff] }
  0x38   :  { %2270 = vmatpush.bf16.msrb.mxu2 %v3687_v0  ;;  %v596_v0 = vpack.c.b16 %v564_v56, %v564_v56  ;;  %v3768_v56 = vld [vmem:[%s4737_s1 + $0x418] sm:$0xff] }
  0x39   :  { %2283 = vmatpush.bf16.msrb.mxu3 %v3695_v1  ;;  %v598_v1 = vpack.c.b16 %v566_v57, %v566_v57  ;;  %v3776_v57 = vld [vmem:[%s4737_s1 + $0x458] sm:$0xff] }
  0x3a   :  { %2245 = vmatpush.bf16.msrb.mxu0 %v3670_v2  ;;  %v3739_v2 = vld [vmem:[%s4737_s1 + $0x330] sm:$0xff] }
  0x3b   :  { %2258 = vmatpush.bf16.msrb.mxu1 %v3678_v3  ;;  %v3747_v3 = vld [vmem:[%s4737_s1 + $0x370] sm:$0xff] }
  0x3c   :  { %2271 = vmatpush.bf16.msrb.mxu2 %v3686_v4  ;;  %v3755_v4 = vld [vmem:[%s4737_s1 + $0x3b0] sm:$0xff] }
  0x3d   :  { %2284 = vmatpush.bf16.msrb.mxu3 %v3694_v5  ;;  %v3763_v5 = vld [vmem:[%s4737_s1 + $0x3f0] sm:$0xff] }
  0x3e   :  { %2246 = vmatpush.bf16.msrb.mxu0 %v3669_v8  ;;  %v3754_v8 = vld [vmem:[%s4737_s1 + $0x3a8] sm:$0xff] }
  0x3f   :  { %2259 = vmatpush.bf16.msrb.mxu1 %v3677_v9  ;;  %v3762_v9 = vld [vmem:[%s4737_s1 + $0x3e8] sm:$0xff] }
  0x40   :  { %2272 = vmatpush.bf16.msrb.mxu2 %v3685_v12  ;;  %v3753_v12 = vld [vmem:[%s4737_s1 + $0x3a0] sm:$0xff] }
  0x41   :  { %2285 = vmatpush.bf16.msrb.mxu3 %v3693_v13  ;;  %2247 = vmatmul.bf16.vlgmr.msrb.gmra.mxu0 %v591_v21  ;;  %v3761_v13 = vld [vmem:[%s4737_s1 + $0x3e0] sm:$0xff]  ;;  %v3759_v21 = vld [vmem:[%s4737_s1 + $0x3d0] sm:$0xff] }
  0x42   :  { %2291 = vmatpush.bf16.msra.mxu0 %v3708_v16  ;;  %2260 = vmatmul.bf16.vlgmr.msrb.gmra.mxu1 %v592_v23  ;;  %v3752_v16 = vld [vmem:[%s4737_s1 + $0x398] sm:$0xff]  ;;  %v3742_v23 = vld [vmem:[%s4737_s1 + $0x348] sm:$0xff] }
  0x43   :  { %2304 = vmatpush.bf16.msra.mxu1 %v3716_v17  ;;  %2273 = vmatmul.bf16.vlgmr.msrb.gmra.mxu2 %v593_v20  ;;  %v3760_v17 = vld [vmem:[%s4737_s1 + $0x3d8] sm:$0xff]  ;;  %v3751_v20 = vld [vmem:[%s4737_s1 + $0x390] sm:$0xff] }
  0x44   :  { %2317 = vmatpush.bf16.msra.mxu2 %v3724_v18  ;;  %2286 = vmatmul.bf16.vlgmr.msrb.gmra.mxu3 %v594_v22  ;;  %v3735_v18 = vld [vmem:[%s4737_s1 + $0x310] sm:$0xff]  ;;  %v3734_v22 = vld [vmem:[%s4737_s1 + $0x308] sm:$0xff] }
  0x45   :  { %2330 = vmatpush.bf16.msra.mxu3 %v3732_v19  ;;  %v3743_v19 = vld [vmem:[%s4737_s1 + $0x350] sm:$0xff] }
  0x46   :  { %2292 = vmatpush.bf16.msra.mxu0 %v3707_v24  ;;  %v3750_v24 = vld [vmem:[%s4737_s1 + $0x388] sm:$0xff] }
  0x47   :  { %2305 = vmatpush.bf16.msra.mxu1 %v3715_v25  ;;  %v3758_v25 = vld [vmem:[%s4737_s1 + $0x3c8] sm:$0xff] }
  0x48   :  { %2318 = vmatpush.bf16.msra.mxu2 %v3723_v26  ;;  %v17_v26 = vld [vmem:[%s4738_s0 + $0x30] sm:$0xff] }
  0x49   :  { %2331 = vmatpush.bf16.msra.mxu3 %v3731_v27  ;;  %v18_v27 = vld [vmem:[%s4738_s0 + $0x38] sm:$0xff] }
  0x4a   :  { %2293 = vmatpush.bf16.msra.mxu0 %v3706_v28  ;;  %v3733_v28 = vld [vmem:[%s4737_s1 + $0x300] sm:$0xff] }
  0x4b   :  { %2306 = vmatpush.bf16.msra.mxu1 %v3714_v29  ;;  %v3741_v29 = vld [vmem:[%s4737_s1 + $0x340] sm:$0xff] }
  0x4c   :  { %2319 = vmatpush.bf16.msra.mxu2 %v3722_v30  ;;  %v567_v30 = vunpack.c.l.b16 %v17_v26 }
  0x4d   :  { %2332 = vmatpush.bf16.msra.mxu3 %v3730_v31  ;;  %v569_v31 = vunpack.c.l.b16 %v18_v27 }
  0x4e   :  { %2294 = vmatpush.bf16.msra.mxu0 %v3705_v32  ;;  %v3749_v32 = vld [vmem:[%s4737_s1 + $0x380] sm:$0xff] }
  0x4f   :  { %2307 = vmatpush.bf16.msra.mxu1 %v3713_v33  ;;  %v3757_v33 = vld [vmem:[%s4737_s1 + $0x3c0] sm:$0xff] }
  0x50   :  { %2320 = vmatpush.bf16.msra.mxu2 %v3721_v34  ;;  %v568_v34 = vunpack.c.h.b16 %v17_v26  ;;  %v3802_v26 = vld [vmem:[%s4737_s1 + $0x528] sm:$0xff] }
  0x51   :  { %2333 = vmatpush.bf16.msra.mxu3 %v3729_v35  ;;  %v570_v35 = vunpack.c.h.b16 %v18_v27  ;;  %v3810_v27 = vld [vmem:[%s4737_s1 + $0x568] sm:$0xff] }
  0x52   :  { %2295 = vmatpush.bf16.msra.mxu0 %v3704_v36  ;;  %v3772_v36 = vld [vmem:[%s4737_s1 + $0x438] sm:$0xff] }
  0x53   :  { %2308 = vmatpush.bf16.msra.mxu1 %v3712_v37  ;;  %v3780_v37 = vld [vmem:[%s4737_s1 + $0x478] sm:$0xff] }
  0x54   :  { %2321 = vmatpush.bf16.msra.mxu2 %v3720_v38  ;;  %v3788_v38 = vld [vmem:[%s4737_s1 + $0x4b8] sm:$0xff] }
  0x55   :  { %2334 = vmatpush.bf16.msra.mxu3 %v3728_v39  ;;  %v3796_v39 = vld [vmem:[%s4737_s1 + $0x4f8] sm:$0xff] }
  0x56   :  { %2296 = vmatpush.bf16.msra.mxu0 %v3703_v40  ;;  %v599_v40 = vpack.c.b16 %v567_v30, %v567_v30 }
  0x57   :  { %2309 = vmatpush.bf16.msra.mxu1 %v3711_v41  ;;  %v601_v41 = vpack.c.b16 %v569_v31, %v569_v31  ;;  %v3801_v31 = vld [vmem:[%s4737_s1 + $0x520] sm:$0xff] }
  0x58   :  { %2322 = vmatpush.bf16.msra.mxu2 %v3719_v42  ;;  %v600_v42 = vpack.c.b16 %v568_v34, %v568_v34  ;;  %v3817_v34 = vld [vmem:[%s4737_s1 + $0x5a0] sm:$0xff] }
  0x59   :  { %2335 = vmatpush.bf16.msra.mxu3 %v3727_v43  ;;  %v602_v43 = vpack.c.b16 %v570_v35, %v570_v35  ;;  %v3825_v35 = vld [vmem:[%s4737_s1 + $0x5e0] sm:$0xff] }
  0x5a   :  { %2297 = vmatpush.bf16.msra.mxu0 %v3702_v44  ;;  %v3771_v44 = vld [vmem:[%s4737_s1 + $0x430] sm:$0xff] }
  0x5b   :  { %2310 = vmatpush.bf16.msra.mxu1 %v3710_v45  ;;  %v3779_v45 = vld [vmem:[%s4737_s1 + $0x470] sm:$0xff] }
  0x5c   :  { %2323 = vmatpush.bf16.msra.mxu2 %v3718_v46  ;;  %v3787_v46 = vld [vmem:[%s4737_s1 + $0x4b0] sm:$0xff] }
  0x5d   :  { %2336 = vmatpush.bf16.msra.mxu3 %v3726_v47  ;;  %v3795_v47 = vld [vmem:[%s4737_s1 + $0x4f0] sm:$0xff] }
  0x5e   :  { %2298 = vmatpush.bf16.msra.mxu0 %v3701_v50  ;;  %v3786_v50 = vld [vmem:[%s4737_s1 + $0x4a8] sm:$0xff] }
  0x5f   :  { %2311 = vmatpush.bf16.msra.mxu1 %v3709_v51  ;;  %v3794_v51 = vld [vmem:[%s4737_s1 + $0x4e8] sm:$0xff] }
  0x60   :  { %2324 = vmatpush.bf16.msra.mxu2 %v3717_v54  ;;  %v3785_v54 = vld [vmem:[%s4737_s1 + $0x4a0] sm:$0xff] }
  0x61   :  { %2337 = vmatpush.bf16.msra.mxu3 %v3725_v55  ;;  %2299 = vmatmul.bf16.vlgmr.msra.gmra.mxu0 %v595_v62  ;;  %v3793_v55 = vld [vmem:[%s4737_s1 + $0x4e0] sm:$0xff]  ;;  %v3783_v62 = vld [vmem:[%s4737_s1 + $0x490] sm:$0xff] }
  0x62   :  { %2343 = vmatpush.bf16.msrb.mxu0 %v3740_v58  ;;  %2312 = vmatmul.bf16.vlgmr.msra.gmra.mxu1 %v596_v0  ;;  %v3784_v58 = vld [vmem:[%s4737_s1 + $0x498] sm:$0xff]  ;;  %v3766_v0 = vld [vmem:[%s4737_s1 + $0x408] sm:$0xff] }
  0x63   :  { %2356 = vmatpush.bf16.msrb.mxu1 %v3748_v59  ;;  %2325 = vmatmul.bf16.vlgmr.msra.gmra.mxu2 %v597_v63  ;;  %v3792_v59 = vld [vmem:[%s4737_s1 + $0x4d8] sm:$0xff]  ;;  %v3791_v63 = vld [vmem:[%s4737_s1 + $0x4d0] sm:$0xff] }
  0x64   :  { %2369 = vmatpush.bf16.msrb.mxu2 %v3756_v60  ;;  %2338 = vmatmul.bf16.vlgmr.msra.gmra.mxu3 %v598_v1  ;;  %v3767_v60 = vld [vmem:[%s4737_s1 + $0x410] sm:$0xff]  ;;  %v3774_v1 = vld [vmem:[%s4737_s1 + $0x448] sm:$0xff] }
  0x65   :  { %2382 = vmatpush.bf16.msrb.mxu3 %v3764_v61  ;;  %v3775_v61 = vld [vmem:[%s4737_s1 + $0x450] sm:$0xff] }
  0x66   :  { %2344 = vmatpush.bf16.msrb.mxu0 %v3739_v2  ;;  %v3782_v2 = vld [vmem:[%s4737_s1 + $0x488] sm:$0xff] }
  0x67   :  { %2357 = vmatpush.bf16.msrb.mxu1 %v3747_v3  ;;  %v3790_v3 = vld [vmem:[%s4737_s1 + $0x4c8] sm:$0xff] }
  0x68   :  { %2370 = vmatpush.bf16.msrb.mxu2 %v3755_v4  ;;  %v19_v4 = vld [vmem:[%s4738_s0 + $0x40] sm:$0xff] }
  0x69   :  { %2383 = vmatpush.bf16.msrb.mxu3 %v3763_v5  ;;  %v20_v5 = vld [vmem:[%s4738_s0 + $0x48] sm:$0xff] }
  0x6a   :  { %2345 = vmatpush.bf16.msrb.mxu0 %v3738_v6  ;;  %v3765_v6 = vld [vmem:[%s4737_s1 + $0x400] sm:$0xff] }
  0x6b   :  { %2358 = vmatpush.bf16.msrb.mxu1 %v3746_v7  ;;  %v3773_v7 = vld [vmem:[%s4737_s1 + $0x440] sm:$0xff] }
  0x6c   :  { %2371 = vmatpush.bf16.msrb.mxu2 %v3754_v8  ;;  %v571_v8 = vunpack.c.l.b16 %v19_v4 }
  0x6d   :  { %2384 = vmatpush.bf16.msrb.mxu3 %v3762_v9  ;;  %v573_v9 = vunpack.c.l.b16 %v20_v5 }
  0x6e   :  { %2346 = vmatpush.bf16.msrb.mxu0 %v3737_v10  ;;  %v3781_v10 = vld [vmem:[%s4737_s1 + $0x480] sm:$0xff] }
  0x6f   :  { %2359 = vmatpush.bf16.msrb.mxu1 %v3745_v11  ;;  %v3789_v11 = vld [vmem:[%s4737_s1 + $0x4c0] sm:$0xff] }
  0x70   :  { %2372 = vmatpush.bf16.msrb.mxu2 %v3753_v12  ;;  %v572_v12 = vunpack.c.h.b16 %v19_v4  ;;  %v3844_v4 = vld [vmem:[%s4737_s1 + $0x678] sm:$0xff] }
  0x71   :  { %2385 = vmatpush.bf16.msrb.mxu3 %v3761_v13  ;;  %v574_v13 = vunpack.c.h.b16 %v20_v5  ;;  %v3852_v5 = vld [vmem:[%s4737_s1 + $0x6b8] sm:$0xff] }
  0x72   :  { %2347 = vmatpush.bf16.msrb.mxu0 %v3736_v14  ;;  %v3804_v14 = vld [vmem:[%s4737_s1 + $0x538] sm:$0xff] }
  0x73   :  { %2360 = vmatpush.bf16.msrb.mxu1 %v3744_v15  ;;  %v3812_v15 = vld [vmem:[%s4737_s1 + $0x578] sm:$0xff] }
  0x74   :  { %2373 = vmatpush.bf16.msrb.mxu2 %v3752_v16  ;;  %v3820_v16 = vld [vmem:[%s4737_s1 + $0x5b8] sm:$0xff] }
  0x75   :  { %2386 = vmatpush.bf16.msrb.mxu3 %v3760_v17  ;;  %v3828_v17 = vld [vmem:[%s4737_s1 + $0x5f8] sm:$0xff] }
  0x76   :  { %2348 = vmatpush.bf16.msrb.mxu0 %v3735_v18  ;;  %v603_v18 = vpack.c.b16 %v571_v8, %v571_v8 }
  0x77   :  { %2361 = vmatpush.bf16.msrb.mxu1 %v3743_v19  ;;  %v605_v19 = vpack.c.b16 %v573_v9, %v573_v9 }
  0x78   :  { %2374 = vmatpush.bf16.msrb.mxu2 %v3751_v20  ;;  %v604_v20 = vpack.c.b16 %v572_v12, %v572_v12  ;;  %v3843_v12 = vld [vmem:[%s4737_s1 + $0x670] sm:$0xff] }
  0x79   :  { %2387 = vmatpush.bf16.msrb.mxu3 %v3759_v21  ;;  %v606_v21 = vpack.c.b16 %v574_v13, %v574_v13  ;;  %v3851_v13 = vld [vmem:[%s4737_s1 + $0x6b0] sm:$0xff] }
  0x7a   :  { %2349 = vmatpush.bf16.msrb.mxu0 %v3734_v22  ;;  %v3803_v22 = vld [vmem:[%s4737_s1 + $0x530] sm:$0xff] }
  0x7b   :  { %2362 = vmatpush.bf16.msrb.mxu1 %v3742_v23  ;;  %v3811_v23 = vld [vmem:[%s4737_s1 + $0x570] sm:$0xff] }
  0x7c   :  { %2375 = vmatpush.bf16.msrb.mxu2 %v3750_v24  ;;  %v3819_v24 = vld [vmem:[%s4737_s1 + $0x5b0] sm:$0xff] }
  0x7d   :  { %2388 = vmatpush.bf16.msrb.mxu3 %v3758_v25  ;;  %v3827_v25 = vld [vmem:[%s4737_s1 + $0x5f0] sm:$0xff] }
  0x7e   :  { %2350 = vmatpush.bf16.msrb.mxu0 %v3733_v28  ;;  %v3818_v28 = vld [vmem:[%s4737_s1 + $0x5a8] sm:$0xff] }
  0x7f   :  { %2363 = vmatpush.bf16.msrb.mxu1 %v3741_v29  ;;  %v3826_v29 = vld [vmem:[%s4737_s1 + $0x5e8] sm:$0xff] }
  0x80   :  { %2376 = vmatpush.bf16.msrb.mxu2 %v3749_v32  ;;  %v3809_v32 = vld [vmem:[%s4737_s1 + $0x560] sm:$0xff] }
  0x81   :  { %2389 = vmatpush.bf16.msrb.mxu3 %v3757_v33  ;;  %2351 = vmatmul.bf16.vlgmr.msrb.gmra.mxu0 %v599_v40  ;;  %v3824_v40 = vld [vmem:[%s4737_s1 + $0x5d8] sm:$0xff] }
  0x82   :  { %2395 = vmatpush.bf16.msra.mxu0 %v3772_v36  ;;  %2364 = vmatmul.bf16.vlgmr.msrb.gmra.mxu1 %v600_v42 }
  0x83   :  { %2408 = vmatpush.bf16.msra.mxu1 %v3780_v37  ;;  %2377 = vmatmul.bf16.vlgmr.msrb.gmra.mxu2 %v601_v41  ;;  %v3800_v37 = vld [vmem:[%s4737_s1 + $0x518] sm:$0xff] }
  0x84   :  { %2421 = vmatpush.bf16.msra.mxu2 %v3788_v38  ;;  %2390 = vmatmul.bf16.vlgmr.msrb.gmra.mxu3 %v602_v43  ;;  %v3808_v38 = vld [vmem:[%s4737_s1 + $0x558] sm:$0xff] }
  0x85   :  { %2434 = vmatpush.bf16.msra.mxu3 %v3796_v39  ;;  %v3816_v39 = vld [vmem:[%s4737_s1 + $0x598] sm:$0xff] }
  0x86   :  { %2396 = vmatpush.bf16.msra.mxu0 %v3771_v44 }
  0x87   :  { %2409 = vmatpush.bf16.msra.mxu1 %v3779_v45  ;;  %v3799_v45 = vld [vmem:[%s4737_s1 + $0x510] sm:$0xff] }
  0x88   :  { %2422 = vmatpush.bf16.msra.mxu2 %v3787_v46  ;;  %v3807_v46 = vld [vmem:[%s4737_s1 + $0x550] sm:$0xff] }
  0x89   :  { %2435 = vmatpush.bf16.msra.mxu3 %v3795_v47 }
  0x8a   :  { %2397 = vmatpush.bf16.msra.mxu0 %v3770_v48 }
  0x8b   :  { %2410 = vmatpush.bf16.msra.mxu1 %v3778_v49  ;;  %v3815_v49 = vld [vmem:[%s4737_s1 + $0x590] sm:$0xff] }
  0x8c   :  { %2423 = vmatpush.bf16.msra.mxu2 %v3786_v50  ;;  %v3823_v50 = vld [vmem:[%s4737_s1 + $0x5d0] sm:$0xff] }
  0x8d   :  { %2436 = vmatpush.bf16.msra.mxu3 %v3794_v51  ;;  %v3798_v51 = vld [vmem:[%s4737_s1 + $0x508] sm:$0xff] }
  0x8e   :  { %2398 = vmatpush.bf16.msra.mxu0 %v3769_v52  ;;  %v3806_v52 = vld [vmem:[%s4737_s1 + $0x548] sm:$0xff] }
  0x8f   :  { %2411 = vmatpush.bf16.msra.mxu1 %v3777_v53  ;;  %v3814_v53 = vld [vmem:[%s4737_s1 + $0x588] sm:$0xff] }
  0x90   :  { %2424 = vmatpush.bf16.msra.mxu2 %v3785_v54  ;;  %v3822_v54 = vld [vmem:[%s4737_s1 + $0x5c8] sm:$0xff] }
  0x91   :  { %2437 = vmatpush.bf16.msra.mxu3 %v3793_v55  ;;  %v21_v55 = vld [vmem:[%s4738_s0 + $0x50] sm:$0xff] }
  0x92   :  { %2399 = vmatpush.bf16.msra.mxu0 %v3768_v56  ;;  %v22_v56 = vld [vmem:[%s4738_s0 + $0x58] sm:$0xff] }
  0x93   :  { %2412 = vmatpush.bf16.msra.mxu1 %v3776_v57 }
  0x94   :  { %2425 = vmatpush.bf16.msra.mxu2 %v3784_v58 }
  0x95   :  { %2438 = vmatpush.bf16.msra.mxu3 %v3792_v59  ;;  %v3797_v59 = vld [vmem:[%s4737_s1 + $0x500] sm:$0xff] }
  0x96   :  { %2400 = vmatpush.bf16.msra.mxu0 %v3767_v60  ;;  %v3805_v60 = vld [vmem:[%s4737_s1 + $0x540] sm:$0xff] }
  0x97   :  { %2413 = vmatpush.bf16.msra.mxu1 %v3775_v61  ;;  %v575_v61 = vunpack.c.l.b16 %v21_v55 }
  0x98   :  { %2426 = vmatpush.bf16.msra.mxu2 %v3783_v62  ;;  %v577_v62 = vunpack.c.l.b16 %v22_v56 }
  0x99   :  { %2439 = vmatpush.bf16.msra.mxu3 %v3791_v63  ;;  %v3813_v63 = vld [vmem:[%s4737_s1 + $0x580] sm:$0xff] }
  0x9a   :  { %2401 = vmatpush.bf16.msra.mxu0 %v3766_v0  ;;  %v3821_v0 = vld [vmem:[%s4737_s1 + $0x5c0] sm:$0xff]  ;;  %v609_v8 = vpack.c.b16 %v577_v62, %v577_v62 }
  0x9b   :  { %2414 = vmatpush.bf16.msra.mxu1 %v3774_v1  ;;  %v576_v1 = vunpack.c.h.b16 %v21_v55 }
  0x9c   :  { %2427 = vmatpush.bf16.msra.mxu2 %v3782_v2  ;;  %v578_v2 = vunpack.c.h.b16 %v22_v56 }
  0x9d   :  { %2440 = vmatpush.bf16.msra.mxu3 %v3790_v3  ;;  %v3836_v3 = vld [vmem:[%s4737_s1 + $0x638] sm:$0xff]  ;;  %v608_v9 = vpack.c.b16 %v576_v1, %v576_v1  ;;  %v3867_v1 = vld [vmem:[%s4737_s1 + $0x730] sm:$0xff] }
  0x9e   :  { %2402 = vmatpush.bf16.msra.mxu0 %v3765_v6  ;;  %v2196_v30 = vpop.f32.mrf.mxu0  ;;  %v3860_v6 = vld [vmem:[%s4737_s1 + $0x6f8] sm:$0xff] }
  0x9f   :  { %2415 = vmatpush.bf16.msra.mxu1 %v3773_v7  ;;  %v2209_v33 = vpop.f32.mrf.mxu1  ;;  %v607_v7 = vpack.c.b16 %v575_v61, %v575_v61 }
  0xa0   :  { %2428 = vmatpush.bf16.msra.mxu2 %v3781_v10  ;;  %v2210_v36 = vadd.f32 %v2209_v33, %v2196_v30  ;;  %v610_v10 = vpack.c.b16 %v578_v2, %v578_v2  ;;  %v3856_v30 = vld [vmem:[%s4737_s1 + $0x6d8] sm:$0xff]  ;;  %v3875_v2 = vld [vmem:[%s4737_s1 + $0x770] sm:$0xff] }
  0xa1   :  { %2441 = vmatpush.bf16.msra.mxu3 %v3789_v11  ;;  %2403 = vmatmul.bf16.vlgmr.msra.gmra.mxu0 %v603_v18  ;;  %v3835_v11 = vld [vmem:[%s4737_s1 + $0x630] sm:$0xff]  ;;  %v3858_v18 = vld [vmem:[%s4737_s1 + $0x6e8] sm:$0xff] }
  0xa2   :  { %2447 = vmatpush.bf16.msrb.mxu0 %v3804_v14  ;;  %2416 = vmatmul.bf16.vlgmr.msra.gmra.mxu1 %v604_v20  ;;  %v3859_v14 = vld [vmem:[%s4737_s1 + $0x6f0] sm:$0xff]  ;;  %v3833_v20 = vld [vmem:[%s4737_s1 + $0x620] sm:$0xff] }
  0xa3   :  { %2460 = vmatpush.bf16.msrb.mxu1 %v3812_v15  ;;  %2429 = vmatmul.bf16.vlgmr.msra.gmra.mxu2 %v605_v19  ;;  %v3834_v15 = vld [vmem:[%s4737_s1 + $0x628] sm:$0xff] }
  0xa4   :  { %2473 = vmatpush.bf16.msrb.mxu2 %v3820_v16  ;;  %2442 = vmatmul.bf16.vlgmr.msra.gmra.mxu3 %v606_v21  ;;  %v3842_v16 = vld [vmem:[%s4737_s1 + $0x668] sm:$0xff]  ;;  %v3841_v21 = vld [vmem:[%s4737_s1 + $0x660] sm:$0xff] }
  0xa5   :  { %2486 = vmatpush.bf16.msrb.mxu3 %v3828_v17  ;;  %v3850_v17 = vld [vmem:[%s4737_s1 + $0x6a8] sm:$0xff] }
  0xa6   :  { %2448 = vmatpush.bf16.msrb.mxu0 %v3803_v22  ;;  %v2222_v41 = vpop.f32.mrf.mxu2  ;;  %v2198_v44 = vpop.f32.mrf.mxu0 }
  0xa7   :  { %2461 = vmatpush.bf16.msrb.mxu1 %v3811_v23  ;;  %v2223_v42 = vadd.f32 %v2222_v41, %v2210_v36  ;;  %v2235_v43 = vpop.f32.mrf.mxu3  ;;  %v2211_v48 = vpop.f32.mrf.mxu1  ;;  %v3839_v36 = vld [vmem:[%s4737_s1 + $0x650] sm:$0xff]  ;;  %v3830_v41 = vld [vmem:[%s4737_s1 + $0x608] sm:$0xff] }
  0xa8   :  { %2474 = vmatpush.bf16.msrb.mxu2 %v3819_v24  ;;  %v3849_v24 = vld [vmem:[%s4737_s1 + $0x6a0] sm:$0xff]  ;;  %v3854_v44 = vld [vmem:[%s4737_s1 + $0x6c8] sm:$0xff] }
  0xa9   :  { %2487 = vmatpush.bf16.msrb.mxu3 %v3827_v25  ;;  %v4488_v47 = vadd.f32 %v2235_v43, %v2223_v42  ;;  %v3857_v25 = vld [vmem:[%s4737_s1 + $0x6e0] sm:$0xff]  ;;  %v3838_v42 = vld [vmem:[%s4737_s1 + $0x648] sm:$0xff] }
  0xaa   :  { %2449 = vmatpush.bf16.msrb.mxu0 %v3802_v26  ;;  %v3846_v43 = vld [vmem:[%s4737_s1 + $0x688] sm:$0xff] }
  0xab   :  { %2462 = vmatpush.bf16.msrb.mxu1 %v3810_v27  ;;  %v3832_v27 = vld [vmem:[%s4737_s1 + $0x618] sm:$0xff] }
  0xac   :  { %2475 = vmatpush.bf16.msrb.mxu2 %v3818_v28  ;;  %v3840_v28 = vld [vmem:[%s4737_s1 + $0x658] sm:$0xff] }
  0xad   :  { %2488 = vmatpush.bf16.msrb.mxu3 %v3826_v29  ;;  %v3848_v29 = vld [vmem:[%s4737_s1 + $0x698] sm:$0xff] }
  0xae   :  { %2450 = vmatpush.bf16.msrb.mxu0 %v3801_v31  ;;  %v2224_v57 = vpop.f32.mrf.mxu2 }
  0xaf   :  { %2463 = vmatpush.bf16.msrb.mxu1 %v3809_v32  ;;  %v2237_v58 = vpop.f32.mrf.mxu3  ;;  %v3868_v57 = vld [vmem:[%s4737_s1 + $0x738] sm:$0xff] }
  0xb0   :  { %2476 = vmatpush.bf16.msrb.mxu2 %v3817_v34  ;;  %v3876_v58 = vld [vmem:[%s4737_s1 + $0x778] sm:$0xff] }
  0xb1   :  { %2489 = vmatpush.bf16.msrb.mxu3 %v3825_v35  ;;  %v3831_v35 = vld [vmem:[%s4737_s1 + $0x610] sm:$0xff] }
  0xb2   :  { %2451 = vmatpush.bf16.msrb.mxu0 %v3800_v37 }
  0xb3   :  { %2464 = vmatpush.bf16.msrb.mxu1 %v3808_v38 }
  0xb4   :  { %2477 = vmatpush.bf16.msrb.mxu2 %v3816_v39  ;;  %v3847_v39 = vld [vmem:[%s4737_s1 + $0x690] sm:$0xff] }
  0xb5   :  { %2490 = vmatpush.bf16.msrb.mxu3 %v3824_v40  ;;  %v3855_v40 = vld [vmem:[%s4737_s1 + $0x6d0] sm:$0xff] }
  0xb6   :  { %2452 = vmatpush.bf16.msrb.mxu0 %v3799_v45  ;;  %v23_v45 = vld [vmem:[%s4738_s0 + $0x60] sm:$0xff] }
  0xb7   :  { %2465 = vmatpush.bf16.msrb.mxu1 %v3807_v46  ;;  %v24_v46 = vld [vmem:[%s4738_s0 + $0x68] sm:$0xff]  ;;  %v580_v55 = vunpack.c.h.b16 %v23_v45 }
  0xb8   :  { %2478 = vmatpush.bf16.msrb.mxu2 %v3815_v49  ;;  %v3829_v49 = vld [vmem:[%s4737_s1 + $0x600] sm:$0xff]  ;;  %v582_v56 = vunpack.c.h.b16 %v24_v46 }
  0xb9   :  { %2491 = vmatpush.bf16.msrb.mxu3 %v3823_v50  ;;  %v3837_v50 = vld [vmem:[%s4737_s1 + $0x640] sm:$0xff] }
  0xba   :  { %2453 = vmatpush.bf16.msrb.mxu0 %v3798_v51  ;;  %v579_v51 = vunpack.c.l.b16 %v23_v45  ;;  %v3877_v45 = vld [vmem:[%s4737_s1 + $0x780] sm:$0xff] }
  0xbb   :  { %2466 = vmatpush.bf16.msrb.mxu1 %v3806_v52  ;;  %v581_v52 = vunpack.c.l.b16 %v24_v46  ;;  %v3885_v46 = vld [vmem:[%s4737_s1 + $0x7c0] sm:$0xff] }
  0xbc   :  { %2479 = vmatpush.bf16.msrb.mxu2 %v3814_v53  ;;  %v3845_v53 = vld [vmem:[%s4737_s1 + $0x680] sm:$0xff]  ;;  %v611_v61 = vpack.c.b16 %v579_v51, %v579_v51 }
  0xbd   :  { %2492 = vmatpush.bf16.msrb.mxu3 %v3822_v54  ;;  %v3853_v54 = vld [vmem:[%s4737_s1 + $0x6c0] sm:$0xff]  ;;  %v613_v62 = vpack.c.b16 %v581_v52, %v581_v52 }
  0xbe   :  { %2454 = vmatpush.bf16.msrb.mxu0 %v3797_v59  ;;  %v2248_v19 = vpop.f32.mrf.mxu0  ;;  %v3884_v59 = vld [vmem:[%s4737_s1 + $0x7b8] sm:$0xff] }
  0xbf   :  { %2467 = vmatpush.bf16.msrb.mxu1 %v3805_v60  ;;  %v2249_v22 = vadd.f32 %v2248_v19, %v4488_v47  ;;  %v2261_v23 = vpop.f32.mrf.mxu1  ;;  %v3892_v60 = vld [vmem:[%s4737_s1 + $0x7f8] sm:$0xff] }
  0xc0   :  { %2480 = vmatpush.bf16.msrb.mxu2 %v3813_v63  ;;  %v612_v63 = vpack.c.b16 %v580_v55, %v580_v55  ;;  %v3880_v19 = vld [vmem:[%s4737_s1 + $0x798] sm:$0xff] }
  0xc1   :  { %2493 = vmatpush.bf16.msrb.mxu3 %v3821_v0  ;;  %2455 = vmatmul.bf16.vlgmr.msrb.gmra.mxu0 %v607_v7  ;;  %v2262_v26 = vadd.f32 %v2261_v23, %v2249_v22  ;;  %v614_v0 = vpack.c.b16 %v582_v56, %v582_v56  ;;  %v3882_v7 = vld [vmem:[%s4737_s1 + $0x7a8] sm:$0xff] }
  0xc2   :  { %2499 = vmatpush.bf16.msra.mxu0 %v3836_v3  ;;  %2468 = vmatmul.bf16.vlgmr.msrb.gmra.mxu1 %v608_v9  ;;  %v3883_v3 = vld [vmem:[%s4737_s1 + $0x7b0] sm:$0xff] }
  0xc3   :  { %2512 = vmatpush.bf16.msra.mxu1 %v3844_v4  ;;  %2481 = vmatmul.bf16.vlgmr.msrb.gmra.mxu2 %v609_v8  ;;  %v3891_v4 = vld [vmem:[%s4737_s1 + $0x7f0] sm:$0xff]  ;;  %v3890_v8 = vld [vmem:[%s4737_s1 + $0x7e8] sm:$0xff] }
  0xc4   :  { %2525 = vmatpush.bf16.msra.mxu2 %v3852_v5  ;;  %2494 = vmatmul.bf16.vlgmr.msrb.gmra.mxu3 %v610_v10  ;;  %v3866_v5 = vld [vmem:[%s4737_s1 + $0x728] sm:$0xff] }
  0xc5   :  { %2538 = vmatpush.bf16.msra.mxu3 %v3860_v6  ;;  %v3874_v6 = vld [vmem:[%s4737_s1 + $0x768] sm:$0xff] }
  0xc6   :  { %2500 = vmatpush.bf16.msra.mxu0 %v3835_v11  ;;  %v2274_v31 = vpop.f32.mrf.mxu2  ;;  %v2250_v34 = vpop.f32.mrf.mxu0  ;;  %v3865_v11 = vld [vmem:[%s4737_s1 + $0x720] sm:$0xff] }
  0xc7   :  { %2513 = vmatpush.bf16.msra.mxu1 %v3843_v12  ;;  %v2275_v32 = vadd.f32 %v2274_v31, %v2262_v26  ;;  %v2287_v33 = vpop.f32.mrf.mxu3  ;;  %v2263_v38 = vpop.f32.mrf.mxu1  ;;  %v3873_v12 = vld [vmem:[%s4737_s1 + $0x760] sm:$0xff]  ;;  %v3863_v26 = vld [vmem:[%s4737_s1 + $0x710] sm:$0xff]  ;;  %v3862_v31 = vld [vmem:[%s4737_s1 + $0x708] sm:$0xff] }
  0xc8   :  { %2526 = vmatpush.bf16.msra.mxu2 %v3851_v13  ;;  %v3878_v34 = vld [vmem:[%s4737_s1 + $0x788] sm:$0xff] }
  0xc9   :  { %2539 = vmatpush.bf16.msra.mxu3 %v3859_v14  ;;  %v4593_v37 = vadd.f32 %v2287_v33, %v2275_v32  ;;  %v3881_v14 = vld [vmem:[%s4737_s1 + $0x7a0] sm:$0xff]  ;;  %v3870_v32 = vld [vmem:[%s4737_s1 + $0x748] sm:$0xff]  ;;  %v25_v33 = vld [vmem:[%s4738_s0 + $0x70] sm:$0xff] }
  0xca   :  { %2501 = vmatpush.bf16.msra.mxu0 %v3834_v15  ;;  %v3889_v15 = vld [vmem:[%s4737_s1 + $0x7e0] sm:$0xff] }
  0xcb   :  { %2514 = vmatpush.bf16.msra.mxu1 %v3842_v16 }
  0xcc   :  { %2527 = vmatpush.bf16.msra.mxu2 %v3850_v17  ;;  %v3864_v17 = vld [vmem:[%s4737_s1 + $0x718] sm:$0xff] }
  0xcd   :  { %2540 = vmatpush.bf16.msra.mxu3 %v3858_v18  ;;  %v3872_v18 = vld [vmem:[%s4737_s1 + $0x758] sm:$0xff] }
  0xce   :  { %2502 = vmatpush.bf16.msra.mxu0 %v3833_v20  ;;  %v2276_v47 = vpop.f32.mrf.mxu2  ;;  %v3888_v20 = vld [vmem:[%s4737_s1 + $0x7d8] sm:$0xff] }
  0xcf   :  { %2515 = vmatpush.bf16.msra.mxu1 %v3841_v21  ;;  %v2289_v48 = vpop.f32.mrf.mxu3 }
  0xd0   :  { %2528 = vmatpush.bf16.msra.mxu2 %v3849_v24 }
  0xd1   :  { %2541 = vmatpush.bf16.msra.mxu3 %v3857_v25 }
  0xd2   :  { %2503 = vmatpush.bf16.msra.mxu0 %v3832_v27  ;;  %v3871_v27 = vld [vmem:[%s4737_s1 + $0x750] sm:$0xff] }
  0xd3   :  { %2516 = vmatpush.bf16.msra.mxu1 %v3840_v28 }
  0xd4   :  { %2529 = vmatpush.bf16.msra.mxu2 %v3848_v29  ;;  %v3879_v29 = vld [vmem:[%s4737_s1 + $0x790] sm:$0xff] }
  0xd5   :  { %2542 = vmatpush.bf16.msra.mxu3 %v3856_v30  ;;  %v3887_v30 = vld [vmem:[%s4737_s1 + $0x7d0] sm:$0xff] }
  0xd6   :  { %2504 = vmatpush.bf16.msra.mxu0 %v3831_v35  ;;  %v3886_v35 = vld [vmem:[%s4737_s1 + $0x7c8] sm:$0xff] }
  0xd7   :  { %2517 = vmatpush.bf16.msra.mxu1 %v3839_v36  ;;  %v26_v36 = vld [vmem:[%s4738_s0 + $0x78] sm:$0xff] }
  0xd8   :  { %2530 = vmatpush.bf16.msra.mxu2 %v3847_v39  ;;  %v583_v39 = vunpack.c.l.b16 %v25_v33 }
  0xd9   :  { %2543 = vmatpush.bf16.msra.mxu3 %v3855_v40  ;;  %v584_v40 = vunpack.c.h.b16 %v25_v33 }
  0xda   :  { %2505 = vmatpush.bf16.msra.mxu0 %v3830_v41  ;;  %v3861_v41 = vld [vmem:[%s4737_s1 + $0x700] sm:$0xff]  ;;  %v615_v47 = vpack.c.b16 %v583_v39, %v583_v39 }
  0xdb   :  { %2518 = vmatpush.bf16.msra.mxu1 %v3838_v42  ;;  %v3869_v42 = vld [vmem:[%s4737_s1 + $0x740] sm:$0xff]  ;;  %v616_v48 = vpack.c.b16 %v584_v40, %v584_v40 }
  0xdc   :  { %2531 = vmatpush.bf16.msra.mxu2 %v3846_v43  ;;  %v585_v43 = vunpack.c.l.b16 %v26_v36 }
  0xdd   :  { %2544 = vmatpush.bf16.msra.mxu3 %v3854_v44  ;;  %v586_v44 = vunpack.c.h.b16 %v26_v36 }
  0xde   :  { %2506 = vmatpush.bf16.msra.mxu0 %v3829_v49  ;;  %v2300_v9 = vpop.f32.mrf.mxu0  ;;  %v617_v49 = vpack.c.b16 %v585_v43, %v585_v43 }
  0xdf   :  { %2519 = vmatpush.bf16.msra.mxu1 %v3837_v50  ;;  %v2301_v10 = vadd.f32 %v2300_v9, %v4593_v37  ;;  %v2313_v13 = vpop.f32.mrf.mxu1  ;;  %v618_v50 = vpack.c.b16 %v586_v44, %v586_v44 }
  0xe0   :  { %2532 = vmatpush.bf16.msra.mxu2 %v3845_v53 }
  0xe1   :  { %2545 = vmatpush.bf16.msra.mxu3 %v3853_v54  ;;  %2507 = vmatmul.bf16.vlgmr.msra.gmra.mxu0 %v611_v61  ;;  %v2314_v16 = vadd.f32 %v2313_v13, %v2301_v10 }
  0xe2   :  { %2551 = vmatpush.bf16.msrb.mxu0 %v3868_v57  ;;  %2520 = vmatmul.bf16.vlgmr.msra.gmra.mxu1 %v612_v63 }
  0xe3   :  { %2564 = vmatpush.bf16.msrb.mxu1 %v3876_v58  ;;  %2533 = vmatmul.bf16.vlgmr.msra.gmra.mxu2 %v613_v62 }
  0xe4   :  { %2577 = vmatpush.bf16.msrb.mxu2 %v3884_v59  ;;  %2546 = vmatmul.bf16.vlgmr.msra.gmra.mxu3 %v614_v0 }
  0xe5   :  { %2590 = vmatpush.bf16.msrb.mxu3 %v3892_v60 }
  0xe6   :  { %2552 = vmatpush.bf16.msrb.mxu0 %v3867_v1  ;;  %v2326_v21 = vpop.f32.mrf.mxu2  ;;  %v2302_v24 = vpop.f32.mrf.mxu0 }
  0xe7   :  { %2565 = vmatpush.bf16.msrb.mxu1 %v3875_v2  ;;  %v2327_v22 = vadd.f32 %v2326_v21, %v2314_v16  ;;  %v2339_v23 = vpop.f32.mrf.mxu3  ;;  %v2315_v28 = vpop.f32.mrf.mxu1 }
  0xe8   :  { %2578 = vmatpush.bf16.msrb.mxu2 %v3883_v3 }
  0xe9   :  { %2591 = vmatpush.bf16.msrb.mxu3 %v3891_v4  ;;  %v2340_v25 = vadd.f32 %v2339_v23, %v2327_v22 }
  0xea   :  { %2553 = vmatpush.bf16.msrb.mxu0 %v3866_v5 }
  0xeb   :  { %2566 = vmatpush.bf16.msrb.mxu1 %v3874_v6 }
  0xec   :  { %2579 = vmatpush.bf16.msrb.mxu2 %v3882_v7 }
  0xed   :  { %2592 = vmatpush.bf16.msrb.mxu3 %v3890_v8 }
  0xee   :  { %2554 = vmatpush.bf16.msrb.mxu0 %v3865_v11  ;;  %v2328_v37 = vpop.f32.mrf.mxu2 }
  0xef   :  { %2567 = vmatpush.bf16.msrb.mxu1 %v3873_v12  ;;  %v2341_v38 = vpop.f32.mrf.mxu3 }
  0xf0   :  { %2580 = vmatpush.bf16.msrb.mxu2 %v3881_v14 }
  0xf1   :  { %2593 = vmatpush.bf16.msrb.mxu3 %v3889_v15 }
  0xf2   :  { %2555 = vmatpush.bf16.msrb.mxu0 %v3864_v17 }
  0xf3   :  { %2568 = vmatpush.bf16.msrb.mxu1 %v3872_v18 }
  0xf4   :  { %2581 = vmatpush.bf16.msrb.mxu2 %v3880_v19 }
  0xf5   :  { %2594 = vmatpush.bf16.msrb.mxu3 %v3888_v20 }
  0xf6   :  { %2556 = vmatpush.bf16.msrb.mxu0 %v3863_v26 }
  0xf7   :  { %2569 = vmatpush.bf16.msrb.mxu1 %v3871_v27 }
  0xf8   :  { %2582 = vmatpush.bf16.msrb.mxu2 %v3879_v29 }
  0xf9   :  { %2595 = vmatpush.bf16.msrb.mxu3 %v3887_v30 }
  0xfa   :  { %2557 = vmatpush.bf16.msrb.mxu0 %v3862_v31 }
  0xfb   :  { %2570 = vmatpush.bf16.msrb.mxu1 %v3870_v32 }
  0xfc   :  { %2583 = vmatpush.bf16.msrb.mxu2 %v3878_v34 }
  0xfd   :  { %2596 = vmatpush.bf16.msrb.mxu3 %v3886_v35 }
  0xfe   :  { %2558 = vmatpush.bf16.msrb.mxu0 %v3861_v41  ;;  %v2352_v51 = vpop.f32.mrf.mxu0 }
  0xff   :  { %2571 = vmatpush.bf16.msrb.mxu1 %v3869_v42  ;;  %v2353_v52 = vadd.f32 %v2352_v51, %v2340_v25  ;;  %v2365_v53 = vpop.f32.mrf.mxu1 }
 0x100   :  { %2584 = vmatpush.bf16.msrb.mxu2 %v3877_v45 }
 0x101   :  { %2597 = vmatpush.bf16.msrb.mxu3 %v3885_v46  ;;  %2559 = vmatmul.bf16.vlgmr.msrb.gmra.mxu0 %v615_v47  ;;  %v2366_v54 = vadd.f32 %v2365_v53, %v2353_v52 }
 0x102   :  { %2572 = vmatmul.bf16.vlgmr.msrb.gmra.mxu1 %v616_v48 }
 0x103   :  { %2585 = vmatmul.bf16.vlgmr.msrb.gmra.mxu2 %v617_v49 }
 0x104   :  { %2598 = vmatmul.bf16.vlgmr.msrb.gmra.mxu3 %v618_v50 }
 0x106   :  { %v2378_v55 = vpop.f32.mrf.mxu2  ;;  %v2354_v58 = vpop.f32.mrf.mxu0 }
 0x107   :  { %v2379_v56 = vadd.f32 %v2378_v55, %v2366_v54  ;;  %v2391_v57 = vpop.f32.mrf.mxu3  ;;  %v2367_v60 = vpop.f32.mrf.mxu1 }
 0x109   :  { %v2392_v59 = vadd.f32 %v2391_v57, %v2379_v56 }
 0x10e   :  { %v2380_v61 = vpop.f32.mrf.mxu2 }
 0x10f   :  { %v2393_v62 = vpop.f32.mrf.mxu3 }
 0x11e   :  { %v2404_v63 = vpop.f32.mrf.mxu0 }
 0x11f   :  { %v2405_v0 = vadd.f32 %v2404_v63, %v2392_v59  ;;  %v2417_v1 = vpop.f32.mrf.mxu1 }
 0x121   :  { %v2418_v2 = vadd.f32 %v2417_v1, %v2405_v0 }
 0x126   :  { %v2430_v3 = vpop.f32.mrf.mxu2  ;;  %v2406_v6 = vpop.f32.mrf.mxu0 }
 0x127   :  { %v2431_v4 = vadd.f32 %v2430_v3, %v2418_v2  ;;  %v2443_v5 = vpop.f32.mrf.mxu3  ;;  %v2419_v8 = vpop.f32.mrf.mxu1 }
 0x129   :  { %v2444_v7 = vadd.f32 %v2443_v5, %v2431_v4 }
 0x12e   :  { %v2432_v9 = vpop.f32.mrf.mxu2 }
 0x12f   :  { %v2445_v10 = vpop.f32.mrf.mxu3 }
 0x13e   :  { %v2456_v11 = vpop.f32.mrf.mxu0 }
 0x13f   :  { %v2469_v12 = vpop.f32.mrf.mxu1  ;;  %v2457_v22 = vadd.f32 %v2456_v11, %v2444_v7 }
 0x141   :  { %v2470_v26 = vadd.f32 %v2469_v12, %v2457_v22 }
 0x146   :  { %v2482_v13 = vpop.f32.mrf.mxu2  ;;  %v2458_v15 = vpop.f32.mrf.mxu0 }
 0x147   :  { %v2495_v14 = vpop.f32.mrf.mxu3  ;;  %v2471_v16 = vpop.f32.mrf.mxu1  ;;  %v2483_v27 = vadd.f32 %v2482_v13, %v2470_v26 }
 0x149   :  { %v2496_v30 = vadd.f32 %v2495_v14, %v2483_v27 }
 0x14e   :  { %v2484_v17 = vpop.f32.mrf.mxu2 }
 0x14f   :  { %v2497_v18 = vpop.f32.mrf.mxu3 }
 0x15e   :  { %v2508_v19 = vpop.f32.mrf.mxu0 }
 0x15f   :  { %v2521_v20 = vpop.f32.mrf.mxu1  ;;  %v2509_v31 = vadd.f32 %v2508_v19, %v2496_v30 }
 0x161   :  { %v2522_v32 = vadd.f32 %v2521_v20, %v2509_v31 }
 0x166   :  { %v2534_v21 = vpop.f32.mrf.mxu2  ;;  %v2510_v24 = vpop.f32.mrf.mxu0 }
 0x167   :  { %v2547_v23 = vpop.f32.mrf.mxu3  ;;  %v2523_v25 = vpop.f32.mrf.mxu1  ;;  %v2535_v33 = vadd.f32 %v2534_v21, %v2522_v32 }
 0x169   :  { %v2548_v34 = vadd.f32 %v2547_v23, %v2535_v33 }
 0x16e   :  { %v2536_v28 = vpop.f32.mrf.mxu2 }
 0x16f   :  { %v2549_v29 = vpop.f32.mrf.mxu3 }
 0x17e   :  { %v2560_v35 = vpop.f32.mrf.mxu0 }
 0x17f   :  { %v2573_v36 = vpop.f32.mrf.mxu1  ;;  %v2561_v37 = vadd.f32 %v2560_v35, %v2548_v34 }
 0x181   :  { %v2574_v38 = vadd.f32 %v2573_v36, %v2561_v37 }
 0x186   :  { %v2586_v39 = vpop.f32.mrf.mxu2  ;;  %v2562_v42 = vpop.f32.mrf.mxu0 }
 0x187   :  { %v2599_v40 = vpop.f32.mrf.mxu3  ;;  %v2587_v41 = vadd.f32 %v2586_v39, %v2574_v38  ;;  %v2575_v43 = vpop.f32.mrf.mxu1 }
 0x189   :  { %v2600_v44 = vadd.f32 %v2599_v40, %v2587_v41 }
 0x18b   :  { %v2603_v45 = vsub.f32 0.0, %v2600_v44 }
 0x18d   :  { %v2604_v46 = vmul.f32 1.442695, %v2603_v45 }
 0x18e   :  { %v2588_v47 = vpop.f32.mrf.mxu2 }
 0x18f   :  { %v2601_v48 = vpop.f32.mrf.mxu3  ;;  %3893 = vpow2.f32 %v2604_v46 }
 0x195   :  { %v3894_v49 = vpop.eup %3893 }
 0x196   :  { %v2606_v50 = vadd.f32 1.0, %v3894_v49 }
 0x198   :  { %3895 = vrcp.f32 %v2606_v50 }
 0x19e   :  { %v3896_v51 = vpop.eup %3895 }
 0x19f   :  { %2608 = vst [vmem:[%s4739_s2] sm:$0xff] %v3896_v51 }

</bundles_post_ra>
